<compile_context>
chip_gen: v6e
topology: v6e:2x2x1
jax: 0.10.0
libtpu: 0.0.40
codegen_flags: <defaults>
</compile_context>

<pallas_src>
import jax
import jax.numpy as jnp
from jax.experimental import pallas as pl
from jax.experimental.pallas import tpu as pltpu

# Pixels per grid step on the lane axis for conv1.  1024 already reaches ~86% of HBM roofline and
# keeps the f32/bf16 tiles well inside v5e's 16 MiB default scoped-VMEM limit.
MAX_TILE_P = 1024


# ----------------------------------------------------------------------------
# Pallas kernels
# ----------------------------------------------------------------------------
def _conv1_kernel(x_ref, w_ref, b_ref, o_ref):
    """Fused conv1 GEMM: (Cout, KKC)bf16 @ (KKC, TILE_P)bf16 + bias, ReLU.  Pixels lane-dense."""
    y = jnp.dot(w_ref[...], x_ref[0], preferred_element_type=jnp.float32)
    o_ref[0] = jnp.maximum(y + b_ref[...], 0.0)


def _maxpool_kernel(x_ref, o_ref):
    """MaxPool2d(3, 2, 1) on 2x2 phase planes of a non-negative input.

    x_ref: (1, 4, C, Hh+1, Wh+1) phase planes [EE, EO, OE, OO] of the conv1 output, zero-padded by
    one at top/left (zero pad is equivalent to -inf here because the input is post-ReLU >= 0).
    o_ref: (1, C, Hh, Wh) pooled output.
    """
    ee, eo, oe, oo = x_ref[0, 0], x_ref[0, 1], x_ref[0, 2], x_ref[0, 3]
    m = ee[:, 1:, 1:]
    for term in (eo[:, 1:, 1:], eo[:, 1:, :-1],
                 oe[:, 1:, 1:], oe[:, :-1, 1:],
                 oo[:, 1:, 1:], oo[:, 1:, :-1], oo[:, :-1, 1:], oo[:, :-1, :-1]):
        m = jnp.maximum(m, term)
    o_ref[0] = m


def _make_stack_kernel(h, w):
    """Whole residual stack in one kernel.

    Activations are held in VMEM scratch in zero-halo "padded-flat" layout (C, (h+2)*(w+2)).
    A 3x3/s1 conv is 9 lane-shifted slices of that buffer matmul'ed with per-tap (Cout, Cin)
    weights (in-VMEM im2col), f32 accumulation, bias + (residual) + ReLU epilogue, and a masked
    store back into the interior so the halo stays zero for the next conv.
    """
    wp = w + 2
    base = wp + 1                       # flat index of interior pixel (0, 0)
    span = (h - 1) * wp + w             # flat span covering all interior pixels
    offsets = tuple(dy * wp + dx for dy in range(3) for dx in range(3))

    def kernel(x_ref, w1_ref, b1_ref, w2_ref, b2_ref, o_ref, act_ref, hid_ref):
        blk = pl.program_id(1)

        @pl.when(blk == 0)
        def _():
            act_ref[...] = x_ref[0]                       # block input (zero halo already present)
            hid_ref[...] = jnp.zeros_like(hid_ref)        # zero halo for the hidden activation

        # Mask keeping the left/right halo columns inside [base, base+span) at zero.
        col = (base + jax.lax.broadcasted_iota(jnp.int32, (1, span), 1)) % wp
        interior = jnp.logical_and(col >= 1, col <= w)

        def conv3x3(src_ref, wt_ref, bb_ref, residual):
            acc = jnp.dot(wt_ref[0, 0].astype(jnp.float32),
                          src_ref[:, offsets[0]:offsets[0] + span],
                          preferred_element_type=jnp.float32)
            for t in range(1, 9):
                acc += jnp.dot(wt_ref[0, t].astype(jnp.float32),
                               src_ref[:, offsets[t]:offsets[t] + span],
                               preferred_element_type=jnp.float32)
            acc += bb_ref[0]
            if residual is not None:
                acc += residual
            return jnp.where(interior, jnp.maximum(acc, 0.0), 0.0)

        # h = ReLU(BN(conv3x3(x)))
        hid_ref[:, base:base + span] = conv3x3(act_ref, w1_ref, b1_ref, None)
        # y = ReLU(BN(conv3x3(h)) + x)   (residual is the resident input tile)
        res = act_ref[:, base:base + span]
        act_ref[:, base:base + span] = conv3x3(hid_ref, w2_ref, b2_ref, res)

        o_ref[0] = act_ref[...]

    return kernel


# ----------------------------------------------------------------------------
# Wrappers
# ----------------------------------------------------------------------------
def _pick_tile(p):
    if p <= MAX_TILE_P:
        return p, p
    n_tiles = -(-p // MAX_TILE_P)
    return MAX_TILE_P, n_tiles * MAX_TILE_P


def _im2col_nchw(x, k, stride, pad):
    """(N, C, H, W) -> (N, k*k*C, Ho*Wo) with patch index ordered (dy, dx, c)."""
    n, c, h, w = x.shape
    ho = (h + 2 * pad - k) // stride + 1
    wo = (w + 2 * pad - k) // stride + 1
    xp = jnp.pad(x, ((0, 0), (0, 0), (pad, pad), (pad, pad)))
    cols = []
    for dy in range(k):
        for dx in range(k):
            cols.append(xp[:, :, dy:dy + stride * ho:stride, dx:dx + stride * wo:stride])
    xcol = jnp.concatenate(cols, axis=1)
    return xcol.reshape(n, k * k * c, ho * wo), ho, wo


def conv1_bn_relu(x, weight, scale, bias):
    """Conv2d(k=7, s=2, p=3, bias=False) + folded BN + ReLU as one Pallas GEMM kernel."""
    n, cin, _, _ = x.shape
    cout = weight.shape[0]
    k, stride, pad = 7, 2, 3

    xcol, ho, wo = _im2col_nchw(x.astype(jnp.bfloat16), k, stride, pad)
    p = ho * wo
    kkc = k * k * cin

    # (O, I, kh, kw) -> (O, kh*kw*I), BN scale folded in, bf16 operands.
    w_col = (jnp.transpose(weight, (0, 2, 3, 1)).reshape(cout, kkc)
             * scale[:, None]).astype(jnp.bfloat16)
    bias2 = bias.reshape(cout, 1).astype(jnp.float32)

    tile_p, p_pad = _pick_tile(p)
    if p_pad != p:
        xcol = jnp.pad(xcol, ((0, 0), (0, 0), (0, p_pad - p)))

    out = pl.pallas_call(
        _conv1_kernel,
        out_shape=jax.ShapeDtypeStruct((n, cout, p_pad), jnp.float32),
        grid_spec=pltpu.PrefetchScalarGridSpec(
            num_scalar_prefetch=0,
            grid=(n, p_pad // tile_p),
            in_specs=[
                pl.BlockSpec((1, kkc, tile_p), lambda ni, pi: (ni, 0, pi)),   # patches, lane-dense
                pl.BlockSpec((cout, kkc), lambda ni, pi: (0, 0)),             # weights, resident
                pl.BlockSpec((cout, 1), lambda ni, pi: (0, 0)),               # folded BN bias
            ],
            out_specs=pl.BlockSpec((1, cout, tile_p), lambda ni, pi: (ni, 0, pi)),
        ),
        compiler_params=pltpu.CompilerParams(
            dimension_semantics=("parallel", "parallel")),
    )(xcol, w_col, bias2)

    if p_pad != p:
        out = out[:, :, :p]
    return out.reshape(n, cout, ho, wo)


def maxpool_3x3_s2_p1(y):
    """MaxPool2d(3, 2, 1) without the 9x window expansion.  Requires y >= 0 (post-ReLU)."""
    n, c, ho, wo = y.shape
    # Pad to even extents with zeros (safe: values are non-negative, so 0 acts as -inf).
    if ho % 2:
        y = jnp.pad(y, ((0, 0), (0, 0), (0, 1), (0, 0)))
    if wo % 2:
        y = jnp.pad(y, ((0, 0), (0, 0), (0, 0), (0, 1)))
    hh, wh = (ho + 1) // 2, (wo + 1) // 2

    phases = jnp.stack([y[:, :, 0::2, 0::2], y[:, :, 0::2, 1::2],
                        y[:, :, 1::2, 0::2], y[:, :, 1::2, 1::2]], axis=1)
    phases = jnp.pad(phases, ((0, 0), (0, 0), (0, 0), (1, 0), (1, 0)))   # zero top/left halo

    out = pl.pallas_call(
        _maxpool_kernel,
        out_shape=jax.ShapeDtypeStruct((n, c, hh, wh), jnp.float32),
        grid_spec=pltpu.PrefetchScalarGridSpec(
            num_scalar_prefetch=0,
            grid=(n,),
            in_specs=[pl.BlockSpec((1, 4, c, hh + 1, wh + 1),
                                   lambda ni: (ni, 0, 0, 0, 0))],
            out_specs=pl.BlockSpec((1, c, hh, wh), lambda ni: (ni, 0, 0, 0)),
        ),
        compiler_params=pltpu.CompilerParams(dimension_semantics=("parallel",)),
    )(phases)
    return out


def residual_stack(x_pooled, stages):
    """conv2_x..conv5_x as a single pallas_call.  x_pooled: (N, 64, H, W) post-pool activation."""
    blocks = [blk for stage in stages for blk in stage]
    num_l = len(blocks)
    if num_l == 0:
        return x_pooled
    n, c, h, w = x_pooled.shape
    lp = (h + 2) * (w + 2)

    def fold(p):
        # (O, I, kh, kw) * scale -> (9, O, I) bf16, ordered tap-major (dy, dx).
        wc = jnp.transpose(p["w"], (0, 2, 3, 1)) * p["scale"][:, None, None, None]
        wc = jnp.transpose(wc, (1, 2, 0, 3)).reshape(9, c, c).astype(jnp.bfloat16)
        return wc, p["bias"].reshape(c, 1).astype(jnp.float32)

    f1 = [fold(b["c1"]) for b in blocks]
    f2 = [fold(b["c2"]) for b in blocks]
    w1 = jnp.stack([f[0] for f in f1])   # (L, 9, 64, 64) bf16
    b1 = jnp.stack([f[1] for f in f1])   # (L, 64, 1)     f32
    w2 = jnp.stack([f[0] for f in f2])
    b2 = jnp.stack([f[1] for f in f2])

    # Zero-halo padded-flat layout: (N, C, (H+2)*(W+2)).
    x_pf = jnp.pad(x_pooled, ((0, 0), (0, 0), (1, 1), (1, 1))).reshape(n, c, lp)

    out = pl.pallas_call(
        _make_stack_kernel(h, w),
        out_shape=jax.ShapeDtypeStruct((n, c, lp), jnp.float32),
        grid_spec=pltpu.PrefetchScalarGridSpec(
            num_scalar_prefetch=0,
            grid=(n, num_l),
            in_specs=[
                pl.BlockSpec((1, c, lp), lambda ni, li: (ni, 0, 0)),        # block input (per batch)
                pl.BlockSpec((1, 9, c, c), lambda ni, li: (li, 0, 0, 0)),   # conv A weights (per block)
                pl.BlockSpec((1, c, 1), lambda ni, li: (li, 0, 0)),
                pl.BlockSpec((1, 9, c, c), lambda ni, li: (li, 0, 0, 0)),   # conv B weights (per block)
                pl.BlockSpec((1, c, 1), lambda ni, li: (li, 0, 0)),
            ],
            out_specs=pl.BlockSpec((1, c, lp), lambda ni, li: (ni, 0, 0)),
            scratch_shapes=[pltpu.VMEM((c, lp), jnp.float32),   # resident activation
                            pltpu.VMEM((c, lp), jnp.float32)],  # hidden activation
        ),
        compiler_params=pltpu.CompilerParams(
            dimension_semantics=("parallel", "arbitrary")),
    )(x_pf, w1, b1, w2, b2)

    return out.reshape(n, c, h + 2, w + 2)[:, :, 1:-1, 1:-1]


def resnet_forward_pallas(x, params):
    p = params["conv1"]
    y = conv1_bn_relu(x, p["w"], p["scale"], p["bias"])
    y = maxpool_3x3_s2_p1(y)
    y = residual_stack(y, params["stages"])
    return y


# ----------------------------------------------------------------------------
# Pure-JAX reference (same math in f32, XLA convs)
# ----------------------------------------------------------------------------
def _conv_bn_act_ref(x, w, scale, bias, *, stride, pad, relu, residual=None):
    y = jax.lax.conv_general_dilated(
        x, w, window_strides=(stride, stride),
        padding=((pad, pad), (pad, pad)),
        dimension_numbers=("NCHW", "OIHW", "NCHW"))
    y = y * scale[None, :, None, None] + bias[None, :, None, None]
    if residual is not None:
        y = y + residual
    if relu:
        y = jnp.maximum(y, 0.0)
    return y


def _maxpool_ref(x):
    return jax.lax.reduce_window(
        x, jnp.array(-jnp.inf, dtype=x.dtype), jax.lax.max,
        window_dimensions=(1, 1, 3, 3), window_strides=(1, 1, 2, 2),
        padding=((0, 0), (0, 0), (1, 1), (1, 1)))


def resnet_forward_ref(x, params):
    p = params["conv1"]
    y = _conv_bn_act_ref(x, p["w"], p["scale"], p["bias"], stride=2, pad=3, relu=True)
    y = _maxpool_ref(y)
    for stage in params["stages"]:
        for blk in stage:
            h = _conv_bn_act_ref(y, blk["c1"]["w"], blk["c1"]["scale"], blk["c1"]["bias"],
                                 stride=1, pad=1, relu=True)
            y = _conv_bn_act_ref(h, blk["c2"]["w"], blk["c2"]["scale"], blk["c2"]["bias"],
                                 stride=1, pad=1, relu=True, residual=y)
    return y


# ----------------------------------------------------------------------------
# Parameters (deterministic, bf16-representable)
# ----------------------------------------------------------------------------
def _qbf16(a):
    return a.astype(jnp.bfloat16).astype(jnp.float32)


def _conv_bn_params(key, cin, cout, k):
    k1, k2, k3 = jax.random.split(key, 3)
    return {
        "w": _qbf16(jax.random.normal(k1, (cout, cin, k, k), dtype=jnp.float32) * 0.05),
        "scale": _qbf16(1.0 + 0.1 * jax.random.normal(k2, (cout,), dtype=jnp.float32)),
        "bias": _qbf16(0.1 * jax.random.normal(k3, (cout,), dtype=jnp.float32)),
    }


def make_params(key, in_channel, num_block):
    keys = iter(jax.random.split(key, 1 + 2 * sum(num_block)))
    params = {"conv1": _conv_bn_params(next(keys), in_channel, 64, 7), "stages": []}
    for nb in num_block:
        stage = []
        for _ in range(nb):
            stage.append({
                "c1": _conv_bn_params(next(keys), 64, 64, 3),
                "c2": _conv_bn_params(next(keys), 64, 64, 3),
            })
        params["stages"].append(stage)
    return params


# ----------------------------------------------------------------------------
if __name__ == "__main__":
    key = jax.random.PRNGKey(0)
    k_x, k_p = jax.random.split(key)

    N, in_channel, H, W = 2, 4, 16, 16
    num_block = [1, 1, 1, 1]          # small ResNet for the test

    x = _qbf16(jax.random.normal(k_x, (N, in_channel, H, W), dtype=jnp.float32))
    params = make_params(k_p, in_channel, num_block)

    out = jax.jit(resnet_forward_pallas)(x, params)
    out = jax.block_until_ready(out)

    ref = resnet_forward_ref(x, params)
    assert out.shape == ref.shape == (N, 64, 4, 4), (out.shape, ref.shape)
    max_diff = float(jnp.max(jnp.abs(out - ref)))
    # Tolerance bounds the only lossy step: BN-scale-folded bf16 weights (~0.2% weight rounding)
    # accumulated over the 9 conv layers vs the pure-f32 reference.
    assert jnp.allclose(out, ref, atol=5e-2, rtol=5e-2), f"max abs diff {max_diff}"

    print("KERNEL_OK")
</pallas_src>

<mosaic_0001>
module attributes {stable_mosaic.version = 11 : i64} {
  func.func @_conv1_kernel(%arg0: i32, %arg1: i32, %arg2: memref<1x196x64xbf16, #tpu.memory_space<vmem>>, %arg3: memref<64x196xbf16, #tpu.memory_space<vmem>>, %arg4: memref<64x1xf32, #tpu.memory_space<vmem>>, %arg5: memref<1x64x64xf32, #tpu.memory_space<vmem>>) attributes {dimension_semantics = [#tpu.dimension_semantics<parallel>, #tpu.dimension_semantics<parallel>], iteration_bounds = array<i64: 2, 1>, scalar_prefetch = 0 : i64, scratch_operands = 0 : i64, tpu.core_type = #tpu.core_type<tc>, window_params = [{transform_indices = @transform_0, window_bounds = array<i64: 1, 196, 64>}, {pipeline_mode = #tpu.pipeline_mode<synchronous>, transform_indices = @transform_1, window_bounds = array<i64: 64, 196>}, {pipeline_mode = #tpu.pipeline_mode<synchronous>, transform_indices = @transform_2, window_bounds = array<i64: 64, 1>}, {transform_indices = @transform_3, window_bounds = array<i64: 1, 64, 64>}]} {
    %c0 = arith.constant 0 : index
    %c0_0 = arith.constant 0 : index
    %0 = vector.load %arg3[%c0, %c0_0] : memref<64x196xbf16, #tpu.memory_space<vmem>>, vector<64x196xbf16>
    %c0_1 = arith.constant 0 : index
    %c0_2 = arith.constant 0 : index
    %c0_3 = arith.constant 0 : index
    %1 = vector.load %arg2[%c0_1, %c0_2, %c0_3] : memref<1x196x64xbf16, #tpu.memory_space<vmem>>, vector<1x196x64xbf16>
    %2 = vector.shape_cast %1 : vector<1x196x64xbf16> to vector<196x64xbf16>
    %cst = arith.constant dense<0.000000e+00> : vector<64x64xf32>
    %3 = tpu.matmul %0, %2, %cst {dimension_numbers = #tpu.dot_dimension_numbers<[1], [0], [0], [1], [0, 0, 1, 1], [], []>} : vector<64x196xbf16>, vector<196x64xbf16>, vector<64x64xf32> -> vector<64x64xf32>
    %c0_4 = arith.constant 0 : index
    %c0_5 = arith.constant 0 : index
    %4 = vector.load %arg4[%c0_4, %c0_5] : memref<64x1xf32, #tpu.memory_space<vmem>>, vector<64x1xf32>
    %5 = vector.broadcast %4 : vector<64x1xf32> to vector<64x64xf32>
    %6 = arith.addf %3, %5 : vector<64x64xf32>
    %cst_6 = arith.constant 0.000000e+00 : f32
    %7 = vector.broadcast %cst_6 : f32 to vector<64x64xf32>
    %8 = arith.maximumf %6, %7 : vector<64x64xf32>
    %c0_7 = arith.constant 0 : index
    %c0_8 = arith.constant 0 : index
    %c0_9 = arith.constant 0 : index
    %9 = vector.load %arg5[%c0_7, %c0_8, %c0_9] : memref<1x64x64xf32, #tpu.memory_space<vmem>>, vector<1x64x64xf32>
    %10 = vector.shape_cast %9 : vector<1x64x64xf32> to vector<64x64xf32>
    %11 = vector.shape_cast %8 : vector<64x64xf32> to vector<1x64x64xf32>
    tpu.vector_store %arg5[%c0_7, %c0_8, %c0_9], %11 {strides = array<i32>} : memref<1x64x64xf32, #tpu.memory_space<vmem>>, vector<1x64x64xf32>,
    return
  }
  func.func @transform_0(%arg0: i32, %arg1: i32) -> (i32, i32, i32) {
    %c0_i32 = arith.constant 0 : i32
    %c0_i32_0 = arith.constant 0 : i32
    return %arg0, %c0_i32, %arg1 : i32, i32, i32
  }
  func.func @transform_1(%arg0: i32, %arg1: i32) -> (i32, i32) {
    %c0_i32 = arith.constant 0 : i32
    %c0_i32_0 = arith.constant 0 : i32
    %c0_i32_1 = arith.constant 0 : i32
    return %c0_i32, %c0_i32_0 : i32, i32
  }
  func.func @transform_2(%arg0: i32, %arg1: i32) -> (i32, i32) {
    %c0_i32 = arith.constant 0 : i32
    %c0_i32_0 = arith.constant 0 : i32
    %c0_i32_1 = arith.constant 0 : i32
    return %c0_i32, %c0_i32_0 : i32, i32
  }
  func.func @transform_3(%arg0: i32, %arg1: i32) -> (i32, i32, i32) {
    %c0_i32 = arith.constant 0 : i32
    %c0_i32_0 = arith.constant 0 : i32
    return %arg0, %c0_i32, %arg1 : i32, i32, i32
  }
}

module attributes {stable_mosaic.version = 11 : i64} {
  func.func @_maxpool_kernel(%arg0: i32, %arg1: memref<1x4x64x5x5xf32, #tpu.memory_space<vmem>>, %arg2: memref<1x64x4x4xf32, #tpu.memory_space<vmem>>) attributes {dimension_semantics = [#tpu.dimension_semantics<parallel>], iteration_bounds = array<i64: 2>, scalar_prefetch = 0 : i64, scratch_operands = 0 : i64, tpu.core_type = #tpu.core_type<tc>, window_params = [{transform_indices = @transform_0, window_bounds = array<i64: 1, 4, 64, 5, 5>}, {transform_indices = @transform_1, window_bounds = array<i64: 1, 64, 4, 4>}]} {
    %c0 = arith.constant 0 : index
    %c0_0 = arith.constant 0 : index
    %c0_1 = arith.constant 0 : index
    %c0_2 = arith.constant 0 : index
    %c0_3 = arith.constant 0 : index
    %0 = vector.load %arg1[%c0, %c0_0, %c0_1, %c0_2, %c0_3] : memref<1x4x64x5x5xf32, #tpu.memory_space<vmem>>, vector<1x1x64x5x5xf32>
    %1 = vector.shape_cast %0 : vector<1x1x64x5x5xf32> to vector<64x5x5xf32>
    %c0_4 = arith.constant 0 : index
    %c1 = arith.constant 1 : index
    %c0_5 = arith.constant 0 : index
    %c0_6 = arith.constant 0 : index
    %c0_7 = arith.constant 0 : index
    %2 = vector.load %arg1[%c0_4, %c1, %c0_5, %c0_6, %c0_7] : memref<1x4x64x5x5xf32, #tpu.memory_space<vmem>>, vector<1x1x64x5x5xf32>
    %3 = vector.shape_cast %2 : vector<1x1x64x5x5xf32> to vector<64x5x5xf32>
    %c0_8 = arith.constant 0 : index
    %c2 = arith.constant 2 : index
    %c0_9 = arith.constant 0 : index
    %c0_10 = arith.constant 0 : index
    %c0_11 = arith.constant 0 : index
    %4 = vector.load %arg1[%c0_8, %c2, %c0_9, %c0_10, %c0_11] : memref<1x4x64x5x5xf32, #tpu.memory_space<vmem>>, vector<1x1x64x5x5xf32>
    %5 = vector.shape_cast %4 : vector<1x1x64x5x5xf32> to vector<64x5x5xf32>
    %c0_12 = arith.constant 0 : index
    %c3 = arith.constant 3 : index
    %c0_13 = arith.constant 0 : index
    %c0_14 = arith.constant 0 : index
    %c0_15 = arith.constant 0 : index
    %6 = vector.load %arg1[%c0_12, %c3, %c0_13, %c0_14, %c0_15] : memref<1x4x64x5x5xf32, #tpu.memory_space<vmem>>, vector<1x1x64x5x5xf32>
    %7 = vector.shape_cast %6 : vector<1x1x64x5x5xf32> to vector<64x5x5xf32>
    %8 = vector.extract_strided_slice %1 {offsets = [0, 1, 1], sizes = [64, 4, 4], strides = [1, 1, 1]} : vector<64x5x5xf32> to vector<64x4x4xf32>
    %9 = vector.extract_strided_slice %3 {offsets = [0, 1, 1], sizes = [64, 4, 4], strides = [1, 1, 1]} : vector<64x5x5xf32> to vector<64x4x4xf32>
    %10 = vector.extract_strided_slice %3 {offsets = [0, 1, 0], sizes = [64, 4, 4], strides = [1, 1, 1]} : vector<64x5x5xf32> to vector<64x4x4xf32>
    %11 = vector.extract_strided_slice %5 {offsets = [0, 1, 1], sizes = [64, 4, 4], strides = [1, 1, 1]} : vector<64x5x5xf32> to vector<64x4x4xf32>
    %12 = vector.extract_strided_slice %5 {offsets = [0, 0, 1], sizes = [64, 4, 4], strides = [1, 1, 1]} : vector<64x5x5xf32> to vector<64x4x4xf32>
    %13 = vector.extract_strided_slice %7 {offsets = [0, 1, 1], sizes = [64, 4, 4], strides = [1, 1, 1]} : vector<64x5x5xf32> to vector<64x4x4xf32>
    %14 = vector.extract_strided_slice %7 {offsets = [0, 1, 0], sizes = [64, 4, 4], strides = [1, 1, 1]} : vector<64x5x5xf32> to vector<64x4x4xf32>
    %15 = vector.extract_strided_slice %7 {offsets = [0, 0, 1], sizes = [64, 4, 4], strides = [1, 1, 1]} : vector<64x5x5xf32> to vector<64x4x4xf32>
    %16 = vector.extract_strided_slice %7 {offsets = [0, 0, 0], sizes = [64, 4, 4], strides = [1, 1, 1]} : vector<64x5x5xf32> to vector<64x4x4xf32>
    %17 = arith.maximumf %8, %9 : vector<64x4x4xf32>
    %18 = arith.maximumf %17, %10 : vector<64x4x4xf32>
    %19 = arith.maximumf %18, %11 : vector<64x4x4xf32>
    %20 = arith.maximumf %19, %12 : vector<64x4x4xf32>
    %21 = arith.maximumf %20, %13 : vector<64x4x4xf32>
    %22 = arith.maximumf %21, %14 : vector<64x4x4xf32>
    %23 = arith.maximumf %22, %15 : vector<64x4x4xf32>
    %24 = arith.maximumf %23, %16 : vector<64x4x4xf32>
    %c0_16 = arith.constant 0 : index
    %c0_17 = arith.constant 0 : index
    %c0_18 = arith.constant 0 : index
    %c0_19 = arith.constant 0 : index
    %25 = vector.load %arg2[%c0_16, %c0_17, %c0_18, %c0_19] : memref<1x64x4x4xf32, #tpu.memory_space<vmem>>, vector<1x64x4x4xf32>
    %26 = vector.shape_cast %25 : vector<1x64x4x4xf32> to vector<64x4x4xf32>
    %27 = vector.shape_cast %24 : vector<64x4x4xf32> to vector<1x64x4x4xf32>
    tpu.vector_store %arg2[%c0_16, %c0_17, %c0_18, %c0_19], %27 {strides = array<i32>} : memref<1x64x4x4xf32, #tpu.memory_space<vmem>>, vector<1x64x4x4xf32>,
    return
  }
  func.func @transform_0(%arg0: i32) -> (i32, i32, i32, i32, i32) {
    %c0_i32 = arith.constant 0 : i32
    %c0_i32_0 = arith.constant 0 : i32
    %c0_i32_1 = arith.constant 0 : i32
    %c0_i32_2 = arith.constant 0 : i32
    %c0_i32_3 = arith.constant 0 : i32
    return %arg0, %c0_i32, %c0_i32_0, %c0_i32_1, %c0_i32_2 : i32, i32, i32, i32, i32
  }
  func.func @transform_1(%arg0: i32) -> (i32, i32, i32, i32) {
    %c0_i32 = arith.constant 0 : i32
    %c0_i32_0 = arith.constant 0 : i32
    %c0_i32_1 = arith.constant 0 : i32
    %c0_i32_2 = arith.constant 0 : i32
    return %arg0, %c0_i32, %c0_i32_0, %c0_i32_1 : i32, i32, i32, i32
  }
}

module attributes {stable_mosaic.version = 11 : i64} {
  func.func @kernel(%arg0: i32, %arg1: i32, %arg2: memref<1x64x36xf32, #tpu.memory_space<vmem>>, %arg3: memref<1x9x64x64xbf16, #tpu.memory_space<vmem>>, %arg4: memref<1x64x1xf32, #tpu.memory_space<vmem>>, %arg5: memref<1x9x64x64xbf16, #tpu.memory_space<vmem>>, %arg6: memref<1x64x1xf32, #tpu.memory_space<vmem>>, %arg7: memref<1x64x36xf32, #tpu.memory_space<vmem>>, %arg8: memref<64x36xf32, #tpu.memory_space<vmem>>, %arg9: memref<64x36xf32, #tpu.memory_space<vmem>>) attributes {dimension_semantics = [#tpu.dimension_semantics<parallel>, #tpu.dimension_semantics<arbitrary>], iteration_bounds = array<i64: 2, 4>, scalar_prefetch = 0 : i64, scratch_operands = 2 : i64, tpu.core_type = #tpu.core_type<tc>, window_params = [{transform_indices = @transform_0, window_bounds = array<i64: 1, 64, 36>}, {transform_indices = @transform_1, window_bounds = array<i64: 1, 9, 64, 64>}, {transform_indices = @transform_2, window_bounds = array<i64: 1, 64, 1>}, {transform_indices = @transform_3, window_bounds = array<i64: 1, 9, 64, 64>}, {transform_indices = @transform_4, window_bounds = array<i64: 1, 64, 1>}, {transform_indices = @transform_5, window_bounds = array<i64: 1, 64, 36>}]} {
    %c0_i32 = arith.constant 0 : i32
    %0 = arith.cmpi eq, %arg1, %c0_i32 : i32
    %1 = arith.extui %0 : i1 to i32
    %c0_i32_0 = arith.constant 0 : i32
    %2 = arith.cmpi ne, %1, %c0_i32_0 : i32
    scf.if %2 {
      %c0_140 = arith.constant 0 : index
      %c0_141 = arith.constant 0 : index
      %c0_142 = arith.constant 0 : index
      %161 = vector.load %arg2[%c0_140, %c0_141, %c0_142] : memref<1x64x36xf32, #tpu.memory_space<vmem>>, vector<1x64x36xf32>
      %162 = vector.shape_cast %161 : vector<1x64x36xf32> to vector<64x36xf32>
      %c0_143 = arith.constant 0 : index
      %c0_144 = arith.constant 0 : index
      %163 = vector.load %arg8[%c0_143, %c0_144] : memref<64x36xf32, #tpu.memory_space<vmem>>, vector<64x36xf32>
      tpu.vector_store %arg8[%c0_143, %c0_144], %162 {strides = array<i32>} : memref<64x36xf32, #tpu.memory_space<vmem>>, vector<64x36xf32>,
      %cst_145 = arith.constant 0.000000e+00 : f32
      %164 = vector.broadcast %cst_145 : f32 to vector<64x36xf32>
      %c0_146 = arith.constant 0 : index
      %c0_147 = arith.constant 0 : index
      %165 = vector.load %arg9[%c0_146, %c0_147] : memref<64x36xf32, #tpu.memory_space<vmem>>, vector<64x36xf32>
      tpu.vector_store %arg9[%c0_146, %c0_147], %164 {strides = array<i32>} : memref<64x36xf32, #tpu.memory_space<vmem>>, vector<64x36xf32>,
    } else {
    }
    %3 = tpu.iota {dimensions = array<i32: 1>} : vector<1x22xi32>
    %c7_i32 = arith.constant 7 : i32
    %4 = vector.broadcast %c7_i32 : i32 to vector<1x22xi32>
    %5 = arith.addi %4, %3 : vector<1x22xi32>
    %c6_i32 = arith.constant 6 : i32
    %c0_i32_1 = arith.constant 0 : i32
    %6 = arith.cmpi eq, %c6_i32, %c0_i32_1 : i32
    %c1_i32 = arith.constant 1 : i32
    %7 = arith.select %6, %c1_i32, %c6_i32 : i32
    %8 = vector.broadcast %7 : i32 to vector<1x22xi32>
    %9 = arith.remsi %5, %8 : vector<1x22xi32>
    %c0_i32_2 = arith.constant 0 : i32
    %10 = vector.broadcast %c0_i32_2 : i32 to vector<1x22xi32>
    %11 = arith.cmpi ne, %9, %10 : vector<1x22xi32>
    %c0_i32_3 = arith.constant 0 : i32
    %12 = vector.broadcast %c0_i32_3 : i32 to vector<1x22xi32>
    %13 = arith.cmpi slt, %9, %12 : vector<1x22xi32>
    %c0_i32_4 = arith.constant 0 : i32
    %14 = arith.cmpi slt, %7, %c0_i32_4 : i32
    %15 = vector.broadcast %14 : i1 to vector<1x22xi1>
    %16 = vector.broadcast %15 : vector<1x22xi1> to vector<1x22xi1>
    %17 = arith.xori %13, %16 : vector<1x22xi1>
    %18 = arith.andi %17, %11 : vector<1x22xi1>
    %19 = vector.broadcast %7 : i32 to vector<1x22xi32>
    %20 = arith.addi %9, %19 : vector<1x22xi32>
    %21 = arith.select %18, %20, %9 : vector<1x22xi1>, vector<1x22xi32>
    %c1_i32_5 = arith.constant 1 : i32
    %22 = vector.broadcast %c1_i32_5 : i32 to vector<1x22xi32>
    %23 = arith.cmpi sge, %21, %22 : vector<1x22xi32>
    %c4_i32 = arith.constant 4 : i32
    %24 = vector.broadcast %c4_i32 : i32 to vector<1x22xi32>
    %25 = arith.cmpi sle, %21, %24 : vector<1x22xi32>
    %26 = arith.andi %23, %25 : vector<1x22xi1>
    %c0 = arith.constant 0 : index
    %c0_6 = arith.constant 0 : index
    %c0_7 = arith.constant 0 : index
    %c0_8 = arith.constant 0 : index
    %27 = vector.load %arg3[%c0, %c0_6, %c0_7, %c0_8] : memref<1x9x64x64xbf16, #tpu.memory_space<vmem>>, vector<1x1x64x64xbf16>
    %28 = vector.shape_cast %27 : vector<1x1x64x64xbf16> to vector<64x64xbf16>
    %29 = arith.extf %28 : vector<64x64xbf16> to vector<64x64xf32>
    %c0_9 = arith.constant 0 : index
    %c0_10 = arith.constant 0 : index
    %30 = vector.load %arg8[%c0_9, %c0_10] : memref<64x36xf32, #tpu.memory_space<vmem>>, vector<64x22xf32>
    %cst = arith.constant dense<0.000000e+00> : vector<64x22xf32>
    %31 = tpu.matmul %29, %30, %cst {dimension_numbers = #tpu.dot_dimension_numbers<[1], [0], [0], [1], [0, 0, 1, 1], [], []>} : vector<64x64xf32>, vector<64x22xf32>, vector<64x22xf32> -> vector<64x22xf32>
    %c0_11 = arith.constant 0 : index
    %c1 = arith.constant 1 : index
    %c0_12 = arith.constant 0 : index
    %c0_13 = arith.constant 0 : index
    %32 = vector.load %arg3[%c0_11, %c1, %c0_12, %c0_13] : memref<1x9x64x64xbf16, #tpu.memory_space<vmem>>, vector<1x1x64x64xbf16>
    %33 = vector.shape_cast %32 : vector<1x1x64x64xbf16> to vector<64x64xbf16>
    %34 = arith.extf %33 : vector<64x64xbf16> to vector<64x64xf32>
    %c0_14 = arith.constant 0 : index
    %c1_15 = arith.constant 1 : index
    %35 = vector.load %arg8[%c0_14, %c1_15] : memref<64x36xf32, #tpu.memory_space<vmem>>, vector<64x22xf32>
    %cst_16 = arith.constant dense<0.000000e+00> : vector<64x22xf32>
    %36 = tpu.matmul %34, %35, %cst_16 {dimension_numbers = #tpu.dot_dimension_numbers<[1], [0], [0], [1], [0, 0, 1, 1], [], []>} : vector<64x64xf32>, vector<64x22xf32>, vector<64x22xf32> -> vector<64x22xf32>
    %37 = arith.addf %31, %36 : vector<64x22xf32>
    %c0_17 = arith.constant 0 : index
    %c2 = arith.constant 2 : index
    %c0_18 = arith.constant 0 : index
    %c0_19 = arith.constant 0 : index
    %38 = vector.load %arg3[%c0_17, %c2, %c0_18, %c0_19] : memref<1x9x64x64xbf16, #tpu.memory_space<vmem>>, vector<1x1x64x64xbf16>
    %39 = vector.shape_cast %38 : vector<1x1x64x64xbf16> to vector<64x64xbf16>
    %40 = arith.extf %39 : vector<64x64xbf16> to vector<64x64xf32>
    %c0_20 = arith.constant 0 : index
    %c2_21 = arith.constant 2 : index
    %41 = vector.load %arg8[%c0_20, %c2_21] : memref<64x36xf32, #tpu.memory_space<vmem>>, vector<64x22xf32>
    %cst_22 = arith.constant dense<0.000000e+00> : vector<64x22xf32>
    %42 = tpu.matmul %40, %41, %cst_22 {dimension_numbers = #tpu.dot_dimension_numbers<[1], [0], [0], [1], [0, 0, 1, 1], [], []>} : vector<64x64xf32>, vector<64x22xf32>, vector<64x22xf32> -> vector<64x22xf32>
    %43 = arith.addf %37, %42 : vector<64x22xf32>
    %c0_23 = arith.constant 0 : index
    %c3 = arith.constant 3 : index
    %c0_24 = arith.constant 0 : index
    %c0_25 = arith.constant 0 : index
    %44 = vector.load %arg3[%c0_23, %c3, %c0_24, %c0_25] : memref<1x9x64x64xbf16, #tpu.memory_space<vmem>>, vector<1x1x64x64xbf16>
    %45 = vector.shape_cast %44 : vector<1x1x64x64xbf16> to vector<64x64xbf16>
    %46 = arith.extf %45 : vector<64x64xbf16> to vector<64x64xf32>
    %c0_26 = arith.constant 0 : index
    %c6 = arith.constant 6 : index
    %47 = vector.load %arg8[%c0_26, %c6] : memref<64x36xf32, #tpu.memory_space<vmem>>, vector<64x22xf32>
    %cst_27 = arith.constant dense<0.000000e+00> : vector<64x22xf32>
    %48 = tpu.matmul %46, %47, %cst_27 {dimension_numbers = #tpu.dot_dimension_numbers<[1], [0], [0], [1], [0, 0, 1, 1], [], []>} : vector<64x64xf32>, vector<64x22xf32>, vector<64x22xf32> -> vector<64x22xf32>
    %49 = arith.addf %43, %48 : vector<64x22xf32>
    %c0_28 = arith.constant 0 : index
    %c4 = arith.constant 4 : index
    %c0_29 = arith.constant 0 : index
    %c0_30 = arith.constant 0 : index
    %50 = vector.load %arg3[%c0_28, %c4, %c0_29, %c0_30] : memref<1x9x64x64xbf16, #tpu.memory_space<vmem>>, vector<1x1x64x64xbf16>
    %51 = vector.shape_cast %50 : vector<1x1x64x64xbf16> to vector<64x64xbf16>
    %52 = arith.extf %51 : vector<64x64xbf16> to vector<64x64xf32>
    %c0_31 = arith.constant 0 : index
    %c7 = arith.constant 7 : index
    %53 = vector.load %arg8[%c0_31, %c7] : memref<64x36xf32, #tpu.memory_space<vmem>>, vector<64x22xf32>
    %cst_32 = arith.constant dense<0.000000e+00> : vector<64x22xf32>
    %54 = tpu.matmul %52, %53, %cst_32 {dimension_numbers = #tpu.dot_dimension_numbers<[1], [0], [0], [1], [0, 0, 1, 1], [], []>} : vector<64x64xf32>, vector<64x22xf32>, vector<64x22xf32> -> vector<64x22xf32>
    %55 = arith.addf %49, %54 : vector<64x22xf32>
    %c0_33 = arith.constant 0 : index
    %c5 = arith.constant 5 : index
    %c0_34 = arith.constant 0 : index
    %c0_35 = arith.constant 0 : index
    %56 = vector.load %arg3[%c0_33, %c5, %c0_34, %c0_35] : memref<1x9x64x64xbf16, #tpu.memory_space<vmem>>, vector<1x1x64x64xbf16>
    %57 = vector.shape_cast %56 : vector<1x1x64x64xbf16> to vector<64x64xbf16>
    %58 = arith.extf %57 : vector<64x64xbf16> to vector<64x64xf32>
    %c0_36 = arith.constant 0 : index
    %c8 = arith.constant 8 : index
    %59 = vector.load %arg8[%c0_36, %c8] : memref<64x36xf32, #tpu.memory_space<vmem>>, vector<64x22xf32>
    %cst_37 = arith.constant dense<0.000000e+00> : vector<64x22xf32>
    %60 = tpu.matmul %58, %59, %cst_37 {dimension_numbers = #tpu.dot_dimension_numbers<[1], [0], [0], [1], [0, 0, 1, 1], [], []>} : vector<64x64xf32>, vector<64x22xf32>, vector<64x22xf32> -> vector<64x22xf32>
    %61 = arith.addf %55, %60 : vector<64x22xf32>
    %c0_38 = arith.constant 0 : index
    %c6_39 = arith.constant 6 : index
    %c0_40 = arith.constant 0 : index
    %c0_41 = arith.constant 0 : index
    %62 = vector.load %arg3[%c0_38, %c6_39, %c0_40, %c0_41] : memref<1x9x64x64xbf16, #tpu.memory_space<vmem>>, vector<1x1x64x64xbf16>
    %63 = vector.shape_cast %62 : vector<1x1x64x64xbf16> to vector<64x64xbf16>
    %64 = arith.extf %63 : vector<64x64xbf16> to vector<64x64xf32>
    %c0_42 = arith.constant 0 : index
    %c12 = arith.constant 12 : index
    %65 = vector.load %arg8[%c0_42, %c12] : memref<64x36xf32, #tpu.memory_space<vmem>>, vector<64x22xf32>
    %cst_43 = arith.constant dense<0.000000e+00> : vector<64x22xf32>
    %66 = tpu.matmul %64, %65, %cst_43 {dimension_numbers = #tpu.dot_dimension_numbers<[1], [0], [0], [1], [0, 0, 1, 1], [], []>} : vector<64x64xf32>, vector<64x22xf32>, vector<64x22xf32> -> vector<64x22xf32>
    %67 = arith.addf %61, %66 : vector<64x22xf32>
    %c0_44 = arith.constant 0 : index
    %c7_45 = arith.constant 7 : index
    %c0_46 = arith.constant 0 : index
    %c0_47 = arith.constant 0 : index
    %68 = vector.load %arg3[%c0_44, %c7_45, %c0_46, %c0_47] : memref<1x9x64x64xbf16, #tpu.memory_space<vmem>>, vector<1x1x64x64xbf16>
    %69 = vector.shape_cast %68 : vector<1x1x64x64xbf16> to vector<64x64xbf16>
    %70 = arith.extf %69 : vector<64x64xbf16> to vector<64x64xf32>
    %c0_48 = arith.constant 0 : index
    %c13 = arith.constant 13 : index
    %71 = vector.load %arg8[%c0_48, %c13] : memref<64x36xf32, #tpu.memory_space<vmem>>, vector<64x22xf32>
    %cst_49 = arith.constant dense<0.000000e+00> : vector<64x22xf32>
    %72 = tpu.matmul %70, %71, %cst_49 {dimension_numbers = #tpu.dot_dimension_numbers<[1], [0], [0], [1], [0, 0, 1, 1], [], []>} : vector<64x64xf32>, vector<64x22xf32>, vector<64x22xf32> -> vector<64x22xf32>
    %73 = arith.addf %67, %72 : vector<64x22xf32>
    %c0_50 = arith.constant 0 : index
    %c8_51 = arith.constant 8 : index
    %c0_52 = arith.constant 0 : index
    %c0_53 = arith.constant 0 : index
    %74 = vector.load %arg3[%c0_50, %c8_51, %c0_52, %c0_53] : memref<1x9x64x64xbf16, #tpu.memory_space<vmem>>, vector<1x1x64x64xbf16>
    %75 = vector.shape_cast %74 : vector<1x1x64x64xbf16> to vector<64x64xbf16>
    %76 = arith.extf %75 : vector<64x64xbf16> to vector<64x64xf32>
    %c0_54 = arith.constant 0 : index
    %c14 = arith.constant 14 : index
    %77 = vector.load %arg8[%c0_54, %c14] : memref<64x36xf32, #tpu.memory_space<vmem>>, vector<64x22xf32>
    %cst_55 = arith.constant dense<0.000000e+00> : vector<64x22xf32>
    %78 = tpu.matmul %76, %77, %cst_55 {dimension_numbers = #tpu.dot_dimension_numbers<[1], [0], [0], [1], [0, 0, 1, 1], [], []>} : vector<64x64xf32>, vector<64x22xf32>, vector<64x22xf32> -> vector<64x22xf32>
    %79 = arith.addf %73, %78 : vector<64x22xf32>
    %c0_56 = arith.constant 0 : index
    %c0_57 = arith.constant 0 : index
    %c0_58 = arith.constant 0 : index
    %80 = vector.load %arg4[%c0_56, %c0_57, %c0_58] : memref<1x64x1xf32, #tpu.memory_space<vmem>>, vector<1x64x1xf32>
    %81 = vector.shape_cast %80 : vector<1x64x1xf32> to vector<64x1xf32>
    %82 = vector.broadcast %81 : vector<64x1xf32> to vector<64x22xf32>
    %83 = arith.addf %79, %82 : vector<64x22xf32>
    %cst_59 = arith.constant 0.000000e+00 : f32
    %84 = vector.broadcast %cst_59 : f32 to vector<64x22xf32>
    %85 = arith.maximumf %83, %84 : vector<64x22xf32>
    %cst_60 = arith.constant 0.000000e+00 : f32
    %86 = vector.shape_cast %26 : vector<1x22xi1> to vector<1x22xi1>
    %87 = vector.broadcast %86 : vector<1x22xi1> to vector<64x22xi1>
    %88 = vector.broadcast %cst_60 : f32 to vector<64x22xf32>
    %89 = arith.select %87, %85, %88 : vector<64x22xi1>, vector<64x22xf32>
    %c0_61 = arith.constant 0 : index
    %c7_62 = arith.constant 7 : index
    %90 = vector.load %arg9[%c0_61, %c7_62] : memref<64x36xf32, #tpu.memory_space<vmem>>, vector<64x22xf32>
    tpu.vector_store %arg9[%c0_61, %c7_62], %89 {strides = array<i32>} : memref<64x36xf32, #tpu.memory_space<vmem>>, vector<64x22xf32>,
    %c0_63 = arith.constant 0 : index
    %c7_64 = arith.constant 7 : index
    %91 = vector.load %arg8[%c0_63, %c7_64] : memref<64x36xf32, #tpu.memory_space<vmem>>, vector<64x22xf32>
    %c0_65 = arith.constant 0 : index
    %c0_66 = arith.constant 0 : index
    %c0_67 = arith.constant 0 : index
    %c0_68 = arith.constant 0 : index
    %92 = vector.load %arg5[%c0_65, %c0_66, %c0_67, %c0_68] : memref<1x9x64x64xbf16, #tpu.memory_space<vmem>>, vector<1x1x64x64xbf16>
    %93 = vector.shape_cast %92 : vector<1x1x64x64xbf16> to vector<64x64xbf16>
    %94 = arith.extf %93 : vector<64x64xbf16> to vector<64x64xf32>
    %c0_69 = arith.constant 0 : index
    %c0_70 = arith.constant 0 : index
    %95 = vector.load %arg9[%c0_69, %c0_70] : memref<64x36xf32, #tpu.memory_space<vmem>>, vector<64x22xf32>
    %cst_71 = arith.constant dense<0.000000e+00> : vector<64x22xf32>
    %96 = tpu.matmul %94, %95, %cst_71 {dimension_numbers = #tpu.dot_dimension_numbers<[1], [0], [0], [1], [0, 0, 1, 1], [], []>} : vector<64x64xf32>, vector<64x22xf32>, vector<64x22xf32> -> vector<64x22xf32>
    %c0_72 = arith.constant 0 : index
    %c1_73 = arith.constant 1 : index
    %c0_74 = arith.constant 0 : index
    %c0_75 = arith.constant 0 : index
    %97 = vector.load %arg5[%c0_72, %c1_73, %c0_74, %c0_75] : memref<1x9x64x64xbf16, #tpu.memory_space<vmem>>, vector<1x1x64x64xbf16>
    %98 = vector.shape_cast %97 : vector<1x1x64x64xbf16> to vector<64x64xbf16>
    %99 = arith.extf %98 : vector<64x64xbf16> to vector<64x64xf32>
    %c0_76 = arith.constant 0 : index
    %c1_77 = arith.constant 1 : index
    %100 = vector.load %arg9[%c0_76, %c1_77] : memref<64x36xf32, #tpu.memory_space<vmem>>, vector<64x22xf32>
    %cst_78 = arith.constant dense<0.000000e+00> : vector<64x22xf32>
    %101 = tpu.matmul %99, %100, %cst_78 {dimension_numbers = #tpu.dot_dimension_numbers<[1], [0], [0], [1], [0, 0, 1, 1], [], []>} : vector<64x64xf32>, vector<64x22xf32>, vector<64x22xf32> -> vector<64x22xf32>
    %102 = arith.addf %96, %101 : vector<64x22xf32>
    %c0_79 = arith.constant 0 : index
    %c2_80 = arith.constant 2 : index
    %c0_81 = arith.constant 0 : index
    %c0_82 = arith.constant 0 : index
    %103 = vector.load %arg5[%c0_79, %c2_80, %c0_81, %c0_82] : memref<1x9x64x64xbf16, #tpu.memory_space<vmem>>, vector<1x1x64x64xbf16>
    %104 = vector.shape_cast %103 : vector<1x1x64x64xbf16> to vector<64x64xbf16>
    %105 = arith.extf %104 : vector<64x64xbf16> to vector<64x64xf32>
    %c0_83 = arith.constant 0 : index
    %c2_84 = arith.constant 2 : index
    %106 = vector.load %arg9[%c0_83, %c2_84] : memref<64x36xf32, #tpu.memory_space<vmem>>, vector<64x22xf32>
    %cst_85 = arith.constant dense<0.000000e+00> : vector<64x22xf32>
    %107 = tpu.matmul %105, %106, %cst_85 {dimension_numbers = #tpu.dot_dimension_numbers<[1], [0], [0], [1], [0, 0, 1, 1], [], []>} : vector<64x64xf32>, vector<64x22xf32>, vector<64x22xf32> -> vector<64x22xf32>
    %108 = arith.addf %102, %107 : vector<64x22xf32>
    %c0_86 = arith.constant 0 : index
    %c3_87 = arith.constant 3 : index
    %c0_88 = arith.constant 0 : index
    %c0_89 = arith.constant 0 : index
    %109 = vector.load %arg5[%c0_86, %c3_87, %c0_88, %c0_89] : memref<1x9x64x64xbf16, #tpu.memory_space<vmem>>, vector<1x1x64x64xbf16>
    %110 = vector.shape_cast %109 : vector<1x1x64x64xbf16> to vector<64x64xbf16>
    %111 = arith.extf %110 : vector<64x64xbf16> to vector<64x64xf32>
    %c0_90 = arith.constant 0 : index
    %c6_91 = arith.constant 6 : index
    %112 = vector.load %arg9[%c0_90, %c6_91] : memref<64x36xf32, #tpu.memory_space<vmem>>, vector<64x22xf32>
    %cst_92 = arith.constant dense<0.000000e+00> : vector<64x22xf32>
    %113 = tpu.matmul %111, %112, %cst_92 {dimension_numbers = #tpu.dot_dimension_numbers<[1], [0], [0], [1], [0, 0, 1, 1], [], []>} : vector<64x64xf32>, vector<64x22xf32>, vector<64x22xf32> -> vector<64x22xf32>
    %114 = arith.addf %108, %113 : vector<64x22xf32>
    %c0_93 = arith.constant 0 : index
    %c4_94 = arith.constant 4 : index
    %c0_95 = arith.constant 0 : index
    %c0_96 = arith.constant 0 : index
    %115 = vector.load %arg5[%c0_93, %c4_94, %c0_95, %c0_96] : memref<1x9x64x64xbf16, #tpu.memory_space<vmem>>, vector<1x1x64x64xbf16>
    %116 = vector.shape_cast %115 : vector<1x1x64x64xbf16> to vector<64x64xbf16>
    %117 = arith.extf %116 : vector<64x64xbf16> to vector<64x64xf32>
    %c0_97 = arith.constant 0 : index
    %c7_98 = arith.constant 7 : index
    %118 = vector.load %arg9[%c0_97, %c7_98] : memref<64x36xf32, #tpu.memory_space<vmem>>, vector<64x22xf32>
    %cst_99 = arith.constant dense<0.000000e+00> : vector<64x22xf32>
    %119 = tpu.matmul %117, %118, %cst_99 {dimension_numbers = #tpu.dot_dimension_numbers<[1], [0], [0], [1], [0, 0, 1, 1], [], []>} : vector<64x64xf32>, vector<64x22xf32>, vector<64x22xf32> -> vector<64x22xf32>
    %120 = arith.addf %114, %119 : vector<64x22xf32>
    %c0_100 = arith.constant 0 : index
    %c5_101 = arith.constant 5 : index
    %c0_102 = arith.constant 0 : index
    %c0_103 = arith.constant 0 : index
    %121 = vector.load %arg5[%c0_100, %c5_101, %c0_102, %c0_103] : memref<1x9x64x64xbf16, #tpu.memory_space<vmem>>, vector<1x1x64x64xbf16>
    %122 = vector.shape_cast %121 : vector<1x1x64x64xbf16> to vector<64x64xbf16>
    %123 = arith.extf %122 : vector<64x64xbf16> to vector<64x64xf32>
    %c0_104 = arith.constant 0 : index
    %c8_105 = arith.constant 8 : index
    %124 = vector.load %arg9[%c0_104, %c8_105] : memref<64x36xf32, #tpu.memory_space<vmem>>, vector<64x22xf32>
    %cst_106 = arith.constant dense<0.000000e+00> : vector<64x22xf32>
    %125 = tpu.matmul %123, %124, %cst_106 {dimension_numbers = #tpu.dot_dimension_numbers<[1], [0], [0], [1], [0, 0, 1, 1], [], []>} : vector<64x64xf32>, vector<64x22xf32>, vector<64x22xf32> -> vector<64x22xf32>
    %126 = arith.addf %120, %125 : vector<64x22xf32>
    %c0_107 = arith.constant 0 : index
    %c6_108 = arith.constant 6 : index
    %c0_109 = arith.constant 0 : index
    %c0_110 = arith.constant 0 : index
    %127 = vector.load %arg5[%c0_107, %c6_108, %c0_109, %c0_110] : memref<1x9x64x64xbf16, #tpu.memory_space<vmem>>, vector<1x1x64x64xbf16>
    %128 = vector.shape_cast %127 : vector<1x1x64x64xbf16> to vector<64x64xbf16>
    %129 = arith.extf %128 : vector<64x64xbf16> to vector<64x64xf32>
    %c0_111 = arith.constant 0 : index
    %c12_112 = arith.constant 12 : index
    %130 = vector.load %arg9[%c0_111, %c12_112] : memref<64x36xf32, #tpu.memory_space<vmem>>, vector<64x22xf32>
    %cst_113 = arith.constant dense<0.000000e+00> : vector<64x22xf32>
    %131 = tpu.matmul %129, %130, %cst_113 {dimension_numbers = #tpu.dot_dimension_numbers<[1], [0], [0], [1], [0, 0, 1, 1], [], []>} : vector<64x64xf32>, vector<64x22xf32>, vector<64x22xf32> -> vector<64x22xf32>
    %132 = arith.addf %126, %131 : vector<64x22xf32>
    %c0_114 = arith.constant 0 : index
    %c7_115 = arith.constant 7 : index
    %c0_116 = arith.constant 0 : index
    %c0_117 = arith.constant 0 : index
    %133 = vector.load %arg5[%c0_114, %c7_115, %c0_116, %c0_117] : memref<1x9x64x64xbf16, #tpu.memory_space<vmem>>, vector<1x1x64x64xbf16>
    %134 = vector.shape_cast %133 : vector<1x1x64x64xbf16> to vector<64x64xbf16>
    %135 = arith.extf %134 : vector<64x64xbf16> to vector<64x64xf32>
    %c0_118 = arith.constant 0 : index
    %c13_119 = arith.constant 13 : index
    %136 = vector.load %arg9[%c0_118, %c13_119] : memref<64x36xf32, #tpu.memory_space<vmem>>, vector<64x22xf32>
    %cst_120 = arith.constant dense<0.000000e+00> : vector<64x22xf32>
    %137 = tpu.matmul %135, %136, %cst_120 {dimension_numbers = #tpu.dot_dimension_numbers<[1], [0], [0], [1], [0, 0, 1, 1], [], []>} : vector<64x64xf32>, vector<64x22xf32>, vector<64x22xf32> -> vector<64x22xf32>
    %138 = arith.addf %132, %137 : vector<64x22xf32>
    %c0_121 = arith.constant 0 : index
    %c8_122 = arith.constant 8 : index
    %c0_123 = arith.constant 0 : index
    %c0_124 = arith.constant 0 : index
    %139 = vector.load %arg5[%c0_121, %c8_122, %c0_123, %c0_124] : memref<1x9x64x64xbf16, #tpu.memory_space<vmem>>, vector<1x1x64x64xbf16>
    %140 = vector.shape_cast %139 : vector<1x1x64x64xbf16> to vector<64x64xbf16>
    %141 = arith.extf %140 : vector<64x64xbf16> to vector<64x64xf32>
    %c0_125 = arith.constant 0 : index
    %c14_126 = arith.constant 14 : index
    %142 = vector.load %arg9[%c0_125, %c14_126] : memref<64x36xf32, #tpu.memory_space<vmem>>, vector<64x22xf32>
    %cst_127 = arith.constant dense<0.000000e+00> : vector<64x22xf32>
    %143 = tpu.matmul %141, %142, %cst_127 {dimension_numbers = #tpu.dot_dimension_numbers<[1], [0], [0], [1], [0, 0, 1, 1], [], []>} : vector<64x64xf32>, vector<64x22xf32>, vector<64x22xf32> -> vector<64x22xf32>
    %144 = arith.addf %138, %143 : vector<64x22xf32>
    %c0_128 = arith.constant 0 : index
    %c0_129 = arith.constant 0 : index
    %c0_130 = arith.constant 0 : index
    %145 = vector.load %arg6[%c0_128, %c0_129, %c0_130] : memref<1x64x1xf32, #tpu.memory_space<vmem>>, vector<1x64x1xf32>
    %146 = vector.shape_cast %145 : vector<1x64x1xf32> to vector<64x1xf32>
    %147 = vector.broadcast %146 : vector<64x1xf32> to vector<64x22xf32>
    %148 = arith.addf %144, %147 : vector<64x22xf32>
    %149 = arith.addf %148, %91 : vector<64x22xf32>
    %cst_131 = arith.constant 0.000000e+00 : f32
    %150 = vector.broadcast %cst_131 : f32 to vector<64x22xf32>
    %151 = arith.maximumf %149, %150 : vector<64x22xf32>
    %cst_132 = arith.constant 0.000000e+00 : f32
    %152 = vector.shape_cast %26 : vector<1x22xi1> to vector<1x22xi1>
    %153 = vector.broadcast %152 : vector<1x22xi1> to vector<64x22xi1>
    %154 = vector.broadcast %cst_132 : f32 to vector<64x22xf32>
    %155 = arith.select %153, %151, %154 : vector<64x22xi1>, vector<64x22xf32>
    %c0_133 = arith.constant 0 : index
    %c7_134 = arith.constant 7 : index
    %156 = vector.load %arg8[%c0_133, %c7_134] : memref<64x36xf32, #tpu.memory_space<vmem>>, vector<64x22xf32>
    tpu.vector_store %arg8[%c0_133, %c7_134], %155 {strides = array<i32>} : memref<64x36xf32, #tpu.memory_space<vmem>>, vector<64x22xf32>,
    %c0_135 = arith.constant 0 : index
    %c0_136 = arith.constant 0 : index
    %157 = vector.load %arg8[%c0_135, %c0_136] : memref<64x36xf32, #tpu.memory_space<vmem>>, vector<64x36xf32>
    %c0_137 = arith.constant 0 : index
    %c0_138 = arith.constant 0 : index
    %c0_139 = arith.constant 0 : index
    %158 = vector.load %arg7[%c0_137, %c0_138, %c0_139] : memref<1x64x36xf32, #tpu.memory_space<vmem>>, vector<1x64x36xf32>
    %159 = vector.shape_cast %158 : vector<1x64x36xf32> to vector<64x36xf32>
    %160 = vector.shape_cast %157 : vector<64x36xf32> to vector<1x64x36xf32>
    tpu.vector_store %arg7[%c0_137, %c0_138, %c0_139], %160 {strides = array<i32>} : memref<1x64x36xf32, #tpu.memory_space<vmem>>, vector<1x64x36xf32>,
    return
  }
  func.func @transform_0(%arg0: i32, %arg1: i32) -> (i32, i32, i32) {
    %c0_i32 = arith.constant 0 : i32
    %c0_i32_0 = arith.constant 0 : i32
    %c0_i32_1 = arith.constant 0 : i32
    return %arg0, %c0_i32, %c0_i32_0 : i32, i32, i32
  }
  func.func @transform_1(%arg0: i32, %arg1: i32) -> (i32, i32, i32, i32) {
    %c0_i32 = arith.constant 0 : i32
    %c0_i32_0 = arith.constant 0 : i32
    %c0_i32_1 = arith.constant 0 : i32
    %c0_i32_2 = arith.constant 0 : i32
    return %arg1, %c0_i32, %c0_i32_0, %c0_i32_1 : i32, i32, i32, i32
  }
  func.func @transform_2(%arg0: i32, %arg1: i32) -> (i32, i32, i32) {
    %c0_i32 = arith.constant 0 : i32
    %c0_i32_0 = arith.constant 0 : i32
    %c0_i32_1 = arith.constant 0 : i32
    return %arg1, %c0_i32, %c0_i32_0 : i32, i32, i32
  }
  func.func @transform_3(%arg0: i32, %arg1: i32) -> (i32, i32, i32, i32) {
    %c0_i32 = arith.constant 0 : i32
    %c0_i32_0 = arith.constant 0 : i32
    %c0_i32_1 = arith.constant 0 : i32
    %c0_i32_2 = arith.constant 0 : i32
    return %arg1, %c0_i32, %c0_i32_0, %c0_i32_1 : i32, i32, i32, i32
  }
  func.func @transform_4(%arg0: i32, %arg1: i32) -> (i32, i32, i32) {
    %c0_i32 = arith.constant 0 : i32
    %c0_i32_0 = arith.constant 0 : i32
    %c0_i32_1 = arith.constant 0 : i32
    return %arg1, %c0_i32, %c0_i32_0 : i32, i32, i32
  }
  func.func @transform_5(%arg0: i32, %arg1: i32) -> (i32, i32, i32) {
    %c0_i32 = arith.constant 0 : i32
    %c0_i32_0 = arith.constant 0 : i32
    %c0_i32_1 = arith.constant 0 : i32
    return %arg0, %c0_i32, %c0_i32_0 : i32, i32, i32
  }
}

</mosaic_0001>

<bundles_post_ra>
// kernel: resnet_forward_pallas.3
= control target key start
LH: loop header
LB: loop body
LE: loop exit
PB: predicated region body
PF: predicated region fallthrough
CT: control target
= control target key end

     0   :  { %s737_s12 = smov 0   ;;  %s739_s13 = smov 0   ;;  %s887_s0 = inlined_call_operand.vmem [shape: bf16[2,196,64], index: 0, kind: input, shape index: {}]   ;;  %s888_s1 = inlined_call_operand.vmem [shape: bf16[64,196], index: 1, kind: input, shape index: {}]   ;;  %s889_s2 = inlined_call_operand.vmem [shape: f32[64,1], index: 2, kind: input, shape index: {}]   ;;  %s890_s3 = inlined_call_operand.vmem [shape: f32[2,64,64], index: 3, kind: output, shape index: {}]  }
   0x1   :  { %s741_s14 = smov 0  }
   0x2 LB: > { %s25_s15 = sadd.s32 1, %s710_s13  ;;  %p581_p0 = scmp.ge.s32.totalorder %s714_s14, 1  ;;  %s714_s14 = sphi %s741_s14, %s13_s14   ;;  %s710_s13 = sphi %s739_s13, %s892_s13   ;;  %s706_s12 = sphi %s737_s12, %s891_s12  }
   0x3   : > { %p27_p1 = scmp.ge.s32.totalorder %s25_s15, 2  ;;  %p156_p2 = scmp.lt.s32.totalorder %s714_s14, 3 }
   0x5   : > { %s894_s15 = smov (%p27_p1, %s25_s15), 0  ;;  %p157_p3 = pnand %p581_p0, %p156_p2 }
   0x6   : > { %p186_p4 = scmp.lt.s32.totalorder (!%p157_p3), %s706_s12, 1 }
   0x7   : > { %160 = sbr.rel (%p157_p3) target bundleno = 278 (0x116), region = 32 }
   0xc   : > { %vm395_vm0 = vcmask 556032   ;;  %v716_v0 = vmov 0   ;;  %v682_v1 = vld [vmem:[%s888_s1 + $0x4] ss:$8 sps:$4 sm:$0xff]   ;;  %s896_s12 = smov (!%p186_p4, %s706_s12), 1  ;;  %v238_v3 = vld [vmem:[%s889_s2 + $0x10] sm:$0xff] }
   0xd   : > { %412 = vmatprep.subr.bf16.mxu0 %v716_v0  ;;  %613 = vmatprep.subr.bf16.mxu1 %v716_v0  ;;  %v685_v2 = vld [vmem:[%s888_s1 + $0x24] ss:$8 sps:$4 sm:$0xff]   ;;  %s639_s20 = smul.u32 100, %s896_s12  ;;  %v239_v5 = vld [vmem:[%s889_s2 + $0x18] sm:$0xff]  ;;  %v242_v15 = vld [vmem:[%s889_s2 + $0x30] sm:$0xff]  ;;  %vm408_vm1 = vcmask 1041408  }
   0xe   : > { %666 = vset.pattern.permute.xlu1 %v716_v0  ;;  %665 = vset.pattern.permute.xlu0 %v716_v0  ;;  %v236_v4 = vld [vmem:[%s889_s2] sm:$0xff]  ;;  %v237_v7 = vld [vmem:[%s889_s2 + $0x8] sm:$0xff]  ;;  %v243_v14 = vld [vmem:[%s889_s2 + $0x38] sm:$0xff]  ;;  %s612_s29 = sshll.u32 %s896_s12, 6  ;;  %vm485_vm2 = vcmask 523264  }
   0xf   : > { %606 = vmatprep.mubr.msk.bf16.mxu0 %vm395_vm0, %v682_v1  ;;  %608 = vmatprep.mubr.msk.bf16.mxu1 %vm395_vm0, %v685_v2  ;;  %s776_s25 = scalar_lea.vmem %s887_s0, %s639_s20  ;;  %v241_v11 = vld [vmem:[%s889_s2 + $0x28] sm:$0xff]  ;;  %v240_v12 = vld [vmem:[%s889_s2 + $0x20] sm:$0xff]  ;;  %v686_v27 = vld [vmem:[%s888_s1 + $0x14] ss:$8 sps:$4 sm:$0xff]   ;;  %s860_s5 = scalar_lea.vmem %s890_s3, %s612_s29 }
  0x10   : > { %256 = vperm.xlu1 %666, %v238_v3   ;;  %v667_v6 = vld [vmem:[%s776_s25 + $0x38] sm:$0xff]   ;;  %246 = vperm.xlu0 %665, %v236_v4   ;;  %v668_v8 = vld [vmem:[%s776_s25 + $0x30] sm:$0xff]   ;;  %v669_v9 = vld [vmem:[%s776_s25 + $0x28] sm:$0xff]  }
  0x11   : > { %413 = vmatpush1.bf16.msra.mxu0 %v667_v6  ;;  %626 = vmatpush1.bf16.msra.mxu1 %v667_v6  ;;  %v670_v10 = vld [vmem:[%s776_s25 + $0x20] sm:$0xff]   ;;  %v671_v13 = vld [vmem:[%s776_s25 + $0x18] sm:$0xff]   ;;  %v672_v16 = vld [vmem:[%s776_s25 + $0x10] sm:$0xff]  }
  0x12   : > { %414 = vmatprep.subr.bf16.mxu0 %v716_v0  ;;  %614 = vmatprep.subr.bf16.mxu1 %v716_v0  ;;  %v673_v17 = vld [vmem:[%s776_s25 + $0x8] sm:$0xff]   ;;  %v674_v18 = vld [vmem:[%s776_s25] sm:$0xff]   ;;  %v676_v21 = vld [vmem:[%s776_s25 + $0x58] sm:$0xff]  }
  0x13   : > { %v675_v19 = vld [vmem:[%s776_s25 + $0x60] ss:$0 sps:$4 sm:$0x33]   ;;  %v677_v22 = vld [vmem:[%s776_s25 + $0x50] sm:$0xff]   ;;  %v678_v23 = vld [vmem:[%s776_s25 + $0x48] sm:$0xff]  }
  0x14   : > { %261 = vperm.xlu1 %666, %v239_v5   ;;  %251 = vperm.xlu0 %665, %v237_v7   ;;  %v410_v20 = vsel %vm408_vm1, %v675_v19, 0  ;;  %v679_v24 = vld [vmem:[%s776_s25 + $0x40] sm:$0xff]   ;;  %v688_v28 = vld [vmem:[%s888_s1 + $0x34] ss:$8 sps:$4 sm:$0xff]   ;;  %v690_v29 = vld [vmem:[%s888_s1 + $0x10] ss:$8 sps:$4 sm:$0xff]  }
  0x15   : > { %415 = vmatpush1.bf16.msra.mxu0 %v668_v8  ;;  %627 = vmatpush1.bf16.msra.mxu1 %v668_v8  ;;  %v680_v25 = vld [vmem:[%s888_s1] ss:$8 sps:$4 sm:$0xff]   ;;  %v691_v30 = vld [vmem:[%s888_s1 + $0x30] ss:$8 sps:$4 sm:$0xff]  }
  0x16   : > { %416 = vmatprep.subr.bf16.mxu0 %v716_v0  ;;  %615 = vmatprep.subr.bf16.mxu1 %v716_v0  ;;  %v683_v26 = vld [vmem:[%s888_s1 + $0x20] ss:$8 sps:$4 sm:$0xff]  }
  0x18   : > { %271 = vperm.xlu1 %666, %v241_v11   ;;  %266 = vperm.xlu0 %665, %v240_v12  }
  0x19   : > { %417 = vmatpush1.bf16.msra.mxu0 %v669_v9  ;;  %628 = vmatpush1.bf16.msra.mxu1 %v669_v9 }
  0x1a   : > { %418 = vmatprep.subr.bf16.mxu0 %v716_v0  ;;  %616 = vmatprep.subr.bf16.mxu1 %v716_v0 }
  0x1c   : > { %281 = vperm.xlu1 %666, %v243_v14   ;;  %276 = vperm.xlu0 %665, %v242_v15  }
  0x1d   : > { %419 = vmatpush1.bf16.msra.mxu0 %v670_v10  ;;  %629 = vmatpush1.bf16.msra.mxu1 %v670_v10 }
  0x1e   : > { %420 = vmatprep.subr.bf16.mxu0 %v716_v0  ;;  %617 = vmatprep.subr.bf16.mxu1 %v716_v0 }
  0x21   : > { %421 = vmatpush1.bf16.msra.mxu0 %v671_v13  ;;  %630 = vmatpush1.bf16.msra.mxu1 %v671_v13 }
  0x22   : > { %422 = vmatprep.subr.bf16.mxu0 %v716_v0  ;;  %618 = vmatprep.subr.bf16.mxu1 %v716_v0 }
  0x25   : > { %423 = vmatpush1.bf16.msra.mxu0 %v672_v16  ;;  %631 = vmatpush1.bf16.msra.mxu1 %v672_v16 }
  0x26   : > { %424 = vmatprep.subr.bf16.mxu0 %v716_v0  ;;  %619 = vmatprep.subr.bf16.mxu1 %v716_v0 }
  0x29   : > { %425 = vmatpush1.bf16.msra.mxu0 %v673_v17  ;;  %632 = vmatpush1.bf16.msra.mxu1 %v673_v17 }
  0x2a   : > { %426 = vmatprep.subr.bf16.mxu0 %v716_v0  ;;  %620 = vmatprep.subr.bf16.mxu1 %v716_v0 }
  0x2d   : > { %427 = vmatpush1.bf16.msra.mxu0 %v674_v18  ;;  %633 = vmatpush1.bf16.msra.mxu1 %v674_v18 }
  0x2e   : > { %434 = vmatprep.subr.bf16.mxu0 %v716_v0  ;;  %621 = vmatprep.subr.bf16.mxu1 %v716_v0 }
  0x31   : > { %435 = vmatpush2.bf16.msra.mxu0 %v410_v20  ;;  %634 = vmatpush2.bf16.msra.mxu1 %v410_v20 }
  0x32   : > { %436 = vmatprep.subr.bf16.mxu0 %v716_v0  ;;  %622 = vmatprep.subr.bf16.mxu1 %v716_v0 }
  0x35   : > { %437 = vmatpush2.bf16.msra.mxu0 %v676_v21  ;;  %635 = vmatpush2.bf16.msra.mxu1 %v676_v21 }
  0x36   : > { %438 = vmatprep.subr.bf16.mxu0 %v716_v0  ;;  %623 = vmatprep.subr.bf16.mxu1 %v716_v0 }
  0x39   : > { %439 = vmatpush2.bf16.msra.mxu0 %v677_v22  ;;  %636 = vmatpush2.bf16.msra.mxu1 %v677_v22 }
  0x3a   : > { %440 = vmatprep.subr.bf16.mxu0 %v716_v0  ;;  %624 = vmatprep.subr.bf16.mxu1 %v716_v0 }
  0x3d   : > { %441 = vmatpush2.bf16.msra.mxu0 %v678_v23  ;;  %637 = vmatpush2.bf16.msra.mxu1 %v678_v23 }
  0x3e   : > { %442 = vmatprep.subr.bf16.mxu0 %v716_v0  ;;  %625 = vmatprep.subr.bf16.mxu1 %v716_v0 }
  0x41   : > { %443 = vmatpush2.bf16.msra.mxu0 %v679_v24  ;;  %638 = vmatpush2.bf16.msra.mxu1 %v679_v24 }
  0x44   : > { %445 = vmatmul.mubr.bf16.vlgmr.msra.gmra.mxu0 %v680_v25  ;;  %461 = vmatmul.mubr.bf16.vlgmr.msra.gmra.mxu1 %v683_v26 }
  0x45   : > { %607 = vmatprep.mubr.msk.bf16.mxu0 %vm395_vm0, %v686_v27  ;;  %609 = vmatprep.mubr.msk.bf16.mxu1 %vm395_vm0, %v688_v28 }
  0x4c   : > { %453 = vmatmul.mubr.bf16.gmra.mxu0 %v690_v29  ;;  %469 = vmatmul.mubr.bf16.gmra.mxu1 %v691_v30 }
  0x8b   : > { %v247_v31 = vpop.permute.xlu0 %246  ;;  %v257_v32 = vpop.permute.xlu1 %256 }
  0x8f   : > { %v252_v33 = vpop.permute.xlu0 %251  ;;  %v262_v34 = vpop.permute.xlu1 %261 }
  0x93   : > { %v267_v35 = vpop.permute.xlu0 %266  ;;  %v272_v42 = vpop.permute.xlu1 %271 }
  0x97   : > { %v277_v51 = vpop.permute.xlu0 %276  ;;  %v282_v60 = vpop.permute.xlu1 %281 }
 0x104   : > { %v446_v36 = vpop.f32.mrf.mxu0  ;;  %v462_v37 = vpop.f32.mrf.mxu1 }
 0x105   : > { %v447_v38 = vadd.f32 %v446_v36, %v247_v31  ;;  %v463_v39 = vadd.f32 %v462_v37, %v267_v35 }
 0x106   : > { %v448_v40 = vpop.f32.mrf.mxu0  ;;  %v464_v41 = vpop.f32.mrf.mxu1 }
 0x107   : > { %v477_v43 = vmax.f32 %v447_v38, 0.0  ;;  %v481_v44 = vmax.f32 %v463_v39, 0.0 }
 0x108   : > { %v449_v45 = vpop.f32.mrf.mxu0  ;;  %v465_v46 = vpop.f32.mrf.mxu1 }
 0x109   : > { %486 = vst.msk [vmem:[%s860_s5] sm:$0xff] %vm485_vm2, %v477_v43  ;;  %490 = vst.msk [vmem:[%s860_s5 + $0x20] sm:$0xff] %vm485_vm2, %v481_v44  ;;  %v450_v47 = vadd.f32 %v449_v45, %v252_v33  ;;  %v466_v48 = vadd.f32 %v465_v46, %v272_v42 }
 0x10a   : > { %v451_v49 = vpop.f32.mrf.mxu0  ;;  %v467_v50 = vpop.f32.mrf.mxu1 }
 0x10b   : > { %v478_v52 = vmax.f32 %v450_v47, 0.0  ;;  %v482_v53 = vmax.f32 %v466_v48, 0.0 }
 0x10c   : > { %v454_v54 = vpop.f32.mrf.mxu0  ;;  %v470_v55 = vpop.f32.mrf.mxu1 }
 0x10d   : > { %487 = vst.msk [vmem:[%s860_s5 + $0x8] sm:$0xff] %vm485_vm2, %v478_v52  ;;  %491 = vst.msk [vmem:[%s860_s5 + $0x28] sm:$0xff] %vm485_vm2, %v482_v53  ;;  %v455_v56 = vadd.f32 %v454_v54, %v257_v32  ;;  %v471_v57 = vadd.f32 %v470_v55, %v277_v51 }
 0x10e   : > { %v456_v58 = vpop.f32.mrf.mxu0  ;;  %v472_v59 = vpop.f32.mrf.mxu1 }
 0x10f   : > { %v479_v61 = vmax.f32 %v455_v56, 0.0  ;;  %v483_v62 = vmax.f32 %v471_v57, 0.0 }
 0x110   : > { %v457_v63 = vpop.f32.mrf.mxu0  ;;  %v473_v0 = vpop.f32.mrf.mxu1 }
 0x111   : > { %488 = vst.msk [vmem:[%s860_s5 + $0x10] sm:$0xff] %vm485_vm2, %v479_v61  ;;  %492 = vst.msk [vmem:[%s860_s5 + $0x30] sm:$0xff] %vm485_vm2, %v483_v62  ;;  %v458_v1 = vadd.f32 %v457_v63, %v262_v34  ;;  %v474_v2 = vadd.f32 %v473_v0, %v282_v60 }
 0x112   : > { %v459_v3 = vpop.f32.mrf.mxu0  ;;  %v475_v4 = vpop.f32.mrf.mxu1 }
 0x113   : > { %v480_v5 = vmax.f32 %v458_v1, 0.0  ;;  %v484_v6 = vmax.f32 %v474_v2, 0.0 }
 0x115   : > { %489 = vst.msk [vmem:[%s860_s5 + $0x18] sm:$0xff] %vm485_vm2, %v480_v5  ;;  %493 = vst.msk [vmem:[%s860_s5 + $0x38] sm:$0xff] %vm485_vm2, %v484_v6 }
 0x116 PF: > { %s13_s14 = sadd.s32 1, %s714_s14   ;;  %s891_s12 = smov %s710_s13 }
 0x117   : > { %p10_p5 = scmp.ge.s32.totalorder %s13_s14, 4   ;;  %s892_s13 = smov %s894_s15 }
 0x119   :  { %12 = sbr.rel (!%p10_p5) target bundleno = 2 (0x2), region = 62 }

// kernel: resnet_forward_pallas.4
= control target key start
LH: loop header
LB: loop body
LE: loop exit
PB: predicated region body
PF: predicated region fallthrough
CT: control target
= control target key end

     0   :  { %s2573_s6 = smov 0   ;;  %s4717_s0 = inlined_call_operand.vmem [shape: f32[2,4,64,5,5], index: 0, kind: input, shape index: {}]   ;;  %s4718_s1 = inlined_call_operand.vmem [shape: f32[2,64,4,4], index: 1, kind: output, shape index: {}]  }
   0x1 LB: > { %s2288_s7 = sadd.s32 4294967295, %s2559_s6   ;;  %p2292_p0 = scmp.ge.s32.totalorder %s2559_s6, 1  ;;  %s2559_s6 = sphi %s2573_s6, %s11_s6  }
   0x2   : > { %p87_p1 = scmp.lt.s32.totalorder %s2559_s6, 3 }
   0x4   : > { %p88_p2 = pnand %p2292_p0, %p87_p1 }
   0x6   : > { %91 = sbr.rel (%p88_p2) target bundleno = 665 (0x299), region = 24 }
   0xb   : > { %p107_p3 = scmp.lt.s32.totalorder %s2288_s7, 1  ;;  %s2561_s12 = smov 1   ;;  %vm2168_vm0 = vcmask 28673  }
   0xc   : > { %s2562_s13 = smov 127  }
   0xd   : > { %s5411_s7 = smov (!%p107_p3, %s2288_s7), 1 }
   0xe   : > { %s2491_s8 = sshll.u32 %s5411_s7, 11  ;;  %s2492_s14 = sshll.u32 %s5411_s7, 8 }
   0xf   : > { %s2587_s11 = scalar_lea.vmem %s4717_s0, %s2491_s8  ;;  %s4566_s17 = scalar_lea.vmem %s4718_s1, %s2492_s14 }
  0x10   : > { %v2590_v0 = vld [vmem:[%s2587_s11 + $0x210] sm:$0x1f]  ;;  %v2593_v1 = vld [vmem:[%s2587_s11 + $0x200] sm:$0x1f]  ;;  %v2600_v2 = vld [vmem:[%s2587_s11 + $0x218] sm:$0x1f] }
  0x11   : > { %4891 = vst [vmem:[#allocation2_spill] sm:$0xff] %v2590_v0  ;;  %508 = vrot.lane.b32.xlu1 %v2590_v0, %s2561_s12  ;;  %504 = vrot.lane.b32.xlu0 %v2593_v1, %s2561_s12  ;;  %4892 = vst [vmem:[#allocation3_spill] sm:$0xff] %v2600_v2  ;;  %v2603_v3 = vld [vmem:[%s2587_s11 + $0x208] sm:$0x1f]  ;;  %v2613_v5 = vld [vmem:[%s2587_s11 + $0x220] sm:$0x1f] }
  0x12   : > { %v2610_v4 = vld [vmem:[%s2587_s11 + $0x228] sm:$0x1f]  ;;  %4894 = vst [vmem:[#allocation5_spill] sm:$0xff] %v2613_v5  ;;  %v2620_v6 = vld [vmem:[%s2587_s11 + $0x238] sm:$0x1f] }
  0x13   : > { %4893 = vst [vmem:[#allocation4_spill] sm:$0xff] %v2610_v4  ;;  %v2623_v7 = vld [vmem:[%s2587_s11 + $0x230] sm:$0x1f]  ;;  %v2630_v8 = vld [vmem:[%s2587_s11 + $0x248] sm:$0x1f] }
  0x14   : > { %v2633_v9 = vld [vmem:[%s2587_s11 + $0x240] sm:$0x1f]  ;;  %v2640_v10 = vld [vmem:[%s2587_s11 + $0x258] sm:$0x1f]  ;;  %v2643_v11 = vld [vmem:[%s2587_s11 + $0x250] sm:$0x1f] }
  0x15   : > { %510 = vrot.lane.b32.xlu1 %v2600_v2, %s2561_s12  ;;  %506 = vrot.lane.b32.xlu0 %v2603_v3, %s2561_s12  ;;  %4895 = vst [vmem:[#allocation6_spill] sm:$0xff] %v2633_v9  ;;  %4896 = vst [vmem:[#allocation7_spill] sm:$0xff] %v2643_v11  ;;  %v2650_v12 = vld [vmem:[%s2587_s11 + $0x268] sm:$0x1f]  ;;  %v2653_v13 = vld [vmem:[%s2587_s11 + $0x260] sm:$0x1f] }
  0x16   : > { %4897 = vst [vmem:[#allocation8_spill] sm:$0xff] %v2650_v12  ;;  %v2660_v14 = vld [vmem:[%s2587_s11 + $0x278] sm:$0x1f]  ;;  %v2663_v15 = vld [vmem:[%s2587_s11 + $0x270] sm:$0x1f] }
  0x17   : > { %4898 = vst [vmem:[#allocation9_spill] sm:$0xff] %v2663_v15  ;;  %v2670_v16 = vld [vmem:[%s2587_s11 + $0x288] sm:$0x1f]  ;;  %v2673_v17 = vld [vmem:[%s2587_s11 + $0x280] sm:$0x1f] }
  0x18   : > { %4899 = vst [vmem:[#allocation10_spill] sm:$0xff] %v2670_v16  ;;  %v2680_v18 = vld [vmem:[%s2587_s11 + $0x298] sm:$0x1f]  ;;  %v2683_v19 = vld [vmem:[%s2587_s11 + $0x290] sm:$0x1f] }
  0x19   : > { %514 = vrot.lane.b32.xlu1 %v2610_v4, %s2561_s12  ;;  %512 = vrot.lane.b32.xlu0 %v2613_v5, %s2561_s12  ;;  %4900 = vst [vmem:[#allocation11_spill] sm:$0xff] %v2683_v19  ;;  %v2690_v20 = vld [vmem:[%s2587_s11 + $0x2a8] sm:$0x1f]  ;;  %v2693_v21 = vld [vmem:[%s2587_s11 + $0x2a0] sm:$0x1f] }
  0x1a   : > { %4901 = vst [vmem:[#allocation12_spill] sm:$0xff] %v2690_v20  ;;  %v2700_v22 = vld [vmem:[%s2587_s11 + $0x2b8] sm:$0x1f]  ;;  %v2703_v23 = vld [vmem:[%s2587_s11 + $0x2b0] sm:$0x1f] }
  0x1b   : > { %4902 = vst [vmem:[#allocation13_spill] sm:$0xff] %v2700_v22  ;;  %v2710_v24 = vld [vmem:[%s2587_s11 + $0x2c8] sm:$0x1f]  ;;  %v2713_v25 = vld [vmem:[%s2587_s11 + $0x2c0] sm:$0x1f] }
  0x1c   : > { %v2720_v26 = vld [vmem:[%s2587_s11 + $0x2d8] sm:$0x1f]  ;;  %v2723_v27 = vld [vmem:[%s2587_s11 + $0x2d0] sm:$0x1f]  ;;  %v2730_v28 = vld [vmem:[%s2587_s11 + $0x2e8] sm:$0x1f] }
  0x1d   : > { %518 = vrot.lane.b32.xlu1 %v2620_v6, %s2561_s12  ;;  %516 = vrot.lane.b32.xlu0 %v2623_v7, %s2561_s12  ;;  %4903 = vst [vmem:[#allocation14_spill] sm:$0xff] %v2720_v26  ;;  %4904 = vst [vmem:[#allocation15_spill] sm:$0xff] %v2723_v27  ;;  %v2733_v29 = vld [vmem:[%s2587_s11 + $0x2e0] sm:$0x1f]  ;;  %v2740_v30 = vld [vmem:[%s2587_s11 + $0x2f8] sm:$0x1f] }
  0x1e   : > { %4905 = vst [vmem:[#allocation16_spill] sm:$0xff] %v2733_v29  ;;  %4906 = vst [vmem:[#allocation17_spill] sm:$0xff] %v2740_v30  ;;  %v2743_v31 = vld [vmem:[%s2587_s11 + $0x2f0] sm:$0x1f]  ;;  %v2750_v32 = vld [vmem:[%s2587_s11 + $0x308] sm:$0x1f] }
  0x1f   : > { %4907 = vst [vmem:[#allocation18_spill] sm:$0xff] %v2743_v31  ;;  %4908 = vst [vmem:[#allocation19_spill] sm:$0xff] %v2750_v32  ;;  %v2753_v33 = vld [vmem:[%s2587_s11 + $0x300] sm:$0x1f]  ;;  %v2760_v34 = vld [vmem:[%s2587_s11 + $0x318] sm:$0x1f] }
  0x20   : > { %4909 = vst [vmem:[#allocation20_spill] sm:$0xff] %v2753_v33  ;;  %4910 = vst [vmem:[#allocation21_spill] sm:$0xff] %v2760_v34  ;;  %v2763_v35 = vld [vmem:[%s2587_s11 + $0x310] sm:$0x1f]  ;;  %v2770_v36 = vld [vmem:[%s2587_s11 + $0x328] sm:$0x1f] }
  0x21   : > { %522 = vrot.lane.b32.xlu1 %v2630_v8, %s2561_s12  ;;  %520 = vrot.lane.b32.xlu0 %v2633_v9, %s2561_s12  ;;  %4911 = vst [vmem:[#allocation22_spill] sm:$0xff] %v2763_v35  ;;  %4912 = vst [vmem:[#allocation23_spill] sm:$0xff] %v2770_v36  ;;  %v2773_v37 = vld [vmem:[%s2587_s11 + $0x320] sm:$0x1f]  ;;  %v2780_v38 = vld [vmem:[%s2587_s11 + $0x338] sm:$0x1f] }
  0x22   : > { %4913 = vst [vmem:[#allocation24_spill] sm:$0xff] %v2773_v37  ;;  %4914 = vst [vmem:[#allocation25_spill] sm:$0xff] %v2780_v38  ;;  %v2783_v39 = vld [vmem:[%s2587_s11 + $0x330] sm:$0x1f]  ;;  %v2790_v40 = vld [vmem:[%s2587_s11 + $0x348] sm:$0x1f] }
  0x23   : > { %4915 = vst [vmem:[#allocation26_spill] sm:$0xff] %v2783_v39  ;;  %4916 = vst [vmem:[#allocation27_spill] sm:$0xff] %v2790_v40  ;;  %v2793_v41 = vld [vmem:[%s2587_s11 + $0x340] sm:$0x1f]  ;;  %v2800_v42 = vld [vmem:[%s2587_s11 + $0x358] sm:$0x1f] }
  0x24   : > { %4917 = vst [vmem:[#allocation28_spill] sm:$0xff] %v2793_v41  ;;  %4918 = vst [vmem:[#allocation29_spill] sm:$0xff] %v2800_v42  ;;  %v2803_v43 = vld [vmem:[%s2587_s11 + $0x350] sm:$0x1f]  ;;  %v2810_v44 = vld [vmem:[%s2587_s11 + $0x368] sm:$0x1f] }
  0x25   : > { %526 = vrot.lane.b32.xlu1 %v2640_v10, %s2561_s12  ;;  %524 = vrot.lane.b32.xlu0 %v2643_v11, %s2561_s12  ;;  %4919 = vst [vmem:[#allocation30_spill] sm:$0xff] %v2803_v43  ;;  %4920 = vst [vmem:[#allocation31_spill] sm:$0xff] %v2810_v44  ;;  %v2813_v45 = vld [vmem:[%s2587_s11 + $0x360] sm:$0x1f]  ;;  %v2820_v46 = vld [vmem:[%s2587_s11 + $0x378] sm:$0x1f] }
  0x26   : > { %4921 = vst [vmem:[#allocation32_spill] sm:$0xff] %v2813_v45  ;;  %4922 = vst [vmem:[#allocation33_spill] sm:$0xff] %v2820_v46  ;;  %v2823_v47 = vld [vmem:[%s2587_s11 + $0x370] sm:$0x1f]  ;;  %v2830_v48 = vld [vmem:[%s2587_s11 + $0x388] sm:$0x1f] }
  0x27   : > { %4923 = vst [vmem:[#allocation34_spill] sm:$0xff] %v2823_v47  ;;  %4924 = vst [vmem:[#allocation35_spill] sm:$0xff] %v2830_v48  ;;  %v2833_v49 = vld [vmem:[%s2587_s11 + $0x380] sm:$0x1f]  ;;  %v2840_v50 = vld [vmem:[%s2587_s11 + $0x398] sm:$0x1f] }
  0x28   : > { %4925 = vst [vmem:[#allocation36_spill] sm:$0xff] %v2833_v49  ;;  %4926 = vst [vmem:[#allocation37_spill] sm:$0xff] %v2840_v50  ;;  %v2843_v51 = vld [vmem:[%s2587_s11 + $0x390] sm:$0x1f]  ;;  %v2350_v52 = vld [vmem:[%s2587_s11 + $0x3a8] sm:$0x1f] }
  0x29   : > { %530 = vrot.lane.b32.xlu1 %v2650_v12, %s2561_s12  ;;  %528 = vrot.lane.b32.xlu0 %v2653_v13, %s2561_s12  ;;  %4927 = vst [vmem:[#allocation38_spill] sm:$0xff] %v2843_v51  ;;  %v2349_v53 = vld [vmem:[%s2587_s11 + $0x3a0] sm:$0x1f]  ;;  %v2352_v54 = vld [vmem:[%s2587_s11 + $0x3b8] sm:$0x1f] }
  0x2a   : > { %v2351_v55 = vld [vmem:[%s2587_s11 + $0x3b0] sm:$0x1f]  ;;  %v2354_v56 = vld [vmem:[%s2587_s11 + $0x3c8] sm:$0x1f]  ;;  %v2353_v57 = vld [vmem:[%s2587_s11 + $0x3c0] sm:$0x1f] }
  0x2b   : > { %v2356_v58 = vld [vmem:[%s2587_s11 + $0x3d8] sm:$0x1f]  ;;  %v2355_v59 = vld [vmem:[%s2587_s11 + $0x3d0] sm:$0x1f]  ;;  %v2358_v62 = vld [vmem:[%s2587_s11 + $0x3e8] sm:$0x1f] }
  0x2c   : > { %v2357_v63 = vld [vmem:[%s2587_s11 + $0x3e0] sm:$0x1f]  ;;  %v3261_v4 = vld [vmem:[%s2587_s11 + $0xd8] sm:$0x1f]  ;;  %v3275_v9 = vld [vmem:[%s2587_s11 + $0xe8] sm:$0x1f] }
  0x2d   : > { %534 = vrot.lane.b32.xlu1 %v2660_v14, %s2561_s12  ;;  %532 = vrot.lane.b32.xlu0 %v2663_v15, %s2561_s12  ;;  %v3234_v0 = vld [vmem:[%s2587_s11 + $0xa0] sm:$0x1f]  ;;  %v3294_v11 = vld [vmem:[%s2587_s11 + $0xf0] sm:$0x1f] }
  0x2e   : > { %5018 = vst [vmem:[#allocation129_spill] sm:$0xff] %v3294_v11  ;;  %v3317_v15 = vld [vmem:[%s2587_s11 + $0x128] sm:$0x1f]  ;;  %v3358_v12 = vld [vmem:[%s2587_s11 + $0x400] sm:$0x1f] }
  0x2f   : > { %5023 = vst [vmem:[#allocation134_spill] sm:$0xff] %v3317_v15 }
  0x31   : > { %538 = vrot.lane.b32.xlu1 %v2670_v16, %s2561_s12  ;;  %536 = vrot.lane.b32.xlu0 %v2673_v17, %s2561_s12  ;;  %v3311_v16 = vld [vmem:[%s2587_s11 + $0x118] sm:$0x1f] }
  0x32   : > { %5021 = vst [vmem:[#allocation132_spill] sm:$0xff] %v3311_v16  ;;  %v5064_v16 = vld [vmem:[#allocation5_spill] sm:$0xff] }
  0x35   : > { %542 = vrot.lane.b32.xlu1 %v2680_v18, %s2561_s12  ;;  %540 = vrot.lane.b32.xlu0 %v2683_v19, %s2561_s12  ;;  %v2475_v19 = vld [vmem:[%s2587_s11 + $0x790] sm:$0x1f] }
  0x39   : > { %546 = vrot.lane.b32.xlu1 %v2690_v20, %s2561_s12  ;;  %544 = vrot.lane.b32.xlu0 %v2693_v21, %s2561_s12  ;;  %v3355_v20 = vld [vmem:[%s2587_s11 + $0x148] sm:$0x1f] }
  0x3a   : > { %5029 = vst [vmem:[#allocation140_spill] sm:$0xff] %v3355_v20 }
  0x3d   : > { %550 = vrot.lane.b32.xlu1 %v2700_v22, %s2561_s12  ;;  %548 = vrot.lane.b32.xlu0 %v2703_v23, %s2561_s12  ;;  %v3343_v22 = vld [vmem:[%s2587_s11 + $0x138] sm:$0x1f] }
  0x3e   : > { %5027 = vst [vmem:[#allocation138_spill] sm:$0xff] %v3343_v22  ;;  %v5045_v22 = vld [vmem:[#allocation2_spill] sm:$0xff] }
  0x41   : > { %554 = vrot.lane.b32.xlu1 %v2710_v24, %s2561_s12  ;;  %552 = vrot.lane.b32.xlu0 %v2713_v25, %s2561_s12 }
  0x45   : > { %558 = vrot.lane.b32.xlu1 %v2720_v26, %s2561_s12  ;;  %556 = vrot.lane.b32.xlu0 %v2723_v27, %s2561_s12  ;;  %v2362_v26 = vld [vmem:[%s2587_s11 + $0x408] sm:$0x1f] }
  0x49   : > { %562 = vrot.lane.b32.xlu1 %v2730_v28, %s2561_s12  ;;  %560 = vrot.lane.b32.xlu0 %v2733_v29, %s2561_s12 }
  0x4d   : > { %566 = vrot.lane.b32.xlu1 %v2740_v30, %s2561_s12  ;;  %564 = vrot.lane.b32.xlu0 %v2743_v31, %s2561_s12 }
  0x51   : > { %570 = vrot.lane.b32.xlu1 %v2750_v32, %s2561_s12  ;;  %568 = vrot.lane.b32.xlu0 %v2753_v33, %s2561_s12  ;;  %v3396_v32 = vld [vmem:[%s2587_s11 + $0x168] sm:$0x1f]  ;;  %v3414_v33 = vld [vmem:[%s2587_s11 + $0x170] sm:$0x1f] }
  0x52   : > { %5037 = vst [vmem:[#allocation145_spill] sm:$0xff] %v3396_v32  ;;  %5042 = vst [vmem:[#allocation148_spill] sm:$0xff] %v3414_v33 }
  0x55   : > { %574 = vrot.lane.b32.xlu1 %v2760_v34, %s2561_s12  ;;  %572 = vrot.lane.b32.xlu0 %v2763_v35, %s2561_s12  ;;  %v3405_v34 = vld [vmem:[%s2587_s11 + $0x160] sm:$0x1f]  ;;  %v5048_v35 = vld [vmem:[#allocation3_spill] sm:$0xff] }
  0x56   : > { %5040 = vst [vmem:[#allocation146_spill] sm:$0xff] %v3405_v34  ;;  %v2368_v34 = vld [vmem:[%s2587_s11 + $0x438] sm:$0x1f] }
  0x57   : > { %v895_v20 = vrot.slane %v2368_v34, 7 }
  0x59   : > { %578 = vrot.lane.b32.xlu1 %v2770_v36, %s2561_s12  ;;  %576 = vrot.lane.b32.xlu0 %v2773_v37, %s2561_s12  ;;  %v3223_v37 = vld [vmem:[%s2587_s11 + $0xa8] sm:$0x1f]  ;;  %v3240_v36 = vld [vmem:[%s2587_s11 + $0xb0] sm:$0x1f] }
  0x5a   : > { %5013 = vst [vmem:[#allocation124_spill] sm:$0xff] %v3223_v37  ;;  %v3332_v37 = vld [vmem:[%s2587_s11 + $0x120] sm:$0x1f] }
  0x5b   : > { %5026 = vst [vmem:[#allocation137_spill] sm:$0xff] %v3332_v37  ;;  %v2363_v37 = vld [vmem:[%s2587_s11 + $0x410] sm:$0x1f] }
  0x5d   : > { %582 = vrot.lane.b32.xlu1 %v2780_v38, %s2561_s12  ;;  %580 = vrot.lane.b32.xlu0 %v2783_v39, %s2561_s12  ;;  %v3217_v39 = vld [vmem:[%s2587_s11 + $0x98] sm:$0x1f]  ;;  %v3220_v38 = vld [vmem:[%s2587_s11 + $0x90] sm:$0x1f] }
  0x61   : > { %586 = vrot.lane.b32.xlu1 %v2790_v40, %s2561_s12  ;;  %584 = vrot.lane.b32.xlu0 %v2793_v41, %s2561_s12  ;;  %v3199_v41 = vld [vmem:[%s2587_s11 + $0x78] sm:$0x1f] }
  0x65   : > { %590 = vrot.lane.b32.xlu1 %v2800_v42, %s2561_s12  ;;  %588 = vrot.lane.b32.xlu0 %v2803_v43, %s2561_s12  ;;  %v2472_v43 = vld [vmem:[%s2587_s11 + $0x778] sm:$0x1f]  ;;  %v3196_v42 = vld [vmem:[%s2587_s11 + $0x60] sm:$0x1f] }
  0x69   : > { %594 = vrot.lane.b32.xlu1 %v2810_v44, %s2561_s12  ;;  %592 = vrot.lane.b32.xlu0 %v2813_v45, %s2561_s12  ;;  %v3188_v45 = vld [vmem:[%s2587_s11 + $0x50] sm:$0x1f]  ;;  %v3191_v44 = vld [vmem:[%s2587_s11 + $0x68] sm:$0x1f] }
  0x6a   : > { %5010 = vst [vmem:[#allocation121_spill] sm:$0xff] %v3191_v44  ;;  %v3291_v44 = vld [vmem:[%s2587_s11 + $0xf8] sm:$0x1f] }
  0x6b   : > { %5017 = vst [vmem:[#allocation128_spill] sm:$0xff] %v3291_v44 }
  0x6d   : > { %598 = vrot.lane.b32.xlu1 %v2820_v46, %s2561_s12  ;;  %596 = vrot.lane.b32.xlu0 %v2823_v47, %s2561_s12  ;;  %v3178_v47 = vld [vmem:[%s2587_s11 + $0x40] sm:$0x1f] }
  0x6e   : > { %5007 = vst [vmem:[#allocation118_spill] sm:$0xff] %v3178_v47  ;;  %v3278_v47 = vld [vmem:[%s2587_s11 + $0xe0] sm:$0x1f] }
  0x71   : > { %602 = vrot.lane.b32.xlu1 %v2830_v48, %s2561_s12  ;;  %600 = vrot.lane.b32.xlu0 %v2833_v49, %s2561_s12  ;;  %v2455_v49 = vld [vmem:[%s2587_s11 + $0x6f0] sm:$0x1f] }
  0x72   : > { %v3172_v48 = vld [vmem:[%s2587_s11 + $0x30] sm:$0x1f] }
  0x73   : > { %v5080_v32 = vmax.f32 %v3172_v48, %v2623_v7 }
  0x75   : > { %606 = vrot.lane.b32.xlu1 %v2840_v50, %s2561_s12  ;;  %604 = vrot.lane.b32.xlu0 %v2843_v51, %s2561_s12  ;;  %v2904_v51 = vld [vmem:[%s2587_s11 + $0x618] sm:$0x1f]  ;;  %v2453_v50 = vld [vmem:[%s2587_s11 + $0x6e0] sm:$0x1f] }
  0x76   : > { %4938 = vst [vmem:[#allocation49_spill] sm:$0xff] %v2904_v51 }
  0x79   : > { %610 = vrot.lane.b32.xlu1 %v2350_v52, %s2561_s12  ;;  %608 = vrot.lane.b32.xlu0 %v2349_v53, %s2561_s12 }
  0x7d   : > { %614 = vrot.lane.b32.xlu1 %v2352_v54, %s2561_s12  ;;  %612 = vrot.lane.b32.xlu0 %v2351_v55, %s2561_s12  ;;  %v2360_v54 = vld [vmem:[%s2587_s11 + $0x3f8] sm:$0x1f]  ;;  %v2359_v55 = vld [vmem:[%s2587_s11 + $0x3f0] sm:$0x1f] }
  0x7e   : > { %v5083_v48 = vld [vmem:[#allocation49_spill] sm:$0xff] }
  0x81   : > { %618 = vrot.lane.b32.xlu1 %v2354_v56, %s2561_s12  ;;  %616 = vrot.lane.b32.xlu0 %v2353_v57, %s2561_s12 }
  0x83   : > { %v2863_v60 = vpop.permute.xlu1 %508  ;;  %v2865_v61 = vpop.permute.xlu0 %504 }
  0x84   : > { %4928 = vst [vmem:[#allocation39_spill] sm:$0xff] %v2863_v60  ;;  %v3214_v60 = vld [vmem:[%s2587_s11 + $0x80] sm:$0x1f] }
  0x85   : > { %622 = vrot.lane.b32.xlu1 %v2356_v58, %s2561_s12  ;;  %620 = vrot.lane.b32.xlu0 %v2355_v59, %s2561_s12 }
  0x87   : > { %v2871_v52 = vpop.permute.xlu1 %510  ;;  %v2873_v53 = vpop.permute.xlu0 %506 }
  0x88   : > { %4929 = vst [vmem:[#allocation40_spill] sm:$0xff] %v2871_v52  ;;  %v3346_v52 = vld [vmem:[%s2587_s11 + $0x130] sm:$0x1f] }
  0x89   : > { %626 = vrot.lane.b32.xlu1 %v2358_v62, %s2561_s12  ;;  %624 = vrot.lane.b32.xlu0 %v2357_v63, %s2561_s12  ;;  %v2890_v62 = vld [vmem:[%s2587_s11 + $0x608] sm:$0x1f]  ;;  %v2893_v63 = vld [vmem:[%s2587_s11 + $0x600] sm:$0x1f]  ;;  %5028 = vst [vmem:[#allocation139_spill] sm:$0xff] %v3346_v52 }
  0x8a   : > { %4934 = vst [vmem:[#allocation45_spill] sm:$0xff] %v2890_v62  ;;  %4935 = vst [vmem:[#allocation46_spill] sm:$0xff] %v2893_v63 }
  0x8b   : > { %v2879_v56 = vpop.permute.xlu1 %514  ;;  %v2881_v57 = vpop.permute.xlu0 %512  ;;  %v5043_v31 = vld [vmem:[#allocation39_spill] sm:$0xff] }
  0x8c   : > { %4930 = vst [vmem:[#allocation41_spill] sm:$0xff] %v2879_v56  ;;  %4931 = vst [vmem:[#allocation42_spill] sm:$0xff] %v2881_v57  ;;  %v3185_v57 = vld [vmem:[%s2587_s11 + $0x58] sm:$0x1f]  ;;  %v2471_v56 = vld [vmem:[%s2587_s11 + $0x770] sm:$0x1f] }
  0x8d   : > { %630 = vrot.lane.b32.xlu1 %v2360_v54, %s2561_s12  ;;  %628 = vrot.lane.b32.xlu0 %v2359_v55, %s2561_s12 }
  0x8f   : > { %v2885_v58 = vpop.permute.xlu1 %518  ;;  %v2887_v59 = vpop.permute.xlu0 %516  ;;  %v5047_v15 = vld [vmem:[#allocation40_spill] sm:$0xff] }
  0x90   : > { %4932 = vst [vmem:[#allocation43_spill] sm:$0xff] %v2885_v58  ;;  %4933 = vst [vmem:[#allocation44_spill] sm:$0xff] %v2887_v59  ;;  %v2907_v58 = vld [vmem:[%s2587_s11 + $0x610] sm:$0x1f]  ;;  %v2918_v59 = vld [vmem:[%s2587_s11 + $0x628] sm:$0x1f] }
  0x91   : > { %1210 = vrot.lane.b32.xlu1 %v2890_v62, %s2561_s12  ;;  %1208 = vrot.lane.b32.xlu0 %v2893_v63, %s2561_s12  ;;  %4939 = vst [vmem:[#allocation50_spill] sm:$0xff] %v2907_v58  ;;  %4942 = vst [vmem:[#allocation53_spill] sm:$0xff] %v2918_v59 }
  0x93   : > { %v2899_v54 = vpop.permute.xlu1 %522  ;;  %v2901_v55 = vpop.permute.xlu0 %520  ;;  %v5062_v44 = vld [vmem:[#allocation42_spill] sm:$0xff] }
  0x94   : > { %4936 = vst [vmem:[#allocation47_spill] sm:$0xff] %v2899_v54  ;;  %4937 = vst [vmem:[#allocation48_spill] sm:$0xff] %v2901_v55  ;;  %v2921_v54 = vld [vmem:[%s2587_s11 + $0x620] sm:$0x1f] }
  0x95   : > { %1214 = vrot.lane.b32.xlu1 %v2904_v51, %s2561_s12  ;;  %1212 = vrot.lane.b32.xlu0 %v2907_v58, %s2561_s12  ;;  %4943 = vst [vmem:[#allocation54_spill] sm:$0xff] %v2921_v54  ;;  %v2932_v51 = vld [vmem:[%s2587_s11 + $0x638] sm:$0x1f] }
  0x96   : > { %4946 = vst [vmem:[#allocation57_spill] sm:$0xff] %v2932_v51 }
  0x97   : > { %v2913_v62 = vpop.permute.xlu1 %526  ;;  %v2915_v63 = vpop.permute.xlu0 %524 }
  0x98   : > { %4940 = vst [vmem:[#allocation51_spill] sm:$0xff] %v2913_v62  ;;  %4941 = vst [vmem:[#allocation52_spill] sm:$0xff] %v2915_v63  ;;  %v2935_v62 = vld [vmem:[%s2587_s11 + $0x630] sm:$0x1f] }
  0x99   : > { %1218 = vrot.lane.b32.xlu1 %v2918_v59, %s2561_s12  ;;  %1216 = vrot.lane.b32.xlu0 %v2921_v54, %s2561_s12  ;;  %4947 = vst [vmem:[#allocation58_spill] sm:$0xff] %v2935_v62  ;;  %v2946_v59 = vld [vmem:[%s2587_s11 + $0x648] sm:$0x1f] }
  0x9a   : > { %4950 = vst [vmem:[#allocation61_spill] sm:$0xff] %v2946_v59 }
  0x9b   : > { %v2927_v55 = vpop.permute.xlu1 %530  ;;  %v2929_v58 = vpop.permute.xlu0 %528 }
  0x9c   : > { %4944 = vst [vmem:[#allocation55_spill] sm:$0xff] %v2927_v55  ;;  %4945 = vst [vmem:[#allocation56_spill] sm:$0xff] %v2929_v58  ;;  %v2949_v55 = vld [vmem:[%s2587_s11 + $0x640] sm:$0x1f] }
  0x9d   : > { %1222 = vrot.lane.b32.xlu1 %v2932_v51, %s2561_s12  ;;  %1220 = vrot.lane.b32.xlu0 %v2935_v62, %s2561_s12  ;;  %4951 = vst [vmem:[#allocation62_spill] sm:$0xff] %v2949_v55  ;;  %v2960_v51 = vld [vmem:[%s2587_s11 + $0x658] sm:$0x1f] }
  0x9e   : > { %4954 = vst [vmem:[#allocation65_spill] sm:$0xff] %v2960_v51 }
  0x9f   : > { %v2941_v63 = vpop.permute.xlu1 %534  ;;  %v2943_v54 = vpop.permute.xlu0 %532 }
  0xa0   : > { %4948 = vst [vmem:[#allocation59_spill] sm:$0xff] %v2941_v63  ;;  %4949 = vst [vmem:[#allocation60_spill] sm:$0xff] %v2943_v54  ;;  %v2963_v63 = vld [vmem:[%s2587_s11 + $0x650] sm:$0x1f] }
  0xa1   : > { %1226 = vrot.lane.b32.xlu1 %v2946_v59, %s2561_s12  ;;  %1224 = vrot.lane.b32.xlu0 %v2949_v55, %s2561_s12  ;;  %4955 = vst [vmem:[#allocation66_spill] sm:$0xff] %v2963_v63  ;;  %v2974_v59 = vld [vmem:[%s2587_s11 + $0x668] sm:$0x1f] }
  0xa2   : > { %4958 = vst [vmem:[#allocation69_spill] sm:$0xff] %v2974_v59 }
  0xa3   : > { %v2955_v58 = vpop.permute.xlu1 %538  ;;  %v2957_v62 = vpop.permute.xlu0 %536 }
  0xa4   : > { %4952 = vst [vmem:[#allocation63_spill] sm:$0xff] %v2955_v58  ;;  %4953 = vst [vmem:[#allocation64_spill] sm:$0xff] %v2957_v62  ;;  %v2977_v58 = vld [vmem:[%s2587_s11 + $0x660] sm:$0x1f] }
  0xa5   : > { %1230 = vrot.lane.b32.xlu1 %v2960_v51, %s2561_s12  ;;  %1228 = vrot.lane.b32.xlu0 %v2963_v63, %s2561_s12  ;;  %4959 = vst [vmem:[#allocation70_spill] sm:$0xff] %v2977_v58  ;;  %v2988_v51 = vld [vmem:[%s2587_s11 + $0x678] sm:$0x1f] }
  0xa6   : > { %4962 = vst [vmem:[#allocation73_spill] sm:$0xff] %v2988_v51 }
  0xa7   : > { %v2969_v54 = vpop.permute.xlu1 %542  ;;  %v2971_v55 = vpop.permute.xlu0 %540 }
  0xa8   : > { %4956 = vst [vmem:[#allocation67_spill] sm:$0xff] %v2969_v54  ;;  %4957 = vst [vmem:[#allocation68_spill] sm:$0xff] %v2971_v55  ;;  %v2991_v54 = vld [vmem:[%s2587_s11 + $0x670] sm:$0x1f] }
  0xa9   : > { %1234 = vrot.lane.b32.xlu1 %v2974_v59, %s2561_s12  ;;  %1232 = vrot.lane.b32.xlu0 %v2977_v58, %s2561_s12  ;;  %4963 = vst [vmem:[#allocation74_spill] sm:$0xff] %v2991_v54  ;;  %v3002_v59 = vld [vmem:[%s2587_s11 + $0x688] sm:$0x1f] }
  0xaa   : > { %4966 = vst [vmem:[#allocation77_spill] sm:$0xff] %v3002_v59 }
  0xab   : > { %v2983_v62 = vpop.permute.xlu1 %546  ;;  %v2985_v63 = vpop.permute.xlu0 %544 }
  0xac   : > { %4960 = vst [vmem:[#allocation71_spill] sm:$0xff] %v2983_v62  ;;  %4961 = vst [vmem:[#allocation72_spill] sm:$0xff] %v2985_v63  ;;  %v3005_v62 = vld [vmem:[%s2587_s11 + $0x680] sm:$0x1f] }
  0xad   : > { %1238 = vrot.lane.b32.xlu1 %v2988_v51, %s2561_s12  ;;  %1236 = vrot.lane.b32.xlu0 %v2991_v54, %s2561_s12  ;;  %4967 = vst [vmem:[#allocation78_spill] sm:$0xff] %v3005_v62  ;;  %v3016_v51 = vld [vmem:[%s2587_s11 + $0x698] sm:$0x1f] }
  0xae   : > { %4970 = vst [vmem:[#allocation81_spill] sm:$0xff] %v3016_v51 }
  0xaf   : > { %v2997_v55 = vpop.permute.xlu1 %550  ;;  %v2999_v58 = vpop.permute.xlu0 %548 }
  0xb0   : > { %4964 = vst [vmem:[#allocation75_spill] sm:$0xff] %v2997_v55  ;;  %4965 = vst [vmem:[#allocation76_spill] sm:$0xff] %v2999_v58  ;;  %v3019_v55 = vld [vmem:[%s2587_s11 + $0x690] sm:$0x1f] }
  0xb1   : > { %1242 = vrot.lane.b32.xlu1 %v3002_v59, %s2561_s12  ;;  %1240 = vrot.lane.b32.xlu0 %v3005_v62, %s2561_s12  ;;  %4971 = vst [vmem:[#allocation82_spill] sm:$0xff] %v3019_v55  ;;  %v3030_v59 = vld [vmem:[%s2587_s11 + $0x6a8] sm:$0x1f] }
  0xb2   : > { %4974 = vst [vmem:[#allocation85_spill] sm:$0xff] %v3030_v59 }
  0xb3   : > { %v3011_v63 = vpop.permute.xlu1 %554  ;;  %v3013_v54 = vpop.permute.xlu0 %552 }
  0xb4   : > { %4968 = vst [vmem:[#allocation79_spill] sm:$0xff] %v3011_v63  ;;  %4969 = vst [vmem:[#allocation80_spill] sm:$0xff] %v3013_v54  ;;  %v3033_v63 = vld [vmem:[%s2587_s11 + $0x6a0] sm:$0x1f] }
  0xb5   : > { %1246 = vrot.lane.b32.xlu1 %v3016_v51, %s2561_s12  ;;  %1244 = vrot.lane.b32.xlu0 %v3019_v55, %s2561_s12  ;;  %4975 = vst [vmem:[#allocation86_spill] sm:$0xff] %v3033_v63  ;;  %v3044_v51 = vld [vmem:[%s2587_s11 + $0x6b8] sm:$0x1f] }
  0xb6   : > { %4978 = vst [vmem:[#allocation89_spill] sm:$0xff] %v3044_v51 }
  0xb7   : > { %v3025_v58 = vpop.permute.xlu1 %558  ;;  %v3027_v62 = vpop.permute.xlu0 %556 }
  0xb8   : > { %4972 = vst [vmem:[#allocation83_spill] sm:$0xff] %v3025_v58  ;;  %4973 = vst [vmem:[#allocation84_spill] sm:$0xff] %v3027_v62  ;;  %v3047_v58 = vld [vmem:[%s2587_s11 + $0x6b0] sm:$0x1f] }
  0xb9   : > { %1250 = vrot.lane.b32.xlu1 %v3030_v59, %s2561_s12  ;;  %1248 = vrot.lane.b32.xlu0 %v3033_v63, %s2561_s12  ;;  %4979 = vst [vmem:[#allocation90_spill] sm:$0xff] %v3047_v58  ;;  %v3058_v59 = vld [vmem:[%s2587_s11 + $0x6c8] sm:$0x1f] }
  0xba   : > { %4982 = vst [vmem:[#allocation93_spill] sm:$0xff] %v3058_v59 }
  0xbb   : > { %v3039_v54 = vpop.permute.xlu1 %562  ;;  %v3041_v55 = vpop.permute.xlu0 %560 }
  0xbc   : > { %4976 = vst [vmem:[#allocation87_spill] sm:$0xff] %v3039_v54  ;;  %4977 = vst [vmem:[#allocation88_spill] sm:$0xff] %v3041_v55  ;;  %v3061_v54 = vld [vmem:[%s2587_s11 + $0x6c0] sm:$0x1f] }
  0xbd   : > { %1254 = vrot.lane.b32.xlu1 %v3044_v51, %s2561_s12  ;;  %1252 = vrot.lane.b32.xlu0 %v3047_v58, %s2561_s12  ;;  %4983 = vst [vmem:[#allocation94_spill] sm:$0xff] %v3061_v54  ;;  %v3072_v51 = vld [vmem:[%s2587_s11 + $0x6d8] sm:$0x1f] }
  0xbe   : > { %4986 = vst [vmem:[#allocation97_spill] sm:$0xff] %v3072_v51 }
  0xbf   : > { %v3053_v62 = vpop.permute.xlu1 %566  ;;  %v3055_v63 = vpop.permute.xlu0 %564 }
  0xc0   : > { %4980 = vst [vmem:[#allocation91_spill] sm:$0xff] %v3053_v62  ;;  %4981 = vst [vmem:[#allocation92_spill] sm:$0xff] %v3055_v63  ;;  %v2451_v62 = vld [vmem:[%s2587_s11 + $0x6d0] sm:$0x1f] }
  0xc1   : > { %1258 = vrot.lane.b32.xlu1 %v3058_v59, %s2561_s12  ;;  %1256 = vrot.lane.b32.xlu0 %v3061_v54, %s2561_s12  ;;  %v2454_v54 = vld [vmem:[%s2587_s11 + $0x6e8] sm:$0x1f] }
  0xc3   : > { %v3067_v55 = vpop.permute.xlu1 %570  ;;  %v3069_v58 = vpop.permute.xlu0 %568 }
  0xc4   : > { %4984 = vst [vmem:[#allocation95_spill] sm:$0xff] %v3067_v55  ;;  %4985 = vst [vmem:[#allocation96_spill] sm:$0xff] %v3069_v58 }
  0xc5   : > { %1262 = vrot.lane.b32.xlu1 %v3072_v51, %s2561_s12  ;;  %1260 = vrot.lane.b32.xlu0 %v2451_v62, %s2561_s12  ;;  %v2456_v51 = vld [vmem:[%s2587_s11 + $0x6f8] sm:$0x1f] }
  0xc7   : > { %v3078_v63 = vpop.permute.xlu1 %574  ;;  %v3080_v59 = vpop.permute.xlu0 %572 }
  0xc8   : > { %4987 = vst [vmem:[#allocation98_spill] sm:$0xff] %v3078_v63  ;;  %4988 = vst [vmem:[#allocation99_spill] sm:$0xff] %v3080_v59  ;;  %v2457_v63 = vld [vmem:[%s2587_s11 + $0x700] sm:$0x1f] }
  0xc9   : > { %1266 = vrot.lane.b32.xlu1 %v2454_v54, %s2561_s12  ;;  %1264 = vrot.lane.b32.xlu0 %v2453_v50, %s2561_s12  ;;  %v2458_v54 = vld [vmem:[%s2587_s11 + $0x708] sm:$0x1f] }
  0xcb   : > { %v3086_v58 = vpop.permute.xlu1 %578  ;;  %v3088_v55 = vpop.permute.xlu0 %576 }
  0xcc   : > { %4989 = vst [vmem:[#allocation100_spill] sm:$0xff] %v3086_v58  ;;  %4990 = vst [vmem:[#allocation101_spill] sm:$0xff] %v3088_v55  ;;  %v2459_v58 = vld [vmem:[%s2587_s11 + $0x710] sm:$0x1f] }
  0xcd   : > { %1270 = vrot.lane.b32.xlu1 %v2456_v51, %s2561_s12  ;;  %1268 = vrot.lane.b32.xlu0 %v2455_v49, %s2561_s12  ;;  %v2460_v51 = vld [vmem:[%s2587_s11 + $0x718] sm:$0x1f] }
  0xcf   : > { %v3094_v62 = vpop.permute.xlu1 %582  ;;  %v3096_v59 = vpop.permute.xlu0 %580 }
  0xd0   : > { %4991 = vst [vmem:[#allocation102_spill] sm:$0xff] %v3094_v62  ;;  %4992 = vst [vmem:[#allocation103_spill] sm:$0xff] %v3096_v59  ;;  %v2461_v62 = vld [vmem:[%s2587_s11 + $0x720] sm:$0x1f] }
  0xd1   : > { %1274 = vrot.lane.b32.xlu1 %v2458_v54, %s2561_s12  ;;  %1272 = vrot.lane.b32.xlu0 %v2457_v63, %s2561_s12  ;;  %v2462_v54 = vld [vmem:[%s2587_s11 + $0x728] sm:$0x1f] }
  0xd3   : > { %v3102_v50 = vpop.permute.xlu1 %586  ;;  %v3104_v55 = vpop.permute.xlu0 %584 }
  0xd4   : > { %4993 = vst [vmem:[#allocation104_spill] sm:$0xff] %v3102_v50  ;;  %4994 = vst [vmem:[#allocation105_spill] sm:$0xff] %v3104_v55  ;;  %v2463_v50 = vld [vmem:[%s2587_s11 + $0x730] sm:$0x1f] }
  0xd5   : > { %1278 = vrot.lane.b32.xlu1 %v2460_v51, %s2561_s12  ;;  %1276 = vrot.lane.b32.xlu0 %v2459_v58, %s2561_s12  ;;  %v2464_v51 = vld [vmem:[%s2587_s11 + $0x738] sm:$0x1f] }
  0xd7   : > { %v3110_v49 = vpop.permute.xlu1 %590  ;;  %v3112_v59 = vpop.permute.xlu0 %588 }
  0xd8   : > { %4995 = vst [vmem:[#allocation106_spill] sm:$0xff] %v3110_v49  ;;  %4996 = vst [vmem:[#allocation107_spill] sm:$0xff] %v3112_v59  ;;  %v2465_v59 = vld [vmem:[%s2587_s11 + $0x740] sm:$0x1f]  ;;  %v3169_v49 = vld [vmem:[%s2587_s11 + $0x38] sm:$0x1f] }
  0xd9   : > { %1282 = vrot.lane.b32.xlu1 %v2462_v54, %s2561_s12  ;;  %1280 = vrot.lane.b32.xlu0 %v2461_v62, %s2561_s12  ;;  %v2466_v62 = vld [vmem:[%s2587_s11 + $0x748] sm:$0x1f] }
  0xdb   : > { %v3118_v63 = vpop.permute.xlu1 %594  ;;  %v3120_v55 = vpop.permute.xlu0 %592 }
  0xdc   : > { %4997 = vst [vmem:[#allocation108_spill] sm:$0xff] %v3118_v63  ;;  %4998 = vst [vmem:[#allocation109_spill] sm:$0xff] %v3120_v55  ;;  %v3152_v63 = vld [vmem:[%s2587_s11] sm:$0x1f] }
  0xdd   : > { %1286 = vrot.lane.b32.xlu1 %v2464_v51, %s2561_s12  ;;  %1284 = vrot.lane.b32.xlu0 %v2463_v50, %s2561_s12  ;;  %v2468_v50 = vld [vmem:[%s2587_s11 + $0x758] sm:$0x1f]  ;;  %v5030_v27 = vmax.f32 %v3152_v63, %v2593_v1 }
  0xde   : > { %v2364_v1 = vld [vmem:[%s2587_s11 + $0x418] sm:$0x1f] }
  0xdf   : > { %v3126_v58 = vpop.permute.xlu1 %598  ;;  %v3128_v54 = vpop.permute.xlu0 %596  ;;  %v891_v30 = vrot.slane %v2364_v1, 7 }
  0xe0   : > { %4999 = vst [vmem:[#allocation110_spill] sm:$0xff] %v3126_v58  ;;  %5000 = vst [vmem:[#allocation111_spill] sm:$0xff] %v3128_v54  ;;  %v2467_v58 = vld [vmem:[%s2587_s11 + $0x750] sm:$0x1f]  ;;  %v2470_v54 = vld [vmem:[%s2587_s11 + $0x768] sm:$0x1f] }
  0xe1   : > { %1290 = vrot.lane.b32.xlu1 %v2466_v62, %s2561_s12  ;;  %1288 = vrot.lane.b32.xlu0 %v2465_v59, %s2561_s12 }
  0xe3   : > { %v3134_v55 = vpop.permute.xlu1 %602  ;;  %v3136_v51 = vpop.permute.xlu0 %600 }
  0xe4   : > { %5001 = vst [vmem:[#allocation112_spill] sm:$0xff] %v3134_v55  ;;  %5002 = vst [vmem:[#allocation113_spill] sm:$0xff] %v3136_v51  ;;  %v2469_v55 = vld [vmem:[%s2587_s11 + $0x760] sm:$0x1f]  ;;  %v3149_v51 = vld [vmem:[%s2587_s11 + $0x10] sm:$0x1f] }
  0xe5   : > { %1294 = vrot.lane.b32.xlu1 %v2468_v50, %s2561_s12  ;;  %1292 = vrot.lane.b32.xlu0 %v2467_v58, %s2561_s12  ;;  %5005 = vst [vmem:[#allocation116_spill] sm:$0xff] %v3149_v51  ;;  %v3157_v58 = vld [vmem:[%s2587_s11 + $0x18] sm:$0x1f]  ;;  %v3160_v50 = vld [vmem:[%s2587_s11 + $0x8] sm:$0x1f] }
  0xe6   : > { %v3237_v51 = vld [vmem:[%s2587_s11 + $0xb8] sm:$0x1f] }
  0xe7   : > { %v3142_v62 = vpop.permute.xlu1 %606  ;;  %v3144_v59 = vpop.permute.xlu0 %604 }
  0xe8   : > { %5003 = vst [vmem:[#allocation114_spill] sm:$0xff] %v3142_v62  ;;  %5004 = vst [vmem:[#allocation115_spill] sm:$0xff] %v3144_v59  ;;  %v3163_v59 = vld [vmem:[%s2587_s11 + $0x28] sm:$0x1f]  ;;  %v3166_v62 = vld [vmem:[%s2587_s11 + $0x20] sm:$0x1f] }
  0xe9   : > { %1298 = vrot.lane.b32.xlu1 %v2470_v54, %s2561_s12  ;;  %1296 = vrot.lane.b32.xlu0 %v2469_v55, %s2561_s12  ;;  %5006 = vst [vmem:[#allocation117_spill] sm:$0xff] %v3166_v62  ;;  %v3175_v54 = vld [vmem:[%s2587_s11 + $0x48] sm:$0x1f]  ;;  %v3258_v62 = vld [vmem:[%s2587_s11 + $0xc0] sm:$0x1f] }
  0xeb   : > { %v3180_v55 = vpop.permute.xlu1 %610  ;;  %v3182_v46 = vpop.permute.xlu0 %608 }
  0xec   : > { %5008 = vst [vmem:[#allocation119_spill] sm:$0xff] %v3180_v55  ;;  %5009 = vst [vmem:[#allocation120_spill] sm:$0xff] %v3182_v46  ;;  %v3202_v55 = vld [vmem:[%s2587_s11 + $0x70] sm:$0x1f]  ;;  %v3205_v46 = vld [vmem:[%s2587_s11 + $0x88] sm:$0x1f] }
  0xed   : > { %5011 = vst [vmem:[#allocation122_spill] sm:$0xff] %v3202_v55  ;;  %5012 = vst [vmem:[#allocation123_spill] sm:$0xff] %v3205_v46  ;;  %1302 = vrot.lane.b32.xlu1 %v2472_v43, %s2561_s12  ;;  %1300 = vrot.lane.b32.xlu0 %v2471_v56, %s2561_s12  ;;  %v377_v56 = vmax.f32 %v3160_v50, %v2603_v3  ;;  %v3243_v43 = vld [vmem:[%s2587_s11 + $0xc8] sm:$0x1f]  ;;  %v2473_v50 = vld [vmem:[%s2587_s11 + $0x780] sm:$0x1f] }
  0xee   : > { %v3314_v46 = vld [vmem:[%s2587_s11 + $0x110] sm:$0x1f] }
  0xef   : > { %v3245_v2 = vpop.permute.xlu1 %614  ;;  %v3247_v3 = vpop.permute.xlu0 %612  ;;  %5022 = vst [vmem:[#allocation133_spill] sm:$0xff] %v3314_v46  ;;  %v5049_v46 = vmax.f32 %v3157_v58, %v5048_v35  ;;  %v5055_v35 = vld [vmem:[#allocation4_spill] sm:$0xff] }
  0xf0   : > { %5014 = vst [vmem:[#allocation125_spill] sm:$0xff] %v3245_v2  ;;  %5015 = vst [vmem:[#allocation126_spill] sm:$0xff] %v3247_v3  ;;  %v3264_v2 = vld [vmem:[%s2587_s11 + $0xd0] sm:$0x1f]  ;;  %v2474_v3 = vld [vmem:[%s2587_s11 + $0x788] sm:$0x1f] }
  0xf1   : > { %5016 = vst [vmem:[#allocation127_spill] sm:$0xff] %v3264_v2  ;;  %1306 = vrot.lane.b32.xlu1 %v2474_v3, %s2561_s12  ;;  %1304 = vrot.lane.b32.xlu0 %v2473_v50, %s2561_s12  ;;  %v3297_v3 = vld [vmem:[%s2587_s11 + $0x108] sm:$0x1f]  ;;  %v3300_v50 = vld [vmem:[%s2587_s11 + $0x100] sm:$0x1f]  ;;  %v696_v2 = vmax.f32 %v5030_v27, %v2865_v61 }
  0xf2   : > { %5019 = vst [vmem:[#allocation130_spill] sm:$0xff] %v3297_v3  ;;  %5020 = vst [vmem:[#allocation131_spill] sm:$0xff] %v3300_v50  ;;  %v3375_v27 = vld [vmem:[%s2587_s11 + $0x140] sm:$0x1f]  ;;  %v3378_v61 = vld [vmem:[%s2587_s11 + $0x158] sm:$0x1f] }
  0xf3   : > { %v3319_v55 = vpop.permute.xlu1 %618  ;;  %v3321_v40 = vpop.permute.xlu0 %616  ;;  %5031 = vst [vmem:[#allocation141_spill] sm:$0xff] %v3375_v27  ;;  %5032 = vst [vmem:[#allocation142_spill] sm:$0xff] %v3378_v61  ;;  %v2477_v3 = vld [vmem:[%s2587_s11 + $0x7a0] sm:$0x1f]  ;;  %v889_v50 = vrot.slane %v2362_v26, 7  ;;  %v760_v52 = vmax.f32 %v696_v2, %v3358_v12  ;;  %v5063_v27 = vld [vmem:[#allocation117_spill] sm:$0xff] }
  0xf4   : > { %5024 = vst [vmem:[#allocation135_spill] sm:$0xff] %v3319_v55  ;;  %5025 = vst [vmem:[#allocation136_spill] sm:$0xff] %v3321_v40  ;;  %v2476_v55 = vld [vmem:[%s2587_s11 + $0x798] sm:$0x1f]  ;;  %v3434_v2 = vld [vmem:[%s2587_s11 + $0x188] sm:$0x1f] }
  0xf5   : > { %1310 = vrot.lane.b32.xlu1 %v2476_v55, %s2561_s12  ;;  %1308 = vrot.lane.b32.xlu0 %v2475_v19, %s2561_s12  ;;  %v697_v19 = vmax.f32 %v377_v56, %v2873_v53  ;;  %v3381_v53 = vld [vmem:[%s2587_s11 + $0x150] sm:$0x1f]  ;;  %v3408_v40 = vld [vmem:[%s2587_s11 + $0x178] sm:$0x1f]  ;;  %v888_v55 = vrot.slane %v3358_v12, 7  ;;  %5053 = vst [vmem:[#allocation39_spill] sm:$0xff] %v3434_v2 }
  0xf6   : > { %5041 = vst [vmem:[#allocation147_spill] sm:$0xff] %v3408_v40  ;;  %v2366_v12 = vld [vmem:[%s2587_s11 + $0x428] sm:$0x1f]  ;;  %v2365_v61 = vld [vmem:[%s2587_s11 + $0x420] sm:$0x1f] }
  0xf7   : > { %v3383_v63 = vpop.permute.xlu1 %622  ;;  %v3385_v56 = vpop.permute.xlu0 %620  ;;  %v893_v33 = vrot.slane %v2366_v12, 7  ;;  %v892_v40 = vrot.slane %v2365_v61, 7 }
  0xf8   : > { %5033 = vst [vmem:[#allocation143_spill] sm:$0xff] %v3383_v63  ;;  %5034 = vst [vmem:[#allocation144_spill] sm:$0xff] %v3385_v56  ;;  %v2478_v63 = vld [vmem:[%s2587_s11 + $0x7a8] sm:$0x1f]  ;;  %v5044_v56 = vld [vmem:[#allocation116_spill] sm:$0xff] }
  0xf9   : > { %1314 = vrot.lane.b32.xlu1 %v2478_v63, %s2561_s12  ;;  %1312 = vrot.lane.b32.xlu0 %v2477_v3, %s2561_s12  ;;  %v5046_v5 = vmax.f32 %v5044_v56, %v5045_v22  ;;  %v699_v63 = vmax.f32 %v5049_v46, %v5047_v15  ;;  %v761_v3 = vmax.f32 %v697_v19, %v2362_v26  ;;  %v3463_v19 = vld [vmem:[%s2587_s11 + $0x180] sm:$0x1f]  ;;  %v890_v22 = vrot.slane %v2363_v37, 7 }
  0xfa   : > { %v5056_v15 = vmax.f32 %v3163_v59, %v5055_v35  ;;  %v5065_v59 = vmax.f32 %v5063_v27, %v5064_v16  ;;  %v2480_v35 = vld [vmem:[%s2587_s11 + $0x7b8] sm:$0x1f]  ;;  %5068 = vst [vmem:[#allocation40_spill] sm:$0xff] %v3463_v19  ;;  %v3471_v16 = vld [vmem:[%s2587_s11 + $0x190] sm:$0x1f]  ;;  %v1016_v56 = vmax.f32 %v760_v52, %v888_v55  ;;  %v5077_v52 = vmax.f32 %v3169_v49, %v2620_v6 }
  0xfb   : > { %v698_v11 = vmax.f32 %v5046_v5, %v5043_v31  ;;  %v5054_v31 = vld [vmem:[#allocation41_spill] sm:$0xff]  ;;  %v3441_v26 = vpop.permute.xlu1 %626  ;;  %v3443_v58 = vpop.permute.xlu0 %624  ;;  %v763_v27 = vmax.f32 %v699_v63, %v2364_v1  ;;  %v2367_v63 = vld [vmem:[%s2587_s11 + $0x430] sm:$0x1f] }
  0xfc   : > { %v701_v46 = vmax.f32 %v5056_v15, %v5054_v31  ;;  %5057 = vst [vmem:[#allocation116_spill] sm:$0xff] %v3441_v26  ;;  %5058 = vst [vmem:[#allocation2_spill] sm:$0xff] %v3443_v58  ;;  %v700_v31 = vmax.f32 %v5065_v59, %v5062_v44  ;;  %v2479_v15 = vld [vmem:[%s2587_s11 + $0x7b0] sm:$0x1f]  ;;  %v3466_v5 = vld [vmem:[%s2587_s11 + $0x198] sm:$0x1f]  ;;  %v1017_v59 = vmax.f32 %v761_v3, %v889_v50 }
  0xfd   : > { %5069 = vst [vmem:[#allocation3_spill] sm:$0xff] %v3466_v5  ;;  %1318 = vrot.lane.b32.xlu1 %v2480_v35, %s2561_s12  ;;  %1316 = vrot.lane.b32.xlu0 %v2479_v15, %s2561_s12  ;;  %5070 = vst [vmem:[#allocation41_spill] sm:$0xff] %v3471_v16  ;;  %v762_v44 = vmax.f32 %v698_v11, %v2363_v37  ;;  %v5076_v50 = vld [vmem:[#allocation43_spill] sm:$0xff]  ;;  %v5081_v15 = vld [vmem:[#allocation45_spill] sm:$0xff]  ;;  %v894_v7 = vrot.slane %v2367_v63, 7 }
  0xfe   : > { %v765_v26 = vmax.f32 %v701_v46, %v2366_v12  ;;  %v764_v1 = vmax.f32 %v700_v31, %v2365_v61  ;;  %v703_v55 = vmax.f32 %v5077_v52, %v5076_v50  ;;  %v2482_v3 = vld [vmem:[%s2587_s11 + $0x7c8] sm:$0x1f]  ;;  %v2481_v12 = vld [vmem:[%s2587_s11 + $0x7c0] sm:$0x1f]  ;;  %v1081_v6 = vmax.f32 %v1017_v59, %v5081_v15  ;;  %v2484_v59 = vld [vmem:[%s2587_s11 + $0x7d8] sm:$0x1f] }
  0xff   : > { %v3476_v29 = vpop.permute.xlu1 %630  ;;  %v3478_v35 = vpop.permute.xlu0 %628  ;;  %v5082_v61 = vld [vmem:[#allocation46_spill] sm:$0xff]  ;;  %v1019_v50 = vmax.f32 %v763_v27, %v891_v30  ;;  %v1018_v52 = vmax.f32 %v762_v44, %v890_v22  ;;  %v2483_v5 = vld [vmem:[%s2587_s11 + $0x7d0] sm:$0x1f]  ;;  %v5084_v30 = vld [vmem:[#allocation47_spill] sm:$0xff]  ;;  %v5085_v22 = vmax.f32 %v3175_v54, %v2630_v8  ;;  %v5091_v8 = vrot.slane %v5081_v15, 7 }
 0x100   : > { %5072 = vst [vmem:[#allocation4_spill] sm:$0xff] %v3476_v29  ;;  %5073 = vst [vmem:[#allocation42_spill] sm:$0xff] %v3478_v35  ;;  %v5079_v35 = vld [vmem:[#allocation44_spill] sm:$0xff]  ;;  %v1080_v49 = vmax.f32 %v1016_v56, %v5082_v61  ;;  %v1021_v46 = vmax.f32 %v765_v26, %v893_v33  ;;  %v2369_v16 = vld [vmem:[%s2587_s11 + $0x440] sm:$0x1f]  ;;  %v1020_v19 = vmax.f32 %v764_v1, %v892_v40 }
 0x101   : > { %v702_v29 = vmax.f32 %v5080_v32, %v5079_v35  ;;  %1322 = vrot.lane.b32.xlu1 %v2482_v3, %s2561_s12  ;;  %1320 = vrot.lane.b32.xlu0 %v2481_v12, %s2561_s12  ;;  %v3504_v32 = vld [vmem:[%s2587_s11 + $0x448] sm:$0x1f]  ;;  %v767_v3 = vmax.f32 %v703_v55, %v2368_v34  ;;  %v705_v44 = vmax.f32 %v5085_v22, %v5084_v30  ;;  %v5086_v27 = vld [vmem:[#allocation48_spill] sm:$0xff]  ;;  %v5087_v58 = vld [vmem:[#allocation118_spill] sm:$0xff]  ;;  %v896_v1 = vrot.slane %v2369_v16, 7 }
 0x102   : > { %v5088_v35 = vld [vmem:[#allocation6_spill] sm:$0xff]  ;;  %v3533_v55 = vld [vmem:[%s2587_s11 + $0x458] sm:$0x1f] }
 0x103   : > { %v1211_v37 = vpop.permute.xlu1 %1210  ;;  %v1209_v31 = vpop.permute.xlu0 %1208  ;;  %v766_v56 = vmax.f32 %v702_v29, %v2367_v63  ;;  %v5089_v2 = vmax.f32 %v5087_v58, %v5088_v35  ;;  %v5090_v34 = vld [vmem:[#allocation50_spill] sm:$0xff]  ;;  %v1083_v29 = vmax.f32 %v1019_v50, %v5083_v48  ;;  %v5093_v58 = vrot.slane %v5082_v61, 7  ;;  %v5095_v63 = vld [vmem:[#allocation53_spill] sm:$0xff]  ;;  %v2371_v50 = vld [vmem:[%s2587_s11 + $0x450] sm:$0x1f] }
 0x104   : > { %v1401_v12 = vmax.f32 %v1081_v6, %v1211_v37  ;;  %v1400_v11 = vmax.f32 %v1080_v49, %v1209_v31  ;;  %v4855_v26 = vrot.slane %v5090_v34, 7  ;;  %v1082_v40 = vmax.f32 %v1018_v52, %v5090_v34  ;;  %v5096_v30 = vld [vmem:[#allocation54_spill] sm:$0xff] }
 0x105   : > { %v704_v33 = vmax.f32 %v5089_v2, %v5086_v27  ;;  %1326 = vrot.lane.b32.xlu1 %v2484_v59, %s2561_s12  ;;  %1324 = vrot.lane.b32.xlu0 %v2483_v5, %s2561_s12  ;;  %v897_v2 = vrot.slane %v3504_v32, 7  ;;  %v1085_v49 = vmax.f32 %v1021_v46, %v5095_v63  ;;  %v2485_v59 = vld [vmem:[%s2587_s11 + $0x7e0] sm:$0x1f]  ;;  %v1023_v22 = vmax.f32 %v767_v3, %v895_v20  ;;  %v5097_v5 = vld [vmem:[#allocation51_spill] sm:$0xff] }
 0x106   : > { %v3525_v54 = vmax.f32 %v1401_v12, %v5091_v8  ;;  %v3529_v37 = vmax.f32 %v1400_v11, %v5093_v58  ;;  %v2486_v12 = vld [vmem:[%s2587_s11 + $0x7e8] sm:$0x1f]  ;;  %v1084_v11 = vmax.f32 %v1020_v19, %v5096_v30  ;;  %v769_v27 = vmax.f32 %v705_v44, %v3504_v32  ;;  %v2488_v58 = vld [vmem:[%s2587_s11 + $0x7f8] sm:$0x1f] }
 0x107   : > { %v1215_v31 = vpop.permute.xlu1 %1214  ;;  %v1213_v6 = vpop.permute.xlu0 %1212  ;;  %v768_v8 = vmax.f32 %v704_v33, %v2369_v16  ;;  %v1022_v46 = vmax.f32 %v766_v56, %v894_v7  ;;  %v5100_v20 = vld [vmem:[#allocation7_spill] sm:$0xff]  ;;  %v5102_v32 = vrot.slane %v5083_v48, 7  ;;  %v899_v7 = vrot.slane %v3533_v55, 7  ;;  %v5106_v33 = vld [vmem:[#allocation121_spill] sm:$0xff] }
 0x108   : > { %5092 = vst [vmem:[#allocation117_spill] sm:$0xff] %v3525_v54  ;;  %5094 = vst [vmem:[#allocation5_spill] sm:$0xff] %v3529_v37  ;;  %v1403_v52 = vmax.f32 %v1083_v29, %v1215_v31  ;;  %v1402_v35 = vmax.f32 %v1082_v40, %v1213_v6  ;;  %v5098_v29 = vmax.f32 %v3185_v57, %v2640_v10  ;;  %v5099_v31 = vld [vmem:[#allocation52_spill] sm:$0xff]  ;;  %v898_v56 = vrot.slane %v2371_v50, 7  ;;  %v2374_v10 = vld [vmem:[%s2587_s11 + $0x468] sm:$0x1f] }
 0x109   : > { %1330 = vrot.lane.b32.xlu1 %v2486_v12, %s2561_s12  ;;  %1328 = vrot.lane.b32.xlu0 %v2485_v59, %s2561_s12  ;;  %v5101_v19 = vmax.f32 %v3188_v45, %v5100_v20  ;;  %v5105_v57 = vld [vmem:[#allocation55_spill] sm:$0xff]  ;;  %v5109_v45 = vld [vmem:[#allocation57_spill] sm:$0xff]  ;;  %v2373_v20 = vld [vmem:[%s2587_s11 + $0x460] sm:$0x1f] }
 0x10a   : > { %v707_v40 = vmax.f32 %v5098_v29, %v5097_v5  ;;  %v3555_v3 = vmax.f32 %v1403_v52, %v5102_v32  ;;  %v3559_v44 = vmax.f32 %v1402_v35, %v4855_v26  ;;  %v5107_v5 = vld [vmem:[#allocation8_spill] sm:$0xff]  ;;  %v4856_v59 = vrot.slane %v5109_v45, 7  ;;  %v5112_v37 = vld [vmem:[#allocation58_spill] sm:$0xff] }
 0x10b   : > { %v706_v16 = vmax.f32 %v5101_v19, %v5099_v31  ;;  %v5108_v6 = vmax.f32 %v5106_v33, %v5107_v5  ;;  %v1219_v29 = vpop.permute.xlu1 %1218  ;;  %v1217_v31 = vpop.permute.xlu0 %1216  ;;  %v5110_v52 = vld [vmem:[#allocation56_spill] sm:$0xff]  ;;  %v5111_v19 = vmax.f32 %v3196_v42, %v2653_v13  ;;  %v1025_v33 = vmax.f32 %v769_v27, %v897_v2  ;;  %v5116_v27 = vld [vmem:[#allocation59_spill] sm:$0xff] }
 0x10c   : > { %5103 = vst [vmem:[#allocation43_spill] sm:$0xff] %v3555_v3  ;;  %5104 = vst [vmem:[#allocation44_spill] sm:$0xff] %v3559_v44  ;;  %v1405_v32 = vmax.f32 %v1085_v49, %v1219_v29  ;;  %v1404_v26 = vmax.f32 %v1084_v11, %v1217_v31  ;;  %v2487_v44 = vld [vmem:[%s2587_s11 + $0x7f0] sm:$0x1f]  ;;  %v1087_v3 = vmax.f32 %v1023_v22, %v5109_v45  ;;  %v5113_v49 = vrot.slane %v5095_v63, 7 }
 0x10d   : > { %v709_v12 = vmax.f32 %v5108_v6, %v5105_v57  ;;  %v708_v35 = vmax.f32 %v5111_v19, %v5110_v52  ;;  %1334 = vrot.lane.b32.xlu1 %v2488_v58, %s2561_s12  ;;  %1332 = vrot.lane.b32.xlu0 %v2487_v44, %s2561_s12  ;;  %v1086_v57 = vmax.f32 %v1022_v46, %v5112_v37  ;;  %v5114_v22 = vrot.slane %v5096_v30, 7  ;;  %v5115_v44 = vld [vmem:[#allocation61_spill] sm:$0xff] }
 0x10e   : > { %v1024_v5 = vmax.f32 %v768_v8, %v896_v1  ;;  %v771_v13 = vmax.f32 %v707_v40, %v3533_v55  ;;  %v770_v42 = vmax.f32 %v706_v16, %v2371_v50  ;;  %v3583_v11 = vmax.f32 %v1405_v32, %v5113_v49  ;;  %v2376_v1 = vld [vmem:[%s2587_s11 + $0x478] sm:$0x1f]  ;;  %v2375_v8 = vld [vmem:[%s2587_s11 + $0x470] sm:$0x1f] }
 0x10f   : > { %v3587_v6 = vmax.f32 %v1404_v26, %v5114_v22  ;;  %v901_v58 = vrot.slane %v2374_v10, 7  ;;  %v773_v29 = vmax.f32 %v709_v12, %v2374_v10  ;;  %v900_v31 = vrot.slane %v2373_v20, 7  ;;  %v1223_v46 = vpop.permute.xlu1 %1222  ;;  %v1221_v19 = vpop.permute.xlu0 %1220  ;;  %v5118_v32 = vld [vmem:[#allocation60_spill] sm:$0xff]  ;;  %v5119_v26 = vld [vmem:[#allocation122_spill] sm:$0xff]  ;;  %v5120_v49 = vld [vmem:[#allocation9_spill] sm:$0xff] }
 0x110   : > { %v772_v2 = vmax.f32 %v708_v35, %v2373_v20  ;;  %v5117_v55 = vmax.f32 %v3199_v41, %v2660_v14  ;;  %v1407_v40 = vmax.f32 %v1087_v3, %v1223_v46  ;;  %v1406_v16 = vmax.f32 %v1086_v57, %v1221_v19  ;;  %v5122_v12 = vld [vmem:[#allocation62_spill] sm:$0xff] }
 0x111   : > { %v5121_v22 = vmax.f32 %v5119_v26, %v5120_v49  ;;  %v5123_v52 = vrot.slane %v5081_v15, 7  ;;  %v5124_v20 = vrot.slane %v5082_v61, 7  ;;  %v1089_v14 = vmax.f32 %v1025_v33, %v5115_v44  ;;  %v2378_v49 = vld [vmem:[%s2587_s11 + $0x488] sm:$0x1f] }
 0x112   : > { %v711_v50 = vmax.f32 %v5117_v55, %v5116_v27  ;;  %v1088_v41 = vmax.f32 %v1024_v5, %v5122_v12  ;;  %v1027_v3 = vmax.f32 %v771_v13, %v899_v7  ;;  %v1026_v35 = vmax.f32 %v770_v42, %v898_v56  ;;  %v5126_v27 = vld [vmem:[#allocation65_spill] sm:$0xff]  ;;  %v2377_v5 = vld [vmem:[%s2587_s11 + $0x480] sm:$0x1f] }
 0x113   : > { %v710_v10 = vmax.f32 %v5121_v22, %v5118_v32  ;;  %1658 = vrot.lane.b32.xlu1 %v5123_v52, %s2561_s12  ;;  %1656 = vrot.lane.b32.xlu0 %v5124_v20, %s2561_s12  ;;  %v3611_v57 = vmax.f32 %v1407_v40, %v4856_v59  ;;  %v5125_v46 = vrot.slane %v5112_v37, 7  ;;  %v903_v52 = vrot.slane %v2376_v1, 7  ;;  %v1227_v55 = vpop.permute.xlu1 %1226  ;;  %v1225_v32 = vpop.permute.xlu0 %1224  ;;  %v5127_v40 = vld [vmem:[#allocation63_spill] sm:$0xff]  ;;  %v5129_v20 = vld [vmem:[#allocation10_spill] sm:$0xff] }
 0x114   : > { %v902_v19 = vrot.slane %v2375_v8, 7  ;;  %v1029_v26 = vmax.f32 %v773_v29, %v901_v58  ;;  %v775_v33 = vmax.f32 %v711_v50, %v2376_v1  ;;  %v1409_v7 = vmax.f32 %v1089_v14, %v1227_v55  ;;  %v5128_v22 = vld [vmem:[#allocation123_spill] sm:$0xff]  ;;  %v5133_v58 = vld [vmem:[#allocation66_spill] sm:$0xff] }
 0x115   : > { %v3615_v15 = vmax.f32 %v1406_v16, %v5125_v46  ;;  %v1408_v56 = vmax.f32 %v1088_v41, %v1225_v32  ;;  %v1028_v13 = vmax.f32 %v772_v2, %v900_v31  ;;  %v774_v42 = vmax.f32 %v710_v10, %v2375_v8  ;;  %v5131_v46 = vld [vmem:[#allocation64_spill] sm:$0xff]  ;;  %v2380_v32 = vld [vmem:[%s2587_s11 + $0x498] sm:$0x1f] }
 0x116   : > { %v5130_v59 = vmax.f32 %v5128_v22, %v5129_v20  ;;  %v5132_v61 = vmax.f32 %v3214_v60, %v2673_v17  ;;  %v4857_v29 = vrot.slane %v5133_v58, 7  ;;  %v5134_v1 = vrot.slane %v5083_v48, 7  ;;  %v5138_v48 = vld [vmem:[#allocation69_spill] sm:$0xff]  ;;  %v5139_v22 = vld [vmem:[#allocation70_spill] sm:$0xff] }
 0x117   : > { %v5135_v31 = vrot.slane %v5090_v34, 7  ;;  %v1091_v2 = vmax.f32 %v1027_v3, %v5126_v27  ;;  %v5136_v50 = vrot.slane %v5115_v44, 7  ;;  %v5137_v17 = vrot.slane %v5122_v12, 7  ;;  %v1229_v55 = vpop.permute.xlu0 %1228  ;;  %v2379_v3 = vld [vmem:[%s2587_s11 + $0x490] sm:$0x1f] }
 0x118   : > { %v713_v16 = vmax.f32 %v5130_v59, %v5127_v40  ;;  %v712_v54 = vmax.f32 %v5132_v61, %v5131_v46  ;;  %1662 = vrot.lane.b32.xlu1 %v5134_v1, %s2561_s12  ;;  %v1090_v59 = vmax.f32 %v1026_v35, %v5133_v58  ;;  %v905_v10 = vrot.slane %v2378_v49, 7  ;;  %v1231_v61 = vpop.permute.xlu1 %1230 }
 0x119   : > { %1660 = vrot.lane.b32.xlu0 %v5135_v31, %s2561_s12  ;;  %v3639_v8 = vmax.f32 %v1409_v7, %v5136_v50  ;;  %v3643_v60 = vmax.f32 %v1408_v56, %v5137_v17  ;;  %v904_v14 = vrot.slane %v2377_v5, 7  ;;  %v4858_v41 = vrot.slane %v5138_v48, 7  ;;  %v5149_v17 = vld [vmem:[#allocation124_spill] sm:$0xff] }
 0x11a   : > { %v1093_v34 = vmax.f32 %v1029_v26, %v5138_v48  ;;  %v1411_v40 = vmax.f32 %v1091_v2, %v1231_v61  ;;  %v1410_v35 = vmax.f32 %v1090_v59, %v1229_v55  ;;  %v1092_v20 = vmax.f32 %v1028_v13, %v5139_v22  ;;  %v5142_v2 = vld [vmem:[#allocation67_spill] sm:$0xff]  ;;  %v5150_v61 = vld [vmem:[#allocation12_spill] sm:$0xff]  ;;  %v5152_v55 = vld [vmem:[#allocation73_spill] sm:$0xff] }
 0x11b   : > { %v1031_v7 = vmax.f32 %v775_v33, %v903_v52  ;;  %v777_v46 = vmax.f32 %v713_v16, %v2378_v49  ;;  %v776_v1 = vmax.f32 %v712_v54, %v2377_v5  ;;  %v5140_v31 = vrot.slane %v5095_v63, 7  ;;  %v5144_v33 = vld [vmem:[#allocation68_spill] sm:$0xff]  ;;  %v5145_v54 = vld [vmem:[#allocation11_spill] sm:$0xff] }
 0x11c   : > { %v5141_v26 = vrot.slane %v5096_v30, 7  ;;  %v1030_v50 = vmax.f32 %v774_v42, %v902_v19  ;;  %v5143_v13 = vmax.f32 %v3217_v39, %v2680_v18  ;;  %v5146_v49 = vmax.f32 %v3220_v38, %v5145_v54  ;;  %v5148_v42 = vld [vmem:[#allocation71_spill] sm:$0xff]  ;;  %v1233_v38 = vpop.permute.xlu0 %1232 }
 0x11d   : > { %1666 = vrot.lane.b32.xlu1 %v5140_v31, %s2561_s12  ;;  %v5147_v16 = vrot.slane %v5126_v27, 7  ;;  %v3671_v63 = vmax.f32 %v1410_v35, %v4857_v29  ;;  %v907_v30 = vrot.slane %v2380_v32, 7  ;;  %v906_v19 = vrot.slane %v2379_v3, 7  ;;  %v5155_v29 = vld [vmem:[#allocation74_spill] sm:$0xff] }
 0x11e   : > { %1664 = vrot.lane.b32.xlu0 %v5141_v26, %s2561_s12  ;;  %v715_v52 = vmax.f32 %v5143_v13, %v5142_v2  ;;  %v714_v5 = vmax.f32 %v5146_v49, %v5144_v33  ;;  %v5151_v18 = vmax.f32 %v5149_v17, %v5150_v61  ;;  %v1479_v31 = vrot.slane %v5152_v55, 7  ;;  %v1235_v26 = vpop.permute.xlu1 %1234  ;;  %v2382_v2 = vld [vmem:[%s2587_s11 + $0x4a8] sm:$0x1f]  ;;  %v2381_v13 = vld [vmem:[%s2587_s11 + $0x4a0] sm:$0x1f]  ;;  %v5153_v33 = vld [vmem:[#allocation72_spill] sm:$0xff] }
 0x11f   : > { %v3667_v59 = vmax.f32 %v1411_v40, %v5147_v16  ;;  %v5154_v40 = vmax.f32 %v3234_v0, %v2693_v21  ;;  %v1413_v35 = vmax.f32 %v1093_v34, %v1235_v26  ;;  %v1412_v49 = vmax.f32 %v1092_v20, %v1233_v38 }
 0x120   : > { %v717_v39 = vmax.f32 %v5151_v18, %v5148_v42  ;;  %v1095_v16 = vmax.f32 %v1031_v7, %v5152_v55  ;;  %v4859_v56 = vrot.slane %v5155_v29, 7  ;;  %v5156_v42 = vrot.slane %v5109_v45, 7 }
 0x121   : > { %v716_v54 = vmax.f32 %v5154_v40, %v5153_v33  ;;  %v5157_v17 = vrot.slane %v5112_v37, 7  ;;  %v1094_v61 = vmax.f32 %v1030_v50, %v5155_v29  ;;  %v1033_v0 = vmax.f32 %v777_v46, %v905_v10  ;;  %v5159_v33 = vld [vmem:[#allocation77_spill] sm:$0xff]  ;;  %v1237_v50 = vpop.permute.xlu0 %1236 }
 0x122   : > { %1670 = vrot.lane.b32.xlu1 %v5156_v42, %s2561_s12  ;;  %v1032_v21 = vmax.f32 %v776_v1, %v904_v14  ;;  %v779_v34 = vmax.f32 %v715_v52, %v2380_v32  ;;  %v778_v20 = vmax.f32 %v714_v5, %v2379_v3  ;;  %v3695_v7 = vmax.f32 %v1413_v35, %v4858_v41  ;;  %v1239_v42 = vpop.permute.xlu1 %1238  ;;  %v2384_v10 = vld [vmem:[%s2587_s11 + $0x4b8] sm:$0x1f]  ;;  %v5160_v14 = vld [vmem:[#allocation75_spill] sm:$0xff]  ;;  %v2383_v1 = vld [vmem:[%s2587_s11 + $0x4b0] sm:$0x1f] }
 0x123   : > { %1668 = vrot.lane.b32.xlu0 %v5157_v17, %s2561_s12  ;;  %v5158_v18 = vrot.slane %v5139_v22, 7  ;;  %v909_v26 = vrot.slane %v2382_v2, 7  ;;  %v781_v38 = vmax.f32 %v717_v39, %v2382_v2  ;;  %v908_v37 = vrot.slane %v2381_v13, 7  ;;  %v5161_v32 = vld [vmem:[#allocation13_spill] sm:$0xff]  ;;  %v5163_v35 = vld [vmem:[#allocation76_spill] sm:$0xff]  ;;  %v5165_v2 = vld [vmem:[#allocation78_spill] sm:$0xff] }
 0x124   : > { %v1481_v40 = vrot.slane %v5159_v33, 7  ;;  %v780_v17 = vmax.f32 %v716_v54, %v2381_v13  ;;  %v5162_v3 = vmax.f32 %v3237_v51, %v5161_v32  ;;  %v1415_v52 = vmax.f32 %v1095_v16, %v1239_v42  ;;  %v5168_v42 = vld [vmem:[#allocation81_spill] sm:$0xff] }
 0x125   : > { %v3699_v45 = vmax.f32 %v1412_v49, %v5158_v18  ;;  %v1414_v5 = vmax.f32 %v1094_v61, %v1237_v50  ;;  %v5164_v49 = vmax.f32 %v3240_v36, %v2703_v23  ;;  %v4862_v18 = vrot.slane %v5165_v2, 7 }
 0x126   : > { %v719_v46 = vmax.f32 %v5162_v3, %v5160_v14  ;;  %v5166_v41 = vrot.slane %v5115_v44, 7  ;;  %v5167_v13 = vrot.slane %v5122_v12, 7  ;;  %v1097_v51 = vmax.f32 %v1033_v0, %v5159_v33  ;;  %v1243_v50 = vpop.permute.xlu1 %1242  ;;  %v1241_v14 = vpop.permute.xlu0 %1240  ;;  %v2386_v3 = vld [vmem:[%s2587_s11 + $0x4c8] sm:$0x1f] }
 0x127   : > { %v718_v39 = vmax.f32 %v5164_v49, %v5163_v35  ;;  %v1096_v54 = vmax.f32 %v1032_v21, %v5165_v2  ;;  %v1035_v16 = vmax.f32 %v779_v34, %v907_v30  ;;  %v1034_v61 = vmax.f32 %v778_v20, %v906_v19  ;;  %v2385_v21 = vld [vmem:[%s2587_s11 + $0x4c0] sm:$0x1f]  ;;  %v5171_v49 = vld [vmem:[#allocation80_spill] sm:$0xff] }
 0x128   : > { %1674 = vrot.lane.b32.xlu1 %v5166_v41, %s2561_s12  ;;  %1672 = vrot.lane.b32.xlu0 %v5167_v13, %s2561_s12  ;;  %v3723_v23 = vmax.f32 %v1415_v52, %v1479_v31  ;;  %v3727_v36 = vmax.f32 %v1414_v5, %v4859_v56  ;;  %v911_v44 = vrot.slane %v2384_v10, 7  ;;  %v910_v41 = vrot.slane %v2383_v1, 7  ;;  %v5169_v52 = vld [vmem:[#allocation79_spill] sm:$0xff] }
 0x129   : > { %v4861_v12 = vrot.slane %v5168_v42, 7  ;;  %v1037_v32 = vmax.f32 %v781_v38, %v909_v26  ;;  %v783_v0 = vmax.f32 %v719_v46, %v2384_v10  ;;  %v1417_v30 = vmax.f32 %v1097_v51, %v1243_v50  ;;  %v5173_v26 = vld [vmem:[#allocation82_spill] sm:$0xff] }
 0x12a   : > { %v1416_v19 = vmax.f32 %v1096_v54, %v1241_v14  ;;  %v1036_v34 = vmax.f32 %v780_v17, %v908_v37  ;;  %v782_v20 = vmax.f32 %v718_v39, %v2383_v1  ;;  %v5170_v35 = vmax.f32 %v3243_v43, %v2710_v24  ;;  %v1247_v39 = vpop.permute.xlu1 %1246  ;;  %v1245_v51 = vpop.permute.xlu0 %1244  ;;  %v2388_v54 = vld [vmem:[%s2587_s11 + $0x4d8] sm:$0x1f]  ;;  %v5177_v14 = vld [vmem:[#allocation86_spill] sm:$0xff] }
 0x12b   : > { %v5172_v13 = vmax.f32 %v3258_v62, %v2713_v25  ;;  %v4860_v38 = vrot.slane %v5173_v26, 7  ;;  %v5174_v10 = vrot.slane %v5126_v27, 7  ;;  %v5175_v37 = vrot.slane %v5133_v58, 7  ;;  %v5176_v27 = vld [vmem:[#allocation85_spill] sm:$0xff] }
 0x12c   : > { %v721_v5 = vmax.f32 %v5170_v35, %v5169_v52  ;;  %v1099_v24 = vmax.f32 %v1035_v16, %v5168_v42  ;;  %v1098_v43 = vmax.f32 %v1034_v61, %v5173_v26  ;;  %v3751_v17 = vmax.f32 %v1417_v30, %v1481_v40  ;;  %v2387_v16 = vld [vmem:[%s2587_s11 + $0x4d0] sm:$0x1f] }
 0x12d   : > { %v720_v56 = vmax.f32 %v5172_v13, %v5171_v49  ;;  %1678 = vrot.lane.b32.xlu1 %v5174_v10, %s2561_s12  ;;  %1676 = vrot.lane.b32.xlu0 %v5175_v37, %s2561_s12  ;;  %v3755_v25 = vmax.f32 %v1416_v19, %v4862_v18  ;;  %v913_v62 = vrot.slane %v2386_v3, 7  ;;  %v912_v46 = vrot.slane %v2385_v21, 7  ;;  %v5180_v37 = vld [vmem:[#allocation83_spill] sm:$0xff] }
 0x12e   : > { %v4864_v1 = vrot.slane %v5176_v27, 7  ;;  %v1101_v58 = vmax.f32 %v1037_v32, %v5176_v27  ;;  %v1419_v50 = vmax.f32 %v1099_v24, %v1247_v39  ;;  %v1418_v61 = vmax.f32 %v1098_v43, %v1245_v51  ;;  %v5181_v24 = vld [vmem:[#allocation14_spill] sm:$0xff]  ;;  %v5189_v51 = vld [vmem:[#allocation89_spill] sm:$0xff] }
 0x12f   : > { %v1100_v52 = vmax.f32 %v1036_v34, %v5177_v14  ;;  %v1039_v30 = vmax.f32 %v783_v0, %v911_v44  ;;  %v785_v35 = vmax.f32 %v721_v5, %v2386_v3  ;;  %v784_v49 = vmax.f32 %v720_v56, %v2385_v21  ;;  %v5183_v0 = vld [vmem:[#allocation84_spill] sm:$0xff]  ;;  %v5184_v3 = vld [vmem:[#allocation127_spill] sm:$0xff] }
 0x130   : > { %v4863_v19 = vrot.slane %v5177_v14, 7  ;;  %v5178_v13 = vrot.slane %v5138_v48, 7  ;;  %v5179_v32 = vrot.slane %v5139_v22, 7  ;;  %v1038_v10 = vmax.f32 %v782_v20, %v910_v41  ;;  %v5185_v56 = vld [vmem:[#allocation15_spill] sm:$0xff] }
 0x131   : > { %v5182_v34 = vmax.f32 %v3261_v4, %v5181_v24  ;;  %v5186_v21 = vmax.f32 %v5184_v3, %v5185_v56  ;;  %v3779_v43 = vmax.f32 %v1419_v50, %v4861_v12  ;;  %v3783_v48 = vmax.f32 %v1418_v61, %v4860_v38  ;;  %v5187_v20 = vld [vmem:[#allocation87_spill] sm:$0xff]  ;;  %v5191_v50 = vld [vmem:[#allocation16_spill] sm:$0xff]  ;;  %v5193_v12 = vld [vmem:[#allocation90_spill] sm:$0xff] }
 0x132   : > { %1682 = vrot.lane.b32.xlu1 %v5178_v13, %s2561_s12  ;;  %1680 = vrot.lane.b32.xlu0 %v5179_v32, %s2561_s12  ;;  %v915_v22 = vrot.slane %v2388_v54, 7  ;;  %v914_v41 = vrot.slane %v2387_v16, 7  ;;  %v5188_v4 = vmax.f32 %v3275_v9, %v2730_v28  ;;  %v4866_v13 = vrot.slane %v5189_v51, 7  ;;  %v1251_v32 = vpop.permute.xlu1 %1250  ;;  %v2390_v24 = vld [vmem:[%s2587_s11 + $0x4e8] sm:$0x1f] }
 0x133   : > { %v723_v44 = vmax.f32 %v5182_v34, %v5180_v37  ;;  %v722_v5 = vmax.f32 %v5186_v21, %v5183_v0  ;;  %v1249_v37 = vpop.permute.xlu0 %1248  ;;  %v2389_v34 = vld [vmem:[%s2587_s11 + $0x4e0] sm:$0x1f]  ;;  %v5190_v0 = vld [vmem:[#allocation88_spill] sm:$0xff]  ;;  %v5192_v3 = vmax.f32 %v3278_v47, %v5191_v50  ;;  %v1421_v61 = vmax.f32 %v1101_v58, %v1251_v32  ;;  %v5195_v32 = vld [vmem:[#allocation93_spill] sm:$0xff] }
 0x134   : > { %v725_v39 = vmax.f32 %v5188_v4, %v5187_v20  ;;  %v1420_v21 = vmax.f32 %v1100_v52, %v1249_v37  ;;  %v1103_v38 = vmax.f32 %v1039_v30, %v5189_v51  ;;  %v4865_v18 = vrot.slane %v5193_v12, 7 }
 0x135   : > { %v724_v56 = vmax.f32 %v5192_v3, %v5190_v0  ;;  %v5194_v9 = vrot.slane %v5155_v29, 7  ;;  %v1102_v28 = vmax.f32 %v1038_v10, %v5193_v12  ;;  %v1041_v47 = vmax.f32 %v785_v35, %v913_v62  ;;  %v2392_v62 = vld [vmem:[%s2587_s11 + $0x4f8] sm:$0x1f] }
 0x136   : > { %1686 = vrot.lane.b32.xlu1 %v1479_v31, %s2561_s12  ;;  %v1040_v20 = vmax.f32 %v784_v49, %v912_v46  ;;  %v787_v58 = vmax.f32 %v723_v44, %v2388_v54  ;;  %v786_v52 = vmax.f32 %v722_v5, %v2387_v16  ;;  %v3807_v30 = vmax.f32 %v1421_v61, %v4864_v1  ;;  %v1255_v0 = vpop.permute.xlu1 %1254  ;;  %v5196_v46 = vld [vmem:[#allocation91_spill] sm:$0xff]  ;;  %v5197_v54 = vld [vmem:[#allocation128_spill] sm:$0xff]  ;;  %v5198_v16 = vld [vmem:[#allocation17_spill] sm:$0xff] }
 0x137   : > { %1684 = vrot.lane.b32.xlu0 %v5194_v9, %s2561_s12  ;;  %v3811_v55 = vmax.f32 %v1420_v21, %v4863_v19  ;;  %v917_v31 = vrot.slane %v2390_v24, 7  ;;  %v789_v4 = vmax.f32 %v725_v39, %v2390_v24  ;;  %v916_v29 = vrot.slane %v2389_v34, 7  ;;  %v1253_v10 = vpop.permute.xlu0 %1252  ;;  %v2391_v44 = vld [vmem:[%s2587_s11 + $0x4f0] sm:$0x1f]  ;;  %v5201_v21 = vld [vmem:[#allocation129_spill] sm:$0xff]  ;;  %v5202_v9 = vld [vmem:[#allocation18_spill] sm:$0xff] }
 0x138   : > { %v788_v50 = vmax.f32 %v724_v56, %v2389_v34  ;;  %v5199_v35 = vmax.f32 %v5197_v54, %v5198_v16  ;;  %v1423_v5 = vmax.f32 %v1103_v38, %v1255_v0  ;;  %v1422_v3 = vmax.f32 %v1102_v28, %v1253_v10  ;;  %v5200_v61 = vld [vmem:[#allocation92_spill] sm:$0xff]  ;;  %v5204_v24 = vld [vmem:[#allocation94_spill] sm:$0xff] }
 0x139   : > { %v5203_v19 = vmax.f32 %v5201_v21, %v5202_v9  ;;  %v5205_v34 = vrot.slane %v5165_v2, 7  ;;  %v1105_v38 = vmax.f32 %v1041_v47, %v5195_v32  ;;  %v1104_v56 = vmax.f32 %v1040_v20, %v5204_v24  ;;  %v5207_v2 = vld [vmem:[#allocation97_spill] sm:$0xff]  ;;  %v5210_v21 = vld [vmem:[#allocation19_spill] sm:$0xff] }
 0x13a   : > { %v727_v49 = vmax.f32 %v5199_v35, %v5196_v46  ;;  %1690 = vrot.lane.b32.xlu1 %v1481_v40, %s2561_s12  ;;  %v1043_v28 = vmax.f32 %v787_v58, %v915_v22  ;;  %v1042_v0 = vmax.f32 %v786_v52, %v914_v41  ;;  %v3839_v33 = vmax.f32 %v1422_v3, %v4865_v18  ;;  %v1259_v54 = vpop.permute.xlu1 %1258  ;;  %v2394_v22 = vld [vmem:[%s2587_s11 + $0x508] sm:$0x1f]  ;;  %v2393_v41 = vld [vmem:[%s2587_s11 + $0x500] sm:$0x1f]  ;;  %v5212_v18 = vld [vmem:[#allocation96_spill] sm:$0xff] }
 0x13b   : > { %v726_v39 = vmax.f32 %v5203_v19, %v5200_v61  ;;  %1688 = vrot.lane.b32.xlu0 %v5205_v34, %s2561_s12  ;;  %v3835_v19 = vmax.f32 %v1423_v5, %v4866_v13  ;;  %v919_v40 = vrot.slane %v2392_v62, 7  ;;  %v918_v10 = vrot.slane %v2391_v44, 7  ;;  %v1257_v47 = vpop.permute.xlu0 %1256  ;;  %v5208_v61 = vld [vmem:[#allocation95_spill] sm:$0xff]  ;;  %v5209_v3 = vld [vmem:[#allocation130_spill] sm:$0xff]  ;;  %v5214_v46 = vld [vmem:[#allocation20_spill] sm:$0xff] }
 0x13c   : > { %5206 = vst [vmem:[#allocation45_spill] sm:$0xff] %v3839_v33  ;;  %v1045_v16 = vmax.f32 %v789_v4, %v917_v31  ;;  %v791_v20 = vmax.f32 %v727_v49, %v2392_v62  ;;  %v1425_v58 = vmax.f32 %v1105_v38, %v1259_v54  ;;  %v1424_v52 = vmax.f32 %v1104_v56, %v1257_v47  ;;  %v5213_v13 = vld [vmem:[#allocation131_spill] sm:$0xff]  ;;  %v3853_v33 = vld [vmem:[%s2587_s11 + $0x6d0] sm:$0x1f]  ;;  %v2396_v54 = vld [vmem:[%s2587_s11 + $0x518] sm:$0x1f] }
 0x13d   : > { %v1044_v35 = vmax.f32 %v788_v50, %v916_v29  ;;  %v790_v5 = vmax.f32 %v726_v39, %v2391_v44  ;;  %v5211_v9 = vmax.f32 %v5209_v3, %v5210_v21  ;;  %v5215_v1 = vmax.f32 %v5213_v13, %v5214_v46  ;;  %v2504_v50 = vld [vmem:[%s2587_s11 + $0x6d8] sm:$0x1f]  ;;  %v3873_v38 = vld [vmem:[%s2587_s11 + $0x6e8] sm:$0x1f] }
 0x13e   : > { %v4867_v31 = vrot.slane %v3853_v33, 7  ;;  %v5216_v4 = vrot.slane %v5168_v42, 7  ;;  %v5217_v29 = vrot.slane %v5173_v26, 7  ;;  %v1107_v62 = vmax.f32 %v1043_v28, %v2504_v50  ;;  %v1263_v56 = vpop.permute.xlu1 %1262 }
 0x13f   : > { %v729_v34 = vmax.f32 %v5211_v9, %v5208_v61  ;;  %v728_v37 = vmax.f32 %v5215_v1, %v5212_v18  ;;  %v1106_v13 = vmax.f32 %v1042_v0, %v3853_v33  ;;  %v5218_v18 = vrot.slane %v5195_v32, 7  ;;  %v1261_v46 = vpop.permute.xlu0 %1260  ;;  %v2395_v0 = vld [vmem:[%s2587_s11 + $0x510] sm:$0x1f] }
 0x140   : > { %1694 = vrot.lane.b32.xlu1 %v5216_v4, %s2561_s12  ;;  %1692 = vrot.lane.b32.xlu0 %v5217_v29, %s2561_s12  ;;  %v5219_v49 = vrot.slane %v5204_v24, 7  ;;  %v921_v42 = vrot.slane %v2394_v22, 7  ;;  %v920_v39 = vrot.slane %v2393_v41, 7  ;;  %v1109_v28 = vmax.f32 %v1045_v16, %v3873_v38 }
 0x141   : > { %v3866_v1 = vmax.f32 %v1425_v58, %v5218_v18  ;;  %v1427_v47 = vmax.f32 %v1107_v62, %v1263_v56  ;;  %v1426_v61 = vmax.f32 %v1106_v13, %v1261_v46  ;;  %v3880_v58 = vld [vmem:[%s2587_s11 + $0x6e0] sm:$0x1f]  ;;  %v1047_v3 = vmax.f32 %v791_v20, %v919_v40  ;;  %v5224_v13 = vld [vmem:[#allocation132_spill] sm:$0xff]  ;;  %v5225_v18 = vld [vmem:[#allocation21_spill] sm:$0xff] }
 0x142   : > { %v3870_v44 = vmax.f32 %v1424_v52, %v5219_v49  ;;  %v1108_v52 = vmax.f32 %v1044_v35, %v3880_v58  ;;  %v793_v21 = vmax.f32 %v729_v34, %v2394_v22  ;;  %v792_v9 = vmax.f32 %v728_v37, %v2393_v41  ;;  %v5223_v62 = vld [vmem:[#allocation98_spill] sm:$0xff]  ;;  %v5227_v20 = vld [vmem:[#allocation99_spill] sm:$0xff]  ;;  %v5228_v37 = vld [vmem:[#allocation133_spill] sm:$0xff] }
 0x143   : > { %v5221_v29 = vrot.slane %v5176_v27, 7  ;;  %v5222_v16 = vrot.slane %v5177_v14, 7  ;;  %v1046_v50 = vmax.f32 %v790_v5, %v918_v10  ;;  %v5226_v35 = vmax.f32 %v5224_v13, %v5225_v18  ;;  %v5229_v22 = vld [vmem:[#allocation22_spill] sm:$0xff]  ;;  %v5234_v56 = vld [vmem:[#allocation100_spill] sm:$0xff]  ;;  %v3911_v13 = vld [vmem:[%s2587_s11 + $0x6f8] sm:$0x1f] }
 0x144   : > { %5220 = vst [vmem:[#allocation46_spill] sm:$0xff] %v3870_v44  ;;  %v5230_v41 = vmax.f32 %v5228_v37, %v5229_v22  ;;  %v5231_v49 = vrot.slane %v5207_v2, 7  ;;  %v3904_v14 = vmax.f32 %v1426_v61, %v4867_v31  ;;  %v923_v10 = vrot.slane %v2396_v54, 7  ;;  %v5235_v46 = vld [vmem:[#allocation134_spill] sm:$0xff]  ;;  %v2398_v37 = vld [vmem:[%s2587_s11 + $0x528] sm:$0x1f] }
 0x145   : > { %1698 = vrot.lane.b32.xlu1 %v5221_v29, %s2561_s12  ;;  %1696 = vrot.lane.b32.xlu0 %v5222_v16, %s2561_s12  ;;  %v731_v40 = vmax.f32 %v5226_v35, %v5223_v62  ;;  %v922_v5 = vrot.slane %v2395_v0, 7  ;;  %v5236_v29 = vld [vmem:[#allocation23_spill] sm:$0xff]  ;;  %v1267_v35 = vpop.permute.xlu1 %1266  ;;  %v5238_v22 = vld [vmem:[#allocation101_spill] sm:$0xff] }
 0x146   : > { %v730_v34 = vmax.f32 %v5230_v41, %v5227_v20  ;;  %v3900_v27 = vmax.f32 %v1427_v47, %v5231_v49  ;;  %5233 = vst [vmem:[#allocation47_spill] sm:$0xff] %v3904_v14  ;;  %v5237_v16 = vmax.f32 %v5235_v46, %v5236_v29  ;;  %v1265_v20 = vpop.permute.xlu0 %1264  ;;  %v2397_v47 = vld [vmem:[%s2587_s11 + $0x520] sm:$0x1f]  ;;  %v5239_v41 = vld [vmem:[#allocation137_spill] sm:$0xff]  ;;  %v5240_v49 = vld [vmem:[#allocation24_spill] sm:$0xff]  ;;  %v1429_v4 = vmax.f32 %v1109_v28, %v1267_v35 }
 0x147   : > { %v5241_v61 = vmax.f32 %v5239_v41, %v5240_v49  ;;  %v1428_v26 = vmax.f32 %v1108_v52, %v1265_v20  ;;  %v1111_v14 = vmax.f32 %v1047_v3, %v3911_v13  ;;  %v3922_v46 = vld [vmem:[%s2587_s11 + $0x6f0] sm:$0x1f]  ;;  %v5242_v29 = vrot.slane %v5189_v51, 7 }
 0x148   : > { %5232 = vst [vmem:[#allocation49_spill] sm:$0xff] %v3900_v27  ;;  %v733_v62 = vmax.f32 %v5237_v16, %v5234_v56  ;;  %v5243_v16 = vrot.slane %v5193_v12, 7  ;;  %v1049_v28 = vmax.f32 %v793_v21, %v921_v42  ;;  %v1048_v52 = vmax.f32 %v792_v9, %v920_v39  ;;  %v5248_v9 = vld [vmem:[#allocation102_spill] sm:$0xff]  ;;  %v5252_v56 = vld [vmem:[#allocation103_spill] sm:$0xff]  ;;  %v5268_v27 = vld [vmem:[#allocation28_spill] sm:$0xff] }
 0x149   : > { %v732_v31 = vmax.f32 %v5241_v61, %v5238_v22  ;;  %1702 = vrot.lane.b32.xlu1 %v5242_v29, %s2561_s12  ;;  %v1110_v22 = vmax.f32 %v1046_v50, %v3922_v46  ;;  %v795_v35 = vmax.f32 %v731_v40, %v2396_v54  ;;  %v794_v3 = vmax.f32 %v730_v34, %v2395_v0  ;;  %v1271_v21 = vpop.permute.xlu1 %1270  ;;  %v2400_v0 = vld [vmem:[%s2587_s11 + $0x538] sm:$0x1f]  ;;  %v5249_v50 = vld [vmem:[#allocation138_spill] sm:$0xff] }
 0x14a   : > { %1700 = vrot.lane.b32.xlu0 %v5243_v16, %s2561_s12  ;;  %v5244_v20 = vrot.slane %v3873_v38, 7  ;;  %v5246_v49 = vrot.slane %v3880_v58, 7  ;;  %v925_v61 = vrot.slane %v2398_v37, 7  ;;  %v797_v12 = vmax.f32 %v733_v62, %v2398_v37  ;;  %v3941_v16 = vld [vmem:[%s2587_s11 + $0x708] sm:$0x1f]  ;;  %v1269_v39 = vpop.permute.xlu0 %1268  ;;  %v5254_v37 = vld [vmem:[#allocation26_spill] sm:$0xff] }
 0x14b   : > { %v924_v29 = vrot.slane %v2397_v47, 7  ;;  %v796_v54 = vmax.f32 %v732_v31, %v2397_v47  ;;  %v5253_v62 = vld [vmem:[#allocation139_spill] sm:$0xff]  ;;  %v5256_v31 = vrot.slane %v5195_v32, 7  ;;  %v5257_v47 = vrot.slane %v5204_v24, 7 }
 0x14c   : > { %v3934_v41 = vmax.f32 %v1429_v4, %v5244_v20  ;;  %v3938_v51 = vmax.f32 %v1428_v26, %v5246_v49  ;;  %v5250_v4 = vld [vmem:[#allocation25_spill] sm:$0xff]  ;;  %v2399_v20 = vld [vmem:[%s2587_s11 + $0x530] sm:$0x1f]  ;;  %v1431_v26 = vmax.f32 %v1111_v14, %v1271_v21  ;;  %v1430_v49 = vmax.f32 %v1110_v22, %v1269_v39 }
 0x14d   : > { %v5251_v40 = vmax.f32 %v5249_v50, %v5250_v4  ;;  %v5255_v18 = vmax.f32 %v5253_v62, %v5254_v37  ;;  %1706 = vrot.lane.b32.xlu1 %v5256_v31, %s2561_s12  ;;  %v1113_v14 = vmax.f32 %v1049_v28, %v3941_v16  ;;  %v1051_v21 = vmax.f32 %v795_v35, %v923_v10  ;;  %v3975_v4 = vld [vmem:[%s2587_s11 + $0x718] sm:$0x1f]  ;;  %v1275_v28 = vpop.permute.xlu1 %1274  ;;  %v2401_v35 = vld [vmem:[%s2587_s11 + $0x540] sm:$0x1f] }
 0x14e   : > { %5245 = vst [vmem:[#allocation48_spill] sm:$0xff] %v3934_v41  ;;  %5247 = vst [vmem:[#allocation118_spill] sm:$0xff] %v3938_v51  ;;  %v3955_v41 = vld [vmem:[%s2587_s11 + $0x700] sm:$0x1f]  ;;  %1704 = vrot.lane.b32.xlu0 %v5257_v47, %s2561_s12  ;;  %v927_v50 = vrot.slane %v2400_v0, 7  ;;  %v926_v24 = vrot.slane %v2399_v20, 7  ;;  %v1273_v62 = vpop.permute.xlu0 %1272  ;;  %v1052_v37 = vmax.f32 %v796_v54, %v924_v29 }
 0x14f   : > { %v735_v34 = vmax.f32 %v5251_v40, %v5248_v9  ;;  %v734_v51 = vmax.f32 %v5255_v18, %v5252_v56  ;;  %v1112_v22 = vmax.f32 %v1048_v52, %v3955_v41  ;;  %v1050_v18 = vmax.f32 %v794_v3, %v922_v5  ;;  %v2402_v5 = vld [vmem:[%s2587_s11 + $0x548] sm:$0x1f]  ;;  %v5263_v47 = vld [vmem:[#allocation140_spill] sm:$0xff] }
 0x150   : > { %v5258_v56 = vrot.slane %v3911_v13, 7  ;;  %v5260_v9 = vrot.slane %v3922_v46, 7  ;;  %v1053_v52 = vmax.f32 %v797_v12, %v925_v61  ;;  %v1433_v3 = vmax.f32 %v1113_v14, %v1275_v28  ;;  %v3989_v61 = vld [vmem:[%s2587_s11 + $0x710] sm:$0x1f]  ;;  %v2404_v28 = vld [vmem:[%s2587_s11 + $0x558] sm:$0x1f] }
 0x151   : > { %v799_v10 = vmax.f32 %v735_v34, %v2400_v0  ;;  %v798_v31 = vmax.f32 %v734_v51, %v2399_v20  ;;  %v4868_v12 = vrot.slane %v3989_v61, 7  ;;  %v5270_v29 = vrot.slane %v5207_v2, 7 }
 0x152   : > { %v3968_v39 = vmax.f32 %v1431_v26, %v5258_v56  ;;  %v3972_v32 = vmax.f32 %v1430_v49, %v5260_v9  ;;  %v1432_v26 = vmax.f32 %v1112_v22, %v1273_v62  ;;  %v5262_v49 = vld [vmem:[#allocation104_spill] sm:$0xff]  ;;  %v5264_v56 = vld [vmem:[#allocation27_spill] sm:$0xff]  ;;  %v5271_v51 = vrot.slane %v3853_v33, 7 }
 0x153   : > { %v5265_v9 = vmax.f32 %v5263_v47, %v5264_v56  ;;  %1710 = vrot.lane.b32.xlu1 %v5270_v29, %s2561_s12  ;;  %v1115_v54 = vmax.f32 %v1051_v21, %v3975_v4  ;;  %v5272_v0 = vrot.slane %v3941_v16, 7  ;;  %v5273_v20 = vrot.slane %v3955_v41, 7 }
 0x154   : > { %5259 = vst [vmem:[#allocation6_spill] sm:$0xff] %v3968_v39  ;;  %5261 = vst [vmem:[#allocation50_spill] sm:$0xff] %v3972_v32  ;;  %v5266_v32 = vld [vmem:[#allocation105_spill] sm:$0xff]  ;;  %1708 = vrot.lane.b32.xlu0 %v5271_v51, %s2561_s12  ;;  %v929_v22 = vrot.slane %v2402_v5, 7  ;;  %v928_v2 = vrot.slane %v2401_v35, 7  ;;  %v1055_v47 = vmax.f32 %v799_v10, %v927_v50  ;;  %v5275_v51 = vrot.slane %v3873_v38, 7 }
 0x155   : > { %v737_v42 = vmax.f32 %v5265_v9, %v5262_v49  ;;  %v5267_v39 = vld [vmem:[#allocation141_spill] sm:$0xff]  ;;  %v4002_v34 = vmax.f32 %v1433_v3, %v5272_v0  ;;  %v4006_v14 = vmax.f32 %v1432_v26, %v5273_v20  ;;  %v4016_v3 = vld [vmem:[%s2587_s11 + $0x720] sm:$0x1f] }
 0x156   : > { %v5269_v40 = vmax.f32 %v5267_v39, %v5268_v27  ;;  %v1114_v27 = vmax.f32 %v1050_v18, %v3989_v61  ;;  %v4009_v39 = vld [vmem:[%s2587_s11 + $0x728] sm:$0x1f]  ;;  %v2403_v18 = vld [vmem:[%s2587_s11 + $0x550] sm:$0x1f]  ;;  %v1116_v26 = vmax.f32 %v1052_v37, %v4016_v3  ;;  %v5278_v0 = vld [vmem:[#allocation142_spill] sm:$0xff] }
 0x157   : > { %5274 = vst [vmem:[#allocation53_spill] sm:$0xff] %v4006_v14  ;;  %v1117_v21 = vmax.f32 %v1053_v52, %v4009_v39  ;;  %v801_v56 = vmax.f32 %v737_v42, %v2402_v5  ;;  %1714 = vrot.lane.b32.xlu1 %v5275_v51, %s2561_s12  ;;  %v5276_v52 = vrot.slane %v3880_v58, 7  ;;  %v5279_v20 = vld [vmem:[#allocation29_spill] sm:$0xff]  ;;  %v5281_v42 = vld [vmem:[#allocation107_spill] sm:$0xff] }
 0x158   : > { %v736_v44 = vmax.f32 %v5269_v40, %v5266_v32  ;;  %v1279_v32 = vpop.permute.xlu1 %1278  ;;  %v1277_v40 = vpop.permute.xlu0 %1276  ;;  %v5280_v37 = vmax.f32 %v5278_v0, %v5279_v20  ;;  %v5289_v51 = vld [vmem:[#allocation31_spill] sm:$0xff]  ;;  %v4047_v0 = vld [vmem:[%s2587_s11 + $0x738] sm:$0x1f] }
 0x159   : > { %v1435_v62 = vmax.f32 %v1115_v54, %v1279_v32  ;;  %v1434_v49 = vmax.f32 %v1114_v27, %v1277_v40  ;;  %1712 = vrot.lane.b32.xlu0 %v5276_v52, %s2561_s12  ;;  %v1054_v54 = vmax.f32 %v798_v31, %v926_v24  ;;  %v5277_v27 = vld [vmem:[#allocation106_spill] sm:$0xff]  ;;  %v931_v24 = vrot.slane %v2404_v28, 7  ;;  %v5287_v32 = vld [vmem:[#allocation108_spill] sm:$0xff]  ;;  %v5288_v40 = vld [vmem:[#allocation145_spill] sm:$0xff] }
 0x15a   : > { %v800_v9 = vmax.f32 %v736_v44, %v2401_v35  ;;  %v739_v50 = vmax.f32 %v5280_v37, %v5277_v27  ;;  %v5282_v44 = vld [vmem:[#allocation30_spill] sm:$0xff]  ;;  %v5284_v35 = vrot.slane %v3975_v4, 7  ;;  %v930_v31 = vrot.slane %v2403_v18, 7 }
 0x15b   : > { %v5283_v10 = vmax.f32 %v3381_v53, %v5282_v44  ;;  %v4040_v58 = vmax.f32 %v1434_v49, %v4868_v12  ;;  %v5290_v52 = vmax.f32 %v5288_v40, %v5289_v51  ;;  %v5291_v44 = vld [vmem:[#allocation109_spill] sm:$0xff]  ;;  %v4058_v40 = vld [vmem:[%s2587_s11 + $0x730] sm:$0x1f]  ;;  %v5295_v51 = vrot.slane %v3911_v13, 7 }
 0x15c   : > { %v4036_v38 = vmax.f32 %v1435_v62, %v5284_v35  ;;  %v1283_v20 = vpop.permute.xlu1 %1282  ;;  %v1281_v37 = vpop.permute.xlu0 %1280  ;;  %v2405_v62 = vld [vmem:[%s2587_s11 + $0x560] sm:$0x1f]  ;;  %v5293_v35 = vld [vmem:[#allocation32_spill] sm:$0xff] }
 0x15d   : > { %v738_v5 = vmax.f32 %v5283_v10, %v5281_v42  ;;  %5286 = vst [vmem:[#allocation51_spill] sm:$0xff] %v4040_v58  ;;  %v741_v27 = vmax.f32 %v5290_v52, %v5287_v32  ;;  %v2406_v42 = vld [vmem:[%s2587_s11 + $0x568] sm:$0x1f]  ;;  %v5292_v10 = vld [vmem:[#allocation146_spill] sm:$0xff]  ;;  %v1437_v29 = vmax.f32 %v1117_v21, %v1283_v20  ;;  %v1436_v33 = vmax.f32 %v1116_v26, %v1281_v37 }
 0x15e   : > { %5285 = vst [vmem:[#allocation54_spill] sm:$0xff] %v4036_v38  ;;  %v5294_v49 = vmax.f32 %v5292_v10, %v5293_v35  ;;  %v1119_v58 = vmax.f32 %v1055_v47, %v4047_v0  ;;  %1718 = vrot.lane.b32.xlu1 %v5295_v51, %s2561_s12  ;;  %v5296_v52 = vrot.slane %v3922_v46, 7  ;;  %v1057_v21 = vmax.f32 %v801_v56, %v929_v22  ;;  %v5305_v32 = vld [vmem:[#allocation111_spill] sm:$0xff]  ;;  %v5321_v38 = vld [vmem:[#allocation36_spill] sm:$0xff] }
 0x15f   : > { %v1056_v26 = vmax.f32 %v800_v9, %v928_v2  ;;  %v803_v20 = vmax.f32 %v739_v50, %v2404_v28  ;;  %v802_v47 = vmax.f32 %v738_v5, %v2403_v18  ;;  %v5297_v37 = vrot.slane %v4009_v39, 7  ;;  %v2408_v18 = vld [vmem:[%s2587_s11 + $0x578] sm:$0x1f]  ;;  %v5301_v9 = vld [vmem:[#allocation110_spill] sm:$0xff] }
 0x160   : > { %v740_v12 = vmax.f32 %v5294_v49, %v5291_v44  ;;  %1716 = vrot.lane.b32.xlu0 %v5296_v52, %s2561_s12  ;;  %v1118_v44 = vmax.f32 %v1054_v54, %v4058_v40  ;;  %v5299_v35 = vrot.slane %v4016_v3, 7  ;;  %v933_v49 = vrot.slane %v2406_v42, 7  ;;  %v4077_v52 = vld [vmem:[%s2587_s11 + $0x748] sm:$0x1f]  ;;  %v1287_v56 = vpop.permute.xlu1 %1286  ;;  %v1285_v2 = vpop.permute.xlu0 %1284 }
 0x161   : > { %v4070_v10 = vmax.f32 %v1437_v29, %v5297_v37  ;;  %v805_v46 = vmax.f32 %v741_v27, %v2406_v42  ;;  %v932_v51 = vrot.slane %v2405_v62, 7  ;;  %v5302_v54 = vld [vmem:[#allocation147_spill] sm:$0xff]  ;;  %v5303_v29 = vld [vmem:[#allocation33_spill] sm:$0xff]  ;;  %v2407_v37 = vld [vmem:[%s2587_s11 + $0x570] sm:$0x1f] }
 0x162   : > { %v4074_v13 = vmax.f32 %v1436_v33, %v5299_v35  ;;  %v804_v28 = vmax.f32 %v740_v12, %v2405_v62  ;;  %v5304_v50 = vmax.f32 %v5302_v54, %v5303_v29  ;;  %v1439_v33 = vmax.f32 %v1119_v58, %v1287_v56  ;;  %v5306_v27 = vld [vmem:[#allocation148_spill] sm:$0xff]  ;;  %v5307_v42 = vld [vmem:[#allocation34_spill] sm:$0xff]  ;;  %v4111_v29 = vld [vmem:[%s2587_s11 + $0x758] sm:$0x1f] }
 0x163   : > { %5298 = vst [vmem:[#allocation52_spill] sm:$0xff] %v4070_v10  ;;  %v1438_v35 = vmax.f32 %v1118_v44, %v1285_v2  ;;  %v5308_v53 = vmax.f32 %v5306_v27, %v5307_v42  ;;  %v4091_v10 = vld [vmem:[%s2587_s11 + $0x740] sm:$0x1f]  ;;  %v5309_v12 = vrot.slane %v3941_v16, 7  ;;  %v5310_v62 = vrot.slane %v3955_v41, 7 }
 0x164   : > { %5300 = vst [vmem:[#allocation7_spill] sm:$0xff] %v4074_v13  ;;  %v743_v5 = vmax.f32 %v5304_v50, %v5301_v9  ;;  %v1121_v58 = vmax.f32 %v1057_v21, %v4077_v52  ;;  %v1120_v44 = vmax.f32 %v1056_v26, %v4091_v10  ;;  %v1059_v56 = vmax.f32 %v803_v20, %v931_v24  ;;  %v1291_v21 = vpop.permute.xlu1 %1290  ;;  %v1289_v27 = vpop.permute.xlu0 %1288  ;;  %v2409_v20 = vld [vmem:[%s2587_s11 + $0x580] sm:$0x1f] }
 0x165   : > { %v742_v13 = vmax.f32 %v5308_v53, %v5305_v32  ;;  %1722 = vrot.lane.b32.xlu1 %v5309_v12, %s2561_s12  ;;  %1720 = vrot.lane.b32.xlu0 %v5310_v62, %s2561_s12  ;;  %v1058_v53 = vmax.f32 %v802_v47, %v930_v31  ;;  %v5311_v32 = vrot.slane %v4047_v0, 7  ;;  %v5313_v9 = vrot.slane %v4058_v40, 7  ;;  %v2410_v31 = vld [vmem:[%s2587_s11 + $0x588] sm:$0x1f] }
 0x166   : > { %v935_v54 = vrot.slane %v2408_v18, 7  ;;  %v934_v41 = vrot.slane %v2407_v37, 7  ;;  %v1061_v26 = vmax.f32 %v805_v46, %v933_v49  ;;  %v807_v24 = vmax.f32 %v743_v5, %v2408_v18  ;;  %v5316_v62 = vld [vmem:[#allocation39_spill] sm:$0xff]  ;;  %v4125_v49 = vld [vmem:[%s2587_s11 + $0x750] sm:$0x1f] }
 0x167   : > { %v4104_v2 = vmax.f32 %v1439_v33, %v5311_v32  ;;  %v4108_v16 = vmax.f32 %v1438_v35, %v5313_v9  ;;  %v1441_v47 = vmax.f32 %v1121_v58, %v1291_v21  ;;  %v1440_v33 = vmax.f32 %v1120_v44, %v1289_v27  ;;  %v5315_v35 = vld [vmem:[#allocation112_spill] sm:$0xff]  ;;  %v5317_v32 = vld [vmem:[#allocation35_spill] sm:$0xff]  ;;  %v2412_v21 = vld [vmem:[%s2587_s11 + $0x598] sm:$0x1f] }
 0x168   : > { %v1060_v42 = vmax.f32 %v804_v28, %v932_v51  ;;  %v806_v12 = vmax.f32 %v742_v13, %v2407_v37  ;;  %v5318_v9 = vmax.f32 %v5316_v62, %v5317_v32  ;;  %v4869_v46 = vrot.slane %v4125_v49, 7 }
 0x169   : > { %5312 = vst [vmem:[#allocation55_spill] sm:$0xff] %v4104_v2  ;;  %5314 = vst [vmem:[#allocation121_spill] sm:$0xff] %v4108_v16  ;;  %v5319_v16 = vld [vmem:[#allocation113_spill] sm:$0xff]  ;;  %v5320_v2 = vld [vmem:[#allocation40_spill] sm:$0xff]  ;;  %v5323_v51 = vrot.slane %v3975_v4, 7  ;;  %v5324_v13 = vrot.slane %v3989_v61, 7  ;;  %v1123_v28 = vmax.f32 %v1059_v56, %v4111_v29 }
 0x16a   : > { %v745_v22 = vmax.f32 %v5318_v9, %v5315_v35  ;;  %v5322_v50 = vmax.f32 %v5320_v2, %v5321_v38  ;;  %v1122_v38 = vmax.f32 %v1058_v53, %v4125_v49  ;;  %v5325_v18 = vrot.slane %v4077_v52, 7  ;;  %v4145_v2 = vld [vmem:[%s2587_s11 + $0x768] sm:$0x1f]  ;;  %v2411_v53 = vld [vmem:[%s2587_s11 + $0x590] sm:$0x1f] }
 0x16b   : > { %1726 = vrot.lane.b32.xlu1 %v5323_v51, %s2561_s12  ;;  %1724 = vrot.lane.b32.xlu0 %v5324_v13, %s2561_s12  ;;  %v5326_v37 = vrot.slane %v4091_v10, 7  ;;  %v937_v44 = vrot.slane %v2410_v31, 7  ;;  %v936_v4 = vrot.slane %v2409_v20, 7  ;;  %v1509_v61 = vrot.slane %v4145_v2, 7 }
 0x16c   : > { %v744_v14 = vmax.f32 %v5322_v50, %v5319_v16  ;;  %v4138_v5 = vmax.f32 %v1441_v47, %v5325_v18  ;;  %v1295_v16 = vpop.permute.xlu1 %1294  ;;  %v1293_v50 = vpop.permute.xlu0 %1292  ;;  %v1125_v56 = vmax.f32 %v1061_v26, %v4145_v2  ;;  %v4152_v47 = vld [vmem:[%s2587_s11 + $0x760] sm:$0x1f]  ;;  %v809_v32 = vmax.f32 %v745_v22, %v2410_v31  ;;  %v5330_v18 = vld [vmem:[#allocation3_spill] sm:$0xff]  ;;  %v5334_v22 = vld [vmem:[#allocation41_spill] sm:$0xff] }
 0x16d   : > { %v4142_v58 = vmax.f32 %v1440_v33, %v5326_v37  ;;  %v1443_v27 = vmax.f32 %v1123_v28, %v1295_v16  ;;  %v1442_v35 = vmax.f32 %v1122_v38, %v1293_v50  ;;  %v1124_v62 = vmax.f32 %v1060_v42, %v4152_v47  ;;  %v5329_v38 = vld [vmem:[#allocation114_spill] sm:$0xff]  ;;  %v5331_v37 = vld [vmem:[#allocation37_spill] sm:$0xff] }
 0x16e   : > { %v1063_v33 = vmax.f32 %v807_v24, %v935_v54  ;;  %v808_v9 = vmax.f32 %v744_v14, %v2409_v20  ;;  %v1508_v51 = vrot.slane %v4152_v47, 7  ;;  %v5327_v13 = vrot.slane %v4009_v39, 7  ;;  %v5333_v54 = vld [vmem:[#allocation115_spill] sm:$0xff]  ;;  %v5335_v14 = vld [vmem:[#allocation38_spill] sm:$0xff] }
 0x16f   : > { %v5328_v26 = vrot.slane %v4016_v3, 7  ;;  %v1062_v28 = vmax.f32 %v806_v12, %v934_v41  ;;  %v5332_v42 = vmax.f32 %v5330_v18, %v5331_v37  ;;  %v5336_v24 = vmax.f32 %v5334_v22, %v5335_v14 }
 0x170   : > { %1730 = vrot.lane.b32.xlu1 %v5327_v13, %s2561_s12  ;;  %v5337_v20 = vrot.slane %v4111_v29, 7  ;;  %v4176_v3 = vmax.f32 %v1442_v35, %v4869_v46  ;;  %v939_v50 = vrot.slane %v2412_v21, 7  ;;  %v938_v41 = vrot.slane %v2411_v53, 7  ;;  %v1299_v12 = vpop.permute.xlu1 %1298  ;;  %v1297_v47 = vpop.permute.xlu0 %1296  ;;  %v2523_v13 = vld [vmem:[%s2587_s11 + $0x778] sm:$0x1f] }
 0x171   : > { %1728 = vrot.lane.b32.xlu0 %v5328_v26, %s2561_s12  ;;  %v747_v16 = vmax.f32 %v5332_v42, %v5329_v38  ;;  %v746_v31 = vmax.f32 %v5336_v24, %v5333_v54  ;;  %v1511_v26 = vrot.slane %v2523_v13, 7  ;;  %v1445_v38 = vmax.f32 %v1125_v56, %v1299_v12  ;;  %v2524_v42 = vld [vmem:[%s2587_s11 + $0x770] sm:$0x1f] }
 0x172   : > { %v4172_v39 = vmax.f32 %v1443_v27, %v5337_v20  ;;  %v1444_v18 = vmax.f32 %v1124_v62, %v1297_v47  ;;  %v1127_v37 = vmax.f32 %v1063_v33, %v2523_v13  ;;  %v1510_v54 = vrot.slane %v2524_v42, 7  ;;  %v2525_v13 = vld [vmem:[%s2587_s11 + $0x788] sm:$0x1f] }
 0x173   : > { %v5338_v27 = vrot.slane %v4047_v0, 7  ;;  %v5339_v35 = vrot.slane %v4058_v40, 7  ;;  %v1126_v22 = vmax.f32 %v1062_v28, %v2524_v42  ;;  %v1065_v14 = vmax.f32 %v809_v32, %v937_v44  ;;  %v2526_v40 = vld [vmem:[%s2587_s11 + $0x780] sm:$0x1f] }
 0x174   : > { %v1064_v24 = vmax.f32 %v808_v9, %v936_v4  ;;  %v811_v20 = vmax.f32 %v747_v16, %v2412_v21  ;;  %v810_v46 = vmax.f32 %v746_v31, %v2411_v53  ;;  %v4188_v56 = vmax.f32 %v1445_v38, %v1509_v61  ;;  %v1303_v33 = vpop.permute.xlu1 %1302  ;;  %v1301_v12 = vpop.permute.xlu0 %1300 }
 0x175   : > { %1734 = vrot.lane.b32.xlu1 %v5338_v27, %s2561_s12  ;;  %1732 = vrot.lane.b32.xlu0 %v5339_v35, %s2561_s12  ;;  %v4190_v62 = vmax.f32 %v1444_v18, %v1508_v51  ;;  %v1447_v0 = vmax.f32 %v1127_v37, %v1303_v33  ;;  %v1446_v47 = vmax.f32 %v1126_v22, %v1301_v12  ;;  %v1513_v27 = vrot.slane %v2525_v13, 7  ;;  %v2527_v35 = vld [vmem:[%s2587_s11 + $0x798] sm:$0x1f] }
 0x176   : > { %v1512_v28 = vrot.slane %v2526_v40, 7  ;;  %v5340_v44 = vrot.slane %v4077_v52, 7  ;;  %v5341_v4 = vrot.slane %v4091_v10, 7  ;;  %v1129_v21 = vmax.f32 %v1065_v14, %v2525_v13  ;;  %v2528_v52 = vld [vmem:[%s2587_s11 + $0x790] sm:$0x1f] }
 0x177   : > { %v1128_v53 = vmax.f32 %v1064_v24, %v2526_v40  ;;  %v1067_v32 = vmax.f32 %v811_v20, %v939_v50  ;;  %v1066_v9 = vmax.f32 %v810_v46, %v938_v41  ;;  %v4200_v16 = vmax.f32 %v1447_v0, %v1511_v26 }
 0x178   : > { %v4202_v31 = vmax.f32 %v1446_v47, %v1510_v54  ;;  %v1307_v38 = vpop.permute.xlu1 %1306  ;;  %v1305_v18 = vpop.permute.xlu0 %1304  ;;  %v1515_v22 = vrot.slane %v2527_v35, 7  ;;  %v1514_v33 = vrot.slane %v2528_v52, 7  ;;  %v5342_v10 = vrot.slane %v4111_v29, 7 }
 0x179   : > { %1738 = vrot.lane.b32.xlu1 %v5340_v44, %s2561_s12  ;;  %1736 = vrot.lane.b32.xlu0 %v5341_v4, %s2561_s12  ;;  %v1449_v37 = vmax.f32 %v1129_v21, %v1307_v38  ;;  %v1448_v42 = vmax.f32 %v1128_v53, %v1305_v18  ;;  %v5343_v50 = vrot.slane %v4125_v49, 7  ;;  %v1131_v46 = vmax.f32 %v1067_v32, %v2527_v35  ;;  %v4247_v4 = vld [vmem:[%s2587_s11 + $0x7a0] sm:$0x1f]  ;;  %v4261_v53 = vld [vmem:[%s2587_s11 + $0x7b8] sm:$0x1f] }
 0x17a   : > { %v1130_v41 = vmax.f32 %v1066_v9, %v2528_v52  ;;  %v4873_v32 = vrot.slane %v4261_v53, 7  ;;  %v4265_v9 = vld [vmem:[%s2587_s11 + $0x7b0] sm:$0x1f] }
 0x17b   : > { %v4212_v14 = vmax.f32 %v1449_v37, %v1513_v27  ;;  %v4214_v24 = vmax.f32 %v1448_v42, %v1512_v28  ;;  %v4872_v38 = vrot.slane %v4265_v9, 7  ;;  %v4279_v42 = vld [vmem:[%s2587_s11 + $0x7c8] sm:$0x1f] }
 0x17c   : > { %v1311_v20 = vpop.permute.xlu1 %1310  ;;  %v1309_v12 = vpop.permute.xlu0 %1308  ;;  %v4871_v35 = vrot.slane %v4279_v42, 7 }
 0x17d   : > { %1742 = vrot.lane.b32.xlu1 %v5342_v10, %s2561_s12  ;;  %1740 = vrot.lane.b32.xlu0 %v5343_v50, %s2561_s12  ;;  %v1451_v0 = vmax.f32 %v1131_v46, %v1311_v20  ;;  %v1450_v47 = vmax.f32 %v1130_v41, %v1309_v12  ;;  %v4297_v50 = vld [vmem:[%s2587_s11 + $0x7d8] sm:$0x1f]  ;;  %v4301_v41 = vld [vmem:[%s2587_s11 + $0x7d0] sm:$0x1f] }
 0x17e   : > { %5351 = vst [vmem:[#allocation122_spill] sm:$0xff] %v4297_v50  ;;  %v4875_v46 = vrot.slane %v4297_v50, 7  ;;  %5352 = vst [vmem:[#allocation9_spill] sm:$0xff] %v4301_v41  ;;  %v4876_v20 = vrot.slane %v4301_v41, 7  ;;  %v5359_v50 = vld [vmem:[#allocation44_spill] sm:$0xff] }
 0x17f   : > { %v4220_v29 = vmax.f32 %v1451_v0, %v1515_v22  ;;  %v4222_v49 = vmax.f32 %v1450_v47, %v1514_v33  ;;  %v4311_v47 = vld [vmem:[%s2587_s11 + $0x7e8] sm:$0x1f] }
 0x180   : > { %v4224_v13 = vpop.permute.xlu1 %1314  ;;  %v4226_v40 = vpop.permute.xlu0 %1312  ;;  %5353 = vst [vmem:[#allocation62_spill] sm:$0xff] %v4311_v47 }
 0x181   : > { %1746 = vrot.lane.b32.xlu1 %v1509_v61, %s2561_s12  ;;  %1744 = vrot.lane.b32.xlu0 %v1508_v51, %s2561_s12 }
 0x184   : > { %v4230_v44 = vpop.permute.xlu1 %1318  ;;  %v4232_v2 = vpop.permute.xlu0 %1316 }
 0x185   : > { %1750 = vrot.lane.b32.xlu1 %v1511_v26, %s2561_s12  ;;  %1748 = vrot.lane.b32.xlu0 %v1510_v54, %s2561_s12  ;;  %v4243_v26 = vld [vmem:[%s2587_s11 + $0x7a8] sm:$0x1f] }
 0x186   : > { %v4877_v54 = vrot.slane %v4243_v26, 7 }
 0x188   : > { %v4236_v61 = vpop.permute.xlu1 %1322  ;;  %v4238_v51 = vpop.permute.xlu0 %1320 }
 0x189   : > { %1754 = vrot.lane.b32.xlu1 %v1513_v27, %s2561_s12  ;;  %1752 = vrot.lane.b32.xlu0 %v1512_v28, %s2561_s12  ;;  %5344 = vst [vmem:[#allocation8_spill] sm:$0xff] %v4238_v51  ;;  %v4874_v27 = vrot.slane %v4247_v4, 7 }
 0x18c   : > { %v4250_v21 = vpop.permute.xlu1 %1326  ;;  %v4252_v28 = vpop.permute.xlu0 %1324 }
 0x18d   : > { %1758 = vrot.lane.b32.xlu1 %v1515_v22, %s2561_s12  ;;  %1756 = vrot.lane.b32.xlu0 %v1514_v33, %s2561_s12  ;;  %5345 = vst [vmem:[#allocation57_spill] sm:$0xff] %v4250_v21  ;;  %5346 = vst [vmem:[#allocation56_spill] sm:$0xff] %v4252_v28  ;;  %v4283_v22 = vld [vmem:[%s2587_s11 + $0x7c0] sm:$0x1f]  ;;  %v5358_v21 = vld [vmem:[#allocation43_spill] sm:$0xff] }
 0x18e   : > { %v4870_v52 = vrot.slane %v4283_v22, 7 }
 0x190   : > { %v4268_v18 = vpop.permute.xlu1 %1330  ;;  %v4270_v37 = vpop.permute.xlu0 %1328 }
 0x191   : > { %1762 = vrot.lane.b32.xlu1 %v4877_v54, %s2561_s12  ;;  %1760 = vrot.lane.b32.xlu0 %v4874_v27, %s2561_s12  ;;  %5347 = vst [vmem:[#allocation58_spill] sm:$0xff] %v4268_v18  ;;  %5348 = vst [vmem:[#allocation61_spill] sm:$0xff] %v4270_v37  ;;  %v4329_v54 = vld [vmem:[%s2587_s11 + $0x7f0] sm:$0x1f]  ;;  %v5357_v18 = vld [vmem:[#allocation5_spill] sm:$0xff] }
 0x194   : > { %v4286_v33 = vpop.permute.xlu1 %1334  ;;  %v4288_v10 = vpop.permute.xlu0 %1332 }
 0x195   : > { %1766 = vrot.lane.b32.xlu1 %v4873_v32, %s2561_s12  ;;  %1764 = vrot.lane.b32.xlu0 %v4872_v38, %s2561_s12  ;;  %5349 = vst [vmem:[#allocation59_spill] sm:$0xff] %v4286_v33  ;;  %5350 = vst [vmem:[#allocation60_spill] sm:$0xff] %v4288_v10  ;;  %v1526_v10 = vrot.slane %v4329_v54, 7 }
 0x198   : > { %v1659_v12 = vpop.permute.xlu1 %1658  ;;  %v1657_v0 = vpop.permute.xlu0 %1656 }
 0x199   : > { %1770 = vrot.lane.b32.xlu1 %v4871_v35, %s2561_s12  ;;  %1768 = vrot.lane.b32.xlu0 %v4870_v52, %s2561_s12  ;;  %v4878_v52 = vrot.slane %v4311_v47, 7  ;;  %v4315_v35 = vld [vmem:[%s2587_s11 + $0x7e0] sm:$0x1f] }
 0x19a   : > { %5354 = vst [vmem:[#allocation65_spill] sm:$0xff] %v4315_v35  ;;  %v4879_v38 = vrot.slane %v4315_v35, 7  ;;  %v1848_v35 = vmax.f32 %v5357_v18, %v1657_v0 }
 0x19c   : > { %v1663_v32 = vpop.permute.xlu1 %1662  ;;  %v1661_v27 = vpop.permute.xlu0 %1660 }
 0x19d   : > { %1774 = vrot.lane.b32.xlu1 %v4875_v46, %s2561_s12  ;;  %1772 = vrot.lane.b32.xlu0 %v4876_v20, %s2561_s12  ;;  %v4325_v46 = vld [vmem:[%s2587_s11 + $0x7f8] sm:$0x1f]  ;;  %v1851_v41 = vmax.f32 %v5358_v21, %v1663_v32 }
 0x19e   : > { %5355 = vst [vmem:[#allocation63_spill] sm:$0xff] %v4325_v46  ;;  %v4890_v20 = vrot.slane %v4325_v46, 7  ;;  %v1850_v46 = vmax.f32 %v5359_v50, %v1661_v27 }
 0x1a0   : > { %v1667_v33 = vpop.permute.xlu1 %1666  ;;  %v1665_v37 = vpop.permute.xlu0 %1664 }
 0x1a1   : > { %1778 = vrot.lane.b32.xlu1 %v4878_v52, %s2561_s12  ;;  %1776 = vrot.lane.b32.xlu0 %v4879_v38, %s2561_s12  ;;  %v5356_v52 = vld [vmem:[#allocation117_spill] sm:$0xff]  ;;  %v1852_v18 = vmax.f32 %v3587_v6, %v1665_v37 }
 0x1a2   : > { %v1849_v38 = vmax.f32 %v5356_v52, %v1659_v12  ;;  %v1853_v52 = vmax.f32 %v3583_v11, %v1667_v33 }
 0x1a4   : > { %v1671_v47 = vpop.permute.xlu1 %1670  ;;  %v1669_v28 = vpop.permute.xlu0 %1668 }
 0x1a5   : > { %1782 = vrot.lane.b32.xlu1 %v4890_v20, %s2561_s12  ;;  %1780 = vrot.lane.b32.xlu0 %v1526_v10, %s2561_s12  ;;  %v1855_v21 = vmax.f32 %v3611_v57, %v1671_v47  ;;  %v1854_v27 = vmax.f32 %v3615_v15, %v1669_v28 }
 0x1a8   : > { %v1675_v20 = vpop.permute.xlu1 %1674  ;;  %v1673_v51 = vpop.permute.xlu0 %1672 }
 0x1a9   : > { %1978 = vrot.lane.b32.xlu1 %v1849_v38, %s2562_s13  ;;  %1976 = vrot.lane.b32.xlu0 %v1848_v35, %s2562_s13  ;;  %v1857_v11 = vmax.f32 %v3639_v8, %v1675_v20  ;;  %v1856_v6 = vmax.f32 %v3643_v60, %v1673_v51 }
 0x1ac   : > { %v1679_v12 = vpop.permute.xlu1 %1678  ;;  %v1677_v0 = vpop.permute.xlu0 %1676 }
 0x1ad   : > { %1982 = vrot.lane.b32.xlu1 %v1851_v41, %s2562_s13  ;;  %1980 = vrot.lane.b32.xlu0 %v1850_v46, %s2562_s13  ;;  %v1859_v57 = vmax.f32 %v3667_v59, %v1679_v12  ;;  %v1858_v15 = vmax.f32 %v3671_v63, %v1677_v0 }
 0x1b0   : > { %v1683_v32 = vpop.permute.xlu1 %1682  ;;  %v1681_v38 = vpop.permute.xlu0 %1680 }
 0x1b1   : > { %1986 = vrot.lane.b32.xlu1 %v1853_v52, %s2562_s13  ;;  %1984 = vrot.lane.b32.xlu0 %v1852_v18, %s2562_s13  ;;  %v1861_v8 = vmax.f32 %v3695_v7, %v1683_v32  ;;  %v1860_v60 = vmax.f32 %v3699_v45, %v1681_v38  ;;  %v5361_v38 = vld [vmem:[#allocation46_spill] sm:$0xff] }
 0x1b4   : > { %v1687_v37 = vpop.permute.xlu1 %1686  ;;  %v1685_v35 = vpop.permute.xlu0 %1684 }
 0x1b5   : > { %1990 = vrot.lane.b32.xlu1 %v1855_v21, %s2562_s13  ;;  %1988 = vrot.lane.b32.xlu0 %v1854_v27, %s2562_s13  ;;  %v1863_v59 = vmax.f32 %v3723_v23, %v1687_v37  ;;  %v1862_v63 = vmax.f32 %v3727_v36, %v1685_v35  ;;  %v5360_v21 = vld [vmem:[#allocation45_spill] sm:$0xff]  ;;  %v5363_v35 = vld [vmem:[#allocation47_spill] sm:$0xff] }
 0x1b6   : > { %v5362_v37 = vld [vmem:[#allocation49_spill] sm:$0xff] }
 0x1b8   : > { %v1691_v28 = vpop.permute.xlu1 %1690  ;;  %v1689_v33 = vpop.permute.xlu0 %1688 }
 0x1b9   : > { %1994 = vrot.lane.b32.xlu1 %v1857_v11, %s2562_s13  ;;  %1992 = vrot.lane.b32.xlu0 %v1856_v6, %s2562_s13  ;;  %v1865_v7 = vmax.f32 %v3751_v17, %v1691_v28  ;;  %v1864_v45 = vmax.f32 %v3755_v25, %v1689_v33  ;;  %v5364_v33 = vld [vmem:[#allocation48_spill] sm:$0xff] }
 0x1bc   : > { %v1695_v51 = vpop.permute.xlu1 %1694  ;;  %v1693_v50 = vpop.permute.xlu0 %1692 }
 0x1bd   : > { %1998 = vrot.lane.b32.xlu1 %v1859_v57, %s2562_s13  ;;  %1996 = vrot.lane.b32.xlu0 %v1858_v15, %s2562_s13  ;;  %v1867_v23 = vmax.f32 %v3779_v43, %v1695_v51  ;;  %v1866_v36 = vmax.f32 %v3783_v48, %v1693_v50 }
 0x1c0   : > { %v1699_v46 = vpop.permute.xlu1 %1698  ;;  %v1697_v41 = vpop.permute.xlu0 %1696 }
 0x1c1   : > { %2002 = vrot.lane.b32.xlu1 %v1861_v8, %s2562_s13  ;;  %2000 = vrot.lane.b32.xlu0 %v1860_v60, %s2562_s13  ;;  %v1869_v17 = vmax.f32 %v3807_v30, %v1699_v46  ;;  %v1868_v25 = vmax.f32 %v3811_v55, %v1697_v41  ;;  %v5365_v8 = vld [vmem:[#allocation118_spill] sm:$0xff] }
 0x1c2   : > { %v5367_v46 = vld [vmem:[#allocation50_spill] sm:$0xff] }
 0x1c4   : > { %v1703_v20 = vpop.permute.xlu1 %1702  ;;  %v1701_v47 = vpop.permute.xlu0 %1700 }
 0x1c5   : > { %2006 = vrot.lane.b32.xlu1 %v1863_v59, %s2562_s13  ;;  %2004 = vrot.lane.b32.xlu0 %v1862_v63, %s2562_s13  ;;  %v1871_v43 = vmax.f32 %v3835_v19, %v1703_v20  ;;  %v1870_v48 = vmax.f32 %v5360_v21, %v1701_v47  ;;  %v5366_v59 = vld [vmem:[#allocation6_spill] sm:$0xff]  ;;  %v5368_v47 = vld [vmem:[#allocation53_spill] sm:$0xff] }
 0x1c8   : > { %v1707_v52 = vpop.permute.xlu1 %1706  ;;  %v1705_v18 = vpop.permute.xlu0 %1704 }
 0x1c9   : > { %2010 = vrot.lane.b32.xlu1 %v1865_v7, %s2562_s13  ;;  %2008 = vrot.lane.b32.xlu0 %v1864_v45, %s2562_s13  ;;  %v1873_v30 = vmax.f32 %v3866_v1, %v1707_v52  ;;  %v1872_v55 = vmax.f32 %v5361_v38, %v1705_v18  ;;  %v5369_v18 = vld [vmem:[#allocation54_spill] sm:$0xff]  ;;  %v170_v38 = vld [vmem:[%s2587_s11 + $0x1a8] sm:$0x1f] }
 0x1cc   : > { %v1711_v12 = vpop.permute.xlu1 %1710  ;;  %v1709_v0 = vpop.permute.xlu0 %1708 }
 0x1cd   : > { %2014 = vrot.lane.b32.xlu1 %v1867_v23, %s2562_s13  ;;  %2012 = vrot.lane.b32.xlu0 %v1866_v36, %s2562_s13  ;;  %v1875_v19 = vmax.f32 %v5362_v37, %v1711_v12  ;;  %v1874_v57 = vmax.f32 %v5363_v35, %v1709_v0  ;;  %v5374_v37 = vld [vmem:[#allocation121_spill] sm:$0xff] }
 0x1d0   : > { %v1715_v27 = vpop.permute.xlu1 %1714  ;;  %v1713_v32 = vpop.permute.xlu0 %1712 }
 0x1d1   : > { %2018 = vrot.lane.b32.xlu1 %v1869_v17, %s2562_s13  ;;  %2016 = vrot.lane.b32.xlu0 %v1868_v25, %s2562_s13  ;;  %v1877_v1 = vmax.f32 %v5364_v33, %v1715_v27  ;;  %v1876_v60 = vmax.f32 %v5365_v8, %v1713_v32  ;;  %v5370_v25 = vld [vmem:[#allocation51_spill] sm:$0xff]  ;;  %v2542_v33 = vld [vmem:[%s2587_s11 + $0x3a0] sm:$0x1f] }
 0x1d4   : > { %v1719_v11 = vpop.permute.xlu1 %1718  ;;  %v1717_v6 = vpop.permute.xlu0 %1716 }
 0x1d5   : > { %2022 = vrot.lane.b32.xlu1 %v1871_v43, %s2562_s13  ;;  %2020 = vrot.lane.b32.xlu0 %v1870_v48, %s2562_s13  ;;  %v1879_v63 = vmax.f32 %v5366_v59, %v1719_v11  ;;  %v1878_v41 = vmax.f32 %v5367_v46, %v1717_v6  ;;  %v5372_v48 = vld [vmem:[#allocation7_spill] sm:$0xff]  ;;  %v172_v59 = vld [vmem:[%s2587_s11 + $0x1b8] sm:$0x1f] }
 0x1d6   : > { %v5373_v11 = vld [vmem:[#allocation55_spill] sm:$0xff] }
 0x1d7   : > { %v174_v46 = vld [vmem:[%s2587_s11 + $0x1c8] sm:$0x1f] }
 0x1d8   : > { %v1723_v15 = vpop.permute.xlu1 %1722  ;;  %v1721_v28 = vpop.permute.xlu0 %1720 }
 0x1d9   : > { %2026 = vrot.lane.b32.xlu1 %v1873_v30, %s2562_s13  ;;  %2024 = vrot.lane.b32.xlu0 %v1872_v55, %s2562_s13  ;;  %v1881_v20 = vmax.f32 %v4002_v34, %v1723_v15  ;;  %v1880_v23 = vmax.f32 %v5368_v47, %v1721_v28  ;;  %v5371_v34 = vld [vmem:[#allocation52_spill] sm:$0xff]  ;;  %v169_v55 = vld [vmem:[%s2587_s11 + $0x1a0] sm:$0x1f]  ;;  %v2541_v15 = vld [vmem:[%s2587_s11 + $0x3a8] sm:$0x1f] }
 0x1da   : > { %v429_v28 = vmax.f32 %v170_v38, %v2541_v15  ;;  %v175_v38 = vld [vmem:[%s2587_s11 + $0x1d0] sm:$0x1f] }
 0x1dd   : > { %2030 = vrot.lane.b32.xlu1 %v1875_v19, %s2562_s13  ;;  %2028 = vrot.lane.b32.xlu0 %v1874_v57, %s2562_s13  ;;  %v1727_v51 = vpop.permute.xlu1 %1726  ;;  %v1725_v50 = vpop.permute.xlu0 %1724 }
 0x1de   : > { %v1883_v17 = vmax.f32 %v5369_v18, %v1727_v51  ;;  %v1882_v12 = vmax.f32 %v5370_v25, %v1725_v50  ;;  %v2413_v18 = vld [vmem:[%s2587_s11 + $0x5a0] sm:$0x1f] }
 0x1e1   : > { %2034 = vrot.lane.b32.xlu1 %v1877_v1, %s2562_s13  ;;  %2032 = vrot.lane.b32.xlu0 %v1876_v60, %s2562_s13  ;;  %v428_v1 = vmax.f32 %v169_v55, %v2542_v33  ;;  %v2416_v55 = vld [vmem:[%s2587_s11 + $0x5b8] sm:$0x1f] }
 0x1e2   : > { %v1731_v7 = vpop.permute.xlu1 %1730 }
 0x1e3   : > { %v1729_v45 = vpop.permute.xlu0 %1728  ;;  %v1885_v21 = vmax.f32 %v5371_v34, %v1731_v7  ;;  %v5375_v7 = vld [vmem:[#allocation119_spill] sm:$0xff] }
 0x1e4   : > { %v1884_v27 = vmax.f32 %v5372_v48, %v1729_v45  ;;  %v5376_v45 = vld [vmem:[#allocation120_spill] sm:$0xff] }
 0x1e5   : > { %2038 = vrot.lane.b32.xlu1 %v1879_v63, %s2562_s13  ;;  %2036 = vrot.lane.b32.xlu0 %v1878_v41, %s2562_s13  ;;  %v171_v63 = vld [vmem:[%s2587_s11 + $0x1b0] sm:$0x1f]  ;;  %v173_v41 = vld [vmem:[%s2587_s11 + $0x1c0] sm:$0x1f] }
 0x1e7   : > { %v1735_v36 = vpop.permute.xlu1 %1734  ;;  %v1733_v52 = vpop.permute.xlu0 %1732 }
 0x1e8   : > { %v1887_v6 = vmax.f32 %v5373_v11, %v1735_v36  ;;  %v1886_v19 = vmax.f32 %v5374_v37, %v1733_v52  ;;  %v2414_v52 = vld [vmem:[%s2587_s11 + $0x5a8] sm:$0x1f]  ;;  %v5377_v11 = vld [vmem:[#allocation125_spill] sm:$0xff]  ;;  %v2415_v37 = vld [vmem:[%s2587_s11 + $0x5b0] sm:$0x1f] }
 0x1e9   : > { %2042 = vrot.lane.b32.xlu1 %v1881_v20, %s2562_s13  ;;  %2040 = vrot.lane.b32.xlu0 %v1880_v23, %s2562_s13  ;;  %v748_v20 = vmax.f32 %v428_v1, %v5376_v45  ;;  %v2544_v23 = vld [vmem:[%s2587_s11 + $0x3b0] sm:$0x1f] }
 0x1ea   : > { %v430_v36 = vmax.f32 %v171_v63, %v2544_v23  ;;  %v5380_v63 = vld [vmem:[#allocation136_spill] sm:$0xff] }
 0x1eb   : > { %v1739_v0 = vpop.permute.xlu1 %1738  ;;  %v1737_v43 = vpop.permute.xlu0 %1736 }
 0x1ec   : > { %v1889_v8 = vmax.f32 %v4138_v5, %v1739_v0  ;;  %v1888_v60 = vmax.f32 %v4142_v58, %v1737_v43  ;;  %v749_v5 = vmax.f32 %v429_v28, %v5375_v7  ;;  %v2543_v58 = vld [vmem:[%s2587_s11 + $0x3b8] sm:$0x1f]  ;;  %v2545_v43 = vld [vmem:[%s2587_s11 + $0x3c8] sm:$0x1f] }
 0x1ed   : > { %2046 = vrot.lane.b32.xlu1 %v1883_v17, %s2562_s13  ;;  %2044 = vrot.lane.b32.xlu0 %v1882_v12, %s2562_s13  ;;  %v431_v47 = vmax.f32 %v172_v59, %v2543_v58  ;;  %v433_v34 = vmax.f32 %v174_v46, %v2545_v43  ;;  %v2417_v58 = vld [vmem:[%s2587_s11 + $0x5c0] sm:$0x1f] }
 0x1ef   : > { %v1743_v32 = vpop.permute.xlu1 %1742  ;;  %v1741_v30 = vpop.permute.xlu0 %1740 }
 0x1f0   : > { %v1891_v17 = vmax.f32 %v4172_v39, %v1743_v32  ;;  %v1890_v25 = vmax.f32 %v4176_v3, %v1741_v30  ;;  %v941_v39 = vrot.slane %v2414_v52, 7  ;;  %v813_v32 = vmax.f32 %v749_v5, %v2414_v52  ;;  %v2548_v5 = vld [vmem:[%s2587_s11 + $0x3d0] sm:$0x1f] }
 0x1f1   : > { %2050 = vrot.lane.b32.xlu1 %v1885_v21, %s2562_s13  ;;  %2048 = vrot.lane.b32.xlu0 %v1884_v27, %s2562_s13  ;;  %v2546_v21 = vld [vmem:[%s2587_s11 + $0x3c0] sm:$0x1f]  ;;  %v176_v27 = vld [vmem:[%s2587_s11 + $0x1d8] sm:$0x1f]  ;;  %v940_v3 = vrot.slane %v2413_v18, 7  ;;  %v812_v30 = vmax.f32 %v748_v20, %v2413_v18  ;;  %v434_v45 = vmax.f32 %v175_v38, %v2548_v5 }
 0x1f2   : > { %v432_v48 = vmax.f32 %v173_v41, %v2546_v21  ;;  %v2547_v41 = vld [vmem:[%s2587_s11 + $0x3d8] sm:$0x1f]  ;;  %v2418_v20 = vld [vmem:[%s2587_s11 + $0x5c8] sm:$0x1f] }
 0x1f3   : > { %v1747_v35 = vpop.permute.xlu1 %1746  ;;  %v1745_v57 = vpop.permute.xlu0 %1744  ;;  %v435_v7 = vmax.f32 %v176_v27, %v2547_v41  ;;  %v1068_v23 = vmax.f32 %v812_v30, %v940_v3  ;;  %v2549_v38 = vld [vmem:[%s2587_s11 + $0x3e8] sm:$0x1f]  ;;  %v180_v30 = vld [vmem:[%s2587_s11 + $0x1f8] sm:$0x1f] }
 0x1f4   : > { %v1893_v28 = vmax.f32 %v4188_v56, %v1747_v35  ;;  %v1892_v33 = vmax.f32 %v4190_v62, %v1745_v57  ;;  %v752_v46 = vmax.f32 %v432_v48, %v5380_v63  ;;  %v178_v56 = vld [vmem:[%s2587_s11 + $0x1e8] sm:$0x1f]  ;;  %v177_v62 = vld [vmem:[%s2587_s11 + $0x1e0] sm:$0x1f]  ;;  %v943_v35 = vrot.slane %v2416_v55, 7 }
 0x1f5   : > { %2054 = vrot.lane.b32.xlu1 %v1887_v6, %s2562_s13  ;;  %2052 = vrot.lane.b32.xlu0 %v1886_v19, %s2562_s13  ;;  %v751_v6 = vmax.f32 %v431_v47, %v5377_v11  ;;  %v5378_v19 = vld [vmem:[#allocation126_spill] sm:$0xff]  ;;  %v942_v57 = vrot.slane %v2415_v37, 7  ;;  %v1069_v47 = vmax.f32 %v813_v32, %v941_v39  ;;  %v944_v48 = vrot.slane %v2417_v58, 7  ;;  %v5382_v11 = vld [vmem:[#allocation144_spill] sm:$0xff] }
 0x1f6   : > { %v750_v15 = vmax.f32 %v430_v36, %v5378_v19  ;;  %v816_v27 = vmax.f32 %v752_v46, %v2417_v58  ;;  %v437_v39 = vmax.f32 %v178_v56, %v2549_v38  ;;  %v2550_v32 = vld [vmem:[%s2587_s11 + $0x3e0] sm:$0x1f]  ;;  %v1132_v19 = vmax.f32 %v1068_v23, %v4247_v4  ;;  %v2551_v46 = vld [vmem:[%s2587_s11 + $0x3f8] sm:$0x1f] }
 0x1f7   : > { %v4424_v51 = vpop.permute.xlu1 %1750  ;;  %v4426_v50 = vpop.permute.xlu0 %1748  ;;  %v815_v36 = vmax.f32 %v751_v6, %v2416_v55  ;;  %v436_v3 = vmax.f32 %v177_v62, %v2550_v32  ;;  %v2419_v55 = vld [vmem:[%s2587_s11 + $0x5d0] sm:$0x1f]  ;;  %v754_v6 = vmax.f32 %v434_v45, %v5382_v11  ;;  %v439_v41 = vmax.f32 %v180_v30, %v2551_v46  ;;  %v5388_v11 = vld [vmem:[#allocation42_spill] sm:$0xff] }
 0x1f8   : > { %v814_v52 = vmax.f32 %v750_v15, %v2415_v37  ;;  %v1895_v18 = vmax.f32 %v4200_v16, %v4424_v51  ;;  %v179_v16 = vld [vmem:[%s2587_s11 + $0x1f0] sm:$0x1f]  ;;  %v5381_v51 = vld [vmem:[#allocation143_spill] sm:$0xff]  ;;  %v1133_v37 = vmax.f32 %v1069_v47, %v4243_v26  ;;  %v1072_v45 = vmax.f32 %v816_v27, %v944_v48  ;;  %v2421_v47 = vld [vmem:[%s2587_s11 + $0x5e0] sm:$0x1f] }
 0x1f9   : > { %2058 = vrot.lane.b32.xlu1 %v1889_v8, %s2562_s13  ;;  %2056 = vrot.lane.b32.xlu0 %v1888_v60, %s2562_s13  ;;  %v5379_v60 = vld [vmem:[#allocation135_spill] sm:$0xff]  ;;  %v1071_v15 = vmax.f32 %v815_v36, %v943_v35  ;;  %v946_v62 = vrot.slane %v2419_v55, 7  ;;  %v5385_v38 = vrot.slane %v4243_v26, 7  ;;  %v948_v32 = vrot.slane %v2421_v47, 7  ;;  %v5387_v26 = vld [vmem:[#allocation4_spill] sm:$0xff] }
 0x1fa   : > { %v753_v59 = vmax.f32 %v433_v34, %v5379_v60  ;;  %v945_v34 = vrot.slane %v2418_v20, 7  ;;  %v2422_v35 = vld [vmem:[%s2587_s11 + $0x5e8] sm:$0x1f]  ;;  %v1136_v27 = vmax.f32 %v1072_v45, %v4283_v22  ;;  %v5390_v46 = vrot.slane %v4261_v53, 7  ;;  %v5393_v45 = vld [vmem:[#allocation9_spill] sm:$0xff] }
 0x1fb   : > { %v4442_v12 = vpop.permute.xlu1 %1754  ;;  %v4444_v0 = vpop.permute.xlu0 %1752  ;;  %v1135_v36 = vmax.f32 %v1071_v15, %v4261_v53 }
 0x1fc   : > { %v817_v21 = vmax.f32 %v753_v59, %v2418_v20  ;;  %v1896_v60 = vmax.f32 %v4214_v24, %v4444_v0  ;;  %v2552_v20 = vld [vmem:[%s2587_s11 + $0x3f0] sm:$0x1f] }
 0x1fd   : > { %2062 = vrot.lane.b32.xlu1 %v1891_v17, %s2562_s13  ;;  %2060 = vrot.lane.b32.xlu0 %v1890_v25, %s2562_s13  ;;  %v1894_v17 = vmax.f32 %v4202_v31, %v4426_v50  ;;  %v2420_v31 = vld [vmem:[%s2587_s11 + $0x5d8] sm:$0x1f]  ;;  %v755_v50 = vmax.f32 %v435_v7, %v5381_v51  ;;  %v1453_v7 = vmax.f32 %v1133_v37, %v4224_v13  ;;  %v5383_v0 = vld [vmem:[#allocation116_spill] sm:$0xff]  ;;  %v5384_v13 = vld [vmem:[#allocation2_spill] sm:$0xff] }
 0x1fe   : > { %v1073_v5 = vmax.f32 %v817_v21, %v945_v34  ;;  %v438_v58 = vmax.f32 %v179_v16, %v2552_v20  ;;  %v947_v56 = vrot.slane %v2420_v31, 7  ;;  %v756_v23 = vmax.f32 %v436_v3, %v5384_v13  ;;  %v2424_v3 = vld [vmem:[%s2587_s11 + $0x5f8] sm:$0x1f] }
 0x1ff   : > { %v4458_v1 = vpop.permute.xlu1 %1758  ;;  %v4460_v8 = vpop.permute.xlu0 %1756  ;;  %v819_v24 = vmax.f32 %v755_v50, %v2420_v31  ;;  %v949_v21 = vrot.slane %v2422_v35, 7  ;;  %v1455_v30 = vmax.f32 %v1135_v36, %v4230_v44  ;;  %v2423_v31 = vld [vmem:[%s2587_s11 + $0x5f0] sm:$0x1f] }
 0x200   : > { %v1137_v48 = vmax.f32 %v1073_v5, %v4279_v42  ;;  %v820_v16 = vmax.f32 %v756_v23, %v2421_v47  ;;  %v5391_v5 = vrot.slane %v4265_v9, 7  ;;  %v5396_v47 = vld [vmem:[#allocation56_spill] sm:$0xff]  ;;  %v5397_v23 = vrot.slane %v4283_v22, 7 }
 0x201   : > { %2066 = vrot.lane.b32.xlu1 %v1893_v28, %s2562_s13  ;;  %2064 = vrot.lane.b32.xlu0 %v1892_v33, %s2562_s13  ;;  %v1070_v28 = vmax.f32 %v814_v52, %v942_v57  ;;  %v1897_v33 = vmax.f32 %v4212_v14, %v4442_v12  ;;  %v1452_v14 = vmax.f32 %v1132_v19, %v4226_v40  ;;  %v951_v19 = vrot.slane %v2424_v3, 7 }
 0x202   : > { %v818_v12 = vmax.f32 %v754_v6, %v2419_v55  ;;  %v757_v57 = vmax.f32 %v437_v39, %v5383_v0  ;;  %v1898_v40 = vmax.f32 %v4222_v49, %v4460_v8  ;;  %v1645_v39 = vmax.f32 %v1453_v7, %v5385_v38  ;;  %v5395_v0 = vld [vmem:[#allocation57_spill] sm:$0xff] }
 0x203   : > { %v4476_v25 = vpop.permute.xlu1 %1762  ;;  %v4478_v43 = vpop.permute.xlu0 %1760  ;;  %v1134_v52 = vmax.f32 %v1070_v28, %v4265_v9  ;;  %v1075_v51 = vmax.f32 %v819_v24, %v947_v56  ;;  %v759_v55 = vmax.f32 %v439_v41, %v5387_v26  ;;  %v758_v6 = vmax.f32 %v438_v58, %v5388_v11  ;;  %v5406_v11 = vld [vmem:[#allocation59_spill] sm:$0xff] }
 0x204   : > { %v821_v8 = vmax.f32 %v757_v57, %v2422_v35  ;;  %v1074_v50 = vmax.f32 %v818_v12, %v946_v62  ;;  %v1901_v44 = vmax.f32 %v1645_v39, %v4476_v25  ;;  %v1457_v15 = vmax.f32 %v1137_v48, %v4236_v61  ;;  %v5392_v25 = vld [vmem:[#allocation122_spill] sm:$0xff] }
 0x205   : > { %2070 = vrot.lane.b32.xlu1 %v1895_v18, %s2562_s13  ;;  %2068 = vrot.lane.b32.xlu0 %v1894_v17, %s2562_s13  ;;  %v1899_v18 = vmax.f32 %v4220_v29, %v4458_v1  ;;  %v1454_v29 = vmax.f32 %v1134_v52, %v4232_v2  ;;  %v5386_v1 = vrot.slane %v4247_v4, 7  ;;  %v950_v28 = vrot.slane %v2423_v31, 7  ;;  %v5398_v52 = vld [vmem:[#allocation62_spill] sm:$0xff] }
 0x206   : > { %v1647_v7 = vmax.f32 %v1455_v30, %v5390_v46  ;;  %v1138_v20 = vmax.f32 %v1074_v50, %v5393_v45  ;;  %v1077_v58 = vmax.f32 %v821_v8, %v949_v21  ;;  %v1076_v61 = vmax.f32 %v820_v16, %v948_v32  ;;  %v5400_v39 = vld [vmem:[#allocation58_spill] sm:$0xff] }
 0x207   : > { %v4496_v59 = vpop.permute.xlu1 %1766  ;;  %v4498_v63 = vpop.permute.xlu0 %1764  ;;  %v1644_v49 = vmax.f32 %v1452_v14, %v5386_v1  ;;  %v1646_v41 = vmax.f32 %v1454_v29, %v5391_v5  ;;  %v823_v56 = vmax.f32 %v759_v55, %v2424_v3  ;;  %v822_v62 = vmax.f32 %v758_v6, %v2423_v31  ;;  %v5401_v3 = vld [vmem:[#allocation61_spill] sm:$0xff] }
 0x208   : > { %v1903_v35 = vmax.f32 %v1647_v7, %v4496_v59  ;;  %v5394_v24 = vrot.slane %v4279_v42, 7  ;;  %v1458_v13 = vmax.f32 %v1138_v20, %v5396_v47  ;;  %v1141_v59 = vmax.f32 %v1077_v58, %v5398_v52 }
 0x209   : > { %2074 = vrot.lane.b32.xlu1 %v1897_v33, %s2562_s13  ;;  %2072 = vrot.lane.b32.xlu0 %v1896_v60, %s2562_s13  ;;  %v1900_v2 = vmax.f32 %v1644_v49, %v4478_v43  ;;  %v5389_v33 = vld [vmem:[#allocation8_spill] sm:$0xff]  ;;  %v1139_v43 = vmax.f32 %v1075_v51, %v5392_v25  ;;  %v1902_v53 = vmax.f32 %v1646_v41, %v4498_v63  ;;  %v5402_v30 = vrot.slane %v5392_v25, 7 }
 0x20a   : > { %v1456_v60 = vmax.f32 %v1136_v27, %v5389_v33  ;;  %v1649_v12 = vmax.f32 %v1457_v15, %v5394_v24  ;;  %v1078_v21 = vmax.f32 %v822_v62, %v950_v28  ;;  %v1461_v32 = vmax.f32 %v1141_v59, %v5400_v39 }
 0x20b   : > { %v1771_v17 = vpop.permute.xlu1 %1770  ;;  %v1769_v34 = vpop.permute.xlu0 %1768  ;;  %v1459_v57 = vmax.f32 %v1139_v43, %v5395_v0  ;;  %v5403_v1 = vrot.slane %v5393_v45, 7  ;;  %v5405_v26 = vrot.slane %v5398_v52, 7 }
 0x20c   : > { %v1648_v36 = vmax.f32 %v1456_v60, %v5397_v23  ;;  %v1905_v42 = vmax.f32 %v1649_v12, %v1771_v17  ;;  %v5404_v17 = vld [vmem:[#allocation63_spill] sm:$0xff]  ;;  %v1142_v8 = vmax.f32 %v1078_v21, %v4329_v54 }
 0x20d   : > { %2078 = vrot.lane.b32.xlu1 %v1899_v18, %s2562_s13  ;;  %2076 = vrot.lane.b32.xlu0 %v1898_v40, %s2562_s13  ;;  %v5399_v18 = vld [vmem:[#allocation65_spill] sm:$0xff]  ;;  %v1079_v40 = vmax.f32 %v823_v56, %v951_v19  ;;  %v1651_v29 = vmax.f32 %v1459_v57, %v5402_v30  ;;  %v1650_v49 = vmax.f32 %v1458_v13, %v5403_v1  ;;  %v5409_v60 = vrot.slane %v5404_v17, 7 }
 0x20e   : > { %v1140_v63 = vmax.f32 %v1076_v61, %v5399_v18  ;;  %v1904_v48 = vmax.f32 %v1648_v36, %v1769_v34  ;;  %v1653_v55 = vmax.f32 %v1461_v32, %v5405_v26  ;;  %v5408_v19 = vrot.slane %v5399_v18, 7 }
 0x20f   : > { %v1775_v37 = vpop.permute.xlu1 %1774  ;;  %v1773_v4 = vpop.permute.xlu0 %1772  ;;  %v1143_v34 = vmax.f32 %v1079_v40, %v5404_v17 }
 0x210   : > { %v1460_v22 = vmax.f32 %v1140_v63, %v5401_v3  ;;  %v1907_v16 = vmax.f32 %v1651_v29, %v1775_v37  ;;  %v1906_v31 = vmax.f32 %v1650_v49, %v1773_v4 }
 0x211   : > { %2082 = vrot.lane.b32.xlu1 %v1901_v44, %s2562_s13  ;;  %2080 = vrot.lane.b32.xlu0 %v1900_v2, %s2562_s13  ;;  %v1463_v6 = vmax.f32 %v1143_v34, %v5406_v11  ;;  %v5407_v44 = vld [vmem:[#allocation60_spill] sm:$0xff] }
 0x212   : > { %v1462_v2 = vmax.f32 %v1142_v8, %v5407_v44  ;;  %v1652_v15 = vmax.f32 %v1460_v22, %v5408_v19 }
 0x213   : > { %v1779_v14 = vpop.permute.xlu1 %1778  ;;  %v1777_v9 = vpop.permute.xlu0 %1776  ;;  %v1655_v46 = vmax.f32 %v1463_v6, %v5409_v60 }
 0x214   : > { %v1909_v37 = vmax.f32 %v1653_v55, %v1779_v14  ;;  %v1908_v4 = vmax.f32 %v1652_v15, %v1777_v9  ;;  %v1654_v7 = vmax.f32 %v1462_v2, %v1526_v10 }
 0x215   : > { %2086 = vrot.lane.b32.xlu1 %v1903_v35, %s2562_s13  ;;  %2084 = vrot.lane.b32.xlu0 %v1902_v53, %s2562_s13 }
 0x217   : > { %v1783_v27 = vpop.permute.xlu1 %1782  ;;  %v1781_v38 = vpop.permute.xlu0 %1780 }
 0x218   : > { %v1911_v5 = vmax.f32 %v1655_v46, %v1783_v27  ;;  %v1910_v41 = vmax.f32 %v1654_v7, %v1781_v38 }
 0x219   : > { %2090 = vrot.lane.b32.xlu1 %v1905_v42, %s2562_s13  ;;  %2088 = vrot.lane.b32.xlu0 %v1904_v48, %s2562_s13 }
 0x21b   : > { %v1979_v51 = vpop.permute.xlu1 %1978  ;;  %v1977_v50 = vpop.permute.xlu0 %1976 }
 0x21c   : > { %2170 = vst.msk [vmem:[%s4566_s17 + $0x3] sm:$0x1e] %vm2168_vm0, %v1979_v51  ;;  %2169 = vst.msk [vmem:[%s4566_s17 - $0x1] sm:$0x1e] %vm2168_vm0, %v1977_v50 }
 0x21d   : > { %2094 = vrot.lane.b32.xlu1 %v1907_v16, %s2562_s13  ;;  %2092 = vrot.lane.b32.xlu0 %v1906_v31, %s2562_s13 }
 0x21f   : > { %v1983_v28 = vpop.permute.xlu1 %1982  ;;  %v1981_v33 = vpop.permute.xlu0 %1980 }
 0x220   : > { %2172 = vst.msk [vmem:[%s4566_s17 + $0xb] sm:$0x1e] %vm2168_vm0, %v1983_v28  ;;  %2171 = vst.msk [vmem:[%s4566_s17 + $0x7] sm:$0x1e] %vm2168_vm0, %v1981_v33 }
 0x221   : > { %2098 = vrot.lane.b32.xlu1 %v1909_v37, %s2562_s13  ;;  %2096 = vrot.lane.b32.xlu0 %v1908_v4, %s2562_s13 }
 0x223   : > { %v1987_v25 = vpop.permute.xlu1 %1986  ;;  %v1985_v43 = vpop.permute.xlu0 %1984 }
 0x224   : > { %2174 = vst.msk [vmem:[%s4566_s17 + $0x13] sm:$0x1e] %vm2168_vm0, %v1987_v25  ;;  %2173 = vst.msk [vmem:[%s4566_s17 + $0xf] sm:$0x1e] %vm2168_vm0, %v1985_v43 }
 0x225   : > { %2102 = vrot.lane.b32.xlu1 %v1911_v5, %s2562_s13  ;;  %2100 = vrot.lane.b32.xlu0 %v1910_v41, %s2562_s13 }
 0x227   : > { %v1991_v54 = vpop.permute.xlu1 %1990  ;;  %v1989_v10 = vpop.permute.xlu0 %1988 }
 0x228   : > { %2176 = vst.msk [vmem:[%s4566_s17 + $0x1b] sm:$0x1e] %vm2168_vm0, %v1991_v54  ;;  %2175 = vst.msk [vmem:[%s4566_s17 + $0x17] sm:$0x1e] %vm2168_vm0, %v1989_v10 }
 0x22b   : > { %v1995_v45 = vpop.permute.xlu1 %1994  ;;  %v1993_v20 = vpop.permute.xlu0 %1992 }
 0x22c   : > { %2178 = vst.msk [vmem:[%s4566_s17 + $0x23] sm:$0x1e] %vm2168_vm0, %v1995_v45  ;;  %2177 = vst.msk [vmem:[%s4566_s17 + $0x1f] sm:$0x1e] %vm2168_vm0, %v1993_v20 }
 0x22f   : > { %v1999_v58 = vpop.permute.xlu1 %1998  ;;  %v1997_v61 = vpop.permute.xlu0 %1996 }
 0x230   : > { %2180 = vst.msk [vmem:[%s4566_s17 + $0x2b] sm:$0x1e] %vm2168_vm0, %v1999_v58  ;;  %2179 = vst.msk [vmem:[%s4566_s17 + $0x27] sm:$0x1e] %vm2168_vm0, %v1997_v61 }
 0x233   : > { %v2003_v56 = vpop.permute.xlu1 %2002  ;;  %v2001_v62 = vpop.permute.xlu0 %2000 }
 0x234   : > { %2182 = vst.msk [vmem:[%s4566_s17 + $0x33] sm:$0x1e] %vm2168_vm0, %v2003_v56  ;;  %2181 = vst.msk [vmem:[%s4566_s17 + $0x2f] sm:$0x1e] %vm2168_vm0, %v2001_v62 }
 0x237   : > { %v2007_v35 = vpop.permute.xlu1 %2006  ;;  %v2005_v53 = vpop.permute.xlu0 %2004 }
 0x238   : > { %2184 = vst.msk [vmem:[%s4566_s17 + $0x3b] sm:$0x1e] %vm2168_vm0, %v2007_v35  ;;  %2183 = vst.msk [vmem:[%s4566_s17 + $0x37] sm:$0x1e] %vm2168_vm0, %v2005_v53 }
 0x23b   : > { %v2011_v14 = vpop.permute.xlu1 %2010  ;;  %v2009_v9 = vpop.permute.xlu0 %2008 }
 0x23c   : > { %2186 = vst.msk [vmem:[%s4566_s17 + $0x43] sm:$0x1e] %vm2168_vm0, %v2011_v14  ;;  %2185 = vst.msk [vmem:[%s4566_s17 + $0x3f] sm:$0x1e] %vm2168_vm0, %v2009_v9 }
 0x23f   : > { %v2015_v24 = vpop.permute.xlu1 %2014  ;;  %v2013_v12 = vpop.permute.xlu0 %2012 }
 0x240   : > { %2188 = vst.msk [vmem:[%s4566_s17 + $0x4b] sm:$0x1e] %vm2168_vm0, %v2015_v24  ;;  %2187 = vst.msk [vmem:[%s4566_s17 + $0x47] sm:$0x1e] %vm2168_vm0, %v2013_v12 }
 0x243   : > { %v2019_v0 = vpop.permute.xlu1 %2018  ;;  %v2017_v57 = vpop.permute.xlu0 %2016 }
 0x244   : > { %2190 = vst.msk [vmem:[%s4566_s17 + $0x53] sm:$0x1e] %vm2168_vm0, %v2019_v0  ;;  %2189 = vst.msk [vmem:[%s4566_s17 + $0x4f] sm:$0x1e] %vm2168_vm0, %v2017_v57 }
 0x247   : > { %v2023_v47 = vpop.permute.xlu1 %2022  ;;  %v2021_v13 = vpop.permute.xlu0 %2020 }
 0x248   : > { %2192 = vst.msk [vmem:[%s4566_s17 + $0x5b] sm:$0x1e] %vm2168_vm0, %v2023_v47  ;;  %2191 = vst.msk [vmem:[%s4566_s17 + $0x57] sm:$0x1e] %vm2168_vm0, %v2021_v13 }
 0x24b   : > { %v2027_v23 = vpop.permute.xlu1 %2026  ;;  %v2025_v36 = vpop.permute.xlu0 %2024 }
 0x24c   : > { %2194 = vst.msk [vmem:[%s4566_s17 + $0x63] sm:$0x1e] %vm2168_vm0, %v2027_v23  ;;  %2193 = vst.msk [vmem:[%s4566_s17 + $0x5f] sm:$0x1e] %vm2168_vm0, %v2025_v36 }
 0x24f   : > { %v2031_v52 = vpop.permute.xlu1 %2030  ;;  %v2029_v59 = vpop.permute.xlu0 %2028 }
 0x250   : > { %2196 = vst.msk [vmem:[%s4566_s17 + $0x6b] sm:$0x1e] %vm2168_vm0, %v2031_v52  ;;  %2195 = vst.msk [vmem:[%s4566_s17 + $0x67] sm:$0x1e] %vm2168_vm0, %v2029_v59 }
 0x253   : > { %v2035_v18 = vpop.permute.xlu1 %2034  ;;  %v2033_v63 = vpop.permute.xlu0 %2032 }
 0x254   : > { %2198 = vst.msk [vmem:[%s4566_s17 + $0x73] sm:$0x1e] %vm2168_vm0, %v2035_v18  ;;  %2197 = vst.msk [vmem:[%s4566_s17 + $0x6f] sm:$0x1e] %vm2168_vm0, %v2033_v63 }
 0x257   : > { %v2039_v40 = vpop.permute.xlu1 %2038  ;;  %v2037_v21 = vpop.permute.xlu0 %2036 }
 0x258   : > { %2200 = vst.msk [vmem:[%s4566_s17 + $0x7b] sm:$0x1e] %vm2168_vm0, %v2039_v40  ;;  %2199 = vst.msk [vmem:[%s4566_s17 + $0x77] sm:$0x1e] %vm2168_vm0, %v2037_v21 }
 0x25b   : > { %v2043_v42 = vpop.permute.xlu1 %2042  ;;  %v2041_v48 = vpop.permute.xlu0 %2040 }
 0x25c   : > { %2202 = vst.msk [vmem:[%s4566_s17 + $0x83] sm:$0x1e] %vm2168_vm0, %v2043_v42  ;;  %2201 = vst.msk [vmem:[%s4566_s17 + $0x7f] sm:$0x1e] %vm2168_vm0, %v2041_v48 }
 0x25f   : > { %v2047_v27 = vpop.permute.xlu1 %2046  ;;  %v2045_v38 = vpop.permute.xlu0 %2044 }
 0x260   : > { %2204 = vst.msk [vmem:[%s4566_s17 + $0x8b] sm:$0x1e] %vm2168_vm0, %v2047_v27  ;;  %2203 = vst.msk [vmem:[%s4566_s17 + $0x87] sm:$0x1e] %vm2168_vm0, %v2045_v38 }
 0x263   : > { %v2051_v39 = vpop.permute.xlu1 %2050  ;;  %v2049_v32 = vpop.permute.xlu0 %2048 }
 0x264   : > { %2206 = vst.msk [vmem:[%s4566_s17 + $0x93] sm:$0x1e] %vm2168_vm0, %v2051_v39  ;;  %2205 = vst.msk [vmem:[%s4566_s17 + $0x8f] sm:$0x1e] %vm2168_vm0, %v2049_v32 }
 0x267   : > { %v2055_v3 = vpop.permute.xlu1 %2054  ;;  %v2053_v22 = vpop.permute.xlu0 %2052 }
 0x268   : > { %2208 = vst.msk [vmem:[%s4566_s17 + $0x9b] sm:$0x1e] %vm2168_vm0, %v2055_v3  ;;  %2207 = vst.msk [vmem:[%s4566_s17 + $0x97] sm:$0x1e] %vm2168_vm0, %v2053_v22 }
 0x26b   : > { %v2059_v30 = vpop.permute.xlu1 %2058  ;;  %v2057_v29 = vpop.permute.xlu0 %2056 }
 0x26c   : > { %2210 = vst.msk [vmem:[%s4566_s17 + $0xa3] sm:$0x1e] %vm2168_vm0, %v2059_v30  ;;  %2209 = vst.msk [vmem:[%s4566_s17 + $0x9f] sm:$0x1e] %vm2168_vm0, %v2057_v29 }
 0x26f   : > { %v2063_v1 = vpop.permute.xlu1 %2062  ;;  %v2061_v49 = vpop.permute.xlu0 %2060 }
 0x270   : > { %2212 = vst.msk [vmem:[%s4566_s17 + $0xab] sm:$0x1e] %vm2168_vm0, %v2063_v1  ;;  %2211 = vst.msk [vmem:[%s4566_s17 + $0xa7] sm:$0x1e] %vm2168_vm0, %v2061_v49 }
 0x273   : > { %v2067_v17 = vpop.permute.xlu1 %2066  ;;  %v2065_v34 = vpop.permute.xlu0 %2064 }
 0x274   : > { %2214 = vst.msk [vmem:[%s4566_s17 + $0xb3] sm:$0x1e] %vm2168_vm0, %v2067_v17  ;;  %2213 = vst.msk [vmem:[%s4566_s17 + $0xaf] sm:$0x1e] %vm2168_vm0, %v2065_v34 }
 0x277   : > { %v2071_v8 = vpop.permute.xlu1 %2070  ;;  %v2069_v16 = vpop.permute.xlu0 %2068 }
 0x278   : > { %2216 = vst.msk [vmem:[%s4566_s17 + $0xbb] sm:$0x1e] %vm2168_vm0, %v2071_v8  ;;  %2215 = vst.msk [vmem:[%s4566_s17 + $0xb7] sm:$0x1e] %vm2168_vm0, %v2069_v16 }
 0x27b   : > { %v2075_v31 = vpop.permute.xlu1 %2074  ;;  %v2073_v51 = vpop.permute.xlu0 %2072 }
 0x27c   : > { %2218 = vst.msk [vmem:[%s4566_s17 + $0xc3] sm:$0x1e] %vm2168_vm0, %v2075_v31  ;;  %2217 = vst.msk [vmem:[%s4566_s17 + $0xbf] sm:$0x1e] %vm2168_vm0, %v2073_v51 }
 0x27f   : > { %v2079_v50 = vpop.permute.xlu1 %2078  ;;  %v2077_v26 = vpop.permute.xlu0 %2076 }
 0x280   : > { %2220 = vst.msk [vmem:[%s4566_s17 + $0xcb] sm:$0x1e] %vm2168_vm0, %v2079_v50  ;;  %2219 = vst.msk [vmem:[%s4566_s17 + $0xc7] sm:$0x1e] %vm2168_vm0, %v2077_v26 }
 0x283   : > { %v2083_v55 = vpop.permute.xlu1 %2082  ;;  %v2081_v11 = vpop.permute.xlu0 %2080 }
 0x284   : > { %2222 = vst.msk [vmem:[%s4566_s17 + $0xd3] sm:$0x1e] %vm2168_vm0, %v2083_v55  ;;  %2221 = vst.msk [vmem:[%s4566_s17 + $0xcf] sm:$0x1e] %vm2168_vm0, %v2081_v11 }
 0x287   : > { %v2087_v6 = vpop.permute.xlu1 %2086  ;;  %v2085_v44 = vpop.permute.xlu0 %2084 }
 0x288   : > { %2224 = vst.msk [vmem:[%s4566_s17 + $0xdb] sm:$0x1e] %vm2168_vm0, %v2087_v6  ;;  %2223 = vst.msk [vmem:[%s4566_s17 + $0xd7] sm:$0x1e] %vm2168_vm0, %v2085_v44 }
 0x28b   : > { %v2091_v2 = vpop.permute.xlu1 %2090  ;;  %v2089_v19 = vpop.permute.xlu0 %2088 }
 0x28c   : > { %2226 = vst.msk [vmem:[%s4566_s17 + $0xe3] sm:$0x1e] %vm2168_vm0, %v2091_v2  ;;  %2225 = vst.msk [vmem:[%s4566_s17 + $0xdf] sm:$0x1e] %vm2168_vm0, %v2089_v19 }
 0x28f   : > { %v2095_v15 = vpop.permute.xlu1 %2094  ;;  %v2093_v37 = vpop.permute.xlu0 %2092 }
 0x290   : > { %2228 = vst.msk [vmem:[%s4566_s17 + $0xeb] sm:$0x1e] %vm2168_vm0, %v2095_v15  ;;  %2227 = vst.msk [vmem:[%s4566_s17 + $0xe7] sm:$0x1e] %vm2168_vm0, %v2093_v37 }
 0x293   : > { %v2099_v4 = vpop.permute.xlu1 %2098  ;;  %v2097_v28 = vpop.permute.xlu0 %2096 }
 0x294   : > { %2230 = vst.msk [vmem:[%s4566_s17 + $0xf3] sm:$0x1e] %vm2168_vm0, %v2099_v4  ;;  %2229 = vst.msk [vmem:[%s4566_s17 + $0xef] sm:$0x1e] %vm2168_vm0, %v2097_v28 }
 0x297   : > { %v2103_v33 = vpop.permute.xlu1 %2102  ;;  %v2101_v60 = vpop.permute.xlu0 %2100 }
 0x298   : > { %2232 = vst.msk [vmem:[%s4566_s17 + $0xfb] sm:$0x1e] %vm2168_vm0, %v2103_v33  ;;  %2231 = vst.msk [vmem:[%s4566_s17 + $0xf7] sm:$0x1e] %vm2168_vm0, %v2101_v60 }
 0x299 PF: > { %s11_s6 = sadd.s32 1, %s2559_s6  }
 0x29a   : > { %p8_p4 = scmp.ge.s32.totalorder %s11_s6, 4  }
 0x29c   :  { %10 = sbr.rel (!%p8_p4) target bundleno = 1 (0x1), region = 57 }

// kernel: resnet_forward_pallas.5
= control target key start
LH: loop header
LB: loop body
LE: loop exit
PB: predicated region body
PF: predicated region fallthrough
CT: control target
= control target key end

     0   :  { %s5510_s18 = smov 0   ;;  %s5512_s19 = smov 0   ;;  %s6637_s0 = inlined_call_operand.vmem [shape: f32[2,64,36], index: 0, kind: input, shape index: {}]   ;;  %s6638_s1 = inlined_call_operand.vmem [shape: bf16[4,9,64,64], index: 1, kind: input, shape index: {}]   ;;  %s6639_s2 = inlined_call_operand.vmem [shape: f32[4,64,1], index: 2, kind: input, shape index: {}]   ;;  %s6640_s3 = inlined_call_operand.vmem [shape: bf16[4,9,64,64], index: 3, kind: input, shape index: {}]   ;;  %s6641_s4 = inlined_call_operand.vmem [shape: f32[4,64,1], index: 4, kind: input, shape index: {}]   ;;  %s6642_s5 = inlined_call_operand.vmem [shape: f32[2,64,36], index: 5, kind: output, shape index: {}]  }
   0x1   :  { %s5514_s20 = smov 0   ;;  %s5516_s21 = smov 0  }
   0x2   :  { %s5518_s22 = smov 0  }
   0x3 LB: > { %s24_s23 = sadd.s32 1, %s5459_s20  ;;  %s27_s24 = sadd.s32 1, %s5463_s21  ;;  %s5467_s22 = sphi %s5518_s22, %s15_s22   ;;  %s5463_s21 = sphi %s5516_s21, %s6676_s21   ;;  %s5459_s20 = sphi %s5514_s20, %s6675_s20   ;;  %s5455_s19 = sphi %s5512_s19, %s6674_s19   ;;  %s5451_s18 = sphi %s5510_s18, %s6673_s18  }
   0x4   : > { %p25_p0 = scmp.ge.s32.totalorder %s24_s23, 4  ;;  %p3933_p1 = scmp.ge.s32.totalorder %s5467_s22, 1 }
   0x5   : > { %p239_p2 = scmp.lt.s32.totalorder %s5467_s22, 9 }
   0x6   : > { %s6678_s23 = smov (%p25_p0, %s24_s23), 0  ;;  %s6680_s24 = smov (!%p25_p0, %s27_s24), %s5463_s21 }
   0x7   : > { %p240_p3 = pnand %p3933_p1, %p239_p2  ;;  %p29_p4 = scmp.ge.s32.totalorder %s6680_s24, 2 }
   0x9   : > { %s6682_s24 = smov (%p29_p4, %s6680_s24), 0  ;;  %243 = sbr.rel (%p240_p3) target bundleno = 1233 (0x4d1), region = 40 }
   0xe   : > { %p287_p5 = scmp.lt.s32.totalorder %s5455_s19, 1  ;;  %p292_p6 = scmp.lt.s32.totalorder %s5451_s18, 3 }
   0xf   : > { %p3944_p7 = scmp.ne.s32.totalorder %s5451_s18, 0 }
  0x10   : > { %s6684_s19 = smov (!%p287_p5, %s5455_s19), 1 }
  0x11   : > { %s293_s25 = scalar_select %p292_p6, %s5451_s18, 3 }
  0x12   : > { %s4219_s26 = sshll.u32 %s6684_s19, 6  ;;  %320 = sbr.rel (%p3944_p7) target bundleno = 32 (0x20), region = 44 }
  0x13   : > { %s5547_s29 = scalar_lea.vmem %s6637_s0, %s4219_s26  ;;  %s5373_s30 = smul.u32 288, %s293_s25 }
  0x14   : > { %s4220_s6 = sshll.u32 %s293_s25, 6  ;;  %s5552_s9 = scalar_lea.vmem %s6642_s5, %s4219_s26 }
  0x15   : > { %s5557_s12 = scalar_lea.vmem %s6638_s1, %s5373_s30  ;;  %s5562_s15 = scalar_lea.vmem %s6639_s2, %s4220_s6 }
  0x16   : > { %s5567_s19 = scalar_lea.vmem %s6640_s3, %s5373_s30  ;;  %s5572_s26 = scalar_lea.vmem %s6641_s4, %s4220_s6 }
  0x17   : > { %v321_v0 = vld [vmem:[%s5547_s29] sm:$0xff]  ;;  %vm329_vm0 = vcmask 293888   ;;  %v322_v1 = vld [vmem:[%s5547_s29 + $0x8] sm:$0xff]  ;;  %v323_v2 = vld [vmem:[%s5547_s29 + $0x10] sm:$0xff]  ;;  %v5469_v6 = vmov 0.0  }
  0x18   : > { %330 = vst.msk [vmem:[#allocation2] sm:$0xff] %vm329_vm0, %v321_v0  ;;  %331 = vst.msk [vmem:[#allocation2 + $0x8] sm:$0xff] %vm329_vm0, %v322_v1  ;;  %v324_v3 = vld [vmem:[%s5547_s29 + $0x18] sm:$0xff]  ;;  %v325_v4 = vld [vmem:[%s5547_s29 + $0x20] sm:$0xff] }
  0x19   : > { %332 = vst.msk [vmem:[#allocation2 + $0x10] sm:$0xff] %vm329_vm0, %v323_v2  ;;  %v326_v5 = vld [vmem:[%s5547_s29 + $0x28] sm:$0xff]  ;;  %338 = vst.msk [vmem:[#allocation3] sm:$0xff] %vm329_vm0, %v5469_v6  ;;  %v327_v7 = vld [vmem:[%s5547_s29 + $0x30] sm:$0xff] }
  0x1a   : > { %339 = vst.msk [vmem:[#allocation3 + $0x8] sm:$0xff] %vm329_vm0, %v5469_v6  ;;  %340 = vst.msk [vmem:[#allocation3 + $0x10] sm:$0xff] %vm329_vm0, %v5469_v6  ;;  %v328_v8 = vld [vmem:[%s5547_s29 + $0x38] sm:$0xff] }
  0x1b   : > { %341 = vst.msk [vmem:[#allocation3 + $0x18] sm:$0xff] %vm329_vm0, %v5469_v6  ;;  %342 = vst.msk [vmem:[#allocation3 + $0x20] sm:$0xff] %vm329_vm0, %v5469_v6 }
  0x1c   : > { %343 = vst.msk [vmem:[#allocation3 + $0x28] sm:$0xff] %vm329_vm0, %v5469_v6  ;;  %344 = vst.msk [vmem:[#allocation3 + $0x30] sm:$0xff] %vm329_vm0, %v5469_v6 }
  0x1d   : > { %345 = vst.msk [vmem:[#allocation3 + $0x38] sm:$0xff] %vm329_vm0, %v5469_v6  ;;  %333 = vst.msk [vmem:[#allocation2 + $0x18] sm:$0xff] %vm329_vm0, %v324_v3 }
  0x1e   : > { %334 = vst.msk [vmem:[#allocation2 + $0x20] sm:$0xff] %vm329_vm0, %v325_v4  ;;  %335 = vst.msk [vmem:[#allocation2 + $0x28] sm:$0xff] %vm329_vm0, %v326_v5 }
  0x1f   : > { %336 = vst.msk [vmem:[#allocation2 + $0x30] sm:$0xff] %vm329_vm0, %v327_v7  ;;  %337 = vst.msk [vmem:[#allocation2 + $0x38] sm:$0xff] %vm329_vm0, %v328_v8 }
  0x20 PF: > { %s5470_s18 = smov 127   ;;  %v5614_v13 = vld [vmem:[%s5557_s12 + $0x20] sm:$0xff]   ;;  %vm441_vm1 = vcmask 523264   ;;  %v5624_v16 = vld [vmem:[#allocation2 + $0x10] sm:$0xff]  ;;  %v5634_v17 = vld [vmem:[#allocation2 + $0x8] sm:$0xff]  ;;  %s5471_s28 = smov 126  }
  0x21   : > { %v4241_v14 = vunpack.c.l.bf16 %v5614_v13  ;;  %v5636_v18 = vld [vmem:[#allocation2] sm:$0xff]  ;;  %s5472_s29 = smov 122   ;;  %s5473_s30 = smov 121   ;;  %v4511_v22 = vld [vmem:[%s5557_s12 + $0x8] sm:$0xff]   ;;  %v4512_v25 = vld [vmem:[%s5557_s12 + $0x10] sm:$0xff]   ;;  %v5478_v43 = vmov 0   ;;  %v4242_v45 = vunpack.c.h.bf16 %v5614_v13 }
  0x22   : > { %v4224_v19 = vld [vmem:[%s5557_s12] sm:$0xff]   ;;  %v4229_v23 = vunpack.c.l.bf16 %v4511_v22  ;;  %v4230_v24 = vunpack.c.h.bf16 %v4511_v22  ;;  %v4233_v26 = vunpack.c.l.bf16 %v4512_v25  ;;  %v4234_v27 = vunpack.c.h.bf16 %v4512_v25  ;;  %v4513_v28 = vld [vmem:[%s5557_s12 + $0x18] sm:$0xff]   ;;  %s5474_s6 = smov 120   ;;  %s5475_s7 = smov 116   ;;  %v4515_v41 = vld [vmem:[%s5557_s12 + $0x28] sm:$0xff]   ;;  %5428 = vset.pattern.permute.xlu1 %v5478_v43  ;;  %5427 = vset.pattern.permute.xlu0 %v5478_v43 }
  0x23   : > { %4885 = vmatprep.mubr.msk.f32.mxu0 %vm441_vm1, %v4241_v14  ;;  %v4225_v20 = vunpack.c.l.bf16 %v4224_v19  ;;  %v4226_v21 = vunpack.c.h.bf16 %v4224_v19  ;;  %v4237_v29 = vunpack.c.l.bf16 %v4513_v28  ;;  %v4238_v30 = vunpack.c.h.bf16 %v4513_v28  ;;  %v5700_v31 = vld [vmem:[%s5557_s12 + $0x60] sm:$0xff]   ;;  %s5476_s8 = smov 115   ;;  %s5477_s10 = smov 114   ;;  %v1952_v42 = vld [vmem:[%s5562_s15 + $0x30] sm:$0xff]  ;;  %v1953_v44 = vld [vmem:[%s5562_s15 + $0x38] sm:$0xff] }
  0x24   : > { %v5622_v15 = vld [vmem:[#allocation2 + $0x18] sm:$0xff]  ;;  %v4273_v32 = vunpack.c.l.bf16 %v5700_v31  ;;  %v4245_v48 = vunpack.c.l.bf16 %v4515_v41  ;;  %v4516_v49 = vld [vmem:[%s5557_s12 + $0x30] sm:$0xff]   ;;  %v1951_v50 = vld [vmem:[%s5562_s15 + $0x28] sm:$0xff]  ;;  %v4246_v51 = vunpack.c.h.bf16 %v4515_v41  ;;  %s5479_s11 = smov 7   ;;  %vm2052_vm8 = vcmask 236600  }
  0x25   : > { %v5601_v10 = vld [vmem:[#allocation2 + $0x28] sm:$0xff]  ;;  %v5609_v12 = vld [vmem:[#allocation2 + $0x20] sm:$0xff]  ;;  %4913 = vmatprep.mubr.msk.f32.mxu1 %vm441_vm1, %v4225_v20  ;;  %v4249_v55 = vunpack.c.l.bf16 %v4516_v49  ;;  %v4517_v56 = vld [vmem:[%s5557_s12 + $0x38] sm:$0xff]   ;;  %v4250_v58 = vunpack.c.h.bf16 %v4516_v49  ;;  %vm3806_vm9 = vcmask 293888  }
  0x26   : > { %v5599_v9 = vld [vmem:[#allocation2 + $0x38] sm:$0xff]  ;;  %427 = vrot.lane.b32.xlu1 %v5601_v10, %s5470_s18  ;;  %v5607_v11 = vld [vmem:[#allocation2 + $0x30] sm:$0xff]  ;;  %v1950_v52 = vld [vmem:[%s5562_s15 + $0x20] sm:$0xff]  ;;  %v4253_v62 = vunpack.c.l.bf16 %v4517_v56  ;;  %v4254_v1 = vunpack.c.h.bf16 %v4517_v56 }
  0x27   : > { %431 = vrot.lane.b32.xlu0 %v5599_v9, %s5470_s18  ;;  %4897 = vmatprep.subr.mxu1 %v5599_v9  ;;  %v1949_v57 = vld [vmem:[%s5562_s15 + $0x18] sm:$0xff]  ;;  %v1948_v59 = vld [vmem:[%s5562_s15 + $0x10] sm:$0xff]  ;;  %v4518_v63 = vld [vmem:[%s5557_s12 + $0x40] sm:$0xff]  }
  0x28   : > { %4898 = vmatpush3.msra.mxu1 %v5599_v9  ;;  %v1947_v0 = vld [vmem:[%s5562_s15 + $0x8] sm:$0xff]  ;;  %v1946_v2 = vld [vmem:[%s5562_s15] sm:$0xff]  ;;  %v4257_v5 = vunpack.c.l.bf16 %v4518_v63  ;;  %v4258_v7 = vunpack.c.h.bf16 %v4518_v63  ;;  %v4529_v56 = vld [vmem:[%s5557_s12 + $0x98] sm:$0xff]  }
  0x29   : > { %4899 = vmatprep.subr.mxu1 %v5607_v11  ;;  %v4519_v6 = vld [vmem:[%s5557_s12 + $0x48] sm:$0xff]   ;;  %v5826_v49 = vld [vmem:[%s5557_s12 + $0xa0] sm:$0xff]  }
  0x2a   : > { %425 = vrot.lane.b32.xlu1 %v5609_v12, %s5470_s18  ;;  %4900 = vmatpush3.msra.mxu1 %v5607_v11 }
  0x2b   : > { %429 = vrot.lane.b32.xlu0 %v5607_v11, %s5470_s18  ;;  %4901 = vmatprep.subr.mxu1 %v5601_v10 }
  0x2c   : > { %4902 = vmatpush3.msra.mxu1 %v5601_v10 }
  0x2d   : > { %4903 = vmatprep.subr.mxu1 %v5609_v12 }
  0x2e   : > { %421 = vrot.lane.b32.xlu1 %v5624_v16, %s5470_s18  ;;  %4904 = vmatpush3.msra.mxu1 %v5609_v12 }
  0x2f   : > { %423 = vrot.lane.b32.xlu0 %v5622_v15, %s5470_s18  ;;  %4905 = vmatprep.subr.mxu1 %v5622_v15 }
  0x30   : > { %4906 = vmatpush3.msra.mxu1 %v5622_v15 }
  0x31   : > { %4907 = vmatprep.subr.mxu1 %v5624_v16 }
  0x32   : > { %417 = vrot.lane.b32.xlu1 %v5636_v18, %s5470_s18  ;;  %4908 = vmatpush3.msra.mxu1 %v5624_v16 }
  0x33   : > { %419 = vrot.lane.b32.xlu0 %v5634_v17, %s5470_s18  ;;  %4909 = vmatprep.subr.mxu1 %v5634_v17 }
  0x34   : > { %4910 = vmatpush3.msra.mxu1 %v5634_v17 }
  0x35   : > { %4911 = vmatprep.subr.mxu1 %v5636_v18 }
  0x36   : > { %729 = vrot.lane.b32.xlu1 %v5607_v11, %s5471_s28  ;;  %4912 = vmatpush3.msra.mxu1 %v5636_v18 }
  0x37   : > { %731 = vrot.lane.b32.xlu0 %v5599_v9, %s5471_s28  ;;  %4914 = vmatmul.mubr.msk.f32.vlgmr.msra.gmra.mxu1 %vm441_vm1, %v4226_v21  ;;  %v4526_v21 = vld [vmem:[%s5557_s12 + $0x80] sm:$0xff]  }
  0x38   : > { %4916 = vmatprep.mubr.msk.f32.mxu1 %vm441_vm1, %v4229_v23  ;;  %v4289_v25 = vunpack.c.l.bf16 %v4526_v21 }
  0x3a   : > { %725 = vrot.lane.b32.xlu1 %v5609_v12, %s5471_s28 }
  0x3b   : > { %727 = vrot.lane.b32.xlu0 %v5601_v10, %s5471_s28  ;;  %4917 = vmatmul.mubr.msk.f32.gmra.mxu1 %vm441_vm1, %v4230_v24 }
  0x3c   : > { %4919 = vmatprep.mubr.msk.f32.mxu1 %vm441_vm1, %v4233_v26 }
  0x3e   : > { %721 = vrot.lane.b32.xlu1 %v5624_v16, %s5471_s28 }
  0x3f   : > { %723 = vrot.lane.b32.xlu0 %v5622_v15, %s5471_s28  ;;  %4920 = vmatmul.mubr.msk.f32.gmra.mxu1 %vm441_vm1, %v4234_v27 }
  0x40   : > { %4922 = vmatprep.mubr.msk.f32.mxu1 %vm441_vm1, %v4237_v29 }
  0x42   : > { %717 = vrot.lane.b32.xlu1 %v5636_v18, %s5471_s28 }
  0x43   : > { %719 = vrot.lane.b32.xlu0 %v5634_v17, %s5471_s28  ;;  %4923 = vmatmul.mubr.msk.f32.gmra.mxu1 %vm441_vm1, %v4238_v30  ;;  %v4523_v30 = vld [vmem:[%s5557_s12 + $0x68] sm:$0xff]  }
  0x44   : > { %4969 = vmatprep.mubr.msk.f32.mxu1 %vm441_vm1, %v4273_v32  ;;  %v4274_v32 = vunpack.c.h.bf16 %v5700_v31  ;;  %v4290_v31 = vunpack.c.h.bf16 %v4526_v21 }
  0x46   : > { %907 = vrot.lane.b32.xlu1 %v5607_v11, %s5472_s29 }
  0x47   : > { %909 = vrot.lane.b32.xlu0 %v5599_v9, %s5472_s29 }
  0x4a   : > { %905 = vrot.lane.b32.xlu1 %v5601_v10, %s5472_s29 }
  0x4b   : > { %1087 = vrot.lane.b32.xlu0 %v5599_v9, %s5473_s30 }
  0x4e   : > { %903 = vrot.lane.b32.xlu1 %v5609_v12, %s5472_s29 }
  0x4f   : > { %1085 = vrot.lane.b32.xlu0 %v5607_v11, %s5473_s30 }
  0x52   : > { %901 = vrot.lane.b32.xlu1 %v5622_v15, %s5472_s29 }
  0x53   : > { %1083 = vrot.lane.b32.xlu0 %v5601_v10, %s5473_s30 }
  0x56   : > { %899 = vrot.lane.b32.xlu1 %v5624_v16, %s5472_s29 }
  0x57   : > { %1081 = vrot.lane.b32.xlu0 %v5609_v12, %s5473_s30 }
  0x5a   : > { %897 = vrot.lane.b32.xlu1 %v5634_v17, %s5472_s29 }
  0x5b   : > { %1079 = vrot.lane.b32.xlu0 %v5622_v15, %s5473_s30 }
  0x5e   : > { %895 = vrot.lane.b32.xlu1 %v5636_v18, %s5472_s29 }
  0x5f   : > { %1077 = vrot.lane.b32.xlu0 %v5624_v16, %s5473_s30 }
  0x62   : > { %1073 = vrot.lane.b32.xlu1 %v5636_v18, %s5473_s30 }
  0x63   : > { %1075 = vrot.lane.b32.xlu0 %v5634_v17, %s5473_s30 }
  0x66   : > { %1263 = vrot.lane.b32.xlu1 %v5607_v11, %s5474_s6 }
  0x67   : > { %1265 = vrot.lane.b32.xlu0 %v5599_v9, %s5474_s6 }
  0x6a   : > { %1261 = vrot.lane.b32.xlu1 %v5601_v10, %s5474_s6 }
  0x6b   : > { %1443 = vrot.lane.b32.xlu0 %v5599_v9, %s5475_s7 }
  0x6e   : > { %1259 = vrot.lane.b32.xlu1 %v5609_v12, %s5474_s6 }
  0x6f   : > { %1441 = vrot.lane.b32.xlu0 %v5607_v11, %s5475_s7 }
  0x72   : > { %1257 = vrot.lane.b32.xlu1 %v5622_v15, %s5474_s6 }
  0x73   : > { %1439 = vrot.lane.b32.xlu0 %v5601_v10, %s5475_s7 }
  0x76   : > { %1255 = vrot.lane.b32.xlu1 %v5624_v16, %s5474_s6 }
  0x77   : > { %1437 = vrot.lane.b32.xlu0 %v5609_v12, %s5475_s7 }
  0x7a   : > { %1253 = vrot.lane.b32.xlu1 %v5634_v17, %s5474_s6 }
  0x7b   : > { %1435 = vrot.lane.b32.xlu0 %v5622_v15, %s5475_s7 }
  0x7e   : > { %1251 = vrot.lane.b32.xlu1 %v5636_v18, %s5474_s6 }
  0x7f   : > { %1433 = vrot.lane.b32.xlu0 %v5624_v16, %s5475_s7 }
  0x82   : > { %1429 = vrot.lane.b32.xlu1 %v5636_v18, %s5475_s7 }
  0x83   : > { %1431 = vrot.lane.b32.xlu0 %v5634_v17, %s5475_s7 }
  0x86   : > { %1619 = vrot.lane.b32.xlu1 %v5607_v11, %s5476_s8 }
  0x87   : > { %1621 = vrot.lane.b32.xlu0 %v5599_v9, %s5476_s8 }
  0x8a   : > { %1617 = vrot.lane.b32.xlu1 %v5601_v10, %s5476_s8 }
  0x8b   : > { %1799 = vrot.lane.b32.xlu0 %v5599_v9, %s5477_s10 }
  0x8e   : > { %1615 = vrot.lane.b32.xlu1 %v5609_v12, %s5476_s8 }
  0x8f   : > { %1797 = vrot.lane.b32.xlu0 %v5607_v11, %s5477_s10  ;;  %v4520_v11 = vld [vmem:[%s5557_s12 + $0x50] sm:$0xff]  }
  0x92   : > { %1613 = vrot.lane.b32.xlu1 %v5622_v15, %s5476_s8 }
  0x93   : > { %1795 = vrot.lane.b32.xlu0 %v5601_v10, %s5477_s10  ;;  %v4261_v10 = vunpack.c.l.bf16 %v4519_v6 }
  0x96   : > { %1611 = vrot.lane.b32.xlu1 %v5624_v16, %s5476_s8 }
  0x97   : > { %1793 = vrot.lane.b32.xlu0 %v5609_v12, %s5477_s10  ;;  %v4262_v12 = vunpack.c.h.bf16 %v4519_v6  ;;  %v4531_v6 = vld [vmem:[%s5557_s12 + $0xa8] sm:$0xff]  }
  0x98   : > { %v428_v34 = vpop.permute.xlu1 %427 }
  0x99   : > { %v432_v33 = vpop.permute.xlu0 %431 }
  0x9a   : > { %4869 = vmatprep.subr.mxu0 %v432_v33  ;;  %1609 = vrot.lane.b32.xlu1 %v5634_v17, %s5476_s8 }
  0x9b   : > { %4870 = vmatpush3.msra.mxu0 %v432_v33  ;;  %1791 = vrot.lane.b32.xlu0 %v5622_v15, %s5477_s10  ;;  %v4265_v15 = vunpack.c.l.bf16 %v4520_v11 }
  0x9c   : > { %v426_v36 = vpop.permute.xlu1 %425 }
  0x9d   : > { %v430_v35 = vpop.permute.xlu0 %429 }
  0x9e   : > { %4871 = vmatprep.subr.mxu0 %v430_v35  ;;  %1607 = vrot.lane.b32.xlu1 %v5636_v18, %s5476_s8 }
  0x9f   : > { %4872 = vmatpush3.msra.mxu0 %v430_v35  ;;  %1789 = vrot.lane.b32.xlu0 %v5624_v16, %s5477_s10  ;;  %v4521_v16 = vld [vmem:[%s5557_s12 + $0x58] sm:$0xff]   ;;  %v4277_v35 = vunpack.c.l.bf16 %v4523_v30 }
  0xa0   : > { %4873 = vmatprep.subr.mxu0 %v428_v34  ;;  %v422_v38 = vpop.permute.xlu1 %421  ;;  %v4269_v20 = vunpack.c.l.bf16 %v4521_v16  ;;  %v4270_v22 = vunpack.c.h.bf16 %v4521_v16 }
  0xa1   : > { %4874 = vmatpush3.msra.mxu0 %v428_v34  ;;  %v424_v37 = vpop.permute.xlu0 %423 }
  0xa2   : > { %4875 = vmatprep.subr.mxu0 %v426_v36  ;;  %1785 = vrot.lane.b32.xlu1 %v5636_v18, %s5477_s10 }
  0xa3   : > { %4876 = vmatpush3.msra.mxu0 %v426_v36  ;;  %1787 = vrot.lane.b32.xlu0 %v5634_v17, %s5477_s10  ;;  %v4266_v17 = vunpack.c.h.bf16 %v4520_v11  ;;  %v4524_v36 = vld [vmem:[%s5557_s12 + $0x70] sm:$0xff]  }
  0xa4   : > { %4877 = vmatprep.subr.mxu0 %v424_v37  ;;  %v418_v40 = vpop.permute.xlu1 %417  ;;  %v4281_v41 = vunpack.c.l.bf16 %v4524_v36  ;;  %v4532_v11 = vld [vmem:[%s5557_s12 + $0xb0] sm:$0xff]  }
  0xa5   : > { %4878 = vmatpush3.msra.mxu0 %v424_v37  ;;  %v420_v39 = vpop.permute.xlu0 %419  ;;  %v4278_v37 = vunpack.c.h.bf16 %v4523_v30  ;;  %v4313_v16 = vunpack.c.l.bf16 %v4532_v11 }
  0xa6   : > { %4879 = vmatprep.subr.mxu0 %v422_v38  ;;  %1986 = vperm.xlu1 %5428, %v1952_v42   ;;  %v4525_v42 = vld [vmem:[%s5557_s12 + $0x78] sm:$0xff]  }
  0xa7   : > { %4880 = vmatpush3.msra.mxu0 %v422_v38  ;;  %1991 = vperm.xlu0 %5427, %v1953_v44   ;;  %v4527_v38 = vld [vmem:[%s5557_s12 + $0x88] sm:$0xff]   ;;  %v4282_v44 = vunpack.c.h.bf16 %v4524_v36 }
  0xa8   : > { %4881 = vmatprep.subr.mxu0 %v420_v39  ;;  %v730_v47 = vpop.permute.xlu1 %729  ;;  %v4293_v43 = vunpack.c.l.bf16 %v4527_v38 }
  0xa9   : > { %4882 = vmatpush3.msra.mxu0 %v420_v39  ;;  %v732_v46 = vpop.permute.xlu0 %731 }
  0xaa   : > { %4883 = vmatprep.subr.mxu0 %v418_v40  ;;  %1981 = vperm.xlu1 %5428, %v1951_v50   ;;  %v4294_v50 = vunpack.c.h.bf16 %v4527_v38  ;;  %v4542_v38 = vld [vmem:[%s5557_s12 + $0x100] sm:$0xff]  }
  0xab   : > { %4884 = vmatpush3.msra.mxu0 %v418_v40  ;;  %1976 = vperm.xlu0 %5427, %v1950_v52  }
  0xac   : > { %4925 = vmatprep.subr.mxu0 %v732_v46  ;;  %4886 = vmatmul.mubr.msk.f32.vlgmr.msra.gmra.mxu0 %vm441_vm1, %v4242_v45  ;;  %v726_v54 = vpop.permute.xlu1 %725 }
  0xad   : > { %v728_v53 = vpop.permute.xlu0 %727  ;;  %4926 = vmatpush3.msra.mxu0 %v732_v46  ;;  %4888 = vmatprep.mubr.msk.f32.mxu0 %vm441_vm1, %v4245_v48  ;;  %v4528_v48 = vld [vmem:[%s5557_s12 + $0x90] sm:$0xff]  }
  0xae   : > { %4927 = vmatprep.subr.mxu0 %v730_v47  ;;  %1971 = vperm.xlu1 %5428, %v1949_v57   ;;  %v4298_v57 = vunpack.c.h.bf16 %v4528_v48 }
  0xaf   : > { %4928 = vmatpush3.msra.mxu0 %v730_v47  ;;  %1966 = vperm.xlu0 %5427, %v1948_v59   ;;  %v4285_v47 = vunpack.c.l.bf16 %v4525_v42 }
  0xb0   : > { %4929 = vmatprep.subr.mxu0 %v728_v53  ;;  %4889 = vmatmul.mubr.msk.f32.gmra.mxu0 %vm441_vm1, %v4246_v51  ;;  %v722_v61 = vpop.permute.xlu1 %721  ;;  %v4286_v51 = vunpack.c.h.bf16 %v4525_v42 }
  0xb1   : > { %v724_v60 = vpop.permute.xlu0 %723  ;;  %4930 = vmatpush3.msra.mxu0 %v728_v53  ;;  %4891 = vmatprep.mubr.msk.f32.mxu0 %vm441_vm1, %v4249_v55  ;;  %v4305_v55 = vunpack.c.l.bf16 %v5826_v49 }
  0xb2   : > { %4931 = vmatprep.subr.mxu0 %v726_v54  ;;  %1961 = vperm.xlu1 %5428, %v1947_v0  }
  0xb3   : > { %4932 = vmatpush3.msra.mxu0 %v726_v54  ;;  %1956 = vperm.xlu0 %5427, %v1946_v2   ;;  %v4297_v54 = vunpack.c.l.bf16 %v4528_v48 }
  0xb4   : > { %4933 = vmatprep.subr.mxu0 %v724_v60  ;;  %4892 = vmatmul.mubr.msk.f32.gmra.mxu0 %vm441_vm1, %v4250_v58  ;;  %v718_v4 = vpop.permute.xlu1 %717 }
  0xb5   : > { %v720_v3 = vpop.permute.xlu0 %719  ;;  %4934 = vmatpush3.msra.mxu0 %v724_v60  ;;  %4894 = vmatprep.mubr.msk.f32.mxu0 %vm441_vm1, %v4253_v62  ;;  %v4301_v60 = vunpack.c.l.bf16 %v4529_v56  ;;  %v4302_v62 = vunpack.c.h.bf16 %v4529_v56  ;;  %v4354_v56 = vunpack.c.h.bf16 %v4542_v38 }
  0xb6   : > { %4935 = vmatprep.subr.mxu0 %v722_v61 }
  0xb7   : > { %4936 = vmatpush3.msra.mxu0 %v722_v61  ;;  %v4534_v61 = vld [vmem:[%s5557_s12 + $0xc0] sm:$0xff]  }
  0xb8   : > { %4937 = vmatprep.subr.mxu0 %v720_v3  ;;  %4895 = vmatmul.mubr.msk.f32.gmra.mxu0 %vm441_vm1, %v4254_v1  ;;  %v908_v9 = vpop.permute.xlu1 %907  ;;  %v4321_v1 = vunpack.c.l.bf16 %v4534_v61 }
  0xb9   : > { %v910_v8 = vpop.permute.xlu0 %909  ;;  %4938 = vmatpush3.msra.mxu0 %v720_v3  ;;  %4941 = vmatprep.mubr.msk.f32.mxu0 %vm441_vm1, %v4257_v5 }
  0xba   : > { %4939 = vmatprep.subr.mxu0 %v718_v4  ;;  %4953 = vmatprep.subr.mxu1 %v910_v8 }
  0xbb   : > { %4940 = vmatpush3.msra.mxu0 %v718_v4  ;;  %4954 = vmatpush3.msra.mxu1 %v910_v8 }
  0xbc   : > { %4955 = vmatprep.subr.mxu1 %v908_v9  ;;  %4942 = vmatmul.mubr.msk.f32.vlgmr.msra.gmra.mxu0 %vm441_vm1, %v4258_v7  ;;  %v906_v14 = vpop.permute.xlu1 %905  ;;  %v4306_v7 = vunpack.c.h.bf16 %v5826_v49 }
  0xbd   : > { %v1088_v13 = vpop.permute.xlu0 %1087  ;;  %4956 = vmatpush3.msra.mxu1 %v908_v9  ;;  %4944 = vmatprep.mubr.msk.f32.mxu0 %vm441_vm1, %v4261_v10  ;;  %v4309_v10 = vunpack.c.l.bf16 %v4531_v6 }
  0xbe   : > { %4981 = vmatprep.subr.mxu0 %v1088_v13  ;;  %4957 = vmatprep.subr.mxu1 %v906_v14 }
  0xbf   : > { %4982 = vmatpush3.msra.mxu0 %v1088_v13  ;;  %4958 = vmatpush3.msra.mxu1 %v906_v14  ;;  %v4535_v13 = vld [vmem:[%s5557_s12 + $0xc8] sm:$0xff]  }
  0xc0   : > { %4945 = vmatmul.mubr.msk.f32.gmra.mxu0 %vm441_vm1, %v4262_v12  ;;  %v904_v19 = vpop.permute.xlu1 %903  ;;  %v4310_v12 = vunpack.c.h.bf16 %v4531_v6 }
  0xc1   : > { %v1086_v18 = vpop.permute.xlu0 %1085  ;;  %4947 = vmatprep.mubr.msk.f32.mxu0 %vm441_vm1, %v4265_v15  ;;  %4959 = vmatprep.subr.mxu1 %v904_v19 }
  0xc2   : > { %4983 = vmatprep.subr.mxu0 %v1086_v18  ;;  %4960 = vmatpush3.msra.mxu1 %v904_v19  ;;  %v4325_v19 = vunpack.c.l.bf16 %v4535_v13 }
  0xc3   : > { %4984 = vmatpush3.msra.mxu0 %v1086_v18  ;;  %v4533_v18 = vld [vmem:[%s5557_s12 + $0xb8] sm:$0xff]  }
  0xc4   : > { %4948 = vmatmul.mubr.msk.f32.gmra.mxu0 %vm441_vm1, %v4266_v17  ;;  %v902_v24 = vpop.permute.xlu1 %901  ;;  %v4322_v17 = vunpack.c.h.bf16 %v4534_v61 }
  0xc5   : > { %v1084_v23 = vpop.permute.xlu0 %1083  ;;  %4950 = vmatprep.mubr.msk.f32.mxu0 %vm441_vm1, %v4269_v20  ;;  %4961 = vmatprep.subr.mxu1 %v902_v24  ;;  %v4314_v20 = vunpack.c.h.bf16 %v4532_v11 }
  0xc6   : > { %4985 = vmatprep.subr.mxu0 %v1084_v23  ;;  %4962 = vmatpush3.msra.mxu1 %v902_v24  ;;  %v4536_v24 = vld [vmem:[%s5557_s12 + $0xd0] sm:$0xff]  }
  0xc7   : > { %4986 = vmatpush3.msra.mxu0 %v1084_v23  ;;  %v4317_v23 = vunpack.c.l.bf16 %v4533_v18 }
  0xc8   : > { %4951 = vmatmul.mubr.msk.f32.gmra.mxu0 %vm441_vm1, %v4270_v22  ;;  %v900_v27 = vpop.permute.xlu1 %899 }
  0xc9   : > { %v1082_v26 = vpop.permute.xlu0 %1081  ;;  %4997 = vmatprep.mubr.msk.f32.mxu0 %vm441_vm1, %v4289_v25  ;;  %4963 = vmatprep.subr.mxu1 %v900_v27  ;;  %v4326_v25 = vunpack.c.h.bf16 %v4535_v13 }
  0xca   : > { %4987 = vmatprep.subr.mxu0 %v1082_v26  ;;  %4964 = vmatpush3.msra.mxu1 %v900_v27  ;;  %v4318_v27 = vunpack.c.h.bf16 %v4533_v18 }
  0xcb   : > { %4988 = vmatpush3.msra.mxu0 %v1082_v26  ;;  %v5854_v26 = vld [vmem:[%s5557_s12 + $0xe0] sm:$0xff]  }
  0xcc   : > { %v898_v29 = vpop.permute.xlu1 %897  ;;  %v4338_v48 = vunpack.c.h.bf16 %v5854_v26 }
  0xcd   : > { %v1080_v28 = vpop.permute.xlu0 %1079  ;;  %4965 = vmatprep.subr.mxu1 %v898_v29 }
  0xce   : > { %4989 = vmatprep.subr.mxu0 %v1080_v28  ;;  %4966 = vmatpush3.msra.mxu1 %v898_v29 }
  0xcf   : > { %4990 = vmatpush3.msra.mxu0 %v1080_v28  ;;  %v4329_v28 = vunpack.c.l.bf16 %v4536_v24 }
  0xd0   : > { %v896_v34 = vpop.permute.xlu1 %895 }
  0xd1   : > { %v1078_v33 = vpop.permute.xlu0 %1077  ;;  %4967 = vmatprep.subr.mxu1 %v896_v34 }
  0xd2   : > { %4991 = vmatprep.subr.mxu0 %v1078_v33  ;;  %4968 = vmatpush3.msra.mxu1 %v896_v34  ;;  %v4330_v34 = vunpack.c.h.bf16 %v4536_v24 }
  0xd3   : > { %4992 = vmatpush3.msra.mxu0 %v1078_v33  ;;  %4970 = vmatmul.mubr.msk.f32.vlgmr.msra.gmra.mxu1 %vm441_vm1, %v4274_v32  ;;  %v4537_v32 = vld [vmem:[%s5557_s12 + $0xd8] sm:$0xff]   ;;  %v4337_v33 = vunpack.c.l.bf16 %v5854_v26 }
  0xd4   : > { %v1074_v40 = vpop.permute.xlu1 %1073  ;;  %4972 = vmatprep.mubr.msk.f32.mxu1 %vm441_vm1, %v4277_v35  ;;  %v4333_v35 = vunpack.c.l.bf16 %v4537_v32 }
  0xd5   : > { %v1076_v39 = vpop.permute.xlu0 %1075 }
  0xd6   : > { %4993 = vmatprep.subr.mxu0 %v1076_v39 }
  0xd7   : > { %4994 = vmatpush3.msra.mxu0 %v1076_v39  ;;  %4973 = vmatmul.mubr.msk.f32.gmra.mxu1 %vm441_vm1, %v4278_v37  ;;  %v4334_v39 = vunpack.c.h.bf16 %v4537_v32 }
  0xd8   : > { %4995 = vmatprep.subr.mxu0 %v1074_v40  ;;  %v1264_v46 = vpop.permute.xlu1 %1263  ;;  %4975 = vmatprep.mubr.msk.f32.mxu1 %vm441_vm1, %v4281_v41 }
  0xd9   : > { %v1266_v45 = vpop.permute.xlu0 %1265  ;;  %4996 = vmatpush3.msra.mxu0 %v1074_v40  ;;  %v4353_v40 = vunpack.c.l.bf16 %v4542_v38 }
  0xda   : > { %5009 = vmatprep.subr.mxu1 %v1266_v45  ;;  %4998 = vmatmul.mubr.msk.f32.vlgmr.msra.gmra.mxu0 %vm441_vm1, %v4290_v31 }
  0xdb   : > { %5010 = vmatpush3.msra.mxu1 %v1266_v45  ;;  %5000 = vmatprep.mubr.msk.f32.mxu0 %vm441_vm1, %v4293_v43 }
  0xdc   : > { %5011 = vmatprep.subr.mxu1 %v1264_v46  ;;  %4976 = vmatmul.mubr.msk.f32.gmra.mxu1 %vm441_vm1, %v4282_v44  ;;  %v1262_v53 = vpop.permute.xlu1 %1261 }
  0xdd   : > { %v1444_v52 = vpop.permute.xlu0 %1443  ;;  %5012 = vmatpush3.msra.mxu1 %v1264_v46  ;;  %4978 = vmatprep.mubr.msk.f32.mxu1 %vm441_vm1, %v4285_v47  ;;  %v4539_v46 = vld [vmem:[%s5557_s12 + $0xe8] sm:$0xff]  }
  0xde   : > { %5037 = vmatprep.subr.mxu0 %v1444_v52  ;;  %5013 = vmatprep.subr.mxu1 %v1262_v53 }
  0xdf   : > { %5038 = vmatpush3.msra.mxu0 %v1444_v52  ;;  %5014 = vmatpush3.msra.mxu1 %v1262_v53  ;;  %v4543_v52 = vld [vmem:[%s5557_s12 + $0x108] sm:$0xff]  }
  0xe0   : > { %5001 = vmatmul.mubr.msk.f32.gmra.mxu0 %vm441_vm1, %v4294_v50  ;;  %4979 = vmatmul.mubr.msk.f32.gmra.mxu1 %vm441_vm1, %v4286_v51  ;;  %v1260_v59 = vpop.permute.xlu1 %1259  ;;  %v4341_v50 = vunpack.c.l.bf16 %v4539_v46  ;;  %v4540_v51 = vld [vmem:[%s5557_s12 + $0xf0] sm:$0xff]  }
  0xe1   : > { %v1442_v58 = vpop.permute.xlu0 %1441  ;;  %5003 = vmatprep.mubr.msk.f32.mxu0 %vm441_vm1, %v4297_v54  ;;  %5025 = vmatprep.mubr.msk.f32.mxu1 %vm441_vm1, %v4305_v55  ;;  %v4342_v54 = vunpack.c.h.bf16 %v4539_v46  ;;  %v4346_v61 = vunpack.c.h.bf16 %v4540_v51 }
  0xe2   : > { %5039 = vmatprep.subr.mxu0 %v1442_v58  ;;  %5015 = vmatprep.subr.mxu1 %v1260_v59 }
  0xe3   : > { %5040 = vmatpush3.msra.mxu0 %v1442_v58  ;;  %5016 = vmatpush3.msra.mxu1 %v1260_v59  ;;  %v4357_v58 = vunpack.c.l.bf16 %v4543_v52  ;;  %v4541_v59 = vld [vmem:[%s5557_s12 + $0xf8] sm:$0xff]  }
  0xe4   : > { %5004 = vmatmul.mubr.msk.f32.gmra.mxu0 %vm441_vm1, %v4298_v57  ;;  %v1258_v0 = vpop.permute.xlu1 %1257  ;;  %v4345_v57 = vunpack.c.l.bf16 %v4540_v51 }
  0xe5   : > { %v1440_v63 = vpop.permute.xlu0 %1439  ;;  %5006 = vmatprep.mubr.msk.f32.mxu0 %vm441_vm1, %v4301_v60  ;;  %5017 = vmatprep.subr.mxu1 %v1258_v0  ;;  %v4544_v60 = vld [vmem:[%s5557_s12 + $0x110] sm:$0xff]  }
  0xe6   : > { %5041 = vmatprep.subr.mxu0 %v1440_v63  ;;  %5018 = vmatpush3.msra.mxu1 %v1258_v0  ;;  %v4361_v0 = vunpack.c.l.bf16 %v4544_v60 }
  0xe7   : > { %5042 = vmatpush3.msra.mxu0 %v1440_v63  ;;  %v4349_v63 = vunpack.c.l.bf16 %v4541_v59 }
  0xe8   : > { %5007 = vmatmul.mubr.msk.f32.gmra.mxu0 %vm441_vm1, %v4302_v62  ;;  %v1256_v3 = vpop.permute.xlu1 %1255  ;;  %v4358_v62 = vunpack.c.h.bf16 %v4543_v52 }
  0xe9   : > { %v1438_v2 = vpop.permute.xlu0 %1437  ;;  %5053 = vmatprep.mubr.msk.f32.mxu0 %vm441_vm1, %v4321_v1  ;;  %5019 = vmatprep.subr.mxu1 %v1256_v3  ;;  %v4545_v1 = vld [vmem:[%s5557_s12 + $0x118] sm:$0xff]  }
  0xea   : > { %5043 = vmatprep.subr.mxu0 %v1438_v2  ;;  %5020 = vmatpush3.msra.mxu1 %v1256_v3  ;;  %v4362_v3 = vunpack.c.h.bf16 %v4544_v60 }
  0xeb   : > { %5044 = vmatpush3.msra.mxu0 %v1438_v2  ;;  %v4350_v2 = vunpack.c.h.bf16 %v4541_v59 }
  0xec   : > { %v1254_v5 = vpop.permute.xlu1 %1253 }
  0xed   : > { %v1436_v4 = vpop.permute.xlu0 %1435  ;;  %5021 = vmatprep.subr.mxu1 %v1254_v5 }
  0xee   : > { %5045 = vmatprep.subr.mxu0 %v1436_v4  ;;  %5022 = vmatpush3.msra.mxu1 %v1254_v5  ;;  %v4366_v5 = vunpack.c.h.bf16 %v4545_v1 }
  0xef   : > { %5046 = vmatpush3.msra.mxu0 %v1436_v4  ;;  %v4365_v4 = vunpack.c.l.bf16 %v4545_v1 }
  0xf0   : > { %v1252_v9 = vpop.permute.xlu1 %1251 }
  0xf1   : > { %v1434_v8 = vpop.permute.xlu0 %1433  ;;  %5023 = vmatprep.subr.mxu1 %v1252_v9 }
  0xf2   : > { %5047 = vmatprep.subr.mxu0 %v1434_v8  ;;  %5024 = vmatpush3.msra.mxu1 %v1252_v9 }
  0xf3   : > { %5048 = vmatpush3.msra.mxu0 %v1434_v8  ;;  %5026 = vmatmul.mubr.msk.f32.vlgmr.msra.gmra.mxu1 %vm441_vm1, %v4306_v7 }
  0xf4   : > { %v1430_v15 = vpop.permute.xlu1 %1429  ;;  %5028 = vmatprep.mubr.msk.f32.mxu1 %vm441_vm1, %v4309_v10 }
  0xf5   : > { %v1432_v14 = vpop.permute.xlu0 %1431 }
  0xf6   : > { %5049 = vmatprep.subr.mxu0 %v1432_v14 }
  0xf7   : > { %5050 = vmatpush3.msra.mxu0 %v1432_v14  ;;  %5029 = vmatmul.mubr.msk.f32.gmra.mxu1 %vm441_vm1, %v4310_v12  ;;  %v5897_v13 = vpop.f32.mrf.mxu1 }
  0xf8   : > { %5051 = vmatprep.subr.mxu0 %v1430_v15  ;;  %v1620_v22 = vpop.permute.xlu1 %1619  ;;  %5031 = vmatprep.mubr.msk.f32.mxu1 %vm441_vm1, %v4313_v16 }
  0xf9   : > { %v1622_v21 = vpop.permute.xlu0 %1621  ;;  %5052 = vmatpush3.msra.mxu0 %v1430_v15  ;;  %v5899_v15 = vpop.f32.mrf.mxu1 }
  0xfa   : > { %5054 = vmatmul.mubr.msk.f32.vlgmr.msra.gmra.mxu0 %vm441_vm1, %v4322_v17  ;;  %5065 = vmatprep.subr.mxu1 %v1622_v21 }
  0xfb   : > { %5066 = vmatpush3.msra.mxu1 %v1622_v21  ;;  %5056 = vmatprep.mubr.msk.f32.mxu0 %vm441_vm1, %v4325_v19  ;;  %v4918_v17 = vpop.f32.mrf.mxu1 }
  0xfc   : > { %5032 = vmatmul.mubr.msk.f32.gmra.mxu1 %vm441_vm1, %v4314_v20  ;;  %5067 = vmatprep.subr.mxu1 %v1620_v22  ;;  %v1618_v30 = vpop.permute.xlu1 %1617 }
  0xfd   : > { %v1800_v29 = vpop.permute.xlu0 %1799  ;;  %5068 = vmatpush3.msra.mxu1 %v1620_v22  ;;  %5034 = vmatprep.mubr.msk.f32.mxu1 %vm441_vm1, %v4317_v23  ;;  %v671_v19 = vpop.f32.mrf.mxu1 }
  0xfe   : > { %5057 = vmatmul.mubr.msk.f32.gmra.mxu0 %vm441_vm1, %v4326_v25  ;;  %5093 = vmatprep.subr.mxu0 %v1800_v29 }
  0xff   : > { %5069 = vmatprep.subr.mxu1 %v1618_v30  ;;  %5094 = vmatpush3.msra.mxu0 %v1800_v29  ;;  %v4921_v21 = vpop.f32.mrf.mxu1 }
 0x100   : > { %5035 = vmatmul.mubr.msk.f32.gmra.mxu1 %vm441_vm1, %v4318_v27  ;;  %5059 = vmatprep.mubr.msk.f32.mxu0 %vm441_vm1, %v4329_v28  ;;  %v1616_v37 = vpop.permute.xlu1 %1615 }
 0x101   : > { %5070 = vmatpush3.msra.mxu1 %v1618_v30  ;;  %v1798_v36 = vpop.permute.xlu0 %1797  ;;  %5081 = vmatprep.mubr.msk.f32.mxu1 %vm441_vm1, %v4337_v33  ;;  %v681_v23 = vpop.f32.mrf.mxu1 }
 0x102   : > { %5060 = vmatmul.mubr.msk.f32.gmra.mxu0 %vm441_vm1, %v4330_v34  ;;  %5095 = vmatprep.subr.mxu0 %v1798_v36 }
 0x103   : > { %5071 = vmatprep.subr.mxu1 %v1616_v37  ;;  %5096 = vmatpush3.msra.mxu0 %v1798_v36  ;;  %v4924_v25 = vpop.f32.mrf.mxu1 }
 0x104   : > { %5072 = vmatpush3.msra.mxu1 %v1616_v37  ;;  %5062 = vmatprep.mubr.msk.f32.mxu0 %vm441_vm1, %v4333_v35  ;;  %v1614_v31 = vpop.permute.xlu1 %1613 }
 0x105   : > { %v1796_v41 = vpop.permute.xlu0 %1795  ;;  %5073 = vmatprep.subr.mxu1 %v1614_v31  ;;  %v691_v27 = vpop.f32.mrf.mxu1 }
 0x106   : > { %5063 = vmatmul.mubr.msk.f32.gmra.mxu0 %vm441_vm1, %v4334_v39  ;;  %5097 = vmatprep.subr.mxu0 %v1796_v41 }
 0x107   : > { %5098 = vmatpush3.msra.mxu0 %v1796_v41  ;;  %5074 = vmatpush3.msra.mxu1 %v1614_v31 }
 0x108   : > { %5109 = vmatprep.mubr.msk.f32.mxu0 %vm441_vm1, %v4353_v40  ;;  %v1612_v43 = vpop.permute.xlu1 %1611 }
 0x109   : > { %v1794_v42 = vpop.permute.xlu0 %1793  ;;  %5075 = vmatprep.subr.mxu1 %v1612_v43 }
 0x10a   : > { %5099 = vmatprep.subr.mxu0 %v1794_v42  ;;  %5076 = vmatpush3.msra.mxu1 %v1612_v43 }
 0x10b   : > { %5100 = vmatpush3.msra.mxu0 %v1794_v42 }
 0x10c   : > { %v1610_v45 = vpop.permute.xlu1 %1609 }
 0x10d   : > { %v1792_v44 = vpop.permute.xlu0 %1791  ;;  %5077 = vmatprep.subr.mxu1 %v1610_v45 }
 0x10e   : > { %5101 = vmatprep.subr.mxu0 %v1792_v44  ;;  %5078 = vmatpush3.msra.mxu1 %v1610_v45 }
 0x10f   : > { %5102 = vmatpush3.msra.mxu0 %v1792_v44 }
 0x110   : > { %v1608_v49 = vpop.permute.xlu1 %1607 }
 0x111   : > { %v1790_v47 = vpop.permute.xlu0 %1789  ;;  %5079 = vmatprep.subr.mxu1 %v1608_v49 }
 0x112   : > { %5103 = vmatprep.subr.mxu0 %v1790_v47  ;;  %5080 = vmatpush3.msra.mxu1 %v1608_v49  ;;  %v346_v49 = vlaneseq }
 0x113   : > { %5104 = vmatpush3.msra.mxu0 %v1790_v47  ;;  %5082 = vmatmul.mubr.msk.f32.vlgmr.msra.gmra.mxu1 %vm441_vm1, %v4338_v48 }
 0x114   : > { %v1786_v55 = vpop.permute.xlu1 %1785  ;;  %5084 = vmatprep.mubr.msk.f32.mxu1 %vm441_vm1, %v4341_v50  ;;  %v347_v52 = vand.u32 127, %v346_v49 }
 0x115   : > { %v1788_v53 = vpop.permute.xlu0 %1787 }
 0x116   : > { %5105 = vmatprep.subr.mxu0 %v1788_v53 }
 0x117   : > { %5106 = vmatpush3.msra.mxu0 %v1788_v53  ;;  %5085 = vmatmul.mubr.msk.f32.gmra.mxu1 %vm441_vm1, %v4342_v54 }
 0x118   : > { %5107 = vmatprep.subr.mxu0 %v1786_v55  ;;  %5087 = vmatprep.mubr.msk.f32.mxu1 %vm441_vm1, %v4345_v57 }
 0x119   : > { %5108 = vmatpush3.msra.mxu0 %v1786_v55  ;;  %v348_v55 = vadd.s32 7, %v347_v52 }
 0x11a   : > { %5110 = vmatmul.mubr.msk.f32.vlgmr.msra.gmra.mxu0 %vm441_vm1, %v4354_v56 }
 0x11b   : > { %5112 = vmatprep.mubr.msk.f32.mxu0 %vm441_vm1, %v4357_v58  ;;  %5088 = vmatmul.mubr.msk.f32.gmra.mxu1 %vm441_vm1, %v4346_v61  ;;  %v5943_v58 = vmul.u32.u64.low 2863311531, %v348_v55  ;;  %v5944_v59 = vmul.u32.u64.high 2863311531, %v348_v55, %v5943_v58 }
 0x11c   : > { %5090 = vmatprep.mubr.msk.f32.mxu1 %vm441_vm1, %v4349_v63 }
 0x11e   : > { %5113 = vmatmul.mubr.msk.f32.gmra.mxu0 %vm441_vm1, %v4358_v62 }
 0x11f   : > { %5115 = vmatprep.mubr.msk.f32.mxu0 %vm441_vm1, %v4361_v0  ;;  %5091 = vmatmul.mubr.msk.f32.gmra.mxu1 %vm441_vm1, %v4350_v2  ;;  %v355_v0 = vshrl.u32 %v5944_v59, 2 }
 0x121   : > { %v356_v52 = vmul.u32 6, %v355_v0 }
 0x122   : > { %5116 = vmatmul.mubr.msk.f32.gmra.mxu0 %vm441_vm1, %v4362_v3 }
 0x123   : > { %5118 = vmatprep.mubr.msk.f32.mxu0 %vm441_vm1, %v4365_v4 }
 0x126   : > { %5119 = vmatmul.mubr.msk.f32.gmra.mxu0 %vm441_vm1, %v4366_v5 }
 0x16c   : > { %v5891_v6 = vpop.f32.mrf.mxu0 }
 0x16d   : > { %v667_v59 = vadd.f32 %v5897_v13, %v5891_v6  ;;  %v5962_v6 = vpop.permute.xlu1 %1986 }
 0x16e   : > { %v5893_v7 = vpop.f32.mrf.mxu0 }
 0x170   : > { %v4890_v8 = vpop.f32.mrf.mxu0 }
 0x171   : > { %v677_v5 = vadd.f32 %v4918_v17, %v4890_v8 }
 0x172   : > { %v5895_v9 = vpop.f32.mrf.mxu0 }
 0x173   : > { %v672_v58 = vadd.f32 %v671_v19, %v5895_v9 }
 0x174   : > { %v4893_v10 = vpop.f32.mrf.mxu0 }
 0x175   : > { %v687_v1 = vadd.f32 %v4921_v21, %v4893_v10 }
 0x176   : > { %v552_v11 = vpop.f32.mrf.mxu0 }
 0x177   : > { %v682_v2 = vadd.f32 %v681_v23, %v552_v11 }
 0x178   : > { %v4896_v12 = vpop.f32.mrf.mxu0 }
 0x179   : > { %v697_v3 = vadd.f32 %v4924_v25, %v4896_v12  ;;  %v357_v12 = vsub.s32 %v348_v55, %v356_v52 }
 0x17a   : > { %v562_v14 = vpop.f32.mrf.mxu0 }
 0x17b   : > { %vm360_vm2 = vcmp.ne.s32.totalorder %v357_v12, 0  ;;  %vm361_vm3 = vcmp.lt.s32.totalorder %v357_v12, 0 }
 0x17c   : > { %v5901_v16 = vpop.f32.mrf.mxu0  ;;  %vm362_vm4 = vmand %vm361_vm3, %vm360_vm2 }
 0x17e   : > { %v5903_v18 = vpop.f32.mrf.mxu0 }
 0x180   : > { %v4946_v20 = vpop.f32.mrf.mxu0 }
 0x181   : > { %v873_v10 = vadd.f32 %v4946_v20, %v677_v5 }
 0x182   : > { %v5905_v22 = vpop.f32.mrf.mxu0 }
 0x183   : > { %v872_v23 = vadd.f32 %v5905_v22, %v672_v58 }
 0x184   : > { %v4949_v24 = vpop.f32.mrf.mxu0 }
 0x186   : > { %v851_v26 = vpop.f32.mrf.mxu0 }
 0x188   : > { %v4952_v28 = vpop.f32.mrf.mxu0 }
 0x18a   : > { %v861_v30 = vpop.f32.mrf.mxu0 }
 0x193   : > { %v5907_v29 = vpop.f32.mrf.mxu1 }
 0x195   : > { %v5909_v32 = vpop.f32.mrf.mxu1 }
 0x197   : > { %v4974_v34 = vpop.f32.mrf.mxu1 }
 0x199   : > { %v5915_v36 = vpop.f32.mrf.mxu1 }
 0x19a   : > { %v5911_v33 = vpop.f32.mrf.mxu0  ;;  %v1050_v22 = vadd.f32 %v5915_v36, %v872_v23 }
 0x19c   : > { %v5913_v35 = vpop.f32.mrf.mxu0  ;;  %v4977_v38 = vpop.f32.mrf.mxu1 }
 0x19d   : > { %6645 = vst [vmem:[#allocation4_spill] sm:$0xff] %v5913_v35 }
 0x19e   : > { %v1029_v40 = vpop.f32.mrf.mxu1 }
 0x1a0   : > { %v5917_v37 = vpop.f32.mrf.mxu0  ;;  %v4980_v31 = vpop.f32.mrf.mxu1 }
 0x1a2   : > { %v5919_v39 = vpop.f32.mrf.mxu0  ;;  %v1039_v43 = vpop.f32.mrf.mxu1 }
 0x1a4   : > { %v5005_v41 = vpop.f32.mrf.mxu0 }
 0x1a6   : > { %v5921_v42 = vpop.f32.mrf.mxu0 }
 0x1a8   : > { %v5923_v44 = vpop.f32.mrf.mxu0 }
 0x1aa   : > { %v5927_v46 = vpop.f32.mrf.mxu0 }
 0x1b3   : > { %v5925_v45 = vpop.f32.mrf.mxu1 }
 0x1b4   : > { %6646 = vst [vmem:[#allocation5_spill] sm:$0xff] %v5925_v45  ;;  %v877_v45 = vadd.f32 %v4952_v28, %v697_v3 }
 0x1b5   : > { %v5929_v47 = vpop.f32.mrf.mxu1 }
 0x1b6   : > { %6647 = vst [vmem:[#allocation6_spill] sm:$0xff] %v5929_v47  ;;  %v1055_v19 = vadd.f32 %v4980_v31, %v877_v45 }
 0x1b7   : > { %v5933_v50 = vpop.f32.mrf.mxu1 }
 0x1b9   : > { %v5937_v53 = vpop.f32.mrf.mxu1 }
 0x1ba   : > { %v5931_v48 = vpop.f32.mrf.mxu0 }
 0x1bb   : > { %6648 = vst [vmem:[#allocation7_spill] sm:$0xff] %v5931_v48  ;;  %v692_v48 = vadd.f32 %v691_v27, %v562_v14  ;;  %v662_v14 = vadd.f32 %v5899_v15, %v5893_v7  ;;  %v1051_v27 = vadd.f32 %v4974_v34, %v873_v10  ;;  %v6651_v10 = vld [vmem:[#allocation4_spill] sm:$0xff] }
 0x1bc   : > { %v5935_v51 = vpop.f32.mrf.mxu0  ;;  %v5033_v56 = vpop.f32.mrf.mxu1 }
 0x1bd   : > { %6649 = vst [vmem:[#allocation8_spill] sm:$0xff] %v5935_v51  ;;  %v875_v51 = vadd.f32 %v4949_v24, %v687_v1  ;;  %v876_v21 = vadd.f32 %v861_v30, %v692_v48  ;;  %v1992_v30 = vpop.permute.xlu0 %1991  ;;  %v870_v15 = vadd.f32 %v5903_v18, %v662_v14 }
 0x1be   : > { %v5939_v54 = vpop.f32.mrf.mxu0  ;;  %v1385_v60 = vpop.f32.mrf.mxu1 }
 0x1bf   : > { %v1053_v8 = vadd.f32 %v4977_v38, %v875_v51  ;;  %v1054_v28 = vadd.f32 %v1039_v43, %v876_v21  ;;  %v1048_v0 = vadd.f32 %v5909_v32, %v870_v15 }
 0x1c0   : > { %v5941_v57 = vpop.f32.mrf.mxu0  ;;  %v5036_v62 = vpop.f32.mrf.mxu1 }
 0x1c1   : > { %6650 = vst [vmem:[#allocation9_spill] sm:$0xff] %v5941_v57  ;;  %v874_v57 = vadd.f32 %v851_v26, %v682_v2  ;;  %v871_v26 = vadd.f32 %v5901_v16, %v667_v59  ;;  %v1231_v20 = vadd.f32 %v5005_v41, %v1053_v8  ;;  %v1233_v16 = vadd.f32 %v5923_v44, %v1055_v19  ;;  %v1977_v5 = vpop.permute.xlu0 %1976 }
 0x1c2   : > { %v5061_v61 = vpop.f32.mrf.mxu0  ;;  %v1395_v4 = vpop.f32.mrf.mxu1  ;;  %v1229_v41 = vadd.f32 %v5917_v37, %v1051_v27  ;;  %v1232_v51 = vadd.f32 %v5927_v46, %v1054_v28  ;;  %v6655_v19 = vld [vmem:[#allocation7_spill] sm:$0xff] }
 0x1c3   : > { %v1052_v9 = vadd.f32 %v1029_v40, %v874_v57  ;;  %v363_v40 = vadd.s32 6, %v357_v12  ;;  %v1409_v34 = vadd.f32 %v5033_v56, %v1231_v20  ;;  %v1049_v48 = vadd.f32 %v5907_v29, %v871_v26  ;;  %v1982_v56 = vpop.permute.xlu1 %1981 }
 0x1c4   : > { %v5946_v63 = vpop.f32.mrf.mxu0  ;;  %v1411_v18 = vadd.f32 %v5036_v62, %v1233_v16  ;;  %v1407_v44 = vadd.f32 %v5933_v50, %v1229_v41  ;;  %v1410_v3 = vadd.f32 %v1395_v4, %v1232_v51  ;;  %v6652_v4 = vld [vmem:[#allocation5_spill] sm:$0xff] }
 0x1c5   : > { %v1230_v31 = vadd.f32 %v5921_v42, %v1052_v9  ;;  %v1587_v57 = vadd.f32 %v5061_v61, %v1409_v34  ;;  %v1228_v42 = vadd.f32 %v5919_v39, %v1050_v22  ;;  %v364_v2 = vsel %vm362_vm4, %v363_v40, %v357_v12  ;;  %v6654_v9 = vld [vmem:[#allocation6_spill] sm:$0xff]  ;;  %v6656_v40 = vld [vmem:[#allocation8_spill] sm:$0xff] }
 0x1c6   : > { %v5064_v49 = vpop.f32.mrf.mxu0  ;;  %v1227_v46 = vadd.f32 %v5911_v33, %v1049_v48  ;;  %v1585_v61 = vadd.f32 %v5939_v54, %v1407_v44  ;;  %v1226_v12 = vadd.f32 %v6651_v10, %v1048_v0  ;;  %vm365_vm5 = vcmp.ge.s32.totalorder %v364_v2, 1 }
 0x1c7   : > { %v1408_v55 = vadd.f32 %v1385_v60, %v1230_v31  ;;  %v1589_v37 = vadd.f32 %v5064_v49, %v1411_v18  ;;  %v1406_v60 = vadd.f32 %v5937_v53, %v1228_v42  ;;  %vm366_vm6 = vcmp.le.s32.totalorder %v364_v2, 4 }
 0x1c8   : > { %v1573_v11 = vpop.f32.mrf.mxu0  ;;  %v1405_v21 = vadd.f32 %v6652_v4, %v1227_v46  ;;  %v1404_v54 = vadd.f32 %v6654_v9, %v1226_v12  ;;  %vm5991_vm7 = vmand %vm365_vm5, %vm366_vm6 }
 0x1c9   : > { %v1586_v29 = vadd.f32 %v5946_v63, %v1408_v55  ;;  %v1588_v39 = vadd.f32 %v1573_v11, %v1410_v3  ;;  %v6653_v63 = vld [vmem:[#allocation9_spill] sm:$0xff]  ;;  %v1972_v11 = vpop.permute.xlu1 %1971 }
 0x1ca   : > { %v1584_v49 = vadd.f32 %v6653_v63, %v1406_v60  ;;  %v1583_v26 = vadd.f32 %v6655_v19, %v1405_v21  ;;  %v1582_v31 = vadd.f32 %v6656_v40, %v1404_v54  ;;  %v4546_v54 = vld [vmem:[%s5567_s19 + $0x8] sm:$0xff]  }
 0x1cb   : > { %v4373_v19 = vunpack.c.l.bf16 %v4546_v54 }
 0x1d3   : > { %v5949_v47 = vpop.f32.mrf.mxu1 }
 0x1d4   : > { %v1761_v16 = vadd.f32 %v5949_v47, %v1583_v26  ;;  %v4374_v26 = vunpack.c.h.bf16 %v4546_v54  ;;  %v4551_v54 = vld [vmem:[%s5567_s19 + $0x30] sm:$0xff]  }
 0x1d5   : > { %v5952_v35 = vpop.f32.mrf.mxu1 }
 0x1d6   : > { %v1760_v51 = vadd.f32 %v5952_v35, %v1582_v31 }
 0x1d7   : > { %v5086_v17 = vpop.f32.mrf.mxu1 }
 0x1d8   : > { %v1763_v14 = vadd.f32 %v5086_v17, %v1585_v61  ;;  %v1967_v17 = vpop.permute.xlu0 %1966 }
 0x1d9   : > { %v1731_v25 = vpop.f32.mrf.mxu1 }
 0x1da   : > { %v5959_v24 = vpop.f32.mrf.mxu0  ;;  %v1762_v27 = vadd.f32 %v1731_v25, %v1584_v49 }
 0x1db   : > { %v5089_v7 = vpop.f32.mrf.mxu1  ;;  %v1939_v25 = vadd.f32 %v5959_v24, %v1761_v16 }
 0x1dc   : > { %v5964_v13 = vpop.f32.mrf.mxu0  ;;  %v1765_v52 = vadd.f32 %v5089_v7, %v1587_v57 }
 0x1dd   : > { %v1741_v45 = vpop.f32.mrf.mxu1 }
 0x1de   : > { %v5114_v38 = vpop.f32.mrf.mxu0  ;;  %v1764_v58 = vadd.f32 %v1741_v45, %v1586_v29 }
 0x1df   : > { %v5092_v36 = vpop.f32.mrf.mxu1  ;;  %v1941_v28 = vadd.f32 %v5114_v38, %v1763_v14  ;;  %v6657_v38 = vmov 0  ;;  %v4368_v14 = vld [vmem:[%s5567_s19] sm:$0xff]  }
 0x1e0   : > { %v1909_v43 = vpop.f32.mrf.mxu0  ;;  %v1767_v50 = vadd.f32 %v5092_v36, %v1589_v37  ;;  %v6658_v38 = vsel %vm5991_vm7, 4294967295, %v6657_v38  ;;  %v1957_v36 = vpop.permute.xlu0 %1956 }
 0x1e1   : > { %v1751_v32 = vpop.f32.mrf.mxu1  ;;  %v1940_v34 = vadd.f32 %v1909_v43, %v1762_v27  ;;  %6659 = vst [vmem:[#allocation4_spill] sm:$0xff] %v6658_v38  ;;  %v1962_v43 = vpop.permute.xlu1 %1961 }
 0x1e2   : > { %v5117_v1 = vpop.f32.mrf.mxu0  ;;  %v1766_v33 = vadd.f32 %v1751_v32, %v1588_v39  ;;  %v1995_v0 = vadd.f32 %v1962_v43, %v1939_v25  ;;  %v3647_v25 = vld [vmem:[%s5572_s26 + $0x8] sm:$0xff] }
 0x1e3   : > { %v1943_v59 = vadd.f32 %v5117_v1, %v1765_v52  ;;  %v1996_v35 = vadd.f32 %v1967_v17, %v1940_v34 }
 0x1e4   : > { %v1919_v62 = vpop.f32.mrf.mxu0  ;;  %v2003_v2 = vmax.f32 %v1995_v0, 0.0 }
 0x1e5   : > { %v1942_v23 = vadd.f32 %v1919_v62, %v1764_v58  ;;  %v1999_v7 = vadd.f32 %v1982_v56, %v1943_v59  ;;  %v2004_v1 = vmax.f32 %v1996_v35, 0.0 }
 0x1e6   : > { %v5120_v8 = vpop.f32.mrf.mxu0 }
 0x1e7   : > { %v1945_v53 = vadd.f32 %v5120_v8, %v1767_v50  ;;  %v1998_v45 = vadd.f32 %v1977_v5, %v1942_v23  ;;  %v2007_v55 = vmax.f32 %v1999_v7, 0.0  ;;  %v2014_v37 = vsel %vm5991_vm7, %v2004_v1, 0.0 }
 0x1e8   : > { %v1929_v20 = vpop.f32.mrf.mxu0  ;;  %v2013_v5 = vsel %vm5991_vm7, %v2003_v2, 0.0  ;;  %v4370_v23 = vunpack.c.h.bf16 %v4368_v14  ;;  %v2062_v2 = vld [vmem:[#allocation2 + $0x8] sm:$0xff] }
 0x1e9   : > { %v2001_v15 = vadd.f32 %v1992_v30, %v1945_v53  ;;  %v1944_v22 = vadd.f32 %v1929_v20, %v1766_v33  ;;  %v1997_v30 = vadd.f32 %v1972_v11, %v1941_v28  ;;  %v2006_v57 = vmax.f32 %v1998_v45, 0.0  ;;  %v6112_v53 = vld [vmem:[%s5567_s19 + $0x20] sm:$0xff]   ;;  %v4547_v11 = vld [vmem:[%s5567_s19 + $0x10] sm:$0xff]   ;;  %v4548_v28 = vld [vmem:[%s5567_s19 + $0x18] sm:$0xff]  }
 0x1ea   : > { %v2017_v44 = vsel %vm5991_vm7, %v2007_v55, 0.0  ;;  %v4369_v33 = vunpack.c.l.bf16 %v4368_v14  ;;  %v4385_v9 = vunpack.c.l.bf16 %v6112_v53  ;;  %v4377_v27 = vunpack.c.l.bf16 %v4547_v11  ;;  %v3648_v55 = vld [vmem:[%s5572_s26 + $0x10] sm:$0xff] }
 0x1eb   : > { %v2009_v48 = vmax.f32 %v2001_v15, 0.0  ;;  %v2000_v41 = vadd.f32 %v5962_v6, %v1944_v22  ;;  %v1938_v6 = vadd.f32 %v5964_v13, %v1760_v51  ;;  %v2005_v42 = vmax.f32 %v1997_v30, 0.0  ;;  %v6158_v22 = vld [vmem:[%s5567_s19 + $0x60] sm:$0xff]  }
 0x1ec   : > { %v2016_v13 = vsel %vm5991_vm7, %v2006_v57, 0.0  ;;  %5165 = vmatprep.mubr.msk.f32.mxu0 %vm441_vm1, %v4369_v33  ;;  %5137 = vmatprep.mubr.msk.f32.mxu1 %vm441_vm1, %v4385_v9  ;;  %v4378_v20 = vunpack.c.h.bf16 %v4547_v11  ;;  %v4381_v7 = vunpack.c.l.bf16 %v4548_v28  ;;  %v4382_v15 = vunpack.c.h.bf16 %v4548_v28  ;;  %v3651_v57 = vld [vmem:[%s5572_s26 + $0x28] sm:$0xff] }
 0x1ed   : > { %v2008_v18 = vmax.f32 %v2000_v41, 0.0  ;;  %v2019_v47 = vsel %vm5991_vm7, %v2009_v48, 0.0  ;;  %v1994_v56 = vadd.f32 %v1957_v36, %v1938_v6  ;;  %v2015_v3 = vsel %vm5991_vm7, %v2005_v42, 0.0  ;;  %v3646_v41 = vld [vmem:[%s5572_s26] sm:$0xff]  ;;  %v3652_v36 = vld [vmem:[%s5572_s26 + $0x30] sm:$0xff]  ;;  %v3653_v42 = vld [vmem:[%s5572_s26 + $0x38] sm:$0xff] }
 0x1ee   : > { %2042 = vrot.lane.b32.xlu1 %v2019_v47, %s5479_s11  ;;  %v4417_v40 = vunpack.c.l.bf16 %v6158_v22  ;;  %v3649_v47 = vld [vmem:[%s5572_s26 + $0x18] sm:$0xff]  ;;  %v3650_v6 = vld [vmem:[%s5572_s26 + $0x20] sm:$0xff]  ;;  %v4386_v33 = vunpack.c.h.bf16 %v6112_v53  ;;  %v4393_v11 = vunpack.c.l.bf16 %v4551_v54  ;;  %v4394_v28 = vunpack.c.h.bf16 %v4551_v54 }
 0x1ef   : > { %v2018_v24 = vsel %vm5991_vm7, %v2008_v18, 0.0  ;;  %v2002_v29 = vmax.f32 %v1994_v56, 0.0 }
 0x1f0   : > { %2040 = vrot.lane.b32.xlu0 %v2018_v24, %s5479_s11 }
 0x1f1   : > { %v2012_v52 = vsel %vm5991_vm7, %v2002_v29, 0.0 }
 0x1f2   : > { %2038 = vrot.lane.b32.xlu1 %v2017_v44, %s5479_s11 }
 0x1f4   : > { %2036 = vrot.lane.b32.xlu0 %v2016_v13, %s5479_s11 }
 0x1f6   : > { %2034 = vrot.lane.b32.xlu1 %v2015_v3, %s5479_s11  ;;  %v2061_v3 = vld [vmem:[#allocation2] sm:$0xff] }
 0x1f8   : > { %2032 = vrot.lane.b32.xlu0 %v2014_v37, %s5479_s11  ;;  %v2064_v37 = vld [vmem:[#allocation2 + $0x18] sm:$0xff] }
 0x1fa   : > { %2030 = vrot.lane.b32.xlu1 %v2013_v5, %s5479_s11  ;;  %v2063_v5 = vld [vmem:[#allocation2 + $0x10] sm:$0xff] }
 0x1fc   : > { %2028 = vrot.lane.b32.xlu0 %v2012_v52, %s5479_s11 }
 0x260   : > { %v2043_v46 = vpop.permute.xlu1 %2042 }
 0x261   : > { %2060 = vst.msk [vmem:[#allocation3 + $0x38] sm:$0xff] %vm2052_vm8, %v2043_v46 }
 0x262   : > { %v2041_v60 = vpop.permute.xlu0 %2040 }
 0x263   : > { %2059 = vst.msk [vmem:[#allocation3 + $0x30] sm:$0xff] %vm2052_vm8, %v2041_v60  ;;  %v2066_v60 = vld [vmem:[#allocation2 + $0x28] sm:$0xff] }
 0x264   : > { %v2039_v61 = vpop.permute.xlu1 %2038 }
 0x265   : > { %2058 = vst.msk [vmem:[#allocation3 + $0x28] sm:$0xff] %vm2052_vm8, %v2039_v61  ;;  %v2065_v61 = vld [vmem:[#allocation2 + $0x20] sm:$0xff] }
 0x266   : > { %v2037_v32 = vpop.permute.xlu0 %2036 }
 0x267   : > { %2057 = vst.msk [vmem:[#allocation3 + $0x20] sm:$0xff] %vm2052_vm8, %v2037_v32 }
 0x268   : > { %v2035_v62 = vpop.permute.xlu1 %2034  ;;  %v6024_v39 = vld [vmem:[#allocation3 + $0x38] sm:$0xff] }
 0x269   : > { %2056 = vst.msk [vmem:[#allocation3 + $0x18] sm:$0xff] %vm2052_vm8, %v2035_v62  ;;  %5149 = vmatprep.subr.mxu0 %v6024_v39 }
 0x26a   : > { %5150 = vmatpush3.msra.mxu0 %v6024_v39  ;;  %v2033_v58 = vpop.permute.xlu0 %2032  ;;  %v6029_v50 = vld [vmem:[#allocation3 + $0x30] sm:$0xff] }
 0x26b   : > { %2055 = vst.msk [vmem:[#allocation3 + $0x10] sm:$0xff] %vm2052_vm8, %v2033_v58  ;;  %5151 = vmatprep.subr.mxu0 %v6029_v50  ;;  %v2067_v58 = vld [vmem:[#allocation2 + $0x30] sm:$0xff] }
 0x26c   : > { %5152 = vmatpush3.msra.mxu0 %v6029_v50  ;;  %v2031_v59 = vpop.permute.xlu1 %2030  ;;  %v6034_v10 = vld [vmem:[#allocation3 + $0x28] sm:$0xff] }
 0x26d   : > { %2054 = vst.msk [vmem:[#allocation3 + $0x8] sm:$0xff] %vm2052_vm8, %v2031_v59  ;;  %5153 = vmatprep.subr.mxu0 %v6034_v10 }
 0x26e   : > { %5154 = vmatpush3.msra.mxu0 %v6034_v10  ;;  %v2029_v12 = vpop.permute.xlu0 %2028  ;;  %v6039_v4 = vld [vmem:[#allocation3 + $0x20] sm:$0xff] }
 0x26f   : > { %2053 = vst.msk [vmem:[#allocation3] sm:$0xff] %vm2052_vm8, %v2029_v12  ;;  %5155 = vmatprep.subr.mxu0 %v6039_v4 }
 0x270   : > { %5156 = vmatpush3.msra.mxu0 %v6039_v4  ;;  %v6044_v21 = vld [vmem:[#allocation3 + $0x18] sm:$0xff] }
 0x271   : > { %5157 = vmatprep.subr.mxu0 %v6044_v21 }
 0x272   : > { %5158 = vmatpush3.msra.mxu0 %v6044_v21  ;;  %v6048_v63 = vld [vmem:[#allocation3 + $0x10] sm:$0xff] }
 0x273   : > { %5159 = vmatprep.subr.mxu0 %v6048_v63 }
 0x274   : > { %5160 = vmatpush3.msra.mxu0 %v6048_v63  ;;  %v6052_v49 = vld [vmem:[#allocation3 + $0x8] sm:$0xff] }
 0x275   : > { %2120 = vrot.lane.b32.xlu1 %v6052_v49, %s5470_s18  ;;  %5161 = vmatprep.subr.mxu0 %v6052_v49 }
 0x276   : > { %2597 = vrot.lane.b32.xlu0 %v6052_v49, %s5472_s29  ;;  %5162 = vmatpush3.msra.mxu0 %v6052_v49  ;;  %v6060_v8 = vld [vmem:[#allocation3] sm:$0xff] }
 0x277   : > { %5163 = vmatprep.subr.mxu0 %v6060_v8 }
 0x278   : > { %5164 = vmatpush3.msra.mxu0 %v6060_v8 }
 0x279   : > { %2419 = vrot.lane.b32.xlu1 %v6052_v49, %s5471_s28  ;;  %5166 = vmatmul.mubr.msk.f32.vlgmr.msra.gmra.mxu0 %vm441_vm1, %v4370_v23 }
 0x27a   : > { %2118 = vrot.lane.b32.xlu0 %v6060_v8, %s5470_s18  ;;  %5168 = vmatprep.mubr.msk.f32.mxu0 %vm441_vm1, %v4373_v19 }
 0x27d   : > { %2775 = vrot.lane.b32.xlu1 %v6052_v49, %s5473_s30  ;;  %5169 = vmatmul.mubr.msk.f32.gmra.mxu0 %vm441_vm1, %v4374_v26 }
 0x27e   : > { %2417 = vrot.lane.b32.xlu0 %v6060_v8, %s5471_s28  ;;  %5171 = vmatprep.mubr.msk.f32.mxu0 %vm441_vm1, %v4377_v27  ;;  %v4552_v27 = vld [vmem:[%s5567_s19 + $0x38] sm:$0xff]  }
 0x281   : > { %2124 = vrot.lane.b32.xlu1 %v6044_v21, %s5470_s18  ;;  %5172 = vmatmul.mubr.msk.f32.gmra.mxu0 %vm441_vm1, %v4378_v20 }
 0x282   : > { %2595 = vrot.lane.b32.xlu0 %v6060_v8, %s5472_s29  ;;  %5174 = vmatprep.mubr.msk.f32.mxu0 %vm441_vm1, %v4381_v7 }
 0x285   : > { %2423 = vrot.lane.b32.xlu1 %v6044_v21, %s5471_s28  ;;  %5175 = vmatmul.mubr.msk.f32.gmra.mxu0 %vm441_vm1, %v4382_v15  ;;  %v4397_v15 = vunpack.c.l.bf16 %v4552_v27 }
 0x286   : > { %2601 = vrot.lane.b32.xlu0 %v6044_v21, %s5472_s29  ;;  %5221 = vmatprep.mubr.msk.f32.mxu0 %vm441_vm1, %v4417_v40  ;;  %v4553_v40 = vld [vmem:[%s5567_s19 + $0x40] sm:$0xff]  }
 0x289   : > { %2779 = vrot.lane.b32.xlu1 %v6044_v21, %s5473_s30 }
 0x28a   : > { %2122 = vrot.lane.b32.xlu0 %v6048_v63, %s5470_s18 }
 0x28d   : > { %2777 = vrot.lane.b32.xlu1 %v6048_v63, %s5473_s30 }
 0x28e   : > { %2421 = vrot.lane.b32.xlu0 %v6048_v63, %s5471_s28 }
 0x291   : > { %2128 = vrot.lane.b32.xlu1 %v6034_v10, %s5470_s18 }
 0x292   : > { %2599 = vrot.lane.b32.xlu0 %v6048_v63, %s5472_s29 }
 0x295   : > { %2427 = vrot.lane.b32.xlu1 %v6034_v10, %s5471_s28 }
 0x296   : > { %2605 = vrot.lane.b32.xlu0 %v6034_v10, %s5472_s29 }
 0x299   : > { %2783 = vrot.lane.b32.xlu1 %v6034_v10, %s5473_s30 }
 0x29a   : > { %2126 = vrot.lane.b32.xlu0 %v6039_v4, %s5470_s18 }
 0x29d   : > { %2781 = vrot.lane.b32.xlu1 %v6039_v4, %s5473_s30 }
 0x29e   : > { %2425 = vrot.lane.b32.xlu0 %v6039_v4, %s5471_s28 }
 0x2a1   : > { %2132 = vrot.lane.b32.xlu1 %v6024_v39, %s5470_s18 }
 0x2a2   : > { %2603 = vrot.lane.b32.xlu0 %v6039_v4, %s5472_s29 }
 0x2a5   : > { %2431 = vrot.lane.b32.xlu1 %v6024_v39, %s5471_s28 }
 0x2a6   : > { %2130 = vrot.lane.b32.xlu0 %v6029_v50, %s5470_s18 }
 0x2a9   : > { %2609 = vrot.lane.b32.xlu1 %v6024_v39, %s5472_s29 }
 0x2aa   : > { %2773 = vrot.lane.b32.xlu0 %v6060_v8, %s5473_s30 }
 0x2ad   : > { %2787 = vrot.lane.b32.xlu1 %v6024_v39, %s5473_s30 }
 0x2ae   : > { %2961 = vrot.lane.b32.xlu0 %v6034_v10, %s5474_s6 }
 0x2b1   : > { %2965 = vrot.lane.b32.xlu1 %v6024_v39, %s5474_s6 }
 0x2b2   : > { %2959 = vrot.lane.b32.xlu0 %v6039_v4, %s5474_s6 }
 0x2b5   : > { %3143 = vrot.lane.b32.xlu1 %v6024_v39, %s5475_s7 }
 0x2b6   : > { %2429 = vrot.lane.b32.xlu0 %v6029_v50, %s5471_s28 }
 0x2b9   : > { %3139 = vrot.lane.b32.xlu1 %v6034_v10, %s5475_s7 }
 0x2ba   : > { %2957 = vrot.lane.b32.xlu0 %v6044_v21, %s5474_s6 }
 0x2bd   : > { %3137 = vrot.lane.b32.xlu1 %v6039_v4, %s5475_s7 }
 0x2be   : > { %2955 = vrot.lane.b32.xlu0 %v6048_v63, %s5474_s6 }
 0x2c1   : > { %3135 = vrot.lane.b32.xlu1 %v6044_v21, %s5475_s7 }
 0x2c2   : > { %2607 = vrot.lane.b32.xlu0 %v6029_v50, %s5472_s29 }
 0x2c5   : > { %2785 = vrot.lane.b32.xlu1 %v6029_v50, %s5473_s30 }
 0x2c6   : > { %2953 = vrot.lane.b32.xlu0 %v6052_v49, %s5474_s6 }
 0x2c9   : > { %3133 = vrot.lane.b32.xlu1 %v6048_v63, %s5475_s7 }
 0x2ca   : > { %2951 = vrot.lane.b32.xlu0 %v6060_v8, %s5474_s6 }
 0x2cd   : > { %3131 = vrot.lane.b32.xlu1 %v6052_v49, %s5475_s7 }
 0x2ce   : > { %3129 = vrot.lane.b32.xlu0 %v6060_v8, %s5475_s7 }
 0x2d1   : > { %3321 = vrot.lane.b32.xlu1 %v6024_v39, %s5476_s8 }
 0x2d2   : > { %2963 = vrot.lane.b32.xlu0 %v6029_v50, %s5474_s6 }
 0x2d5   : > { %3141 = vrot.lane.b32.xlu1 %v6029_v50, %s5475_s7 }
 0x2d6   : > { %3317 = vrot.lane.b32.xlu0 %v6034_v10, %s5476_s8 }
 0x2d9   : > { %3499 = vrot.lane.b32.xlu1 %v6024_v39, %s5477_s10  ;;  %v2068_v39 = vld [vmem:[#allocation2 + $0x38] sm:$0xff] }
 0x2da   : > { %3315 = vrot.lane.b32.xlu0 %v6039_v4, %s5476_s8 }
 0x2dd   : > { %3495 = vrot.lane.b32.xlu1 %v6034_v10, %s5477_s10 }
 0x2de   : > { %3313 = vrot.lane.b32.xlu0 %v6044_v21, %s5476_s8 }
 0x2e1   : > { %3493 = vrot.lane.b32.xlu1 %v6039_v4, %s5477_s10 }
 0x2e2   : > { %3319 = vrot.lane.b32.xlu0 %v6029_v50, %s5476_s8 }
 0x2e5   : > { %3497 = vrot.lane.b32.xlu1 %v6029_v50, %s5477_s10 }
 0x2e6   : > { %3311 = vrot.lane.b32.xlu0 %v6048_v63, %s5476_s8 }
 0x2e7   : > { %v6198_v31 = vpop.permute.xlu1 %2120 }
 0x2e8   : > { %v6200_v16 = vpop.permute.xlu0 %2597 }
 0x2e9   : > { %3491 = vrot.lane.b32.xlu1 %v6044_v21, %s5477_s10 }
 0x2ea   : > { %3309 = vrot.lane.b32.xlu0 %v6052_v49, %s5476_s8 }
 0x2eb   : > { %v6206_v17 = vpop.permute.xlu1 %2419 }
 0x2ec   : > { %v6208_v34 = vpop.permute.xlu0 %2118 }
 0x2ed   : > { %3489 = vrot.lane.b32.xlu1 %v6048_v63, %s5477_s10 }
 0x2ee   : > { %3307 = vrot.lane.b32.xlu0 %v6060_v8, %s5476_s8 }
 0x2ef   : > { %v6214_v45 = vpop.permute.xlu1 %2775 }
 0x2f0   : > { %v6216_v48 = vpop.permute.xlu0 %2417 }
 0x2f1   : > { %3487 = vrot.lane.b32.xlu1 %v6052_v49, %s5477_s10 }
 0x2f2   : > { %3485 = vrot.lane.b32.xlu0 %v6060_v8, %s5477_s10  ;;  %v4550_v8 = vld [vmem:[%s5567_s19 + $0x28] sm:$0xff]  }
 0x2f3   : > { %v6223_v51 = vpop.permute.xlu1 %2124  ;;  %v4389_v9 = vunpack.c.l.bf16 %v4550_v8  ;;  %v4390_v26 = vunpack.c.h.bf16 %v4550_v8  ;;  %v4564_v8 = vld [vmem:[%s5567_s19 + $0x98] sm:$0xff]  }
 0x2f4   : > { %v6226_v30 = vpop.permute.xlu0 %2595 }
 0x2f5   : > { %3656 = vperm.xlu1 %5428, %v3646_v41  }
 0x2f6   : > { %3661 = vperm.xlu0 %5427, %v3647_v25  }
 0x2f7   : > { %v6229_v18 = vpop.permute.xlu1 %2423 }
 0x2f8   : > { %v6232_v43 = vpop.permute.xlu0 %2601 }
 0x2f9   : > { %3666 = vperm.xlu1 %5428, %v3648_v55   ;;  %v4402_v55 = vunpack.c.h.bf16 %v4553_v40 }
 0x2fa   : > { %3671 = vperm.xlu0 %5427, %v3649_v47   ;;  %v4554_v47 = vld [vmem:[%s5567_s19 + $0x48] sm:$0xff]  }
 0x2fb   : > { %v6235_v35 = vpop.permute.xlu1 %2779 }
 0x2fc   : > { %v2123_v24 = vpop.permute.xlu0 %2122 }
 0x2fd   : > { %3676 = vperm.xlu1 %5428, %v3650_v6   ;;  %v4405_v6 = vunpack.c.l.bf16 %v4554_v47 }
 0x2fe   : > { %3681 = vperm.xlu0 %5427, %v3651_v57  }
 0x2ff   : > { %v6239_v0 = vpop.permute.xlu1 %2777 }
 0x300   : > { %v6242_v44 = vpop.permute.xlu0 %2421 }
 0x301   : > { %3686 = vperm.xlu1 %5428, %v3652_v36   ;;  %v4555_v36 = vld [vmem:[%s5567_s19 + $0x50] sm:$0xff]  }
 0x302   : > { %3691 = vperm.xlu0 %5427, %v3653_v42   ;;  %v4409_v42 = vunpack.c.l.bf16 %v4555_v36 }
 0x303   : > { %v2129_v56 = vpop.permute.xlu1 %2128 }
 0x304   : > { %v6244_v1 = vpop.permute.xlu0 %2599 }
 0x305   : > { %3710 = vrot.lane.b32.xlu1 %v2061_v3, %s5473_s30 }
 0x306   : > { %3712 = vrot.lane.b32.xlu0 %v2062_v2, %s5473_s30 }
 0x307   : > { %v6246_v13 = vpop.permute.xlu1 %2427 }
 0x308   : > { %v6248_v29 = vpop.permute.xlu0 %2605 }
 0x309   : > { %3714 = vrot.lane.b32.xlu1 %v2063_v5, %s5473_s30 }
 0x30a   : > { %3716 = vrot.lane.b32.xlu0 %v2064_v37, %s5473_s30 }
 0x30b   : > { %v6252_v52 = vpop.permute.xlu1 %2783 }
 0x30c   : > { %v2127_v46 = vpop.permute.xlu0 %2126 }
 0x30d   : > { %3718 = vrot.lane.b32.xlu1 %v2065_v61, %s5473_s30 }
 0x30e   : > { %3720 = vrot.lane.b32.xlu0 %v2066_v60, %s5473_s30  ;;  %v4562_v60 = vld [vmem:[%s5567_s19 + $0x88] sm:$0xff]  }
 0x30f   : > { %v6256_v32 = vpop.permute.xlu1 %2781 }
 0x310   : > { %v2426_v62 = vpop.permute.xlu0 %2425 }
 0x311   : > { %3722 = vrot.lane.b32.xlu1 %v2067_v58, %s5473_s30  ;;  %v4438_v58 = vunpack.c.h.bf16 %v4562_v60 }
 0x312   : > { %3724 = vrot.lane.b32.xlu0 %v2068_v39, %s5473_s30 }
 0x313   : > { %v2133_v50 = vpop.permute.xlu1 %2132 }
 0x314   : > { %v6260_v59 = vpop.permute.xlu0 %2603  ;;  %5121 = vmatprep.subr.mxu1 %v2133_v50 }
 0x315   : > { %5122 = vmatpush3.msra.mxu1 %v2133_v50  ;;  %v4560_v50 = vld [vmem:[%s5567_s19 + $0x78] sm:$0xff]  }
 0x317   : > { %v2432_v10 = vpop.permute.xlu1 %2431 }
 0x318   : > { %v2131_v12 = vpop.permute.xlu0 %2130 }
 0x319   : > { %5123 = vmatprep.subr.mxu1 %v2131_v12 }
 0x31a   : > { %5124 = vmatpush3.msra.mxu1 %v2131_v12 }
 0x31b   : > { %5125 = vmatprep.subr.mxu1 %v2129_v56  ;;  %v2610_v4 = vpop.permute.xlu1 %2609 }
 0x31c   : > { %5126 = vmatpush3.msra.mxu1 %v2129_v56  ;;  %v6264_v21 = vpop.permute.xlu0 %2773  ;;  %5205 = vmatprep.subr.mxu0 %v2610_v4  ;;  %v4410_v56 = vunpack.c.h.bf16 %v4555_v36 }
 0x31d   : > { %5127 = vmatprep.subr.mxu1 %v2127_v46  ;;  %5206 = vmatpush3.msra.mxu0 %v2610_v4  ;;  %v4429_v4 = vunpack.c.l.bf16 %v4560_v50 }
 0x31e   : > { %5128 = vmatpush3.msra.mxu1 %v2127_v46 }
 0x31f   : > { %5129 = vmatprep.subr.mxu1 %v6223_v51  ;;  %v6267_v63 = vpop.permute.xlu1 %2787 }
 0x320   : > { %5130 = vmatpush3.msra.mxu1 %v6223_v51  ;;  %v6270_v49 = vpop.permute.xlu0 %2961  ;;  %v4401_v51 = vunpack.c.l.bf16 %v4553_v40 }
 0x321   : > { %5131 = vmatprep.subr.mxu1 %v2123_v24 }
 0x322   : > { %5132 = vmatpush3.msra.mxu1 %v2123_v24  ;;  %v4406_v24 = vunpack.c.h.bf16 %v4554_v47 }
 0x323   : > { %5133 = vmatprep.subr.mxu1 %v6198_v31  ;;  %v6274_v14 = vpop.permute.xlu1 %2965 }
 0x324   : > { %5134 = vmatpush3.msra.mxu1 %v6198_v31  ;;  %v6278_v23 = vpop.permute.xlu0 %2959 }
 0x325   : > { %5135 = vmatprep.subr.mxu1 %v6208_v34 }
 0x326   : > { %5136 = vmatpush3.msra.mxu1 %v6208_v34  ;;  %v4398_v34 = vunpack.c.h.bf16 %v4552_v27  ;;  %v4569_v27 = vld [vmem:[%s5567_s19 + $0xc0] sm:$0xff]  }
 0x327   : > { %5138 = vmatmul.mubr.msk.f32.vlgmr.msra.gmra.mxu1 %vm441_vm1, %v4386_v33  ;;  %5177 = vmatprep.subr.mxu1 %v2432_v10  ;;  %v6284_v19 = vpop.permute.xlu1 %3143  ;;  %v4565_v33 = vld [vmem:[%s5567_s19 + $0xa0] sm:$0xff]  }
 0x328   : > { %5178 = vmatpush3.msra.mxu1 %v2432_v10  ;;  %v2430_v53 = vpop.permute.xlu0 %2429  ;;  %5140 = vmatprep.mubr.msk.f32.mxu1 %vm441_vm1, %v4389_v9  ;;  %v4445_v9 = vunpack.c.l.bf16 %v4564_v8  ;;  %v4449_v54 = vunpack.c.l.bf16 %v4565_v33 }
 0x329   : > { %5179 = vmatprep.subr.mxu1 %v2430_v53 }
 0x32a   : > { %5180 = vmatpush3.msra.mxu1 %v2430_v53  ;;  %v4566_v53 = vld [vmem:[%s5567_s19 + $0xa8] sm:$0xff]  }
 0x32b   : > { %5141 = vmatmul.mubr.msk.f32.gmra.mxu1 %vm441_vm1, %v4390_v26  ;;  %5181 = vmatprep.subr.mxu1 %v6246_v13  ;;  %v6290_v20 = vpop.permute.xlu1 %3139  ;;  %v4446_v26 = vunpack.c.h.bf16 %v4564_v8  ;;  %v4454_v40 = vunpack.c.h.bf16 %v4566_v53 }
 0x32c   : > { %5182 = vmatpush3.msra.mxu1 %v6246_v13  ;;  %v6293_v7 = vpop.permute.xlu0 %2957  ;;  %5143 = vmatprep.mubr.msk.f32.mxu1 %vm441_vm1, %v4393_v11  ;;  %v4556_v13 = vld [vmem:[%s5567_s19 + $0x58] sm:$0xff]  }
 0x32d   : > { %5183 = vmatprep.subr.mxu1 %v2426_v62  ;;  %v4414_v37 = vunpack.c.h.bf16 %v4556_v13 }
 0x32e   : > { %5184 = vmatpush3.msra.mxu1 %v2426_v62  ;;  %v4437_v62 = vunpack.c.l.bf16 %v4562_v60 }
 0x32f   : > { %5144 = vmatmul.mubr.msk.f32.gmra.mxu1 %vm441_vm1, %v4394_v28  ;;  %5185 = vmatprep.subr.mxu1 %v6229_v18  ;;  %v6299_v31 = vpop.permute.xlu1 %3137  ;;  %v4453_v28 = vunpack.c.l.bf16 %v4566_v53 }
 0x330   : > { %5186 = vmatpush3.msra.mxu1 %v6229_v18  ;;  %v6302_v41 = vpop.permute.xlu0 %2955  ;;  %5146 = vmatprep.mubr.msk.f32.mxu1 %vm441_vm1, %v4397_v15  ;;  %v4466_v15 = vunpack.c.h.bf16 %v4569_v27 }
 0x331   : > { %5187 = vmatprep.subr.mxu1 %v6242_v44 }
 0x332   : > { %5188 = vmatpush3.msra.mxu1 %v6242_v44 }
 0x333   : > { %5147 = vmatmul.mubr.msk.f32.gmra.mxu1 %vm441_vm1, %v4398_v34  ;;  %5189 = vmatprep.subr.mxu1 %v6206_v17  ;;  %v6309_v25 = vpop.permute.xlu1 %3135  ;;  %v4570_v34 = vld [vmem:[%s5567_s19 + $0xc8] sm:$0xff]  }
 0x334   : > { %5190 = vmatpush3.msra.mxu1 %v6206_v17  ;;  %v2608_v18 = vpop.permute.xlu0 %2607  ;;  %5193 = vmatprep.mubr.msk.f32.mxu1 %vm441_vm1, %v4401_v51 }
 0x335   : > { %5191 = vmatprep.subr.mxu1 %v6216_v48  ;;  %5207 = vmatprep.subr.mxu0 %v2608_v18 }
 0x336   : > { %5192 = vmatpush3.msra.mxu1 %v6216_v48  ;;  %5208 = vmatpush3.msra.mxu0 %v2608_v18  ;;  %v4470_v18 = vunpack.c.h.bf16 %v4570_v34 }
 0x337   : > { %5194 = vmatmul.mubr.msk.f32.vlgmr.msra.gmra.mxu1 %vm441_vm1, %v4402_v55  ;;  %5209 = vmatprep.subr.mxu0 %v6248_v29  ;;  %v2786_v57 = vpop.permute.xlu1 %2785  ;;  %v4469_v55 = vunpack.c.l.bf16 %v4570_v34 }
 0x338   : > { %5233 = vmatprep.subr.mxu1 %v6267_v63  ;;  %5210 = vmatpush3.msra.mxu0 %v6248_v29  ;;  %v6320_v17 = vpop.permute.xlu0 %2953  ;;  %v4418_v29 = vunpack.c.h.bf16 %v6158_v22 }
 0x339   : > { %5234 = vmatpush3.msra.mxu1 %v6267_v63  ;;  %5211 = vmatprep.subr.mxu0 %v6260_v59  ;;  %v4430_v63 = vunpack.c.h.bf16 %v4560_v50 }
 0x33a   : > { %5235 = vmatprep.subr.mxu1 %v2786_v57  ;;  %5196 = vmatprep.mubr.msk.f32.mxu1 %vm441_vm1, %v4405_v6  ;;  %v4568_v6 = vld [vmem:[%s5567_s19 + $0xb8] sm:$0xff]  }
 0x33b   : > { %5212 = vmatpush3.msra.mxu0 %v6260_v59  ;;  %5236 = vmatpush3.msra.mxu1 %v2786_v57  ;;  %v6327_v48 = vpop.permute.xlu1 %3133  ;;  %v4563_v59 = vld [vmem:[%s5567_s19 + $0x90] sm:$0xff]   ;;  %v4461_v36 = vunpack.c.l.bf16 %v4568_v6 }
 0x33c   : > { %5197 = vmatmul.mubr.msk.f32.gmra.mxu1 %vm441_vm1, %v4406_v24  ;;  %5213 = vmatprep.subr.mxu0 %v6232_v43  ;;  %v6331_v44 = vpop.permute.xlu0 %2951  ;;  %v4571_v57 = vld [vmem:[%s5567_s19 + $0xd0] sm:$0xff]  }
 0x33d   : > { %5237 = vmatprep.subr.mxu1 %v6252_v52  ;;  %5214 = vmatpush3.msra.mxu0 %v6232_v43  ;;  %v4413_v43 = vunpack.c.l.bf16 %v4556_v13 }
 0x33e   : > { %5238 = vmatpush3.msra.mxu1 %v6252_v52  ;;  %5215 = vmatprep.subr.mxu0 %v6244_v1  ;;  %v4561_v52 = vld [vmem:[%s5567_s19 + $0x80] sm:$0xff]  }
 0x33f   : > { %5239 = vmatprep.subr.mxu1 %v6256_v32  ;;  %5199 = vmatprep.mubr.msk.f32.mxu1 %vm441_vm1, %v4409_v42  ;;  %v6340_v2 = vpop.permute.xlu1 %3131  ;;  %v4434_v46 = vunpack.c.h.bf16 %v4561_v52  ;;  %v4462_v42 = vunpack.c.h.bf16 %v4568_v6 }
 0x340   : > { %5216 = vmatpush3.msra.mxu0 %v6244_v1  ;;  %5240 = vmatpush3.msra.mxu1 %v6256_v32  ;;  %v6344_v3 = vpop.permute.xlu0 %3129  ;;  %v4558_v1 = vld [vmem:[%s5567_s19 + $0x68] sm:$0xff]  }
 0x341   : > { %5200 = vmatmul.mubr.msk.f32.gmra.mxu1 %vm441_vm1, %v4410_v56  ;;  %5217 = vmatprep.subr.mxu0 %v6200_v16  ;;  %v4572_v56 = vld [vmem:[%s5567_s19 + $0xd8] sm:$0xff]  }
 0x342   : > { %5241 = vmatprep.subr.mxu1 %v6235_v35  ;;  %5218 = vmatpush3.msra.mxu0 %v6200_v16  ;;  %v4421_v16 = vunpack.c.l.bf16 %v4558_v1 }
 0x343   : > { %5242 = vmatpush3.msra.mxu1 %v6235_v35  ;;  %5219 = vmatprep.subr.mxu0 %v6226_v30  ;;  %v6356_v5 = vpop.permute.xlu1 %3321  ;;  %v4433_v35 = vunpack.c.l.bf16 %v4561_v52  ;;  %v4478_v52 = vunpack.c.h.bf16 %v4572_v56 }
 0x344   : > { %5243 = vmatprep.subr.mxu1 %v6239_v0  ;;  %5202 = vmatprep.mubr.msk.f32.mxu1 %vm441_vm1, %v4413_v43  ;;  %v2964_v22 = vpop.permute.xlu0 %2963  ;;  %v4477_v43 = vunpack.c.l.bf16 %v4572_v56 }
 0x345   : > { %5220 = vmatpush3.msra.mxu0 %v6226_v30  ;;  %5244 = vmatpush3.msra.mxu1 %v6239_v0  ;;  %v4422_v30 = vunpack.c.h.bf16 %v4558_v1  ;;  %v4559_v0 = vld [vmem:[%s5567_s19 + $0x70] sm:$0xff]   ;;  %v4577_v1 = vld [vmem:[%s5567_s19 + $0x100] sm:$0xff]  }
 0x346   : > { %5203 = vmatmul.mubr.msk.f32.gmra.mxu1 %vm441_vm1, %v4414_v37  ;;  %5222 = vmatmul.mubr.msk.f32.vlgmr.msra.gmra.mxu0 %vm441_vm1, %v4418_v29  ;;  %v4425_v32 = vunpack.c.l.bf16 %v4559_v0  ;;  %v4426_v39 = vunpack.c.h.bf16 %v4559_v0  ;;  %v4574_v29 = vld [vmem:[%s5567_s19 + $0xe8] sm:$0xff]   ;;  %v4498_v60 = vunpack.c.h.bf16 %v4577_v1 }
 0x347   : > { %5245 = vmatprep.subr.mxu1 %v6214_v45  ;;  %5261 = vmatprep.subr.mxu0 %v6274_v14  ;;  %v3142_v61 = vpop.permute.xlu1 %3141  ;;  %v4486_v0 = vunpack.c.h.bf16 %v4574_v29 }
 0x348   : > { %5246 = vmatpush3.msra.mxu1 %v6214_v45  ;;  %5262 = vmatpush3.msra.mxu0 %v6274_v14  ;;  %v6375_v45 = vpop.permute.xlu0 %3317 }
 0x349   : > { %5247 = vmatprep.subr.mxu1 %v6264_v21  ;;  %5263 = vmatprep.subr.mxu0 %v2964_v22 }
 0x34a   : > { %5224 = vmatprep.mubr.msk.f32.mxu0 %vm441_vm1, %v4421_v16  ;;  %5248 = vmatpush3.msra.mxu1 %v6264_v21  ;;  %v4441_v21 = vunpack.c.l.bf16 %v4563_v59 }
 0x34b   : > { %5249 = vmatprep.mubr.msk.f32.mxu1 %vm441_vm1, %v4433_v35  ;;  %5264 = vmatpush3.msra.mxu0 %v2964_v22  ;;  %v6386_v10 = vpop.permute.xlu1 %3499  ;;  %v4485_v22 = vunpack.c.l.bf16 %v4574_v29  ;;  %v4497_v35 = vunpack.c.l.bf16 %v4577_v1 }
 0x34c   : > { %5225 = vmatmul.mubr.msk.f32.gmra.mxu0 %vm441_vm1, %v4422_v30  ;;  %5250 = vmatmul.mubr.msk.f32.vlgmr.msra.gmra.mxu1 %vm441_vm1, %v4434_v46  ;;  %v6391_v12 = vpop.permute.xlu0 %3315  ;;  %v4575_v46 = vld [vmem:[%s5567_s19 + $0xf0] sm:$0xff]   ;;  %v4578_v30 = vld [vmem:[%s5567_s19 + $0x108] sm:$0xff]  }
 0x34d   : > { %5265 = vmatprep.subr.mxu0 %v6270_v49  ;;  %5289 = vmatprep.subr.mxu1 %v6284_v19  ;;  %v4502_v50 = vunpack.c.h.bf16 %v4578_v30 }
 0x34e   : > { %5266 = vmatpush3.msra.mxu0 %v6270_v49  ;;  %5290 = vmatpush3.msra.mxu1 %v6284_v19  ;;  %v4442_v49 = vunpack.c.h.bf16 %v4563_v59  ;;  %v4450_v19 = vunpack.c.h.bf16 %v4565_v33 }
 0x34f   : > { %5267 = vmatprep.subr.mxu0 %v6278_v23  ;;  %5291 = vmatprep.subr.mxu1 %v3142_v61  ;;  %v6402_v14 = vpop.permute.xlu1 %3495 }
 0x350   : > { %5227 = vmatprep.mubr.msk.f32.mxu0 %vm441_vm1, %v4425_v32  ;;  %5252 = vmatprep.mubr.msk.f32.mxu1 %vm441_vm1, %v4437_v62  ;;  %v4501_v32 = vunpack.c.l.bf16 %v4578_v30  ;;  %v4576_v62 = vld [vmem:[%s5567_s19 + $0xf8] sm:$0xff]  }
 0x351   : > { %5268 = vmatpush3.msra.mxu0 %v6278_v23  ;;  %5292 = vmatpush3.msra.mxu1 %v3142_v61  ;;  %v6409_v23 = vpop.permute.xlu0 %3313  ;;  %v4489_v61 = vunpack.c.l.bf16 %v4575_v46  ;;  %v4493_v59 = vunpack.c.l.bf16 %v4576_v62 }
 0x352   : > { %5228 = vmatmul.mubr.msk.f32.gmra.mxu0 %vm441_vm1, %v4426_v39  ;;  %5253 = vmatmul.mubr.msk.f32.gmra.mxu1 %vm441_vm1, %v4438_v58  ;;  %v4579_v39 = vld [vmem:[%s5567_s19 + $0x110] sm:$0xff]   ;;  %v4490_v58 = vunpack.c.h.bf16 %v4575_v46 }
 0x353   : > { %5269 = vmatprep.subr.mxu0 %v6293_v7  ;;  %5293 = vmatprep.subr.mxu1 %v6290_v20  ;;  %v3494_v11 = vpop.permute.xlu1 %3493 }
 0x354   : > { %5270 = vmatpush3.msra.mxu0 %v6293_v7  ;;  %5294 = vmatpush3.msra.mxu1 %v6290_v20  ;;  %v4465_v7 = vunpack.c.l.bf16 %v4569_v27 }
 0x355   : > { %5271 = vmatprep.subr.mxu0 %v6302_v41  ;;  %5295 = vmatprep.subr.mxu1 %v6299_v31  ;;  %v3320_v20 = vpop.permute.xlu0 %3319 }
 0x356   : > { %5230 = vmatprep.mubr.msk.f32.mxu0 %vm441_vm1, %v4429_v4  ;;  %5255 = vmatprep.mubr.msk.f32.mxu1 %vm441_vm1, %v4441_v21  ;;  %v4494_v4 = vunpack.c.h.bf16 %v4576_v62  ;;  %v4506_v21 = vunpack.c.h.bf16 %v4579_v39 }
 0x357   : > { %5272 = vmatpush3.msra.mxu0 %v6302_v41  ;;  %5296 = vmatpush3.msra.mxu1 %v6299_v31  ;;  %v4567_v31 = vld [vmem:[%s5567_s19 + $0xb0] sm:$0xff]   ;;  %v3498_v41 = vpop.permute.xlu1 %3497 }
 0x358   : > { %5231 = vmatmul.mubr.msk.f32.gmra.mxu0 %vm441_vm1, %v4430_v63  ;;  %5256 = vmatmul.mubr.msk.f32.gmra.mxu1 %vm441_vm1, %v4442_v49  ;;  %v4458_v47 = vunpack.c.h.bf16 %v4567_v31 }
 0x359   : > { %5273 = vmatprep.subr.mxu0 %v6320_v17  ;;  %5297 = vmatprep.subr.mxu1 %v6309_v25  ;;  %v3312_v51 = vpop.permute.xlu0 %3311 }
 0x35a   : > { %5274 = vmatpush3.msra.mxu0 %v6320_v17  ;;  %5298 = vmatpush3.msra.mxu1 %v6309_v25  ;;  %v4457_v25 = vunpack.c.l.bf16 %v4567_v31 }
 0x35b   : > { %5275 = vmatprep.subr.mxu0 %v6331_v44  ;;  %5299 = vmatprep.subr.mxu1 %v6327_v48  ;;  %v3492_v17 = vpop.permute.xlu1 %3491 }
 0x35c   : > { %5258 = vmatprep.mubr.msk.f32.mxu1 %vm441_vm1, %v4445_v9  ;;  %5276 = vmatpush3.msra.mxu0 %v6331_v44  ;;  %v4474_v44 = vunpack.c.h.bf16 %v4571_v57 }
 0x35d   : > { %5277 = vmatprep.mubr.msk.f32.mxu0 %vm441_vm1, %v4449_v54  ;;  %5300 = vmatpush3.msra.mxu1 %v6327_v48  ;;  %v3310_v24 = vpop.permute.xlu0 %3309  ;;  %v4473_v48 = vunpack.c.l.bf16 %v4571_v57 }
 0x35e   : > { %5259 = vmatmul.mubr.msk.f32.gmra.mxu1 %vm441_vm1, %v4446_v26  ;;  %5278 = vmatmul.mubr.msk.f32.vlgmr.msra.gmra.mxu0 %vm441_vm1, %v4450_v19 }
 0x35f   : > { %5301 = vmatprep.subr.mxu1 %v6340_v2  ;;  %5317 = vmatprep.subr.mxu0 %v6356_v5  ;;  %v3490_v13 = vpop.permute.xlu1 %3489 }
 0x360   : > { %5302 = vmatpush3.msra.mxu1 %v6340_v2  ;;  %5318 = vmatpush3.msra.mxu0 %v6356_v5  ;;  %v4573_v2 = vld [vmem:[%s5567_s19 + $0xe0] sm:$0xff]  }
 0x361   : > { %5303 = vmatprep.subr.mxu1 %v6344_v3  ;;  %5319 = vmatprep.subr.mxu0 %v3320_v20  ;;  %v4481_v37 = vunpack.c.l.bf16 %v4573_v2  ;;  %v4482_v5 = vunpack.c.h.bf16 %v4573_v2 }
 0x362   : > { %5280 = vmatprep.mubr.msk.f32.mxu0 %vm441_vm1, %v4453_v28  ;;  %5304 = vmatpush3.msra.mxu1 %v6344_v3  ;;  %v3308_v3 = vpop.permute.xlu0 %3307 }
 0x363   : > { %5305 = vmatprep.mubr.msk.f32.mxu1 %vm441_vm1, %v4465_v7  ;;  %5320 = vmatpush3.msra.mxu0 %v3320_v20  ;;  %v3488_v16 = vpop.permute.xlu1 %3487 }
 0x364   : > { %5281 = vmatmul.mubr.msk.f32.gmra.mxu0 %vm441_vm1, %v4454_v40  ;;  %5306 = vmatmul.mubr.msk.f32.vlgmr.msra.gmra.mxu1 %vm441_vm1, %v4466_v15 }
 0x365   : > { %5321 = vmatprep.subr.mxu0 %v6375_v45  ;;  %5345 = vmatprep.subr.mxu1 %v6386_v10 }
 0x366   : > { %5322 = vmatpush3.msra.mxu0 %v6375_v45  ;;  %5346 = vmatpush3.msra.mxu1 %v6386_v10  ;;  %v3486_v45 = vpop.permute.xlu0 %3485  ;;  %v4505_v10 = vunpack.c.l.bf16 %v4579_v39 }
 0x367   : > { %5323 = vmatprep.subr.mxu0 %v6391_v12  ;;  %5347 = vmatprep.subr.mxu1 %v3498_v41 }
 0x368   : > { %5283 = vmatprep.mubr.msk.f32.mxu0 %vm441_vm1, %v4457_v25  ;;  %5308 = vmatprep.mubr.msk.f32.mxu1 %vm441_vm1, %v4469_v55 }
 0x369   : > { %5324 = vmatpush3.msra.mxu0 %v6391_v12  ;;  %5348 = vmatpush3.msra.mxu1 %v3498_v41  ;;  %v4580_v12 = vld [vmem:[%s5567_s19 + $0x118] sm:$0xff]  }
 0x36a   : > { %5284 = vmatmul.mubr.msk.f32.gmra.mxu0 %vm441_vm1, %v4458_v47  ;;  %5309 = vmatmul.mubr.msk.f32.gmra.mxu1 %vm441_vm1, %v4470_v18  ;;  %v4509_v63 = vunpack.c.l.bf16 %v4580_v12  ;;  %v4510_v49 = vunpack.c.h.bf16 %v4580_v12 }
 0x36b   : > { %5325 = vmatprep.subr.mxu0 %v6409_v23  ;;  %5349 = vmatprep.subr.mxu1 %v6402_v14 }
 0x36c   : > { %5326 = vmatpush3.msra.mxu0 %v6409_v23  ;;  %5350 = vmatpush3.msra.mxu1 %v6402_v14  ;;  %v5167_v14 = vpop.f32.mrf.mxu0 }
 0x36d   : > { %5327 = vmatprep.subr.mxu0 %v3312_v51  ;;  %5351 = vmatprep.subr.mxu1 %v3494_v11 }
 0x36e   : > { %5286 = vmatprep.mubr.msk.f32.mxu0 %vm441_vm1, %v4461_v36  ;;  %5311 = vmatprep.mubr.msk.f32.mxu1 %vm441_vm1, %v4473_v48  ;;  %v2361_v9 = vpop.f32.mrf.mxu0 }
 0x36f   : > { %5328 = vmatpush3.msra.mxu0 %v3312_v51  ;;  %5352 = vmatpush3.msra.mxu1 %v3494_v11 }
 0x370   : > { %5287 = vmatmul.mubr.msk.f32.gmra.mxu0 %vm441_vm1, %v4462_v42  ;;  %5312 = vmatmul.mubr.msk.f32.gmra.mxu1 %vm441_vm1, %v4474_v44  ;;  %v5170_v26 = vpop.f32.mrf.mxu0 }
 0x371   : > { %5329 = vmatprep.subr.mxu0 %v3310_v24  ;;  %5353 = vmatprep.subr.mxu1 %v3492_v17 }
 0x372   : > { %5330 = vmatpush3.msra.mxu0 %v3310_v24  ;;  %5354 = vmatpush3.msra.mxu1 %v3492_v17  ;;  %v2371_v27 = vpop.f32.mrf.mxu0 }
 0x373   : > { %5331 = vmatprep.subr.mxu0 %v3308_v3  ;;  %5355 = vmatprep.subr.mxu1 %v3490_v13 }
 0x374   : > { %5314 = vmatprep.mubr.msk.f32.mxu1 %vm441_vm1, %v4477_v43  ;;  %5332 = vmatpush3.msra.mxu0 %v3308_v3  ;;  %v5173_v7 = vpop.f32.mrf.mxu0 }
 0x375   : > { %5333 = vmatprep.mubr.msk.f32.mxu0 %vm441_vm1, %v4481_v37  ;;  %5356 = vmatpush3.msra.mxu1 %v3490_v13 }
 0x376   : > { %5315 = vmatmul.mubr.msk.f32.gmra.mxu1 %vm441_vm1, %v4478_v52  ;;  %5334 = vmatmul.mubr.msk.f32.vlgmr.msra.gmra.mxu0 %vm441_vm1, %v4482_v5  ;;  %v6492_v40 = vpop.f32.mrf.mxu0 }
 0x377   : > { %5357 = vmatprep.subr.mxu1 %v3488_v16  ;;  %5336 = vmatprep.mubr.msk.f32.mxu0 %vm441_vm1, %v4485_v22  ;;  %v6518_v22 = vpop.permute.xlu0 %3661 }
 0x378   : > { %5358 = vmatpush3.msra.mxu1 %v3488_v16  ;;  %5361 = vmatprep.mubr.msk.f32.mxu1 %vm441_vm1, %v4497_v35  ;;  %v6494_v41 = vpop.f32.mrf.mxu0  ;;  %v6520_v16 = vpop.permute.xlu1 %3656 }
 0x379   : > { %5359 = vmatprep.subr.mxu1 %v3486_v45  ;;  %6661 = vst [vmem:[#allocation9_spill] sm:$0xff] %v6520_v16 }
 0x37a   : > { %5337 = vmatmul.mubr.msk.f32.gmra.mxu0 %vm441_vm1, %v4486_v0  ;;  %5360 = vmatpush3.msra.mxu1 %v3486_v45  ;;  %v6498_v55 = vpop.f32.mrf.mxu0 }
 0x37b   : > { %5362 = vmatmul.mubr.msk.f32.vlgmr.msra.gmra.mxu1 %vm441_vm1, %v4498_v60  ;;  %5339 = vmatprep.mubr.msk.f32.mxu0 %vm441_vm1, %v4489_v61  ;;  %v6522_v60 = vpop.permute.xlu0 %3671 }
 0x37c   : > { %5364 = vmatprep.mubr.msk.f32.mxu1 %vm441_vm1, %v4501_v32  ;;  %6662 = vst [vmem:[#allocation6_spill] sm:$0xff] %v6522_v60  ;;  %v6524_v61 = vpop.permute.xlu1 %3666 }
 0x37d   : > { %6663 = vst [vmem:[#allocation7_spill] sm:$0xff] %v6524_v61 }
 0x37e   : > { %5340 = vmatmul.mubr.msk.f32.gmra.mxu0 %vm441_vm1, %v4490_v58 }
 0x37f   : > { %5365 = vmatmul.mubr.msk.f32.gmra.mxu1 %vm441_vm1, %v4502_v50  ;;  %5342 = vmatprep.mubr.msk.f32.mxu0 %vm441_vm1, %v4493_v59  ;;  %v6528_v58 = vpop.permute.xlu0 %3681 }
 0x380   : > { %5367 = vmatprep.mubr.msk.f32.mxu1 %vm441_vm1, %v4505_v10  ;;  %6665 = vst [vmem:[#allocation10_spill] sm:$0xff] %v6528_v58  ;;  %v6530_v59 = vpop.permute.xlu1 %3676 }
 0x382   : > { %5343 = vmatmul.mubr.msk.f32.gmra.mxu0 %vm441_vm1, %v4494_v4 }
 0x383   : > { %5368 = vmatmul.mubr.msk.f32.gmra.mxu1 %vm441_vm1, %v4506_v21 }
 0x384   : > { %5370 = vmatprep.mubr.msk.f32.mxu1 %vm441_vm1, %v4509_v63 }
 0x387   : > { %5371 = vmatmul.mubr.msk.f32.gmra.mxu1 %vm441_vm1, %v4510_v49 }
 0x3e7   : > { %v5139_v8 = vpop.f32.mrf.mxu1 }
 0x3e8   : > { %v2367_v50 = vadd.f32 %v5167_v14, %v5139_v8  ;;  %v6540_v14 = vpop.permute.xlu1 %3686 }
 0x3e9   : > { %v2232_v33 = vpop.f32.mrf.mxu1 }
 0x3ea   : > { %v2362_v10 = vadd.f32 %v2361_v9, %v2232_v33 }
 0x3eb   : > { %v5142_v23 = vpop.f32.mrf.mxu1 }
 0x3ec   : > { %v2377_v63 = vadd.f32 %v5170_v26, %v5142_v23 }
 0x3ed   : > { %v2242_v54 = vpop.f32.mrf.mxu1 }
 0x3ee   : > { %v2372_v16 = vadd.f32 %v2371_v27, %v2242_v54 }
 0x3ef   : > { %v6484_v19 = vpop.f32.mrf.mxu1 }
 0x3f0   : > { %v2387_v33 = vadd.f32 %v5173_v7, %v6484_v19 }
 0x3f1   : > { %v6486_v53 = vpop.f32.mrf.mxu1 }
 0x3f3   : > { %v6488_v11 = vpop.f32.mrf.mxu1 }
 0x3f4   : > { %v2397_v19 = vadd.f32 %v6494_v41, %v6488_v11 }
 0x3f5   : > { %v6490_v20 = vpop.f32.mrf.mxu1 }
 0x3f7   : > { %v5195_v28 = vpop.f32.mrf.mxu1 }
 0x3f8   : > { %v2571_v12 = vadd.f32 %v5195_v28, %v2367_v50 }
 0x3f9   : > { %v2531_v15 = vpop.f32.mrf.mxu1 }
 0x3fa   : > { %v2570_v49 = vadd.f32 %v2531_v15, %v2362_v10 }
 0x3fc   : > { %v5198_v31 = vpop.f32.mrf.mxu1 }
 0x3fe   : > { %v2541_v34 = vpop.f32.mrf.mxu1 }
 0x3ff   : > { %v2572_v9 = vadd.f32 %v2541_v34, %v2372_v16 }
 0x401   : > { %v5201_v51 = vpop.f32.mrf.mxu1 }
 0x402   : > { %v2575_v10 = vadd.f32 %v5201_v51, %v2387_v33 }
 0x403   : > { %v6496_v25 = vpop.f32.mrf.mxu1 }
 0x406   : > { %v6500_v47 = vpop.f32.mrf.mxu1  ;;  %v5223_v18 = vpop.f32.mrf.mxu0 }
 0x407   : > { %v2749_v38 = vadd.f32 %v5223_v18, %v2571_v12  ;;  %v2382_v18 = vadd.f32 %v6492_v40, %v6486_v53  ;;  %v2392_v40 = vadd.f32 %v6498_v55, %v6490_v20  ;;  %v2577_v51 = vadd.f32 %v6500_v47, %v2397_v19 }
 0x408   : > { %v6502_v6 = vpop.f32.mrf.mxu1  ;;  %v2709_v57 = vpop.f32.mrf.mxu0 }
 0x409   : > { %v2748_v58 = vadd.f32 %v2709_v57, %v2570_v49  ;;  %v2574_v7 = vadd.f32 %v6496_v25, %v2382_v18 }
 0x40c   : > { %v5226_v17 = vpop.f32.mrf.mxu0  ;;  %v5251_v24 = vpop.f32.mrf.mxu1 }
 0x40d   : > { %v2927_v8 = vadd.f32 %v5251_v24, %v2749_v38  ;;  %v3711_v24 = vpop.permute.xlu1 %3710 }
 0x40e   : > { %v2719_v36 = vpop.f32.mrf.mxu0  ;;  %v2887_v48 = vpop.f32.mrf.mxu1 }
 0x40f   : > { %v2926_v50 = vadd.f32 %v2887_v48, %v2748_v58  ;;  %v2750_v54 = vadd.f32 %v2719_v36, %v2572_v9 }
 0x412   : > { %v5229_v42 = vpop.f32.mrf.mxu0  ;;  %v5254_v44 = vpop.f32.mrf.mxu1 }
 0x413   : > { %v2753_v34 = vadd.f32 %v5229_v42, %v2575_v10 }
 0x414   : > { %v6504_v56 = vpop.f32.mrf.mxu0  ;;  %v2897_v13 = vpop.f32.mrf.mxu1 }
 0x415   : > { %v2928_v48 = vadd.f32 %v2897_v13, %v2750_v54  ;;  %v2752_v36 = vadd.f32 %v6504_v56, %v2574_v7  ;;  %v2576_v13 = vadd.f32 %v6502_v6, %v2392_v40 }
 0x418   : > { %v6506_v2 = vpop.f32.mrf.mxu0  ;;  %v6508_v3 = vpop.f32.mrf.mxu1 }
 0x41a   : > { %v6510_v43 = vpop.f32.mrf.mxu0  ;;  %v6512_v29 = vpop.f32.mrf.mxu1 }
 0x41e   : > { %v6514_v37 = vpop.f32.mrf.mxu1  ;;  %v5279_v1 = vpop.f32.mrf.mxu0 }
 0x41f   : > { %v3105_v23 = vadd.f32 %v5279_v1, %v2927_v8 }
 0x420   : > { %v6516_v5 = vpop.f32.mrf.mxu1  ;;  %v3065_v52 = vpop.f32.mrf.mxu0 }
 0x421   : > { %6660 = vst [vmem:[#allocation5_spill] sm:$0xff] %v6516_v5  ;;  %v6538_v5 = vpop.permute.xlu0 %3691 }
 0x424   : > { %v5282_v35 = vpop.f32.mrf.mxu0  ;;  %v5307_v46 = vpop.f32.mrf.mxu1 }
 0x425   : > { %v3713_v12 = vpop.permute.xlu0 %3712  ;;  %v3283_v38 = vadd.f32 %v5307_v46, %v3105_v23  ;;  %v6667_v23 = vld [vmem:[#allocation9_spill] sm:$0xff] }
 0x426   : > { %v3075_v30 = vpop.f32.mrf.mxu0  ;;  %v3243_v0 = vpop.f32.mrf.mxu1 }
 0x427   : > { %v3106_v41 = vadd.f32 %v3075_v30, %v2928_v48  ;;  %v2754_v30 = vadd.f32 %v6510_v43, %v2576_v13 }
 0x429   : > { %v3717_v55 = vpop.permute.xlu0 %3716 }
 0x42a   : > { %v5285_v45 = vpop.f32.mrf.mxu0  ;;  %v5310_v32 = vpop.f32.mrf.mxu1 }
 0x42c   : > { %v6526_v62 = vpop.f32.mrf.mxu0  ;;  %v3253_v39 = vpop.f32.mrf.mxu1 }
 0x42d   : > { %6664 = vst [vmem:[#allocation8_spill] sm:$0xff] %v6526_v62  ;;  %v2573_v62 = vadd.f32 %v5198_v31, %v2377_v63  ;;  %v3104_v31 = vadd.f32 %v3065_v52, %v2926_v50  ;;  %v3284_v47 = vadd.f32 %v3253_v39, %v3106_v41  ;;  %v3721_v48 = vpop.permute.xlu0 %3720 }
 0x42f   : > { %v2751_v28 = vadd.f32 %v5226_v17, %v2573_v62  ;;  %v3282_v16 = vadd.f32 %v3243_v0, %v3104_v31  ;;  %v2930_v0 = vadd.f32 %v6512_v29, %v2752_v36 }
 0x430   : > { %v6532_v4 = vpop.f32.mrf.mxu0  ;;  %v5313_v21 = vpop.f32.mrf.mxu1 }
 0x431   : > { %v2929_v27 = vadd.f32 %v5254_v44, %v2751_v28  ;;  %v2931_v44 = vadd.f32 %v6508_v3, %v2753_v34 }
 0x432   : > { %v6534_v60 = vpop.f32.mrf.mxu0  ;;  %v6536_v61 = vpop.f32.mrf.mxu1 }
 0x433   : > { %v3107_v1 = vadd.f32 %v5282_v35, %v2929_v27  ;;  %v2755_v35 = vadd.f32 %v6506_v2, %v2577_v51  ;;  %v3109_v58 = vadd.f32 %v5285_v45, %v2931_v44  ;;  %v3715_v2 = vpop.permute.xlu1 %3714  ;;  %v6671_v51 = vld [vmem:[#allocation7_spill] sm:$0xff] }
 0x434   : > { %v6666_v8 = vld [vmem:[#allocation8_spill] sm:$0xff] }
 0x435   : > { %v3285_v25 = vadd.f32 %v5310_v32, %v3107_v1  ;;  %v2933_v32 = vadd.f32 %v6514_v37, %v2755_v35  ;;  %v3108_v33 = vadd.f32 %v6666_v8, %v2930_v0  ;;  %v3287_v6 = vadd.f32 %v5313_v21, %v3109_v58 }
 0x436   : > { %v6543_v26 = vpop.f32.mrf.mxu1  ;;  %v5335_v15 = vpop.f32.mrf.mxu0 }
 0x437   : > { %v3461_v62 = vadd.f32 %v5335_v15, %v3283_v38  ;;  %v6668_v15 = vld [vmem:[#allocation5_spill] sm:$0xff]  ;;  %v3111_v10 = vadd.f32 %v6532_v4, %v2933_v32  ;;  %v6669_v38 = vld [vmem:[#allocation6_spill] sm:$0xff] }
 0x438   : > { %v3421_v57 = vpop.f32.mrf.mxu0  ;;  %v3273_v17 = vpop.f32.mrf.mxu1  ;;  %v2932_v18 = vadd.f32 %v6668_v15, %v2754_v30 }
 0x439   : > { %v3460_v42 = vadd.f32 %v3421_v57, %v3282_v16 }
 0x43a   : > { %v5338_v53 = vpop.f32.mrf.mxu0  ;;  %v3110_v19 = vadd.f32 %v6534_v60, %v2932_v18  ;;  %v3719_v60 = vpop.permute.xlu1 %3718 }
 0x43b   : > { %v5363_v11 = vpop.f32.mrf.mxu1  ;;  %v3463_v63 = vadd.f32 %v5338_v53, %v3285_v25  ;;  %v6672_v25 = vld [vmem:[#allocation10_spill] sm:$0xff] }
 0x43c   : > { %v3431_v52 = vpop.f32.mrf.mxu0  ;;  %v3639_v46 = vadd.f32 %v5363_v11, %v3461_v62  ;;  %v3288_v40 = vadd.f32 %v3273_v17, %v3110_v19 }
 0x43d   : > { %v3599_v20 = vpop.f32.mrf.mxu1  ;;  %v3462_v28 = vadd.f32 %v3431_v52, %v3284_v47  ;;  %v3725_v47 = vpop.permute.xlu0 %3724 }
 0x43e   : > { %v5341_v56 = vpop.f32.mrf.mxu0  ;;  %v3638_v49 = vadd.f32 %v3599_v20, %v3460_v42  ;;  %v3695_v3 = vadd.f32 %v6518_v22, %v3639_v46  ;;  %v3286_v22 = vadd.f32 %v6536_v61, %v3108_v33  ;;  %v3723_v32 = vpop.permute.xlu1 %3722 }
 0x43f   : > { %v5366_v9 = vpop.f32.mrf.mxu1  ;;  %v3465_v43 = vadd.f32 %v5341_v56, %v3287_v6 }
 0x440   : > { %v3441_v29 = vpop.f32.mrf.mxu0  ;;  %v3641_v45 = vadd.f32 %v5366_v9, %v3463_v63  ;;  %v3735_v50 = vadd.f32 %v3713_v12, %v3695_v3  ;;  %v3694_v39 = vadd.f32 %v6667_v23, %v3638_v49  ;;  %v3289_v12 = vadd.f32 %v6543_v26, %v3111_v10 }
 0x441   : > { %v3609_v54 = vpop.f32.mrf.mxu1  ;;  %v3464_v7 = vadd.f32 %v3441_v29, %v3286_v22 }
 0x442   : > { %v3743_v37 = vmax.f32 %v3735_v50, 0.0  ;;  %v3734_v27 = vadd.f32 %v3711_v24, %v3694_v39  ;;  %v5344_v31 = vpop.f32.mrf.mxu0  ;;  %v3640_v21 = vadd.f32 %v3609_v54, %v3462_v28  ;;  %v3697_v57 = vadd.f32 %v6669_v38, %v3641_v45 }
 0x443   : > { %v5369_v34 = vpop.f32.mrf.mxu1  ;;  %v3467_v24 = vadd.f32 %v5344_v31, %v3289_v12 }
 0x444   : > { %v3751_v4 = vsel %vm5991_vm7, %v3743_v37, 0.0  ;;  %v3742_v16 = vmax.f32 %v3734_v27, 0.0  ;;  %v3451_v61 = vpop.f32.mrf.mxu0  ;;  %v3643_v62 = vadd.f32 %v5369_v34, %v3465_v43  ;;  %v3737_v53 = vadd.f32 %v3717_v55, %v3697_v57 }
 0x445   : > { %v3696_v36 = vadd.f32 %v6671_v51, %v3640_v21  ;;  %v3619_v44 = vpop.f32.mrf.mxu1  ;;  %3768 = vrot.lane.b32.xlu0 %v3751_v4, %s5479_s11  ;;  %v3466_v52 = vadd.f32 %v3451_v61, %v3288_v40 }
 0x446   : > { %v3750_v26 = vsel %vm5991_vm7, %v3742_v16, 0.0  ;;  %v3745_v11 = vmax.f32 %v3737_v53, 0.0  ;;  %v3642_v41 = vadd.f32 %v3619_v44, %v3464_v7  ;;  %v3699_v42 = vadd.f32 %v6672_v25, %v3643_v62 }
 0x447   : > { %v3736_v46 = vadd.f32 %v3715_v2, %v3696_v36  ;;  %3766 = vrot.lane.b32.xlu1 %v3750_v26, %s5479_s11  ;;  %v5372_v13 = vpop.f32.mrf.mxu1 }
 0x448   : > { %v3753_v17 = vsel %vm5991_vm7, %v3745_v11, 0.0  ;;  %v3645_v35 = vadd.f32 %v5372_v13, %v3467_v24  ;;  %v3739_v0 = vadd.f32 %v3721_v48, %v3699_v42  ;;  %v3698_v58 = vadd.f32 %v6530_v59, %v3642_v41 }
 0x449   : > { %v3744_v20 = vmax.f32 %v3736_v46, 0.0  ;;  %v3629_v55 = vpop.f32.mrf.mxu1  ;;  %3772 = vrot.lane.b32.xlu0 %v3753_v17, %s5479_s11 }
 0x44a   : > { %v3747_v63 = vmax.f32 %v3739_v0, 0.0  ;;  %v3738_v56 = vadd.f32 %v3719_v60, %v3698_v58  ;;  %v3644_v49 = vadd.f32 %v3629_v55, %v3466_v52  ;;  %v3701_v3 = vadd.f32 %v6538_v5, %v3645_v35 }
 0x44b   : > { %v3752_v30 = vsel %vm5991_vm7, %v3744_v20, 0.0 }
 0x44c   : > { %v3755_v8 = vsel %vm5991_vm7, %v3747_v63, 0.0  ;;  %v3746_v33 = vmax.f32 %v3738_v56, 0.0  ;;  %3770 = vrot.lane.b32.xlu1 %v3752_v30, %s5479_s11  ;;  %v3741_v59 = vadd.f32 %v3725_v47, %v3701_v3  ;;  %v3700_v6 = vadd.f32 %v6540_v14, %v3644_v49 }
 0x44d   : > { %3776 = vrot.lane.b32.xlu0 %v3755_v8, %s5479_s11 }
 0x44e   : > { %v3754_v9 = vsel %vm5991_vm7, %v3746_v33, 0.0  ;;  %v3749_v2 = vmax.f32 %v3741_v59, 0.0  ;;  %v3740_v5 = vadd.f32 %v3723_v32, %v3700_v6 }
 0x450   : > { %v3757_v28 = vsel %vm5991_vm7, %v3749_v2, 0.0  ;;  %v3748_v29 = vmax.f32 %v3740_v5, 0.0  ;;  %3774 = vrot.lane.b32.xlu1 %v3754_v9, %s5479_s11 }
 0x451   : > { %3780 = vrot.lane.b32.xlu0 %v3757_v28, %s5479_s11 }
 0x452   : > { %v3756_v45 = vsel %vm5991_vm7, %v3748_v29, 0.0 }
 0x454   : > { %3778 = vrot.lane.b32.xlu1 %v3756_v45, %s5479_s11 }
 0x4b7   : > { %v3769_v14 = vpop.permute.xlu0 %3768 }
 0x4b8   : > { %3791 = vst.msk [vmem:[#allocation2 + $0x8] sm:$0xff] %vm2052_vm8, %v3769_v14 }
 0x4b9   : > { %v3767_v50 = vpop.permute.xlu1 %3766 }
 0x4ba   : > { %3790 = vst.msk [vmem:[#allocation2] sm:$0xff] %vm2052_vm8, %v3767_v50 }
 0x4bb   : > { %v3773_v23 = vpop.permute.xlu0 %3772 }
 0x4bc   : > { %3793 = vst.msk [vmem:[#allocation2 + $0x18] sm:$0xff] %vm2052_vm8, %v3773_v23 }
 0x4be   : > { %v3771_v39 = vpop.permute.xlu1 %3770 }
 0x4bf   : > { %v3799_v15 = vld [vmem:[#allocation2 + $0x8] sm:$0xff]  ;;  %3792 = vst.msk [vmem:[#allocation2 + $0x10] sm:$0xff] %vm2052_vm8, %v3771_v39  ;;  %v3777_v18 = vpop.permute.xlu0 %3776 }
 0x4c0   : > { %3808 = vst.msk [vmem:[%s5552_s9 + $0x8] sm:$0xff] %vm3806_vm9, %v3799_v15 }
 0x4c1   : > { %3795 = vst.msk [vmem:[#allocation2 + $0x28] sm:$0xff] %vm2052_vm8, %v3777_v18  ;;  %v3798_v10 = vld [vmem:[#allocation2] sm:$0xff] }
 0x4c2   : > { %3807 = vst.msk [vmem:[%s5552_s9] sm:$0xff] %vm3806_vm9, %v3798_v10  ;;  %v3775_v22 = vpop.permute.xlu1 %3774 }
 0x4c3   : > { %v3801_v43 = vld [vmem:[#allocation2 + $0x18] sm:$0xff]  ;;  %3794 = vst.msk [vmem:[#allocation2 + $0x20] sm:$0xff] %vm2052_vm8, %v3775_v22  ;;  %v3781_v54 = vpop.permute.xlu0 %3780 }
 0x4c4   : > { %3810 = vst.msk [vmem:[%s5552_s9 + $0x18] sm:$0xff] %vm3806_vm9, %v3801_v43 }
 0x4c5   : > { %3797 = vst.msk [vmem:[#allocation2 + $0x38] sm:$0xff] %vm2052_vm8, %v3781_v54 }
 0x4c6   : > { %v3800_v37 = vld [vmem:[#allocation2 + $0x10] sm:$0xff]  ;;  %v3779_v27 = vpop.permute.xlu1 %3778 }
 0x4c7   : > { %3809 = vst.msk [vmem:[%s5552_s9 + $0x10] sm:$0xff] %vm3806_vm9, %v3800_v37 }
 0x4c8   : > { %v3803_v31 = vld [vmem:[#allocation2 + $0x28] sm:$0xff]  ;;  %3796 = vst.msk [vmem:[#allocation2 + $0x30] sm:$0xff] %vm2052_vm8, %v3779_v27 }
 0x4c9   : > { %3812 = vst.msk [vmem:[%s5552_s9 + $0x28] sm:$0xff] %vm3806_vm9, %v3803_v31 }
 0x4ca   : > { %v3802_v21 = vld [vmem:[#allocation2 + $0x20] sm:$0xff] }
 0x4cb   : > { %3811 = vst.msk [vmem:[%s5552_s9 + $0x20] sm:$0xff] %vm3806_vm9, %v3802_v21 }
 0x4cc   : > { %v3805_v38 = vld [vmem:[#allocation2 + $0x38] sm:$0xff] }
 0x4cd   : > { %3814 = vst.msk [vmem:[%s5552_s9 + $0x38] sm:$0xff] %vm3806_vm9, %v3805_v38 }
 0x4cf   : > { %v3804_v57 = vld [vmem:[#allocation2 + $0x30] sm:$0xff] }
 0x4d0   : > { %3813 = vst.msk [vmem:[%s5552_s9 + $0x30] sm:$0xff] %vm3806_vm9, %v3804_v57 }
 0x4d1 PF: > { %s15_s22 = sadd.s32 1, %s5467_s22   ;;  %s6673_s18 = smov %s5459_s20 }
 0x4d2   : > { %p12_p8 = scmp.ge.s32.totalorder %s15_s22, 10   ;;  %s6674_s19 = smov %s5463_s21 }
 0x4d3   : > { %s6675_s20 = smov %s6678_s23  ;;  %s6676_s21 = smov %s6682_s24 }
 0x4d4   :  { %14 = sbr.rel (!%p12_p8) target bundleno = 3 (0x3), region = 102 }

</bundles_post_ra>
